<compile_context>
chip_gen: v7x
topology: tpu7x:2x2x1
jax: 0.10.0
libtpu: 0.0.40
codegen_flags: <defaults>
</compile_context>

<pallas_src>
import functools

import jax
import jax.numpy as jnp
from jax.experimental import pallas as pl
from jax.experimental.pallas import tpu as pltpu


_VMEM_LIMIT = 48 * 1024 * 1024  # <= ~56 MiB so the budget is legal on v7x.


# -----------------------------------------------------------------------------
# Wrapper-side data prep (pure JAX glue: pad / im2col / halo tiling).
# -----------------------------------------------------------------------------
def _im2col3x3(x_nhwc):
    """(N,H,W,C) -> (N,H,W,9*C); tap channel index = (kh*3 + kw)*C + c."""
    N, H, W, C = x_nhwc.shape
    xp = jnp.pad(x_nhwc, ((0, 0), (1, 1), (1, 1), (0, 0)))
    cols = [xp[:, kh:kh + H, kw:kw + W, :] for kh in range(3) for kw in range(3)]
    return jnp.concatenate(cols, axis=-1)


def _halo_tiles(x_nhwc, th, halo):
    """(N,H,W,C) -> (N*nT, th+2*halo, W+2*halo, C) zero-padded halo tiles."""
    N, H, W, C = x_nhwc.shape
    nT = H // th
    xp = jnp.pad(x_nhwc, ((0, 0), (halo, halo), (halo, halo), (0, 0)))
    tiles = jnp.stack([xp[:, t * th:t * th + th + 2 * halo] for t in range(nT)],
                      axis=1)
    return tiles.reshape(N * nT, th + 2 * halo, W + 2 * halo, C)


# -----------------------------------------------------------------------------
# Fully fused forward kernel: conv1 -> conv2 -> conv3 -> FC partial sum.
# One grid step = one (TH x W) output tile of one batch element.
# -----------------------------------------------------------------------------
def _fused_forward_kernel(x9_ref, w1_ref, b1_ref, w2_ref, b2_ref, w3_ref, b3_ref,
                          fcw_ref, o_ref, acc2_ref, acc3_ref,
                          *, TH, W, H, C1, C2, C3):
    t = pl.program_id(1)
    R1, V1 = TH + 4, W + 4          # conv1 output tile (halo 2)
    R2, V2 = TH + 2, W + 2          # conv2 output tile (halo 1)

    # ---- conv1 (im2col'd pointwise) + bias + ReLU, masked to valid image ----
    x9 = x9_ref[0].reshape(R1 * V1, 9)
    y1 = jnp.dot(x9, w1_ref[...], preferred_element_type=jnp.float32) + b1_ref[...]
    y1 = jnp.maximum(y1, 0.0).reshape(R1, V1, C1)
    r1 = jax.lax.broadcasted_iota(jnp.int32, (R1, V1, C1), 0) + (t * TH - 2)
    c1 = jax.lax.broadcasted_iota(jnp.int32, (R1, V1, C1), 1) - 2
    m1 = (r1 >= 0) & (r1 < H) & (c1 >= 0) & (c1 < W)
    a1 = jnp.where(m1, y1, 0.0).astype(jnp.bfloat16)            # (R1, V1, C1)

    # ---- conv2 3x3 (valid over halo) + bias + ReLU, masked ------------------
    acc2_ref[...] = jnp.zeros_like(acc2_ref)
    for kw in range(3):
        xs = a1[:, kw:kw + V2, :]
        for kh in range(3):
            patch = xs[kh:kh + R2].reshape(R2 * V2, C1)
            acc2_ref[...] += jnp.dot(patch, w2_ref[kh, kw, :, :],
                                     preferred_element_type=jnp.float32)
    y2 = jnp.maximum(acc2_ref[...] + b2_ref[...], 0.0).reshape(R2, V2, C2)
    r2 = jax.lax.broadcasted_iota(jnp.int32, (R2, V2, C2), 0) + (t * TH - 1)
    c2 = jax.lax.broadcasted_iota(jnp.int32, (R2, V2, C2), 1) - 1
    m2 = (r2 >= 0) & (r2 < H) & (c2 >= 0) & (c2 < W)
    a2 = jnp.where(m2, y2, 0.0).astype(jnp.bfloat16)             # (R2, V2, C2)

    # ---- conv3 3x3 (valid) + bias + ReLU, stays in VMEM ---------------------
    acc3_ref[...] = jnp.zeros_like(acc3_ref)
    for kw in range(3):
        xs = a2[:, kw:kw + W, :]
        for kh in range(3):
            patch = xs[kh:kh + TH].reshape(TH * W, C2)
            acc3_ref[...] += jnp.dot(patch, w3_ref[kh, kw, :, :],
                                     preferred_element_type=jnp.float32)
    a3 = jnp.maximum(acc3_ref[...] + b3_ref[...], 0.0)            # (TH*W, C3) f32

    # ---- fused FC partial reduction -----------------------------------------
    partial = jnp.sum(a3 * fcw_ref[0], axis=0, keepdims=True)     # (1, C3)
    o_ref[...] = partial.reshape(1, 1, 1, C3)


def fused_forward_partials(x9_tiles, w1, b1, w2, b2, w3, b3, fcw_tiles,
                           *, N, H, W, th):
    nT = H // th
    C1, C2, C3 = w1.shape[-1], w2.shape[-1], w3.shape[-1]
    kernel = functools.partial(_fused_forward_kernel,
                               TH=th, W=W, H=H, C1=C1, C2=C2, C3=C3)
    return pl.pallas_call(
        kernel,
        out_shape=jax.ShapeDtypeStruct((N, nT, 1, C3), jnp.float32),
        grid_spec=pltpu.PrefetchScalarGridSpec(
            num_scalar_prefetch=0,
            grid=(N, nT),
            in_specs=[
                pl.BlockSpec((1, th + 4, W + 4, 9),
                             lambda n, t: (n * nT + t, 0, 0, 0)),
                pl.BlockSpec((9, C1), lambda n, t: (0, 0)),
                pl.BlockSpec((1, C1), lambda n, t: (0, 0)),
                pl.BlockSpec((3, 3, C1, C2), lambda n, t: (0, 0, 0, 0)),
                pl.BlockSpec((1, C2), lambda n, t: (0, 0)),
                pl.BlockSpec((3, 3, C2, C3), lambda n, t: (0, 0, 0, 0)),
                pl.BlockSpec((1, C3), lambda n, t: (0, 0)),
                pl.BlockSpec((1, th * W, C3), lambda n, t: (t, 0, 0)),
            ],
            out_specs=pl.BlockSpec((1, 1, 1, C3), lambda n, t: (n, t, 0, 0)),
            scratch_shapes=[
                pltpu.VMEM(((th + 2) * (W + 2), C2), jnp.float32),
                pltpu.VMEM((th * W, C3), jnp.float32),
            ],
        ),
        compiler_params=pltpu.CompilerParams(
            dimension_semantics=("parallel", "parallel"),
            vmem_limit_bytes=_VMEM_LIMIT,
        ),
    )(x9_tiles, w1, b1, w2, b2, w3, b3, fcw_tiles)


# -----------------------------------------------------------------------------
# Finish: sum the (tile, channel) partials per batch element and add FC bias.
# -----------------------------------------------------------------------------
def _fc_finish_kernel(p_ref, b_ref, o_ref):
    o_ref[...] = jnp.sum(p_ref[...], axis=1, keepdims=True) + b_ref[...]


def fc_finish(partials_flat, fc_b):
    N, K = partials_flat.shape
    return pl.pallas_call(
        _fc_finish_kernel,
        out_shape=jax.ShapeDtypeStruct((N, 1), jnp.float32),
        grid_spec=pltpu.PrefetchScalarGridSpec(
            num_scalar_prefetch=0,
            grid=(1,),
            in_specs=[
                pl.BlockSpec((N, K), lambda i: (0, 0)),
                pl.BlockSpec((1, 1), lambda i: (0, 0)),
            ],
            out_specs=pl.BlockSpec((N, 1), lambda i: (0, 0)),
        ),
        compiler_params=pltpu.CompilerParams(
            dimension_semantics=("arbitrary",),
            vmem_limit_bytes=_VMEM_LIMIT,
        ),
    )(partials_flat, fc_b.astype(jnp.float32))


# -----------------------------------------------------------------------------
# Full forward pass (PyTorch NCHW convention at the boundary).
# -----------------------------------------------------------------------------
def yolo_forward(x_nchw, params, *, th=8):
    x = jnp.transpose(x_nchw, (0, 2, 3, 1)).astype(jnp.float32)     # (N,H,W,1)
    N, H, W, _ = x.shape
    assert H % th == 0
    nT = H // th
    C1 = params["w1"].shape[-1]
    C2 = params["w2"].shape[-1]
    C3 = params["w3"].shape[-1]

    # conv1: Cin=1 -> im2col to a lane-dense K=9 pointwise matmul; halo=2 so
    # all three convs + FC can be fused per spatial tile.
    x9 = _im2col3x3(x).astype(jnp.bfloat16)                          # (N,H,W,9)
    x9_tiles = _halo_tiles(x9, th, halo=2)                           # (N*nT, th+4, W+4, 9)

    w1 = params["w1"].reshape(9, C1).astype(jnp.bfloat16)            # (9,64)
    w2 = params["w2"].astype(jnp.bfloat16)                           # (3,3,64,128)
    w3 = params["w3"].astype(jnp.bfloat16)                           # (3,3,128,256)
    b1 = params["b1"].reshape(1, C1).astype(jnp.float32)
    b2 = params["b2"].reshape(1, C2).astype(jnp.float32)
    b3 = params["b3"].reshape(1, C3).astype(jnp.float32)

    # PyTorch flattens NCHW channel-major: fc_w index = c*H*W + h*W + w.
    fcw_hwc = params["fc_w"][:, 0].reshape(C3, H, W).transpose(1, 2, 0)   # (H,W,256)
    fcw_tiles = fcw_hwc.reshape(nT, th * W, C3).astype(jnp.float32)       # (nT,TH*W,256)

    partials = fused_forward_partials(
        x9_tiles, w1, b1, w2, b2, w3, b3, fcw_tiles, N=N, H=H, W=W, th=th)

    return fc_finish(partials.reshape(N, nT * C3), params["fc_b"])   # (N, 1)


def init_params(key, H, W):
    """Deterministic small-scale init. Conv weights stored as (KH, KW, Cin, Cout)."""
    ks = jax.random.split(key, 8)
    scale = 0.05
    w1 = scale * jax.random.normal(ks[0], (3, 3, 1, 64), jnp.float32)
    b1 = scale * jax.random.normal(ks[1], (64,), jnp.float32)
    w2 = scale * jax.random.normal(ks[2], (3, 3, 64, 128), jnp.float32)
    b2 = scale * jax.random.normal(ks[3], (128,), jnp.float32)
    w3 = scale * jax.random.normal(ks[4], (3, 3, 128, 256), jnp.float32)
    b3 = scale * jax.random.normal(ks[5], (256,), jnp.float32)
    # NOTE: original module uses 256*720*576 FC input features; spatial size is
    # reduced to H x W here, so the FC input dim is 256*H*W.
    fc_w = scale * jax.random.normal(ks[6], (256 * H * W, 1), jnp.float32)
    fc_b = scale * jax.random.normal(ks[7], (1, 1), jnp.float32)
    return dict(w1=w1, b1=b1, w2=w2, b2=b2, w3=w3, b3=b3, fc_w=fc_w, fc_b=fc_b)


# -----------------------------------------------------------------------------
# Pure-JAX f32 reference (same math, via lax.conv) used as a correctness check.
# -----------------------------------------------------------------------------
def yolo_forward_ref(x_nchw, params):
    def conv(x, w, b):  # x: NCHW, w: (KH,KW,Cin,Cout)
        y = jax.lax.conv_general_dilated(
            x, w, window_strides=(1, 1), padding=((1, 1), (1, 1)),
            dimension_numbers=("NCHW", "HWIO", "NCHW"))
        return jnp.maximum(y + b[None, :, None, None], 0.0)

    x = x_nchw.astype(jnp.float32)
    x = conv(x, params["w1"], params["b1"])
    x = conv(x, params["w2"], params["b2"])
    x = conv(x, params["w3"], params["b3"])
    x_flat = x.reshape(x.shape[0], -1)
    return x_flat @ params["fc_w"] + params["fc_b"]


if __name__ == "__main__":
    N, Cin, H, W = 2, 1, 16, 16  # small spatial size instead of 720x576
    key = jax.random.PRNGKey(0)
    k_x, k_p = jax.random.split(key)
    x = jax.random.normal(k_x, (N, Cin, H, W), jnp.float32)
    params = init_params(k_p, H, W)

    out = jax.block_until_ready(yolo_forward(x, params, th=8))
    ref = jax.block_until_ready(yolo_forward_ref(x, params))

    assert out.shape == (N, 1), out.shape
    assert bool(jnp.all(jnp.isfinite(out)))
    assert bool(jnp.allclose(out, ref, rtol=5e-2, atol=5e-2)), (out, ref)

    print("KERNEL_OK")
</pallas_src>

<mosaic_0001>
module attributes {stable_mosaic.version = 11 : i64} {
  func.func @_fused_forward_kernel(%arg0: i32, %arg1: i32, %arg2: memref<1x12x20x9xbf16, #tpu.memory_space<vmem>>, %arg3: memref<9x64xbf16, #tpu.memory_space<vmem>>, %arg4: memref<1x64xf32, #tpu.memory_space<vmem>>, %arg5: memref<3x3x64x128xbf16, #tpu.memory_space<vmem>>, %arg6: memref<1x128xf32, #tpu.memory_space<vmem>>, %arg7: memref<3x3x128x256xbf16, #tpu.memory_space<vmem>>, %arg8: memref<1x256xf32, #tpu.memory_space<vmem>>, %arg9: memref<1x128x256xf32, #tpu.memory_space<vmem>>, %arg10: memref<1x1x1x256xf32, #tpu.memory_space<vmem>>, %arg11: memref<180x128xf32, #tpu.memory_space<vmem>>, %arg12: memref<128x256xf32, #tpu.memory_space<vmem>>) attributes {dimension_semantics = [#tpu.dimension_semantics<parallel>, #tpu.dimension_semantics<parallel>], iteration_bounds = array<i64: 2, 2>, scalar_prefetch = 0 : i64, scratch_operands = 2 : i64, tpu.core_type = #tpu.core_type<tc>, window_params = [{transform_indices = @transform_0, window_bounds = array<i64: 1, 12, 20, 9>}, {pipeline_mode = #tpu.pipeline_mode<synchronous>, transform_indices = @transform_1, window_bounds = array<i64: 9, 64>}, {pipeline_mode = #tpu.pipeline_mode<synchronous>, transform_indices = @transform_2, window_bounds = array<i64: 1, 64>}, {pipeline_mode = #tpu.pipeline_mode<synchronous>, transform_indices = @transform_3, window_bounds = array<i64: 3, 3, 64, 128>}, {pipeline_mode = #tpu.pipeline_mode<synchronous>, transform_indices = @transform_4, window_bounds = array<i64: 1, 128>}, {pipeline_mode = #tpu.pipeline_mode<synchronous>, transform_indices = @transform_5, window_bounds = array<i64: 3, 3, 128, 256>}, {pipeline_mode = #tpu.pipeline_mode<synchronous>, transform_indices = @transform_6, window_bounds = array<i64: 1, 256>}, {transform_indices = @transform_7, window_bounds = array<i64: 1, 128, 256>}, {transform_indices = @transform_8, window_bounds = array<i64: 1, 1, 1, 256>}]} {
    %c0 = arith.constant 0 : index
    %c0_0 = arith.constant 0 : index
    %c0_1 = arith.constant 0 : index
    %c0_2 = arith.constant 0 : index
    %0 = vector.load %arg2[%c0, %c0_0, %c0_1, %c0_2] : memref<1x12x20x9xbf16, #tpu.memory_space<vmem>>, vector<1x12x20x9xbf16>
    %1 = vector.shape_cast %0 : vector<1x12x20x9xbf16> to vector<12x20x9xbf16>
    %2 = vector.shape_cast %1 : vector<12x20x9xbf16> to vector<240x9xbf16>
    %c0_3 = arith.constant 0 : index
    %c0_4 = arith.constant 0 : index
    %3 = vector.load %arg3[%c0_3, %c0_4] : memref<9x64xbf16, #tpu.memory_space<vmem>>, vector<9x64xbf16>
    %cst = arith.constant dense<0.000000e+00> : vector<240x64xf32>
    %4 = tpu.matmul %2, %3, %cst {dimension_numbers = #tpu.dot_dimension_numbers<[1], [0], [0], [1], [0, 0, 1, 1], [], []>} : vector<240x9xbf16>, vector<9x64xbf16>, vector<240x64xf32> -> vector<240x64xf32>
    %c0_5 = arith.constant 0 : index
    %c0_6 = arith.constant 0 : index
    %5 = vector.load %arg4[%c0_5, %c0_6] : memref<1x64xf32, #tpu.memory_space<vmem>>, vector<1x64xf32>
    %6 = vector.broadcast %5 : vector<1x64xf32> to vector<240x64xf32>
    %7 = arith.addf %4, %6 : vector<240x64xf32>
    %cst_7 = arith.constant 0.000000e+00 : f32
    %8 = vector.broadcast %cst_7 : f32 to vector<240x64xf32>
    %9 = arith.maximumf %7, %8 : vector<240x64xf32>
    %10 = vector.shape_cast %9 : vector<240x64xf32> to vector<12x20x64xf32>
    %11 = tpu.iota {dimensions = array<i32: 0>} : vector<12x20x64xi32>
    %c8_i32 = arith.constant 8 : i32
    %12 = arith.muli %arg1, %c8_i32 : i32
    %c2_i32 = arith.constant 2 : i32
    %13 = arith.subi %12, %c2_i32 : i32
    %14 = vector.broadcast %13 : i32 to vector<12x20x64xi32>
    %15 = arith.addi %11, %14 : vector<12x20x64xi32>
    %16 = tpu.iota {dimensions = array<i32: 1>} : vector<12x20x64xi32>
    %c2_i32_8 = arith.constant 2 : i32
    %17 = vector.broadcast %c2_i32_8 : i32 to vector<12x20x64xi32>
    %18 = arith.subi %16, %17 : vector<12x20x64xi32>
    %c0_i32 = arith.constant 0 : i32
    %19 = vector.broadcast %c0_i32 : i32 to vector<12x20x64xi32>
    %20 = arith.cmpi sge, %15, %19 : vector<12x20x64xi32>
    %c16_i32 = arith.constant 16 : i32
    %21 = vector.broadcast %c16_i32 : i32 to vector<12x20x64xi32>
    %22 = arith.cmpi slt, %15, %21 : vector<12x20x64xi32>
    %23 = arith.andi %20, %22 : vector<12x20x64xi1>
    %c0_i32_9 = arith.constant 0 : i32
    %24 = vector.broadcast %c0_i32_9 : i32 to vector<12x20x64xi32>
    %25 = arith.cmpi sge, %18, %24 : vector<12x20x64xi32>
    %26 = arith.andi %23, %25 : vector<12x20x64xi1>
    %c16_i32_10 = arith.constant 16 : i32
    %27 = vector.broadcast %c16_i32_10 : i32 to vector<12x20x64xi32>
    %28 = arith.cmpi slt, %18, %27 : vector<12x20x64xi32>
    %29 = arith.andi %26, %28 : vector<12x20x64xi1>
    %cst_11 = arith.constant 0.000000e+00 : f32
    %30 = vector.broadcast %cst_11 : f32 to vector<12x20x64xf32>
    %31 = arith.select %29, %10, %30 : vector<12x20x64xi1>, vector<12x20x64xf32>
    %32 = arith.truncf %31 : vector<12x20x64xf32> to vector<12x20x64xbf16>
    %cst_12 = arith.constant 0.000000e+00 : f32
    %33 = vector.broadcast %cst_12 : f32 to vector<180x128xf32>
    %c0_13 = arith.constant 0 : index
    %c0_14 = arith.constant 0 : index
    %34 = vector.load %arg11[%c0_13, %c0_14] : memref<180x128xf32, #tpu.memory_space<vmem>>, vector<180x128xf32>
    tpu.vector_store %arg11[%c0_13, %c0_14], %33 {strides = array<i32>} : memref<180x128xf32, #tpu.memory_space<vmem>>, vector<180x128xf32>,
    %35 = vector.extract_strided_slice %32 {offsets = [0, 0, 0], sizes = [12, 18, 64], strides = [1, 1, 1]} : vector<12x20x64xbf16> to vector<12x18x64xbf16>
    %36 = vector.extract_strided_slice %35 {offsets = [0, 0, 0], sizes = [10, 18, 64], strides = [1, 1, 1]} : vector<12x18x64xbf16> to vector<10x18x64xbf16>
    %37 = vector.shape_cast %36 : vector<10x18x64xbf16> to vector<180x64xbf16>
    %c0_15 = arith.constant 0 : index
    %c0_16 = arith.constant 0 : index
    %38 = vector.load %arg11[%c0_15, %c0_16] : memref<180x128xf32, #tpu.memory_space<vmem>>, vector<180x128xf32>
    %c0_17 = arith.constant 0 : index
    %c0_18 = arith.constant 0 : index
    %c0_19 = arith.constant 0 : index
    %c0_20 = arith.constant 0 : index
    %39 = vector.load %arg5[%c0_17, %c0_18, %c0_19, %c0_20] : memref<3x3x64x128xbf16, #tpu.memory_space<vmem>>, vector<1x1x64x128xbf16>
    %40 = vector.shape_cast %39 : vector<1x1x64x128xbf16> to vector<64x128xbf16>
    %cst_21 = arith.constant dense<0.000000e+00> : vector<180x128xf32>
    %41 = tpu.matmul %37, %40, %cst_21 {dimension_numbers = #tpu.dot_dimension_numbers<[1], [0], [0], [1], [0, 0, 1, 1], [], []>} : vector<180x64xbf16>, vector<64x128xbf16>, vector<180x128xf32> -> vector<180x128xf32>
    %42 = arith.addf %38, %41 : vector<180x128xf32>
    %c0_22 = arith.constant 0 : index
    %c0_23 = arith.constant 0 : index
    %43 = vector.load %arg11[%c0_22, %c0_23] : memref<180x128xf32, #tpu.memory_space<vmem>>, vector<180x128xf32>
    tpu.vector_store %arg11[%c0_22, %c0_23], %42 {strides = array<i32>} : memref<180x128xf32, #tpu.memory_space<vmem>>, vector<180x128xf32>,
    %44 = vector.extract_strided_slice %35 {offsets = [1, 0, 0], sizes = [10, 18, 64], strides = [1, 1, 1]} : vector<12x18x64xbf16> to vector<10x18x64xbf16>
    %45 = vector.shape_cast %44 : vector<10x18x64xbf16> to vector<180x64xbf16>
    %c0_24 = arith.constant 0 : index
    %c0_25 = arith.constant 0 : index
    %46 = vector.load %arg11[%c0_24, %c0_25] : memref<180x128xf32, #tpu.memory_space<vmem>>, vector<180x128xf32>
    %c1 = arith.constant 1 : index
    %c0_26 = arith.constant 0 : index
    %c0_27 = arith.constant 0 : index
    %c0_28 = arith.constant 0 : index
    %47 = vector.load %arg5[%c1, %c0_26, %c0_27, %c0_28] : memref<3x3x64x128xbf16, #tpu.memory_space<vmem>>, vector<1x1x64x128xbf16>
    %48 = vector.shape_cast %47 : vector<1x1x64x128xbf16> to vector<64x128xbf16>
    %cst_29 = arith.constant dense<0.000000e+00> : vector<180x128xf32>
    %49 = tpu.matmul %45, %48, %cst_29 {dimension_numbers = #tpu.dot_dimension_numbers<[1], [0], [0], [1], [0, 0, 1, 1], [], []>} : vector<180x64xbf16>, vector<64x128xbf16>, vector<180x128xf32> -> vector<180x128xf32>
    %50 = arith.addf %46, %49 : vector<180x128xf32>
    %c0_30 = arith.constant 0 : index
    %c0_31 = arith.constant 0 : index
    %51 = vector.load %arg11[%c0_30, %c0_31] : memref<180x128xf32, #tpu.memory_space<vmem>>, vector<180x128xf32>
    tpu.vector_store %arg11[%c0_30, %c0_31], %50 {strides = array<i32>} : memref<180x128xf32, #tpu.memory_space<vmem>>, vector<180x128xf32>,
    %52 = vector.extract_strided_slice %35 {offsets = [2, 0, 0], sizes = [10, 18, 64], strides = [1, 1, 1]} : vector<12x18x64xbf16> to vector<10x18x64xbf16>
    %53 = vector.shape_cast %52 : vector<10x18x64xbf16> to vector<180x64xbf16>
    %c0_32 = arith.constant 0 : index
    %c0_33 = arith.constant 0 : index
    %54 = vector.load %arg11[%c0_32, %c0_33] : memref<180x128xf32, #tpu.memory_space<vmem>>, vector<180x128xf32>
    %c2 = arith.constant 2 : index
    %c0_34 = arith.constant 0 : index
    %c0_35 = arith.constant 0 : index
    %c0_36 = arith.constant 0 : index
    %55 = vector.load %arg5[%c2, %c0_34, %c0_35, %c0_36] : memref<3x3x64x128xbf16, #tpu.memory_space<vmem>>, vector<1x1x64x128xbf16>
    %56 = vector.shape_cast %55 : vector<1x1x64x128xbf16> to vector<64x128xbf16>
    %cst_37 = arith.constant dense<0.000000e+00> : vector<180x128xf32>
    %57 = tpu.matmul %53, %56, %cst_37 {dimension_numbers = #tpu.dot_dimension_numbers<[1], [0], [0], [1], [0, 0, 1, 1], [], []>} : vector<180x64xbf16>, vector<64x128xbf16>, vector<180x128xf32> -> vector<180x128xf32>
    %58 = arith.addf %54, %57 : vector<180x128xf32>
    %c0_38 = arith.constant 0 : index
    %c0_39 = arith.constant 0 : index
    %59 = vector.load %arg11[%c0_38, %c0_39] : memref<180x128xf32, #tpu.memory_space<vmem>>, vector<180x128xf32>
    tpu.vector_store %arg11[%c0_38, %c0_39], %58 {strides = array<i32>} : memref<180x128xf32, #tpu.memory_space<vmem>>, vector<180x128xf32>,
    %60 = vector.extract_strided_slice %32 {offsets = [0, 1, 0], sizes = [12, 18, 64], strides = [1, 1, 1]} : vector<12x20x64xbf16> to vector<12x18x64xbf16>
    %61 = vector.extract_strided_slice %60 {offsets = [0, 0, 0], sizes = [10, 18, 64], strides = [1, 1, 1]} : vector<12x18x64xbf16> to vector<10x18x64xbf16>
    %62 = vector.shape_cast %61 : vector<10x18x64xbf16> to vector<180x64xbf16>
    %c0_40 = arith.constant 0 : index
    %c0_41 = arith.constant 0 : index
    %63 = vector.load %arg11[%c0_40, %c0_41] : memref<180x128xf32, #tpu.memory_space<vmem>>, vector<180x128xf32>
    %c0_42 = arith.constant 0 : index
    %c1_43 = arith.constant 1 : index
    %c0_44 = arith.constant 0 : index
    %c0_45 = arith.constant 0 : index
    %64 = vector.load %arg5[%c0_42, %c1_43, %c0_44, %c0_45] : memref<3x3x64x128xbf16, #tpu.memory_space<vmem>>, vector<1x1x64x128xbf16>
    %65 = vector.shape_cast %64 : vector<1x1x64x128xbf16> to vector<64x128xbf16>
    %cst_46 = arith.constant dense<0.000000e+00> : vector<180x128xf32>
    %66 = tpu.matmul %62, %65, %cst_46 {dimension_numbers = #tpu.dot_dimension_numbers<[1], [0], [0], [1], [0, 0, 1, 1], [], []>} : vector<180x64xbf16>, vector<64x128xbf16>, vector<180x128xf32> -> vector<180x128xf32>
    %67 = arith.addf %63, %66 : vector<180x128xf32>
    %c0_47 = arith.constant 0 : index
    %c0_48 = arith.constant 0 : index
    %68 = vector.load %arg11[%c0_47, %c0_48] : memref<180x128xf32, #tpu.memory_space<vmem>>, vector<180x128xf32>
    tpu.vector_store %arg11[%c0_47, %c0_48], %67 {strides = array<i32>} : memref<180x128xf32, #tpu.memory_space<vmem>>, vector<180x128xf32>,
    %69 = vector.extract_strided_slice %60 {offsets = [1, 0, 0], sizes = [10, 18, 64], strides = [1, 1, 1]} : vector<12x18x64xbf16> to vector<10x18x64xbf16>
    %70 = vector.shape_cast %69 : vector<10x18x64xbf16> to vector<180x64xbf16>
    %c0_49 = arith.constant 0 : index
    %c0_50 = arith.constant 0 : index
    %71 = vector.load %arg11[%c0_49, %c0_50] : memref<180x128xf32, #tpu.memory_space<vmem>>, vector<180x128xf32>
    %c1_51 = arith.constant 1 : index
    %c1_52 = arith.constant 1 : index
    %c0_53 = arith.constant 0 : index
    %c0_54 = arith.constant 0 : index
    %72 = vector.load %arg5[%c1_51, %c1_52, %c0_53, %c0_54] : memref<3x3x64x128xbf16, #tpu.memory_space<vmem>>, vector<1x1x64x128xbf16>
    %73 = vector.shape_cast %72 : vector<1x1x64x128xbf16> to vector<64x128xbf16>
    %cst_55 = arith.constant dense<0.000000e+00> : vector<180x128xf32>
    %74 = tpu.matmul %70, %73, %cst_55 {dimension_numbers = #tpu.dot_dimension_numbers<[1], [0], [0], [1], [0, 0, 1, 1], [], []>} : vector<180x64xbf16>, vector<64x128xbf16>, vector<180x128xf32> -> vector<180x128xf32>
    %75 = arith.addf %71, %74 : vector<180x128xf32>
    %c0_56 = arith.constant 0 : index
    %c0_57 = arith.constant 0 : index
    %76 = vector.load %arg11[%c0_56, %c0_57] : memref<180x128xf32, #tpu.memory_space<vmem>>, vector<180x128xf32>
    tpu.vector_store %arg11[%c0_56, %c0_57], %75 {strides = array<i32>} : memref<180x128xf32, #tpu.memory_space<vmem>>, vector<180x128xf32>,
    %77 = vector.extract_strided_slice %60 {offsets = [2, 0, 0], sizes = [10, 18, 64], strides = [1, 1, 1]} : vector<12x18x64xbf16> to vector<10x18x64xbf16>
    %78 = vector.shape_cast %77 : vector<10x18x64xbf16> to vector<180x64xbf16>
    %c0_58 = arith.constant 0 : index
    %c0_59 = arith.constant 0 : index
    %79 = vector.load %arg11[%c0_58, %c0_59] : memref<180x128xf32, #tpu.memory_space<vmem>>, vector<180x128xf32>
    %c2_60 = arith.constant 2 : index
    %c1_61 = arith.constant 1 : index
    %c0_62 = arith.constant 0 : index
    %c0_63 = arith.constant 0 : index
    %80 = vector.load %arg5[%c2_60, %c1_61, %c0_62, %c0_63] : memref<3x3x64x128xbf16, #tpu.memory_space<vmem>>, vector<1x1x64x128xbf16>
    %81 = vector.shape_cast %80 : vector<1x1x64x128xbf16> to vector<64x128xbf16>
    %cst_64 = arith.constant dense<0.000000e+00> : vector<180x128xf32>
    %82 = tpu.matmul %78, %81, %cst_64 {dimension_numbers = #tpu.dot_dimension_numbers<[1], [0], [0], [1], [0, 0, 1, 1], [], []>} : vector<180x64xbf16>, vector<64x128xbf16>, vector<180x128xf32> -> vector<180x128xf32>
    %83 = arith.addf %79, %82 : vector<180x128xf32>
    %c0_65 = arith.constant 0 : index
    %c0_66 = arith.constant 0 : index
    %84 = vector.load %arg11[%c0_65, %c0_66] : memref<180x128xf32, #tpu.memory_space<vmem>>, vector<180x128xf32>
    tpu.vector_store %arg11[%c0_65, %c0_66], %83 {strides = array<i32>} : memref<180x128xf32, #tpu.memory_space<vmem>>, vector<180x128xf32>,
    %85 = vector.extract_strided_slice %32 {offsets = [0, 2, 0], sizes = [12, 18, 64], strides = [1, 1, 1]} : vector<12x20x64xbf16> to vector<12x18x64xbf16>
    %86 = vector.extract_strided_slice %85 {offsets = [0, 0, 0], sizes = [10, 18, 64], strides = [1, 1, 1]} : vector<12x18x64xbf16> to vector<10x18x64xbf16>
    %87 = vector.shape_cast %86 : vector<10x18x64xbf16> to vector<180x64xbf16>
    %c0_67 = arith.constant 0 : index
    %c0_68 = arith.constant 0 : index
    %88 = vector.load %arg11[%c0_67, %c0_68] : memref<180x128xf32, #tpu.memory_space<vmem>>, vector<180x128xf32>
    %c0_69 = arith.constant 0 : index
    %c2_70 = arith.constant 2 : index
    %c0_71 = arith.constant 0 : index
    %c0_72 = arith.constant 0 : index
    %89 = vector.load %arg5[%c0_69, %c2_70, %c0_71, %c0_72] : memref<3x3x64x128xbf16, #tpu.memory_space<vmem>>, vector<1x1x64x128xbf16>
    %90 = vector.shape_cast %89 : vector<1x1x64x128xbf16> to vector<64x128xbf16>
    %cst_73 = arith.constant dense<0.000000e+00> : vector<180x128xf32>
    %91 = tpu.matmul %87, %90, %cst_73 {dimension_numbers = #tpu.dot_dimension_numbers<[1], [0], [0], [1], [0, 0, 1, 1], [], []>} : vector<180x64xbf16>, vector<64x128xbf16>, vector<180x128xf32> -> vector<180x128xf32>
    %92 = arith.addf %88, %91 : vector<180x128xf32>
    %c0_74 = arith.constant 0 : index
    %c0_75 = arith.constant 0 : index
    %93 = vector.load %arg11[%c0_74, %c0_75] : memref<180x128xf32, #tpu.memory_space<vmem>>, vector<180x128xf32>
    tpu.vector_store %arg11[%c0_74, %c0_75], %92 {strides = array<i32>} : memref<180x128xf32, #tpu.memory_space<vmem>>, vector<180x128xf32>,
    %94 = vector.extract_strided_slice %85 {offsets = [1, 0, 0], sizes = [10, 18, 64], strides = [1, 1, 1]} : vector<12x18x64xbf16> to vector<10x18x64xbf16>
    %95 = vector.shape_cast %94 : vector<10x18x64xbf16> to vector<180x64xbf16>
    %c0_76 = arith.constant 0 : index
    %c0_77 = arith.constant 0 : index
    %96 = vector.load %arg11[%c0_76, %c0_77] : memref<180x128xf32, #tpu.memory_space<vmem>>, vector<180x128xf32>
    %c1_78 = arith.constant 1 : index
    %c2_79 = arith.constant 2 : index
    %c0_80 = arith.constant 0 : index
    %c0_81 = arith.constant 0 : index
    %97 = vector.load %arg5[%c1_78, %c2_79, %c0_80, %c0_81] : memref<3x3x64x128xbf16, #tpu.memory_space<vmem>>, vector<1x1x64x128xbf16>
    %98 = vector.shape_cast %97 : vector<1x1x64x128xbf16> to vector<64x128xbf16>
    %cst_82 = arith.constant dense<0.000000e+00> : vector<180x128xf32>
    %99 = tpu.matmul %95, %98, %cst_82 {dimension_numbers = #tpu.dot_dimension_numbers<[1], [0], [0], [1], [0, 0, 1, 1], [], []>} : vector<180x64xbf16>, vector<64x128xbf16>, vector<180x128xf32> -> vector<180x128xf32>
    %100 = arith.addf %96, %99 : vector<180x128xf32>
    %c0_83 = arith.constant 0 : index
    %c0_84 = arith.constant 0 : index
    %101 = vector.load %arg11[%c0_83, %c0_84] : memref<180x128xf32, #tpu.memory_space<vmem>>, vector<180x128xf32>
    tpu.vector_store %arg11[%c0_83, %c0_84], %100 {strides = array<i32>} : memref<180x128xf32, #tpu.memory_space<vmem>>, vector<180x128xf32>,
    %102 = vector.extract_strided_slice %85 {offsets = [2, 0, 0], sizes = [10, 18, 64], strides = [1, 1, 1]} : vector<12x18x64xbf16> to vector<10x18x64xbf16>
    %103 = vector.shape_cast %102 : vector<10x18x64xbf16> to vector<180x64xbf16>
    %c0_85 = arith.constant 0 : index
    %c0_86 = arith.constant 0 : index
    %104 = vector.load %arg11[%c0_85, %c0_86] : memref<180x128xf32, #tpu.memory_space<vmem>>, vector<180x128xf32>
    %c2_87 = arith.constant 2 : index
    %c2_88 = arith.constant 2 : index
    %c0_89 = arith.constant 0 : index
    %c0_90 = arith.constant 0 : index
    %105 = vector.load %arg5[%c2_87, %c2_88, %c0_89, %c0_90] : memref<3x3x64x128xbf16, #tpu.memory_space<vmem>>, vector<1x1x64x128xbf16>
    %106 = vector.shape_cast %105 : vector<1x1x64x128xbf16> to vector<64x128xbf16>
    %cst_91 = arith.constant dense<0.000000e+00> : vector<180x128xf32>
    %107 = tpu.matmul %103, %106, %cst_91 {dimension_numbers = #tpu.dot_dimension_numbers<[1], [0], [0], [1], [0, 0, 1, 1], [], []>} : vector<180x64xbf16>, vector<64x128xbf16>, vector<180x128xf32> -> vector<180x128xf32>
    %108 = arith.addf %104, %107 : vector<180x128xf32>
    %c0_92 = arith.constant 0 : index
    %c0_93 = arith.constant 0 : index
    %109 = vector.load %arg11[%c0_92, %c0_93] : memref<180x128xf32, #tpu.memory_space<vmem>>, vector<180x128xf32>
    tpu.vector_store %arg11[%c0_92, %c0_93], %108 {strides = array<i32>} : memref<180x128xf32, #tpu.memory_space<vmem>>, vector<180x128xf32>,
    %c0_94 = arith.constant 0 : index
    %c0_95 = arith.constant 0 : index
    %110 = vector.load %arg11[%c0_94, %c0_95] : memref<180x128xf32, #tpu.memory_space<vmem>>, vector<180x128xf32>
    %c0_96 = arith.constant 0 : index
    %c0_97 = arith.constant 0 : index
    %111 = vector.load %arg6[%c0_96, %c0_97] : memref<1x128xf32, #tpu.memory_space<vmem>>, vector<1x128xf32>
    %112 = vector.broadcast %111 : vector<1x128xf32> to vector<180x128xf32>
    %113 = arith.addf %110, %112 : vector<180x128xf32>
    %cst_98 = arith.constant 0.000000e+00 : f32
    %114 = vector.broadcast %cst_98 : f32 to vector<180x128xf32>
    %115 = arith.maximumf %113, %114 : vector<180x128xf32>
    %116 = vector.shape_cast %115 : vector<180x128xf32> to vector<10x18x128xf32>
    %117 = tpu.iota {dimensions = array<i32: 0>} : vector<10x18x128xi32>
    %c8_i32_99 = arith.constant 8 : i32
    %118 = arith.muli %arg1, %c8_i32_99 : i32
    %c1_i32 = arith.constant 1 : i32
    %119 = arith.subi %118, %c1_i32 : i32
    %120 = vector.broadcast %119 : i32 to vector<10x18x128xi32>
    %121 = arith.addi %117, %120 : vector<10x18x128xi32>
    %122 = tpu.iota {dimensions = array<i32: 1>} : vector<10x18x128xi32>
    %c1_i32_100 = arith.constant 1 : i32
    %123 = vector.broadcast %c1_i32_100 : i32 to vector<10x18x128xi32>
    %124 = arith.subi %122, %123 : vector<10x18x128xi32>
    %c0_i32_101 = arith.constant 0 : i32
    %125 = vector.broadcast %c0_i32_101 : i32 to vector<10x18x128xi32>
    %126 = arith.cmpi sge, %121, %125 : vector<10x18x128xi32>
    %c16_i32_102 = arith.constant 16 : i32
    %127 = vector.broadcast %c16_i32_102 : i32 to vector<10x18x128xi32>
    %128 = arith.cmpi slt, %121, %127 : vector<10x18x128xi32>
    %129 = arith.andi %126, %128 : vector<10x18x128xi1>
    %c0_i32_103 = arith.constant 0 : i32
    %130 = vector.broadcast %c0_i32_103 : i32 to vector<10x18x128xi32>
    %131 = arith.cmpi sge, %124, %130 : vector<10x18x128xi32>
    %132 = arith.andi %129, %131 : vector<10x18x128xi1>
    %c16_i32_104 = arith.constant 16 : i32
    %133 = vector.broadcast %c16_i32_104 : i32 to vector<10x18x128xi32>
    %134 = arith.cmpi slt, %124, %133 : vector<10x18x128xi32>
    %135 = arith.andi %132, %134 : vector<10x18x128xi1>
    %cst_105 = arith.constant 0.000000e+00 : f32
    %136 = vector.broadcast %cst_105 : f32 to vector<10x18x128xf32>
    %137 = arith.select %135, %116, %136 : vector<10x18x128xi1>, vector<10x18x128xf32>
    %138 = arith.truncf %137 : vector<10x18x128xf32> to vector<10x18x128xbf16>
    %cst_106 = arith.constant 0.000000e+00 : f32
    %139 = vector.broadcast %cst_106 : f32 to vector<128x256xf32>
    %c0_107 = arith.constant 0 : index
    %c0_108 = arith.constant 0 : index
    %140 = vector.load %arg12[%c0_107, %c0_108] : memref<128x256xf32, #tpu.memory_space<vmem>>, vector<128x256xf32>
    tpu.vector_store %arg12[%c0_107, %c0_108], %139 {strides = array<i32>} : memref<128x256xf32, #tpu.memory_space<vmem>>, vector<128x256xf32>,
    %141 = vector.extract_strided_slice %138 {offsets = [0, 0, 0], sizes = [10, 16, 128], strides = [1, 1, 1]} : vector<10x18x128xbf16> to vector<10x16x128xbf16>
    %142 = vector.extract_strided_slice %141 {offsets = [0, 0, 0], sizes = [8, 16, 128], strides = [1, 1, 1]} : vector<10x16x128xbf16> to vector<8x16x128xbf16>
    %143 = vector.shape_cast %142 : vector<8x16x128xbf16> to vector<128x128xbf16>
    %c0_109 = arith.constant 0 : index
    %c0_110 = arith.constant 0 : index
    %144 = vector.load %arg12[%c0_109, %c0_110] : memref<128x256xf32, #tpu.memory_space<vmem>>, vector<128x256xf32>
    %c0_111 = arith.constant 0 : index
    %c0_112 = arith.constant 0 : index
    %c0_113 = arith.constant 0 : index
    %c0_114 = arith.constant 0 : index
    %145 = vector.load %arg7[%c0_111, %c0_112, %c0_113, %c0_114] : memref<3x3x128x256xbf16, #tpu.memory_space<vmem>>, vector<1x1x128x256xbf16>
    %146 = vector.shape_cast %145 : vector<1x1x128x256xbf16> to vector<128x256xbf16>
    %cst_115 = arith.constant dense<0.000000e+00> : vector<128x256xf32>
    %147 = tpu.matmul %143, %146, %cst_115 {dimension_numbers = #tpu.dot_dimension_numbers<[1], [0], [0], [1], [0, 0, 1, 1], [], []>} : vector<128x128xbf16>, vector<128x256xbf16>, vector<128x256xf32> -> vector<128x256xf32>
    %148 = arith.addf %144, %147 : vector<128x256xf32>
    %c0_116 = arith.constant 0 : index
    %c0_117 = arith.constant 0 : index
    %149 = vector.load %arg12[%c0_116, %c0_117] : memref<128x256xf32, #tpu.memory_space<vmem>>, vector<128x256xf32>
    tpu.vector_store %arg12[%c0_116, %c0_117], %148 {strides = array<i32>} : memref<128x256xf32, #tpu.memory_space<vmem>>, vector<128x256xf32>,
    %150 = vector.extract_strided_slice %141 {offsets = [1, 0, 0], sizes = [8, 16, 128], strides = [1, 1, 1]} : vector<10x16x128xbf16> to vector<8x16x128xbf16>
    %151 = vector.shape_cast %150 : vector<8x16x128xbf16> to vector<128x128xbf16>
    %c0_118 = arith.constant 0 : index
    %c0_119 = arith.constant 0 : index
    %152 = vector.load %arg12[%c0_118, %c0_119] : memref<128x256xf32, #tpu.memory_space<vmem>>, vector<128x256xf32>
    %c1_120 = arith.constant 1 : index
    %c0_121 = arith.constant 0 : index
    %c0_122 = arith.constant 0 : index
    %c0_123 = arith.constant 0 : index
    %153 = vector.load %arg7[%c1_120, %c0_121, %c0_122, %c0_123] : memref<3x3x128x256xbf16, #tpu.memory_space<vmem>>, vector<1x1x128x256xbf16>
    %154 = vector.shape_cast %153 : vector<1x1x128x256xbf16> to vector<128x256xbf16>
    %cst_124 = arith.constant dense<0.000000e+00> : vector<128x256xf32>
    %155 = tpu.matmul %151, %154, %cst_124 {dimension_numbers = #tpu.dot_dimension_numbers<[1], [0], [0], [1], [0, 0, 1, 1], [], []>} : vector<128x128xbf16>, vector<128x256xbf16>, vector<128x256xf32> -> vector<128x256xf32>
    %156 = arith.addf %152, %155 : vector<128x256xf32>
    %c0_125 = arith.constant 0 : index
    %c0_126 = arith.constant 0 : index
    %157 = vector.load %arg12[%c0_125, %c0_126] : memref<128x256xf32, #tpu.memory_space<vmem>>, vector<128x256xf32>
    tpu.vector_store %arg12[%c0_125, %c0_126], %156 {strides = array<i32>} : memref<128x256xf32, #tpu.memory_space<vmem>>, vector<128x256xf32>,
    %158 = vector.extract_strided_slice %141 {offsets = [2, 0, 0], sizes = [8, 16, 128], strides = [1, 1, 1]} : vector<10x16x128xbf16> to vector<8x16x128xbf16>
    %159 = vector.shape_cast %158 : vector<8x16x128xbf16> to vector<128x128xbf16>
    %c0_127 = arith.constant 0 : index
    %c0_128 = arith.constant 0 : index
    %160 = vector.load %arg12[%c0_127, %c0_128] : memref<128x256xf32, #tpu.memory_space<vmem>>, vector<128x256xf32>
    %c2_129 = arith.constant 2 : index
    %c0_130 = arith.constant 0 : index
    %c0_131 = arith.constant 0 : index
    %c0_132 = arith.constant 0 : index
    %161 = vector.load %arg7[%c2_129, %c0_130, %c0_131, %c0_132] : memref<3x3x128x256xbf16, #tpu.memory_space<vmem>>, vector<1x1x128x256xbf16>
    %162 = vector.shape_cast %161 : vector<1x1x128x256xbf16> to vector<128x256xbf16>
    %cst_133 = arith.constant dense<0.000000e+00> : vector<128x256xf32>
    %163 = tpu.matmul %159, %162, %cst_133 {dimension_numbers = #tpu.dot_dimension_numbers<[1], [0], [0], [1], [0, 0, 1, 1], [], []>} : vector<128x128xbf16>, vector<128x256xbf16>, vector<128x256xf32> -> vector<128x256xf32>
    %164 = arith.addf %160, %163 : vector<128x256xf32>
    %c0_134 = arith.constant 0 : index
    %c0_135 = arith.constant 0 : index
    %165 = vector.load %arg12[%c0_134, %c0_135] : memref<128x256xf32, #tpu.memory_space<vmem>>, vector<128x256xf32>
    tpu.vector_store %arg12[%c0_134, %c0_135], %164 {strides = array<i32>} : memref<128x256xf32, #tpu.memory_space<vmem>>, vector<128x256xf32>,
    %166 = vector.extract_strided_slice %138 {offsets = [0, 1, 0], sizes = [10, 16, 128], strides = [1, 1, 1]} : vector<10x18x128xbf16> to vector<10x16x128xbf16>
    %167 = vector.extract_strided_slice %166 {offsets = [0, 0, 0], sizes = [8, 16, 128], strides = [1, 1, 1]} : vector<10x16x128xbf16> to vector<8x16x128xbf16>
    %168 = vector.shape_cast %167 : vector<8x16x128xbf16> to vector<128x128xbf16>
    %c0_136 = arith.constant 0 : index
    %c0_137 = arith.constant 0 : index
    %169 = vector.load %arg12[%c0_136, %c0_137] : memref<128x256xf32, #tpu.memory_space<vmem>>, vector<128x256xf32>
    %c0_138 = arith.constant 0 : index
    %c1_139 = arith.constant 1 : index
    %c0_140 = arith.constant 0 : index
    %c0_141 = arith.constant 0 : index
    %170 = vector.load %arg7[%c0_138, %c1_139, %c0_140, %c0_141] : memref<3x3x128x256xbf16, #tpu.memory_space<vmem>>, vector<1x1x128x256xbf16>
    %171 = vector.shape_cast %170 : vector<1x1x128x256xbf16> to vector<128x256xbf16>
    %cst_142 = arith.constant dense<0.000000e+00> : vector<128x256xf32>
    %172 = tpu.matmul %168, %171, %cst_142 {dimension_numbers = #tpu.dot_dimension_numbers<[1], [0], [0], [1], [0, 0, 1, 1], [], []>} : vector<128x128xbf16>, vector<128x256xbf16>, vector<128x256xf32> -> vector<128x256xf32>
    %173 = arith.addf %169, %172 : vector<128x256xf32>
    %c0_143 = arith.constant 0 : index
    %c0_144 = arith.constant 0 : index
    %174 = vector.load %arg12[%c0_143, %c0_144] : memref<128x256xf32, #tpu.memory_space<vmem>>, vector<128x256xf32>
    tpu.vector_store %arg12[%c0_143, %c0_144], %173 {strides = array<i32>} : memref<128x256xf32, #tpu.memory_space<vmem>>, vector<128x256xf32>,
    %175 = vector.extract_strided_slice %166 {offsets = [1, 0, 0], sizes = [8, 16, 128], strides = [1, 1, 1]} : vector<10x16x128xbf16> to vector<8x16x128xbf16>
    %176 = vector.shape_cast %175 : vector<8x16x128xbf16> to vector<128x128xbf16>
    %c0_145 = arith.constant 0 : index
    %c0_146 = arith.constant 0 : index
    %177 = vector.load %arg12[%c0_145, %c0_146] : memref<128x256xf32, #tpu.memory_space<vmem>>, vector<128x256xf32>
    %c1_147 = arith.constant 1 : index
    %c1_148 = arith.constant 1 : index
    %c0_149 = arith.constant 0 : index
    %c0_150 = arith.constant 0 : index
    %178 = vector.load %arg7[%c1_147, %c1_148, %c0_149, %c0_150] : memref<3x3x128x256xbf16, #tpu.memory_space<vmem>>, vector<1x1x128x256xbf16>
    %179 = vector.shape_cast %178 : vector<1x1x128x256xbf16> to vector<128x256xbf16>
    %cst_151 = arith.constant dense<0.000000e+00> : vector<128x256xf32>
    %180 = tpu.matmul %176, %179, %cst_151 {dimension_numbers = #tpu.dot_dimension_numbers<[1], [0], [0], [1], [0, 0, 1, 1], [], []>} : vector<128x128xbf16>, vector<128x256xbf16>, vector<128x256xf32> -> vector<128x256xf32>
    %181 = arith.addf %177, %180 : vector<128x256xf32>
    %c0_152 = arith.constant 0 : index
    %c0_153 = arith.constant 0 : index
    %182 = vector.load %arg12[%c0_152, %c0_153] : memref<128x256xf32, #tpu.memory_space<vmem>>, vector<128x256xf32>
    tpu.vector_store %arg12[%c0_152, %c0_153], %181 {strides = array<i32>} : memref<128x256xf32, #tpu.memory_space<vmem>>, vector<128x256xf32>,
    %183 = vector.extract_strided_slice %166 {offsets = [2, 0, 0], sizes = [8, 16, 128], strides = [1, 1, 1]} : vector<10x16x128xbf16> to vector<8x16x128xbf16>
    %184 = vector.shape_cast %183 : vector<8x16x128xbf16> to vector<128x128xbf16>
    %c0_154 = arith.constant 0 : index
    %c0_155 = arith.constant 0 : index
    %185 = vector.load %arg12[%c0_154, %c0_155] : memref<128x256xf32, #tpu.memory_space<vmem>>, vector<128x256xf32>
    %c2_156 = arith.constant 2 : index
    %c1_157 = arith.constant 1 : index
    %c0_158 = arith.constant 0 : index
    %c0_159 = arith.constant 0 : index
    %186 = vector.load %arg7[%c2_156, %c1_157, %c0_158, %c0_159] : memref<3x3x128x256xbf16, #tpu.memory_space<vmem>>, vector<1x1x128x256xbf16>
    %187 = vector.shape_cast %186 : vector<1x1x128x256xbf16> to vector<128x256xbf16>
    %cst_160 = arith.constant dense<0.000000e+00> : vector<128x256xf32>
    %188 = tpu.matmul %184, %187, %cst_160 {dimension_numbers = #tpu.dot_dimension_numbers<[1], [0], [0], [1], [0, 0, 1, 1], [], []>} : vector<128x128xbf16>, vector<128x256xbf16>, vector<128x256xf32> -> vector<128x256xf32>
    %189 = arith.addf %185, %188 : vector<128x256xf32>
    %c0_161 = arith.constant 0 : index
    %c0_162 = arith.constant 0 : index
    %190 = vector.load %arg12[%c0_161, %c0_162] : memref<128x256xf32, #tpu.memory_space<vmem>>, vector<128x256xf32>
    tpu.vector_store %arg12[%c0_161, %c0_162], %189 {strides = array<i32>} : memref<128x256xf32, #tpu.memory_space<vmem>>, vector<128x256xf32>,
    %191 = vector.extract_strided_slice %138 {offsets = [0, 2, 0], sizes = [10, 16, 128], strides = [1, 1, 1]} : vector<10x18x128xbf16> to vector<10x16x128xbf16>
    %192 = vector.extract_strided_slice %191 {offsets = [0, 0, 0], sizes = [8, 16, 128], strides = [1, 1, 1]} : vector<10x16x128xbf16> to vector<8x16x128xbf16>
    %193 = vector.shape_cast %192 : vector<8x16x128xbf16> to vector<128x128xbf16>
    %c0_163 = arith.constant 0 : index
    %c0_164 = arith.constant 0 : index
    %194 = vector.load %arg12[%c0_163, %c0_164] : memref<128x256xf32, #tpu.memory_space<vmem>>, vector<128x256xf32>
    %c0_165 = arith.constant 0 : index
    %c2_166 = arith.constant 2 : index
    %c0_167 = arith.constant 0 : index
    %c0_168 = arith.constant 0 : index
    %195 = vector.load %arg7[%c0_165, %c2_166, %c0_167, %c0_168] : memref<3x3x128x256xbf16, #tpu.memory_space<vmem>>, vector<1x1x128x256xbf16>
    %196 = vector.shape_cast %195 : vector<1x1x128x256xbf16> to vector<128x256xbf16>
    %cst_169 = arith.constant dense<0.000000e+00> : vector<128x256xf32>
    %197 = tpu.matmul %193, %196, %cst_169 {dimension_numbers = #tpu.dot_dimension_numbers<[1], [0], [0], [1], [0, 0, 1, 1], [], []>} : vector<128x128xbf16>, vector<128x256xbf16>, vector<128x256xf32> -> vector<128x256xf32>
    %198 = arith.addf %194, %197 : vector<128x256xf32>
    %c0_170 = arith.constant 0 : index
    %c0_171 = arith.constant 0 : index
    %199 = vector.load %arg12[%c0_170, %c0_171] : memref<128x256xf32, #tpu.memory_space<vmem>>, vector<128x256xf32>
    tpu.vector_store %arg12[%c0_170, %c0_171], %198 {strides = array<i32>} : memref<128x256xf32, #tpu.memory_space<vmem>>, vector<128x256xf32>,
    %200 = vector.extract_strided_slice %191 {offsets = [1, 0, 0], sizes = [8, 16, 128], strides = [1, 1, 1]} : vector<10x16x128xbf16> to vector<8x16x128xbf16>
    %201 = vector.shape_cast %200 : vector<8x16x128xbf16> to vector<128x128xbf16>
    %c0_172 = arith.constant 0 : index
    %c0_173 = arith.constant 0 : index
    %202 = vector.load %arg12[%c0_172, %c0_173] : memref<128x256xf32, #tpu.memory_space<vmem>>, vector<128x256xf32>
    %c1_174 = arith.constant 1 : index
    %c2_175 = arith.constant 2 : index
    %c0_176 = arith.constant 0 : index
    %c0_177 = arith.constant 0 : index
    %203 = vector.load %arg7[%c1_174, %c2_175, %c0_176, %c0_177] : memref<3x3x128x256xbf16, #tpu.memory_space<vmem>>, vector<1x1x128x256xbf16>
    %204 = vector.shape_cast %203 : vector<1x1x128x256xbf16> to vector<128x256xbf16>
    %cst_178 = arith.constant dense<0.000000e+00> : vector<128x256xf32>
    %205 = tpu.matmul %201, %204, %cst_178 {dimension_numbers = #tpu.dot_dimension_numbers<[1], [0], [0], [1], [0, 0, 1, 1], [], []>} : vector<128x128xbf16>, vector<128x256xbf16>, vector<128x256xf32> -> vector<128x256xf32>
    %206 = arith.addf %202, %205 : vector<128x256xf32>
    %c0_179 = arith.constant 0 : index
    %c0_180 = arith.constant 0 : index
    %207 = vector.load %arg12[%c0_179, %c0_180] : memref<128x256xf32, #tpu.memory_space<vmem>>, vector<128x256xf32>
    tpu.vector_store %arg12[%c0_179, %c0_180], %206 {strides = array<i32>} : memref<128x256xf32, #tpu.memory_space<vmem>>, vector<128x256xf32>,
    %208 = vector.extract_strided_slice %191 {offsets = [2, 0, 0], sizes = [8, 16, 128], strides = [1, 1, 1]} : vector<10x16x128xbf16> to vector<8x16x128xbf16>
    %209 = vector.shape_cast %208 : vector<8x16x128xbf16> to vector<128x128xbf16>
    %c0_181 = arith.constant 0 : index
    %c0_182 = arith.constant 0 : index
    %210 = vector.load %arg12[%c0_181, %c0_182] : memref<128x256xf32, #tpu.memory_space<vmem>>, vector<128x256xf32>
    %c2_183 = arith.constant 2 : index
    %c2_184 = arith.constant 2 : index
    %c0_185 = arith.constant 0 : index
    %c0_186 = arith.constant 0 : index
    %211 = vector.load %arg7[%c2_183, %c2_184, %c0_185, %c0_186] : memref<3x3x128x256xbf16, #tpu.memory_space<vmem>>, vector<1x1x128x256xbf16>
    %212 = vector.shape_cast %211 : vector<1x1x128x256xbf16> to vector<128x256xbf16>
    %cst_187 = arith.constant dense<0.000000e+00> : vector<128x256xf32>
    %213 = tpu.matmul %209, %212, %cst_187 {dimension_numbers = #tpu.dot_dimension_numbers<[1], [0], [0], [1], [0, 0, 1, 1], [], []>} : vector<128x128xbf16>, vector<128x256xbf16>, vector<128x256xf32> -> vector<128x256xf32>
    %214 = arith.addf %210, %213 : vector<128x256xf32>
    %c0_188 = arith.constant 0 : index
    %c0_189 = arith.constant 0 : index
    %215 = vector.load %arg12[%c0_188, %c0_189] : memref<128x256xf32, #tpu.memory_space<vmem>>, vector<128x256xf32>
    tpu.vector_store %arg12[%c0_188, %c0_189], %214 {strides = array<i32>} : memref<128x256xf32, #tpu.memory_space<vmem>>, vector<128x256xf32>,
    %c0_190 = arith.constant 0 : index
    %c0_191 = arith.constant 0 : index
    %216 = vector.load %arg12[%c0_190, %c0_191] : memref<128x256xf32, #tpu.memory_space<vmem>>, vector<128x256xf32>
    %c0_192 = arith.constant 0 : index
    %c0_193 = arith.constant 0 : index
    %217 = vector.load %arg8[%c0_192, %c0_193] : memref<1x256xf32, #tpu.memory_space<vmem>>, vector<1x256xf32>
    %218 = vector.broadcast %217 : vector<1x256xf32> to vector<128x256xf32>
    %219 = arith.addf %216, %218 : vector<128x256xf32>
    %cst_194 = arith.constant 0.000000e+00 : f32
    %220 = vector.broadcast %cst_194 : f32 to vector<128x256xf32>
    %221 = arith.maximumf %219, %220 : vector<128x256xf32>
    %c0_195 = arith.constant 0 : index
    %c0_196 = arith.constant 0 : index
    %c0_197 = arith.constant 0 : index
    %222 = vector.load %arg9[%c0_195, %c0_196, %c0_197] : memref<1x128x256xf32, #tpu.memory_space<vmem>>, vector<1x128x256xf32>
    %223 = vector.shape_cast %222 : vector<1x128x256xf32> to vector<128x256xf32>
    %224 = arith.mulf %221, %223 : vector<128x256xf32>
    %cst_198 = arith.constant dense<0.000000e+00> : vector<256xf32>
    %225 = vector.multi_reduction <add>, %224, %cst_198 [0] : vector<128x256xf32> to vector<256xf32>
    %226 = vector.shape_cast %225 : vector<256xf32> to vector<1x256xf32>
    %227 = vector.shape_cast %226 : vector<1x256xf32> to vector<1x1x1x256xf32>
    %c0_199 = arith.constant 0 : index
    %c0_200 = arith.constant 0 : index
    %c0_201 = arith.constant 0 : index
    %c0_202 = arith.constant 0 : index
    %228 = vector.load %arg10[%c0_199, %c0_200, %c0_201, %c0_202] : memref<1x1x1x256xf32, #tpu.memory_space<vmem>>, vector<1x1x1x256xf32>
    tpu.vector_store %arg10[%c0_199, %c0_200, %c0_201, %c0_202], %227 {strides = array<i32>} : memref<1x1x1x256xf32, #tpu.memory_space<vmem>>, vector<1x1x1x256xf32>,
    return
  }
  func.func @transform_0(%arg0: i32, %arg1: i32) -> (i32, i32, i32, i32) {
    %c2_i32 = arith.constant 2 : i32
    %0 = arith.muli %arg0, %c2_i32 : i32
    %1 = arith.addi %0, %arg1 : i32
    %c0_i32 = arith.constant 0 : i32
    %c0_i32_0 = arith.constant 0 : i32
    %c0_i32_1 = arith.constant 0 : i32
    %c0_i32_2 = arith.constant 0 : i32
    return %1, %c0_i32, %c0_i32_0, %c0_i32_1 : i32, i32, i32, i32
  }
  func.func @transform_1(%arg0: i32, %arg1: i32) -> (i32, i32) {
    %c0_i32 = arith.constant 0 : i32
    %c0_i32_0 = arith.constant 0 : i32
    %c0_i32_1 = arith.constant 0 : i32
    return %c0_i32, %c0_i32_0 : i32, i32
  }
  func.func @transform_2(%arg0: i32, %arg1: i32) -> (i32, i32) {
    %c0_i32 = arith.constant 0 : i32
    %c0_i32_0 = arith.constant 0 : i32
    %c0_i32_1 = arith.constant 0 : i32
    return %c0_i32, %c0_i32_0 : i32, i32
  }
  func.func @transform_3(%arg0: i32, %arg1: i32) -> (i32, i32, i32, i32) {
    %c0_i32 = arith.constant 0 : i32
    %c0_i32_0 = arith.constant 0 : i32
    %c0_i32_1 = arith.constant 0 : i32
    %c0_i32_2 = arith.constant 0 : i32
    %c0_i32_3 = arith.constant 0 : i32
    return %c0_i32, %c0_i32_0, %c0_i32_1, %c0_i32_2 : i32, i32, i32, i32
  }
  func.func @transform_4(%arg0: i32, %arg1: i32) -> (i32, i32) {
    %c0_i32 = arith.constant 0 : i32
    %c0_i32_0 = arith.constant 0 : i32
    %c0_i32_1 = arith.constant 0 : i32
    return %c0_i32, %c0_i32_0 : i32, i32
  }
  func.func @transform_5(%arg0: i32, %arg1: i32) -> (i32, i32, i32, i32) {
    %c0_i32 = arith.constant 0 : i32
    %c0_i32_0 = arith.constant 0 : i32
    %c0_i32_1 = arith.constant 0 : i32
    %c0_i32_2 = arith.constant 0 : i32
    %c0_i32_3 = arith.constant 0 : i32
    return %c0_i32, %c0_i32_0, %c0_i32_1, %c0_i32_2 : i32, i32, i32, i32
  }
  func.func @transform_6(%arg0: i32, %arg1: i32) -> (i32, i32) {
    %c0_i32 = arith.constant 0 : i32
    %c0_i32_0 = arith.constant 0 : i32
    %c0_i32_1 = arith.constant 0 : i32
    return %c0_i32, %c0_i32_0 : i32, i32
  }
  func.func @transform_7(%arg0: i32, %arg1: i32) -> (i32, i32, i32) {
    %c0_i32 = arith.constant 0 : i32
    %c0_i32_0 = arith.constant 0 : i32
    %c0_i32_1 = arith.constant 0 : i32
    return %arg1, %c0_i32, %c0_i32_0 : i32, i32, i32
  }
  func.func @transform_8(%arg0: i32, %arg1: i32) -> (i32, i32, i32, i32) {
    %c0_i32 = arith.constant 0 : i32
    %c0_i32_0 = arith.constant 0 : i32
    %c0_i32_1 = arith.constant 0 : i32
    return %arg0, %arg1, %c0_i32, %c0_i32_0 : i32, i32, i32, i32
  }
}

</mosaic_0001>

<bundles_post_ra>
// kernel: tpu_custom_call.1
= control target key start
LH: loop header
LB: loop body
LE: loop exit
PB: predicated region body
PF: predicated region fallthrough
CT: control target
= control target key end

     0   :  { %13 = vsyncpa [#allocation5], 0  ;;  %s20556_s0 = inlined_call_operand.vmem [shape: bf16[4,12,20,9], index: 0, kind: input, shape index: {}]   ;;  %s20557_s1 = inlined_call_operand.vmem [shape: bf16[9,64], index: 1, kind: input, shape index: {}]   ;;  %s20558_s2 = inlined_call_operand.vmem [shape: f32[1,64], index: 2, kind: input, shape index: {}]   ;;  %s20559_s3 = inlined_call_operand.vmem [shape: bf16[3,3,64,128], index: 3, kind: input, shape index: {}]   ;;  %s20560_s4 = inlined_call_operand.vmem [shape: f32[1,128], index: 4, kind: input, shape index: {}]   ;;  %s20561_s5 = inlined_call_operand.hbm [shape: bf16[3,3,128,256], index: 5, kind: input, shape index: {}]   ;;  %s20562_s6 = inlined_call_operand.vmem [shape: f32[1,256], index: 6, kind: input, shape index: {}]   ;;  %s20563_s7 = inlined_call_operand.vmem [shape: f32[2,128,256], index: 7, kind: input, shape index: {}]   ;;  %s20564_s8 = inlined_call_operand.hbm [shape: f32[2,2,1,256], index: 8, kind: output, shape index: {}]  }
   0x1   :  { %14 = vsyncpa [#allocation6], 0 }
   0x2   :  { %16 = vsyncpa [#allocation6 + $0x1], 0  ;;  %s15683_s27 = smov 0   ;;  %s15685_s28 = smov 0  }
   0x3   :  { %s15687_s29 = smov 0   ;;  %s15689_s30 = smov 0  }
   0x4   :  { %s15691_s9 = smov 0   ;;  %s15693_s10 = smov 0  }
   0x5   :  { %s15695_s11 = smov 0   ;;  %s15697_s12 = smov 0  }
   0x6 LB: > { %20982 = sst [smem:[#allocation10_spill]] %s15622_s11  ;;  %s13501_s13 = sadd.s32 4294967295, %s15626_s12   ;;  %s15626_s12 = sphi %s15697_s12, %s22_s12   ;;  %s15622_s11 = sphi %s15695_s11, %s21760_s11   ;;  %s15618_s10 = sphi %s15693_s10, %s21765_s10   ;;  %s15614_s9 = sphi %s15691_s9, %s21758_s9   ;;  %s15610_s30 = sphi %s15689_s30, %s21764_s30   ;;  %s15606_s29 = sphi %s15687_s29, %s21763_s29   ;;  %s15602_s28 = sphi %s15685_s28, %s21762_s28   ;;  %s15598_s27 = sphi %s15683_s27, %s21761_s27  }
   0x7   : > { %s13502_s14 = sadd.s32 4294967294, %s15626_s12   ;;  %s31_s15 = sadd.s32 1, %s15618_s10 }
   0x8   : > { %s34_s16 = sadd.s32 1, %s15622_s11  ;;  %p32_p0 = scmp.ge.s32.totalorder %s31_s15, 2 }
   0x9   : > { %s225_s17 = sadd.s32 1, %s15606_s29  ;;  %p235_p1 = scmp.ne.s32.totalorder %s15606_s29, %s15602_s28 }
   0xa   : > { %p236_p2 = scmp.eq.s32.totalorder %s13501_s13, 3  ;;  %s21767_s15 = smov (%p32_p0, %s31_s15), 0 }
   0xb   : > { %20983 = sst [smem:[#allocation11_spill]] %s21767_s15  ;;  %s21769_s16 = smov (!%p32_p0, %s34_s16), %s15622_s11 }
   0xc   : > { %s221_s18 = ssub.s32 %s15618_s10, %s21767_s15  ;;  %p15735_p3 = por %p236_p2, %p235_p1 }
   0xd   : > { %p36_p4 = scmp.ge.s32.totalorder %s21769_s16, 2  ;;  %p241_p5 = scmp.ne.s32.totalorder %s15602_s28, %s15598_s27 }
   0xe   : > { %s20984_s19 = scalar_select %p15735_p3, 1, 0 }
   0xf   : > { %p242_p6 = scmp.eq.s32.totalorder %s13502_s14, 3  ;;  %p13505_p7 = scmp.ge.s32.totalorder %s15626_s12, 1 }
  0x10   : > { %s21771_s16 = smov (%p36_p4, %s21769_s16), 0  ;;  %p249_p9 = scmp.lt.s32.totalorder %s15626_s12, 5 }
  0x11   : > { %20985 = sst [smem:[#allocation12_spill]] %s21771_s16  ;;  %p15744_p8 = por %p242_p6, %p241_p5 }
  0x12   : > { %s220_s21 = ssub.s32 %s15622_s11, %s21771_s16  ;;  %p15751_p10 = pnand %p13505_p7, %p249_p9 }
  0x13   : > { %s20986_s20 = scalar_select %p15744_p8, 1, 0 }
  0x14   : > { %s222_s22 = sor.u32 %s221_s18, %s220_s21  ;;  %p15755_p12 = scmp.eq.s32.totalorder %s13501_s13, 0 }
  0x15   : > { %s20987_s23 = scalar_select %p15751_p10, 1, 0 }
  0x16   : > { %p223_p11 = scmp.eq.s32.totalorder %s222_s22, 0  ;;  %p15162_p13 = pneg %p15751_p10 }
  0x17   : > { %s20988_s24 = scalar_select %p15755_p12, 1, 0 }
  0x18   : > { %s15762_s25 = scalar_select %p223_p11, %s15606_s29, %s225_s17  }
  0x19   : > { %s15628_s26 = smov [#allocation4]   ;;  %p15766_p0 = pnand %p15755_p12, %p15162_p13 }
  0x1a   : > { %s273_s14 = sshll.u32 %s15628_s26, 4  ;;  %s15500_s13 = scalar_lea.hbm %s20561_s5, 18432  ;;  %s274_s14 = int_to_ptr.vmem [resolvable:$true] %s273_s14 }
  0x1b   : > { %p15501_p1 = scmp.ne.s32.totalorder %s20561_s5, %s15500_s13  ;;  %p15502_p2 = pneg %p15766_p0 }
  0x1c   : > { %p15507_p6 = scmp.lt.u32.totalorder %s15500_s13, %s20561_s5 }
  0x1d   : > { %p15503_p4 = pnand %p15502_p2, %p15501_p1 }
  0x1f   : > { %p15504_p5 = pneg %p15503_p4 }
  0x21   : > { %p15509_p7 = pnand %p15507_p6, %p15504_p5 }
  0x23   : > { %15512 = shalt.err (!%p15509_p7)
}
  0x24   : > { %s15513_s11 = scalar_lea.vmem %s274_s14, 18432  ;;  %p15521_p8 = scmp.lt.s32.totalorder %s274_s14, %s274_s14 }
  0x25   : > { %p15514_p9 = scmp.ne.s32.totalorder %s274_s14, %s15513_s11  ;;  %p15522_p3 = scmp.lt.s32.totalorder %s15513_s11, %s15513_s11 }
  0x27   : > { %p15516_p11 = pnand %p15514_p9, %p15502_p2  ;;  %p15523_p12 = por %p15522_p3, %p15521_p8 }
  0x29   : > { %p15517_p13 = pneg %p15516_p11 }
  0x2b   : > { %p15524_p10 = pnand %p15523_p12, %p15517_p13 }
  0x2d   : > { %15527 = shalt.err (!%p15524_p10)
}
  0x2e   : > { %s15629_s15 = smov 128   ;;  %s15630_s16 = smov 8  }
  0x2f   : > { %15165 = dma.hbm_to_vmem [thread:$0]  (!%p15766_p0), %s20561_s5, 18432, %s274_s14, [#allocation5], %s15629_s15, %s15629_s15, %s15630_s16  }
  0x30   : > { %p20990_p1 = scmp.ne.s32.totalorder %s20987_s23, 0 }
  0x32   : > { %312 = sbr.rel (%p20990_p1) target bundleno = 1867 (0x74b), region = 52 }
  0x39   : > { %p20991_p4 = scmp.ne.s32.totalorder %s20988_s24, 0 }
  0x3b   : > { %15589 = dma.done.wait (%p20991_p4), [#allocation5], 18432  }
  0x3c   : > { %15591 = vsyncadd (%p20991_p4), [#allocation5], 4294948864  ;;  %vm1031_vm0 = vcmask 1043456   ;;  %v15631_v0 = vmov 0.0   ;;  %s13511_s11 = sshll.u32 %s15614_s9, 1  ;;  %vm15632_vm1 = vmmov 0   ;;  %v20572_v1 = vlaneseq }
  0x3d   : > { %14313 = vmatprep.subr.bf16.mxu1 %v15631_v0  ;;  %1552 = vst [vmem:[#allocation2 + $0xb0] sm:$0xf] %v15631_v0  ;;  %14315 = vmatprep.mubr.msk.bf16.mxu1 %vm15632_vm1, %v15631_v0  ;;  %s354_s23 = sadd.s32 %s15610_s30, %s13511_s11  ;;  %vm1032_vm2 = vcmask 1044480   ;;  %v15633_v2 = vmov 65535   ;;  %v15634_v4 = vmov 1983009808  }
  0x3e   : > { %v1033_v3 = vsel %vm1031_vm0, 4294967295, %v15633_v2  ;;  %p355_p3 = scmp.lt.s32.totalorder %s354_s23, 3  ;;  %v728_v5 = vunpack.c.l.s4 %v15634_v4  ;;  %v15799_v7 = vshrl.u32 %v20572_v1, 7  ;;  %v15246_v8 = vld [vmem:[%s20557_s1] sm:$0x1f]   ;;  %vm985_vm3 = vcmask 72704  }
  0x3f   : > { %v1034_v6 = vsel %vm1032_vm2, %v1033_v3, 0  ;;  %v15247_v10 = vld [vmem:[%s20559_s3] sm:$0xff]   ;;  %v15248_v29 = vld [vmem:[%s20559_s3 + $0x8] sm:$0xff]   ;;  %s13568_s17 = sshll.u32 %s15610_s30, 3  ;;  %vm4585_vm13 = vsmask.f32 256 }
  0x40   : > { %s21773_s23 = smov (!%p355_p3, %s354_s23), 3  ;;  %20992 = vst [vmem:[#allocation13_spill] sm:$0xff] %v15799_v7  ;;  %v729_v9 = vunpack.c.0.s8 %v728_v5  ;;  %v1036_v11 = vand.u32 %v15246_v8, %v1034_v6  ;;  %s13569_s26 = sadd.s32 4294967294, %s13568_s17  ;;  %vm4586_vm14 = vsmask.f32 1284 }
  0x41   : > { %s15155_s18 = smul.u32 144, %s21773_s23  ;;  %vm4588_vm15 = vsmask.f32 2312  ;;  %vm4590_vm2 = vsmask.f32 3340  ;;  %s13926_s21 = sadd.s32 4294967295, %s13568_s17 }
  0x42   : > { %14314 = vmatpush3.bf16.msra.mxu1 %v1036_v11  ;;  %v15815_v15 = vsub.s32 %v729_v9, %v15799_v7  ;;  %p362_p8 = scmp.lt.s32.totalorder %s15610_s30, 1  ;;  %s350_s13 = sand.u32 1, %s15602_s28  }
  0x43   : > { %s15810_s16 = scalar_lea.vmem %s20556_s0, %s15155_s18  ;;  %14375 = vmatprep.subr.bf16.mxu1 %v15247_v10  ;;  %s14147_s15 = sshll.u32 %s15610_s30, 1 }
  0x44   : > { %v13515_v12 = vld.sshfl [vmem:[%s15810_s16] sm:$0x33 pattern:$0x76325410]  ;;  %20993 = vst [vmem:[#allocation14_spill] sm:$0xff] %v15815_v15  ;;  %s363_s17 = scalar_select %p362_p8, %s15610_s30, 1 }
  0x45   : > { %v13516_v13 = vld.sshfl [vmem:[%s15810_s16 + $0x4] sm:$0x33 pattern:$0x76325410]  ;;  %v447_v14 = vcombine.high %v13515_v12, %v13515_v12  ;;  %p21756_p12 = scmp.ne.s32.totalorder %s20984_s19, 0 }
  0x46   : > { %v455_v16 = vcombine.high %v13516_v13, %v13516_v13  ;;  %v13517_v17 = vld.sshfl [vmem:[%s15810_s16 + $0x8] sm:$0x3 pattern:$0x76325410]  ;;  %s14152_s23 = sshll.u32 %s363_s17, 8 }
  0x47   : > { %v725_v18 = vcombine.low %v13515_v12, %v447_v14  ;;  %v13518_v19 = vld.sshfl [vmem:[%s15810_s16 + $0xc] sm:$0x33 pattern:$0x76325410]  ;;  %s20416_s18 = scalar_lea.vmem %s20563_s7, %s14152_s23 }
  0x48   : > { %v726_v20 = vcombine.low %v13516_v13, %v455_v16  ;;  %v13519_v21 = vld.sshfl [vmem:[%s15810_s16 + $0x10] sm:$0x33 pattern:$0x76325410]  ;;  %v470_v22 = vcombine.high %v13518_v19, %v13518_v19  ;;  %v742_v25 = vcombine.low %v13517_v17, %v13518_v19 }
  0x49   : > { %v733_v23 = vrot.slane %v725_v18, %v15815_v15  ;;  %v13521_v27 = vld.sshfl [vmem:[%s15810_s16 + $0x18] sm:$0x33 pattern:$0x76325410]  ;;  %v478_v32 = vcombine.high %v13519_v21, %v13519_v21 }
  0x4a   : > { %v740_v24 = vrot.slane %v726_v20, %v15815_v15  ;;  %v743_v26 = vcombine.low %v470_v22, %v13519_v21  ;;  %v750_v30 = vrot.slane %v742_v25, %v15815_v15  ;;  %v493_v33 = vcombine.high %v13521_v27, %v13521_v27  ;;  %v13520_v34 = vld.sshfl [vmem:[%s15810_s16 + $0x14] sm:$0x3 pattern:$0x76325410] }
  0x4b   : > { %v759_v36 = vcombine.low %v478_v32, %v13520_v34  ;;  %v13522_v38 = vld.sshfl [vmem:[%s15810_s16 + $0x1c] sm:$0x33 pattern:$0x76325410] }
  0x4c   : > { %v741_v28 = vcombine.low %v733_v23, %v740_v24  ;;  %v757_v31 = vrot.slane %v743_v26, %v15815_v15  ;;  %v760_v37 = vcombine.low %v13521_v27, %v493_v33  ;;  %v13523_v41 = vld.sshfl [vmem:[%s15810_s16 + $0x20] sm:$0x3 pattern:$0x76325410]  ;;  %v501_v42 = vcombine.high %v13522_v38, %v13522_v38 }
  0x4d   : > { %v767_v39 = vrot.slane %v759_v36, %v15815_v15  ;;  %v13524_v43 = vld.sshfl [vmem:[%s15810_s16 + $0x24] sm:$0x33 pattern:$0x76325410] }
  0x4e   : > { %14316 = vmatmul.mubr.msk.bf16.vlgmr.msra.gmra.mrb[0].mxu1 %vm985_vm3, %v741_v28  ;;  %v758_v35 = vcombine.low %v750_v30, %v757_v31  ;;  %v774_v40 = vrot.slane %v760_v37, %v15815_v15  ;;  %v776_v45 = vcombine.low %v13522_v38, %v501_v42  ;;  %v777_v46 = vcombine.low %v13523_v41, %v13524_v43  ;;  %v13525_v47 = vld.sshfl [vmem:[%s15810_s16 + $0x28] sm:$0x33 pattern:$0x76325410] }
  0x4f   : > { %14319 = vmatprep.mubr.msk.bf16.mxu1 %vm15632_vm1, %v15631_v0  ;;  %14376 = vmatpush3.bf16.msra.mxu1 %v15247_v10  ;;  %v516_v50 = vcombine.high %v13524_v43, %v13524_v43  ;;  %v524_v51 = vcombine.high %v13525_v47, %v13525_v47  ;;  %v13526_v52 = vld.sshfl [vmem:[%s15810_s16 + $0x2c] sm:$0x3 pattern:$0x76325410] }
  0x50   : > { %14377 = vmatprep.subr.bf16.mxu1 %v15248_v29  ;;  %v775_v44 = vcombine.low %v767_v39, %v774_v40  ;;  %v784_v48 = vrot.slane %v776_v45, %v15815_v15  ;;  %v791_v49 = vrot.slane %v777_v46, %v15815_v15  ;;  %v13527_v56 = vld.sshfl [vmem:[%s15810_s16 + $0x30] sm:$0x33 pattern:$0x76325410] }
  0x51   : > { %v793_v54 = vcombine.low %v516_v50, %v13525_v47  ;;  %v794_v55 = vcombine.low %v524_v51, %v13526_v52  ;;  %v13528_v57 = vld.sshfl [vmem:[%s15810_s16 + $0x34] sm:$0x33 pattern:$0x76325410]  ;;  %v539_v60 = vcombine.high %v13527_v56, %v13527_v56 }
  0x52   : > { %v792_v53 = vcombine.low %v784_v48, %v791_v49  ;;  %v547_v61 = vcombine.high %v13528_v57, %v13528_v57  ;;  %v13530_v62 = vld.sshfl [vmem:[%s15810_s16 + $0x3c] sm:$0x33 pattern:$0x76325410] }
  0x53   : > { %14378 = vmatpush3.bf16.msra.mxu1 %v15248_v29  ;;  %v801_v58 = vrot.slane %v793_v54, %v15815_v15  ;;  %v808_v59 = vrot.slane %v794_v55, %v15815_v15  ;;  %v810_v2 = vcombine.low %v13527_v56, %v539_v60  ;;  %v13529_v4 = vld.sshfl [vmem:[%s15810_s16 + $0x38] sm:$0x3 pattern:$0x76325410]  ;;  %v562_v9 = vcombine.high %v13530_v62, %v13530_v62 }
  0x54   : > { %v811_v3 = vcombine.low %v13528_v57, %v547_v61  ;;  %v13531_v5 = vld.sshfl [vmem:[%s15810_s16 + $0x40] sm:$0x33 pattern:$0x76325410]  ;;  %v827_v12 = vcombine.low %v13529_v4, %v13530_v62 }
  0x55   : > { %v809_v63 = vcombine.low %v801_v58, %v808_v59  ;;  %v818_v6 = vrot.slane %v810_v2, %v15815_v15  ;;  %v13533_v10 = vld.sshfl [vmem:[%s15810_s16 + $0x48] sm:$0x33 pattern:$0x76325410]  ;;  %v828_v13 = vcombine.low %v562_v9, %v13531_v5  ;;  %v570_v18 = vcombine.high %v13531_v5, %v13531_v5 }
  0x56   : > { %14320 = vmatmul.mubr.msk.bf16.gmra.mrb[4].mxu1 %vm985_vm3, %v758_v35  ;;  %v825_v8 = vrot.slane %v811_v3, %v15815_v15  ;;  %v13532_v14 = vld.sshfl [vmem:[%s15810_s16 + $0x44] sm:$0x3 pattern:$0x76325410]  ;;  %v835_v16 = vrot.slane %v827_v12, %v15815_v15  ;;  %v585_v19 = vcombine.high %v13533_v10, %v13533_v10 }
  0x57   : > { %14323 = vmatprep.mubr.msk.bf16.mxu1 %vm15632_vm1, %v15631_v0  ;;  %v842_v17 = vrot.slane %v828_v13, %v15815_v15  ;;  %v13534_v20 = vld.sshfl [vmem:[%s15810_s16 + $0x4c] sm:$0x33 pattern:$0x76325410]  ;;  %v844_v22 = vcombine.low %v570_v18, %v13532_v14 }
  0x58   : > { %v826_v11 = vcombine.low %v818_v6, %v825_v8  ;;  %v845_v23 = vcombine.low %v13533_v10, %v585_v19  ;;  %v13535_v24 = vld.sshfl [vmem:[%s15810_s16 + $0x50] sm:$0x3 pattern:$0x76325410]  ;;  %v593_v28 = vcombine.high %v13534_v20, %v13534_v20 }
  0x59   : > { %v843_v21 = vcombine.low %v835_v16, %v842_v17  ;;  %v13536_v25 = vld.sshfl [vmem:[%s15810_s16 + $0x54] sm:$0x33 pattern:$0x76325410]  ;;  %v852_v26 = vrot.slane %v844_v22, %v15815_v15 }
  0x5a   : > { %v859_v27 = vrot.slane %v845_v23, %v15815_v15  ;;  %v13537_v29 = vld.sshfl [vmem:[%s15810_s16 + $0x58] sm:$0x33 pattern:$0x76325410]  ;;  %v861_v31 = vcombine.low %v13534_v20, %v593_v28  ;;  %v862_v32 = vcombine.low %v13535_v24, %v13536_v25  ;;  %v608_v36 = vcombine.high %v13536_v25, %v13536_v25 }
  0x5b   : > { %v13538_v33 = vld.sshfl [vmem:[%s15810_s16 + $0x5c] sm:$0x3 pattern:$0x76325410]  ;;  %v616_v37 = vcombine.high %v13537_v29, %v13537_v29 }
  0x5c   : > { %v860_v30 = vcombine.low %v852_v26, %v859_v27  ;;  %v869_v34 = vrot.slane %v861_v31, %v15815_v15  ;;  %v876_v35 = vrot.slane %v862_v32, %v15815_v15  ;;  %v13539_v38 = vld.sshfl [vmem:[%s15810_s16 + $0x60] sm:$0x33 pattern:$0x76325410]  ;;  %v878_v41 = vcombine.low %v608_v36, %v13537_v29  ;;  %v15249_v29 = vld [vmem:[%s20559_s3 + $0x10] sm:$0xff]  }
  0x5d   : > { %v13540_v39 = vld.sshfl [vmem:[%s15810_s16 + $0x64] sm:$0x33 pattern:$0x76325410]  ;;  %v879_v42 = vcombine.low %v616_v37, %v13538_v33  ;;  %v631_v45 = vcombine.high %v13539_v38, %v13539_v38  ;;  %14379 = vmatprep.subr.bf16.mxu1 %v15249_v29  ;;  %v15947_v32 = vstv %s13569_s26  ;;  %v15954_v37 = vadd.s32 16, %v15799_v7  ;;  %s13510_s26 = sshll.u32 %s350_s13, 1 }
  0x5e   : > { %14324 = vmatmul.mubr.msk.bf16.gmra.mrb[8].mxu1 %vm985_vm3, %v775_v44  ;;  %v877_v40 = vcombine.low %v869_v34, %v876_v35  ;;  %v886_v43 = vrot.slane %v878_v41, %v15815_v15  ;;  %v639_v46 = vcombine.high %v13540_v39, %v13540_v39  ;;  %v13542_v47 = vld.sshfl [vmem:[%s15810_s16 + $0x6c] sm:$0x33 pattern:$0x76325410]  ;;  %v15936_v31 = vld [vmem:[%s20559_s3 + $0x60] sm:$0xff]   ;;  %v15951_v35 = vadd.s32 4294967294, %v15799_v7 }
  0x5f   : > { %14327 = vmatprep.mubr.msk.bf16.mxu1 %vm15632_vm1, %v15631_v0  ;;  %v893_v44 = vrot.slane %v879_v42, %v15815_v15  ;;  %v895_v49 = vcombine.low %v13539_v38, %v631_v45  ;;  %v13541_v51 = vld.sshfl [vmem:[%s15810_s16 + $0x68] sm:$0x3 pattern:$0x76325410]  ;;  %v654_v55 = vcombine.high %v13542_v47, %v13542_v47  ;;  %14380 = vmatpush3.bf16.msra.mxu1 %v15249_v29  ;;  %vm1308_vm4 = vcmp.ge.s32.totalorder %v15947_v32, 0  ;;  %s352_s22 = scalar_lea.vmem [#allocation7], %s13510_s26 }
  0x60   : > { %v896_v50 = vcombine.low %v13540_v39, %v639_v46  ;;  %v13543_v52 = vld.sshfl [vmem:[%s15810_s16 + $0x70] sm:$0x33 pattern:$0x76325410]  ;;  %v912_v58 = vcombine.low %v13541_v51, %v13542_v47  ;;  %20994 = vst [vmem:[#allocation15_spill] sm:$0xff] %v15954_v37  ;;  %vm1320_vm5 = vcmp.lt.s32.totalorder %v15947_v32, 16 }
  0x61   : > { %v894_v48 = vcombine.low %v886_v43, %v893_v44  ;;  %v13545_v56 = vld.sshfl [vmem:[%s15810_s16 + $0x78] sm:$0x33 pattern:$0x76325410]  ;;  %v913_v59 = vcombine.low %v654_v55, %v13543_v52  ;;  %v15635_v39 = vmov 1966171168   ;;  %vm15959_vm6 = vmand %vm1308_vm4, %vm1320_vm5 }
  0x62   : > { %v910_v54 = vrot.slane %v896_v50, %v15815_v15  ;;  %v13544_v60 = vld.sshfl [vmem:[%s15810_s16 + $0x74] sm:$0x3 pattern:$0x76325410]  ;;  %v920_v61 = vrot.slane %v912_v58, %v15815_v15  ;;  %v677_v2 = vcombine.high %v13545_v56, %v13545_v56  ;;  %vm1344_vm7 = vcmp.ge.s32.totalorder %v15951_v35, 0  ;;  %s13404_s11 = sshll.u32 %s352_s22, 4  ;;  %s20505_s11 = int_to_ptr.vmem [resolvable:$true] %s13404_s11 }
  0x63   : > { %v927_v62 = vrot.slane %v913_v59, %v15815_v15  ;;  %v13546_v6 = vld.sshfl [vmem:[%s15810_s16 + $0x7c] sm:$0x33 pattern:$0x76325410]  ;;  %v15965_v47 = vadd.s32 4294967294, %v15954_v37  ;;  %vm1347_vm8 = vmand %vm15959_vm6, %vm1344_vm7  ;;  %v15252_v37 = vld [vmem:[%s20559_s3 + $0x68] sm:$0xff]  }
  0x64   : > { %v930_v5 = vcombine.low %v13545_v56, %v677_v2  ;;  %v13547_v10 = vld.sshfl [vmem:[%s15810_s16 + $0x80] sm:$0x3 pattern:$0x76325410]  ;;  %s15528_s14 = scalar_lea.vmem %s20505_s11, 32 }
  0x65   : > { %v928_v3 = vcombine.low %v920_v61, %v927_v62  ;;  %v13548_v12 = vld.sshfl [vmem:[%s15810_s16 + $0x84] sm:$0x33 pattern:$0x76325410]  ;;  %vm1385_vm9 = vcmp.lt.s32.totalorder %v15965_v47, 16  ;;  %p15529_p10 = scmp.ne.s32.totalorder %s20505_s11, %s15528_s14 }
  0x66   : > { %14328 = vmatmul.mubr.msk.bf16.gmra.mrb[12].mxu1 %vm985_vm3, %v792_v53  ;;  %v903_v53 = vrot.slane %v895_v49, %v15815_v15  ;;  %v944_v9 = vrot.slane %v930_v5, %v15815_v15  ;;  %v947_v16 = vcombine.low %v13547_v10, %v13548_v12  ;;  %v13549_v17 = vld.sshfl [vmem:[%s15810_s16 + $0x88] sm:$0x33 pattern:$0x76325410]  ;;  %v700_v20 = vcombine.high %v13548_v12, %v13548_v12  ;;  %vm1388_vm10 = vmand %vm15959_vm6, %vm1385_vm9 }
  0x67   : > { %14331 = vmatprep.mubr.msk.bf16.mxu1 %vm15632_vm1, %v15631_v0  ;;  %v13550_v22 = vld.sshfl [vmem:[%s15810_s16 + $0x8c] sm:$0x3 pattern:$0x76325410]  ;;  %s14148_s16 = sshll.u32 %s15614_s9, 2  ;;  %s13388_s9 = scalar_lea.sflag [#allocation6], %s350_s13 }
  0x68   : > { %v911_v57 = vcombine.low %v903_v53, %v910_v54  ;;  %v961_v19 = vrot.slane %v947_v16, %v15815_v15  ;;  %v963_v24 = vcombine.low %v700_v20, %v13549_v17  ;;  %p15530_p0 = pnand %p15529_p10, %p21756_p12 }
  0x6a   : > { %v971_v26 = vrot.slane %v963_v24, %v15815_v15  ;;  %v1291_v24 = vadd.s32 2, %v15947_v32  ;;  %p15531_p2 = pneg %p15530_p0 }
  0x6e   : > { %14332 = vmatmul.mubr.msk.bf16.gmra.mrb[16].mxu1 %vm985_vm3, %v809_v63  ;;  %v662_v63 = vcombine.high %v13543_v52, %v13543_v52 }
  0x6f   : > { %14335 = vmatprep.mubr.msk.bf16.mxu1 %vm15632_vm1, %v15631_v0 }
  0x70   : > { %v929_v4 = vcombine.low %v662_v63, %v13544_v60 }
  0x72   : > { %v937_v8 = vrot.slane %v929_v4, %v15815_v15 }
  0x74   : > { %v945_v13 = vcombine.low %v937_v8, %v944_v9 }
  0x76   : > { %14336 = vmatmul.mubr.msk.bf16.gmra.mrb[20].mxu1 %vm985_vm3, %v826_v11  ;;  %v685_v11 = vcombine.high %v13546_v6, %v13546_v6 }
  0x77   : > { %14339 = vmatprep.mubr.msk.bf16.mxu1 %vm15632_vm1, %v15631_v0 }
  0x78   : > { %v946_v14 = vcombine.low %v13546_v6, %v685_v11 }
  0x7a   : > { %v954_v18 = vrot.slane %v946_v14, %v15815_v15 }
  0x7c   : > { %v962_v23 = vcombine.low %v954_v18, %v961_v19 }
  0x7e   : > { %14340 = vmatmul.mubr.msk.bf16.gmra.mrb[24].mxu1 %vm985_vm3, %v843_v21  ;;  %v708_v21 = vcombine.high %v13549_v17, %v13549_v17 }
  0x7f   : > { %14343 = vmatprep.mubr.msk.bf16.mxu1 %vm15632_vm1, %v15631_v0 }
  0x80   : > { %v964_v25 = vcombine.low %v708_v21, %v13550_v22 }
  0x82   : > { %v978_v27 = vrot.slane %v964_v25, %v15815_v15 }
  0x84   : > { %v979_v28 = vcombine.low %v971_v26, %v978_v27 }
  0x86   : > { %14344 = vmatmul.mubr.msk.bf16.gmra.mrb[28].mxu1 %vm985_vm3, %v860_v30  ;;  %v15250_v30 = vld [vmem:[%s20559_s3 + $0x18] sm:$0xff]  }
  0x87   : > { %14347 = vmatprep.mubr.msk.bf16.mxu1 %vm15632_vm1, %v15631_v0  ;;  %14381 = vmatprep.subr.bf16.mxu1 %v15250_v30 }
  0x88   : > { %14382 = vmatpush3.bf16.msra.mxu1 %v15250_v30 }
  0x89   : > { %14407 = vmatprep.subr.bf16.mxu1 %v15936_v31 }
  0x8e   : > { %14348 = vmatmul.mubr.msk.bf16.gmra.mrb[32].mxu1 %vm985_vm3, %v877_v40  ;;  %v1575_v40 = vunpack.c.l.s4 %v15635_v39 }
  0x8f   : > { %14351 = vmatprep.mubr.msk.bf16.mxu1 %vm15632_vm1, %v15631_v0 }
  0x96   : > { %14352 = vmatmul.mubr.msk.bf16.gmra.mrb[36].mxu1 %vm985_vm3, %v894_v48  ;;  %v1576_v48 = vunpack.c.0.s8 %v1575_v40 }
  0x97   : > { %14355 = vmatprep.mubr.msk.bf16.mxu1 %vm15632_vm1, %v15631_v0 }
  0x98   : > { %v15974_v55 = vsub.s32 %v1576_v48, %v15799_v7 }
  0x9a   : > { %20997 = vst [vmem:[#allocation16_spill] sm:$0xff] %v15974_v55 }
  0x9e   : > { %14356 = vmatmul.mubr.msk.bf16.gmra.mrb[40].mxu1 %vm985_vm3, %v911_v57  ;;  %v1290_v57 = vadd.s32 1, %v15947_v32 }
  0x9f   : > { %14359 = vmatprep.mubr.msk.bf16.mxu1 %vm15632_vm1, %v15631_v0 }
  0xa0   : > { %vm1309_vm11 = vcmp.ge.s32.totalorder %v1290_v57, 0  ;;  %vm1321_vm12 = vcmp.lt.s32.totalorder %v1290_v57, 16 }
  0xa1   : > { %vm15993_vm0 = vmand %vm1309_vm11, %vm1321_vm12  ;;  %vm4596_vm12 = vsmask.f32 6424 }
  0xa2   : > { %vm16011_vm4 = vmand %vm15993_vm0, %vm1344_vm7 }
  0xa6   : > { %14360 = vmatmul.mubr.msk.bf16.gmra.mrb[44].mxu1 %vm985_vm3, %v928_v3 }
  0xa7   : > { %14363 = vmatprep.mubr.msk.bf16.mxu1 %vm15632_vm1, %v15631_v0 }
  0xae   : > { %14364 = vmatmul.mubr.msk.bf16.gmra.mrb[48].mxu1 %vm985_vm3, %v945_v13 }
  0xaf   : > { %14367 = vmatprep.mubr.msk.bf16.mxu1 %vm15632_vm1, %v15631_v0 }
  0xb6   : > { %14368 = vmatmul.mubr.msk.bf16.gmra.mrb[52].mxu1 %vm985_vm3, %v962_v23 }
  0xb7   : > { %14371 = vmatprep.mubr.msk.bf16.mxu1 %vm15632_vm1, %v15631_v0  ;;  %v15945_v0 = vld [vmem:[%s20558_s2] ss:$0 sm:$0xff]  ;;  %vm4587_vm1 = vmor %vm4585_vm13, %vm4586_vm14  ;;  %vm1322_vm13 = vcmp.lt.s32.totalorder %v1291_v24, 16 }
  0xb8   : > { %vm4589_vm5 = vmor %vm4587_vm1, %vm4588_vm15  ;;  %vm4598_vm15 = vsmask.f32 7452 }
  0xb9   : > { %vm16042_vm11 = vmor %vm4589_vm5, %vm4590_vm2 }
  0xbe   : > { %14372 = vmatmul.mubr.msk.bf16.gmra.mrb[56].mxu1 %vm985_vm3, %v979_v28  ;;  %vm4592_vm3 = vsmask.f32 4368 }
  0xbf   : > { %vm16058_vm14 = vmor %vm16042_vm11, %vm4592_vm3 }
 0x121   : > { %v1072_v33 = vpop.f32.mrb[0].mxu1 }
 0x122   : > { %v1073_v34 = vadd.f32 %v15945_v0, %v1072_v33  ;;  %v14317_v36 = vpop.f32.mrb[1].mxu1 }
 0x123   : > { %v1075_v38 = vpop.f32.mrb[2].mxu1 }
 0x124   : > { %v1191_v41 = vmax.f32 %v1073_v34, 0.0  ;;  %v1076_v42 = vadd.f32 %v15945_v0, %v1075_v38  ;;  %v14318_v43 = vpop.f32.mrb[3].mxu1 }
 0x126   : > { %v1251_v44 = vcombine.high %v1191_v41, %v1191_v41  ;;  %v1192_v46 = vmax.f32 %v1076_v42, 0.0 }
 0x128   : > { %v1422_v49 = vcombine.low %v1191_v41, %v1251_v44  ;;  %v1252_v50 = vcombine.high %v1192_v46, %v1192_v46 }
 0x129   : > { %v1080_v51 = vpop.f32.mrb[4].mxu1 }
 0x12a   : > { %v1423_v52 = vcombine.low %v1192_v46, %v1252_v50  ;;  %v1081_v53 = vadd.f32 %v15945_v0, %v1080_v51  ;;  %v14321_v54 = vpop.f32.mrb[5].mxu1  ;;  %v1470_v58 = vsel %vm1347_vm8, %v1422_v49, 0.0  ;;  %vm16025_vm8 = vmand %vm15993_vm0, %vm1385_vm9  ;;  %v16039_v46 = vadd.s32 3, %v15947_v32 }
 0x12b   : > { %v1083_v56 = vpop.f32.mrb[6].mxu1 }
 0x12c   : > { %v1471_v59 = vsel %vm15959_vm6, %v1423_v52, 0.0  ;;  %v1193_v60 = vmax.f32 %v1081_v53, 0.0  ;;  %v1084_v61 = vadd.f32 %v15945_v0, %v1083_v56  ;;  %v14322_v62 = vpop.f32.mrb[7].mxu1  ;;  %vm4594_vm6 = vsmask.f32 5396 }
 0x12d   : > { %v1506_v63 = vpack.c.bf16 %v1471_v59, %v1470_v58  ;;  %v13573_v2 = vpack.c.bf16 %v1471_v59, %v1471_v59  ;;  %vm1311_vm2 = vcmp.ge.s32.totalorder %v16039_v46, 0  ;;  %vm1323_vm3 = vcmp.lt.s32.totalorder %v16039_v46, 16 }
 0x12e   : > { %v1253_v3 = vcombine.high %v1193_v60, %v1193_v60  ;;  %v1194_v4 = vmax.f32 %v1084_v61, 0.0  ;;  %v1472_v8 = vsel %vm1388_vm10, %v1193_v60, 0.0  ;;  %vm1310_vm10 = vcmp.ge.s32.totalorder %v1291_v24, 0 }
 0x12f   : > { %v1580_v5 = vrot.slane %v1506_v63, %v15974_v55  ;;  %v1587_v6 = vrot.slane %v13573_v2, %v15974_v55  ;;  %v1507_v18 = vpack.c.bf16 %v1472_v8, %v1472_v8  ;;  %vm16072_vm1 = vmand %vm1310_vm10, %vm1322_vm13  ;;  %v16098_v24 = vadd.s32 9, %v15947_v32 }
 0x130   : > { %v1424_v9 = vcombine.low %v1253_v3, %v1194_v4  ;;  %v1254_v26 = vcombine.high %v1194_v4, %v1194_v4  ;;  %v16064_v4 = vadd.s32 4, %v15947_v32  ;;  %vm16111_vm5 = vmand %vm16072_vm1, %vm1344_vm7 }
 0x131   : > { %v1588_v10 = vcombine.high %v1580_v5, %v1580_v5  ;;  %v1589_v11 = vcombine.high %v1587_v6, %v1587_v6  ;;  %v1088_v12 = vpop.f32.mrb[8].mxu1  ;;  %v15988_v16 = vrot.slane %v1580_v5, %v15974_v55  ;;  %v16005_v28 = vrot.slane %v1587_v6, %v15974_v55  ;;  %vm16190_vm13 = vmand %vm1311_vm2, %vm1323_vm3 }
 0x132   : > { %v1089_v13 = vadd.f32 %v15945_v0, %v1088_v12  ;;  %v14325_v14 = vpop.f32.mrb[9].mxu1  ;;  %v16018_v33 = vrot.slane %v1507_v18, %v15974_v55  ;;  %v1473_v42 = vsel %vm16011_vm4, %v1424_v9, 0.0  ;;  %v16067_v5 = vadd.s32 5, %v15947_v32  ;;  %vm16093_vm4 = vmor %vm16058_vm14, %vm4594_vm6 }
 0x133   : > { %20998 = vst [vmem:[#allocation17_spill] sm:$0xff] %v15988_v16  ;;  %v15991_v17 = vrot.slane %v1588_v10, %v15974_v55  ;;  %v1091_v20 = vpop.f32.mrb[10].mxu1  ;;  %v15998_v21 = vrot.slane %v1589_v11, %v15974_v55  ;;  %21003 = vst [vmem:[#allocation20_spill] sm:$0xff] %v16005_v28  ;;  %v16079_v11 = vadd.s32 6, %v15947_v32  ;;  %v16082_v14 = vadd.s32 7, %v15947_v32 }
 0x134   : > { %v1195_v22 = vmax.f32 %v1089_v13, 0.0  ;;  %v1092_v23 = vadd.f32 %v15945_v0, %v1091_v20  ;;  %v14326_v25 = vpop.f32.mrb[11].mxu1  ;;  %v4505_v54 = vcombine.high %v16018_v33, %v16018_v33  ;;  %v16085_v18 = vadd.s32 8, %v15947_v32  ;;  %vm16124_vm6 = vmand %vm16072_vm1, %vm1385_vm9 }
 0x135   : > { %20999 = vst [vmem:[#allocation18_spill] sm:$0xff] %v15991_v17  ;;  %21002 = vst [vmem:[#allocation19_spill] sm:$0xff] %v15998_v21  ;;  %v2234_v27 = vcombine.low %v15988_v16, %v15991_v17  ;;  %v13583_v30 = vcombine.high %v15988_v16, %v15991_v17  ;;  %v2236_v40 = vcombine.low %v16005_v28, %v15998_v21  ;;  %vm1312_vm10 = vcmp.ge.s32.totalorder %v16064_v4, 0 }
 0x136   : > { %v1255_v34 = vcombine.high %v1195_v22, %v1195_v22  ;;  %v1425_v36 = vcombine.low %v1254_v26, %v1195_v22  ;;  %v1196_v38 = vmax.f32 %v1092_v23, 0.0  ;;  %v13584_v41 = vcombine.high %v16005_v28, %v15998_v21  ;;  %vm1356_vm14 = vmand %vm16190_vm13, %vm1344_vm7 }
 0x137   : > { %v2244_v45 = vrot.slane %v2234_v27, %v15974_v55  ;;  %v2251_v53 = vrot.slane %v13583_v30, %v15974_v55  ;;  %v2258_v62 = vrot.slane %v2236_v40, %v15974_v55  ;;  %v16088_v19 = vrot.slane %v4505_v54, %v15974_v55 }
 0x138   : > { %v1474_v43 = vsel %vm15993_vm0, %v1425_v36, 0.0  ;;  %v1475_v56 = vsel %vm16025_vm8, %v1255_v34, 0.0  ;;  %v1256_v57 = vcombine.high %v1196_v38, %v1196_v38  ;;  %v2265_v63 = vrot.slane %v13584_v41, %v15974_v55  ;;  %vm16147_vm8 = vmor %vm16093_vm4, %vm4596_vm12 }
 0x139   : > { %v1096_v44 = vpop.f32.mrb[12].mxu1  ;;  %v1508_v49 = vpack.c.bf16 %v1474_v43, %v1473_v42  ;;  %v13574_v50 = vpack.c.bf16 %v1474_v43, %v1474_v43  ;;  %vm2812_vm0 = vcmask 523264   ;;  %v1509_v6 = vpack.c.bf16 %v1475_v56, %v1475_v56  ;;  %vm16180_vm12 = vmor %vm16147_vm8, %vm4598_vm15 }
 0x13a   : > { %v1097_v51 = vadd.f32 %v15945_v0, %v1096_v44  ;;  %v14329_v52 = vpop.f32.mrb[13].mxu1  ;;  %v2266_v10 = vcombine.low %v2244_v45, %v2251_v53  ;;  %v1426_v22 = vcombine.low %v1196_v38, %v1256_v57  ;;  %v2267_v23 = vcombine.low %v2258_v62, %v2265_v63 }
 0x13b   : > { %v1099_v58 = vpop.f32.mrb[14].mxu1  ;;  %v1643_v59 = vrot.slane %v1508_v49, %v15974_v55  ;;  %v1650_v8 = vrot.slane %v13574_v50, %v15974_v55  ;;  %v16102_v25 = vcombine.high %v15988_v16, %v15988_v16  ;;  %v16116_v34 = vadd.s32 10, %v15947_v32 }
 0x13c   : > { %v1197_v60 = vmax.f32 %v1097_v51, 0.0  ;;  %v14330_v61 = vpop.f32.mrb[15].mxu1  ;;  %v1100_v3 = vadd.f32 %v15945_v0, %v1099_v58  ;;  %v1691_v39 = vrot.slane %v1509_v6, %v15974_v55  ;;  %v2274_v41 = vrot.slane %v2266_v10, %v15974_v55 }
 0x13d   : > { %v1651_v12 = vcombine.high %v1643_v59, %v1643_v59  ;;  %21016 = vst [vmem:[#allocation21_spill] sm:$0xff] %v16102_v25  ;;  %v16105_v26 = vrot.slane %v1643_v59, %v15974_v55  ;;  %v1652_v38 = vcombine.high %v1650_v8, %v1650_v8  ;;  %v16131_v43 = vrot.slane %v16018_v33, %v15974_v55 }
 0x13e   : > { %v1257_v13 = vcombine.high %v1197_v60, %v1197_v60  ;;  %v1198_v29 = vmax.f32 %v1100_v3, 0.0  ;;  %v16134_v44 = vrot.slane %v1650_v8, %v15974_v55  ;;  %v4670_v50 = vshll.u32 %v16088_v19, 16 }
 0x13f   : > { %21017 = vst [vmem:[#allocation22_spill] sm:$0xff] %v16105_v26  ;;  %21022 = vst [vmem:[#allocation23_spill] sm:$0xff] %v16131_v43  ;;  %v16137_v45 = vrot.slane %v1651_v12, %v15974_v55  ;;  %v1476_v51 = vsel %vm16111_vm5, %v1426_v22, 0.0  ;;  %v2281_v52 = vrot.slane %v2267_v23, %v15974_v55  ;;  %v16153_v56 = vcombine.high %v16105_v26, %v16105_v26 }
 0x140   : > { %21023 = vst [vmem:[#allocation24_spill] sm:$0xff] %v16134_v44  ;;  %v1427_v48 = vcombine.low %v1197_v60, %v1257_v13  ;;  %v1478_v58 = vsel %vm16124_vm6, %v1198_v29, 0.0  ;;  %v16161_v60 = vrot.slane %v1652_v38, %v15974_v55  ;;  %v4513_v61 = vcombine.high %v1691_v39, %v1691_v39 }
 0x141   : > { %v1104_v30 = vpop.f32.mrb[16].mxu1  ;;  %21026 = vst [vmem:[#allocation25_spill] sm:$0xff] %v16153_v56  ;;  %v2282_v63 = vcombine.low %v2274_v41, %v2281_v52  ;;  %vm1324_vm11 = vcmp.lt.s32.totalorder %v16064_v4, 16  ;;  %v16167_v2 = vcombine.high %v16134_v44, %v16134_v44  ;;  %v1258_v3 = vcombine.high %v1198_v29, %v1198_v29 }
 0x142   : > { %v14333_v42 = vpop.f32.mrb[17].mxu1  ;;  %v1105_v53 = vadd.f32 %v15945_v0, %v1104_v30  ;;  %v1477_v57 = vsel %vm16072_vm1, %v1427_v48, 0.0  ;;  %21027 = vst [vmem:[#allocation26_spill] sm:$0xff] %v16161_v60  ;;  %v16171_v8 = vcombine.high %v16137_v45, %v16137_v45  ;;  %v16175_v9 = vcombine.high %v15998_v21, %v15998_v21  ;;  %vm16246_vm15 = vmand %vm1312_vm10, %vm1324_vm11 }
 0x143   : > { %v1107_v49 = vpop.f32.mrb[18].mxu1  ;;  %v1510_v62 = vpack.c.bf16 %v1477_v57, %v1476_v51  ;;  %21028 = vst [vmem:[#allocation27_spill] sm:$0xff] %v16167_v2  ;;  %v21031_v10 = vmov 0  ;;  %v4665_v12 = vshrl.u32 %v16131_v43, 16  ;;  %v13575_v13 = vpack.c.bf16 %v1477_v57, %v1477_v57  ;;  %14383 = vmatprep.mubr.msk.bf16.mxu1 %vm2812_vm0, %v2282_v63  ;;  %vm16259_vm1 = vmand %vm16190_vm13, %vm1385_vm9 }
 0x144   : > { %v14334_v54 = vpop.f32.mrb[19].mxu1  ;;  %v1108_v59 = vadd.f32 %v15945_v0, %v1107_v49  ;;  %v1199_v6 = vmax.f32 %v1105_v53, 0.0  ;;  %21029 = vst [vmem:[#allocation28_spill] sm:$0xff] %v16171_v8  ;;  %21030 = vst [vmem:[#allocation29_spill] sm:$0xff] %v16175_v9  ;;  %v21032_v10 = vsel %vm16180_vm12, 4294967295, %v21031_v10  ;;  %v1511_v20 = vpack.c.bf16 %v1478_v58, %v1478_v58 }
 0x145   : > { %21033 = vst [vmem:[#allocation30_spill] sm:$0xff] %v21032_v10  ;;  %v2284_v38 = vcombine.low %v16137_v45, %v16153_v56  ;;  %v16199_v41 = vsel %vm16180_vm12, %v4665_v12, %v4670_v50  ;;  %v2283_v42 = vcombine.low %v16131_v43, %v16105_v26  ;;  %v1706_v46 = vrot.slane %v1510_v62, %v15974_v55  ;;  %vm16285_vm4 = vmand %vm16246_vm15, %vm1344_vm7 }
 0x146   : > { %v1259_v22 = vcombine.high %v1199_v6, %v1199_v6  ;;  %v1428_v27 = vcombine.low %v1258_v3, %v1199_v6  ;;  %v1200_v29 = vmax.f32 %v1108_v59, 0.0  ;;  %21036 = vst [vmem:[#allocation31_spill] sm:$0xff] %v16199_v41  ;;  %v16205_v49 = vrot.slane %v1691_v39, %v15974_v55  ;;  %vm16321_vm5 = vmand %vm16246_vm15, %vm1385_vm9 }
 0x147   : > { %v16208_v51 = vrot.slane %v4513_v61, %v15974_v55  ;;  %v2285_v53 = vcombine.low %v16171_v8, %v16134_v44  ;;  %v2286_v50 = vcombine.low %v16161_v60, %v16167_v2  ;;  %v1713_v58 = vrot.slane %v13575_v13, %v15974_v55 }
 0x148   : > { %21037 = vst [vmem:[#allocation32_spill] sm:$0xff] %v16205_v49  ;;  %v1754_v61 = vrot.slane %v1511_v20, %v15974_v55  ;;  %v1429_v62 = vcombine.low %v1259_v22, %v1200_v29  ;;  %v16225_v63 = vrot.slane %v2284_v38, %v15974_v55  ;;  %v1714_v3 = vcombine.high %v1706_v46, %v1706_v46 }
 0x149   : > { %v1112_v30 = vpop.f32.mrb[20].mxu1  ;;  %21038 = vst [vmem:[#allocation33_spill] sm:$0xff] %v16208_v51  ;;  %v2293_v13 = vrot.slane %v2283_v42, %v15974_v55  ;;  %v16238_v20 = vrot.slane %v2286_v50, %v15974_v55  ;;  %v1715_v22 = vcombine.high %v1713_v58, %v1713_v58  ;;  %v1260_v57 = vcombine.high %v1200_v29, %v1200_v29 }
 0x14a   : > { %v14337_v48 = vpop.f32.mrb[21].mxu1  ;;  %21039 = vst [vmem:[#allocation34_spill] sm:$0xff] %v16225_v63  ;;  %v1113_v6 = vadd.f32 %v15945_v0, %v1112_v30  ;;  %v16232_v1 = vsel %vm16190_vm13, %v1429_v62, 0.0  ;;  %vm1313_vm2 = vcmp.ge.s32.totalorder %v16067_v5, 0  ;;  %vm1325_vm3 = vcmp.lt.s32.totalorder %v16067_v5, 16 }
 0x14b   : > { %v1115_v52 = vpop.f32.mrb[22].mxu1  ;;  %v1479_v48 = vsel %vm1356_vm14, %v1428_v27, 0.0  ;;  %21041 = vst [vmem:[#allocation36_spill] sm:$0xff] %v16238_v20  ;;  %v2315_v42 = vcombine.low %v2293_v13, %v16225_v63  ;;  %v16270_v23 = vcombine.high %v16161_v60, %v16161_v60  ;;  %v16279_v13 = vrot.slane %v1754_v61, %v15974_v55  ;;  %vm16379_vm6 = vmand %vm1313_vm2, %vm1325_vm3 }
 0x14c   : > { %v14338_v39 = vpop.f32.mrb[23].mxu1  ;;  %v1116_v12 = vadd.f32 %v15945_v0, %v1115_v52  ;;  %v1512_v38 = vpack.c.bf16 %v16232_v1, %v1479_v48  ;;  %v1201_v33 = vmax.f32 %v1113_v6, 0.0  ;;  %v16273_v6 = vrot.slane %v1714_v3, %v15974_v55  ;;  %vm16397_vm11 = vmand %vm16379_vm6, %vm1344_vm7 }
 0x14d   : > { %v16235_v39 = vrot.slane %v2285_v53, %v15974_v55  ;;  %v2323_v52 = vrot.slane %v2315_v42, %v15974_v55  ;;  %21046 = vst [vmem:[#allocation37_spill] sm:$0xff] %v16270_v23  ;;  %21048 = vst [vmem:[#allocation39_spill] sm:$0xff] %v16279_v13  ;;  %v4521_v42 = vcombine.high %v1754_v61, %v1754_v61  ;;  %v1481_v3 = vsel %vm16259_vm1, %v1260_v57, 0.0 }
 0x14e   : > { %v1202_v30 = vmax.f32 %v1116_v12, 0.0  ;;  %v1261_v29 = vcombine.high %v1201_v33, %v1201_v33  ;;  %21047 = vst [vmem:[#allocation38_spill] sm:$0xff] %v16273_v6  ;;  %v16295_v61 = vrot.slane %v1706_v46, %v15974_v55  ;;  %v1769_v15 = vrot.slane %v1512_v38, %v15974_v55  ;;  %vm16453_vm13 = vmand %vm16379_vm6, %vm1385_vm9 }
 0x14f   : > { %21040 = vst [vmem:[#allocation35_spill] sm:$0xff] %v16235_v39  ;;  %v2316_v53 = vcombine.low %v16235_v39, %v16238_v20  ;;  %v2332_v46 = vcombine.low %v16270_v23, %v16205_v49  ;;  %v1513_v38 = vpack.c.bf16 %v1481_v3, %v1481_v3  ;;  %vm1314_vm8 = vcmp.ge.s32.totalorder %v16079_v11, 0 }
 0x150   : > { %v1262_v12 = vcombine.high %v1202_v30, %v1202_v30  ;;  %v1430_v40 = vcombine.low %v1201_v33, %v1261_v29  ;;  %v1777_v4 = vcombine.high %v1769_v15, %v1769_v15  ;;  %v16349_v27 = vcombine.high %v16295_v61, %v16295_v61 }
 0x151   : > { %v1120_v50 = vpop.f32.mrb[24].mxu1  ;;  %v2330_v59 = vrot.slane %v2316_v53, %v15974_v55  ;;  %v16339_v53 = vrot.slane %v2332_v46, %v15974_v55  ;;  %vm1326_vm10 = vcmp.lt.s32.totalorder %v16079_v11, 16  ;;  %vm1327_vm1 = vcmp.lt.s32.totalorder %v16082_v14, 16 }
 0x152   : > { %v14341_v48 = vpop.f32.mrb[25].mxu1  ;;  %v1431_v36 = vcombine.low %v1202_v30, %v1262_v12  ;;  %v1121_v7 = vadd.f32 %v15945_v0, %v1120_v50  ;;  %v1482_v33 = vsel %vm16285_vm4, %v1430_v40, 0.0  ;;  %v13585_v50 = vcombine.high %v16295_v61, %v16273_v6  ;;  %vm16496_vm14 = vmand %vm1314_vm8, %vm1326_vm10 }
 0x153   : > { %v1123_v62 = vpop.f32.mrb[26].mxu1  ;;  %v16276_v48 = vrot.slane %v1715_v22, %v15974_v55  ;;  %v2331_v22 = vcombine.low %v2323_v52, %v2330_v59  ;;  %v16313_v59 = vrot.slane %v4521_v42, %v15974_v55  ;;  %v2333_v52 = vcombine.low %v16295_v61, %v16273_v6  ;;  %21054 = vst [vmem:[#allocation41_spill] sm:$0xff] %v16339_v53  ;;  %vm16518_vm2 = vmand %vm16496_vm14, %vm1344_vm7 }
 0x154   : > { %v14342_v54 = vpop.f32.mrb[27].mxu1  ;;  %v1124_v20 = vadd.f32 %v15945_v0, %v1123_v62  ;;  %v16307_v57 = vsel %vm16246_vm15, %v1431_v36, 0.0  ;;  %vm1315_vm15 = vcmp.ge.s32.totalorder %v16082_v14, 0  ;;  %vm1316_vm3 = vcmp.ge.s32.totalorder %v16085_v18, 0 }
 0x155   : > { %v16301_v54 = vrot.slane %v1713_v58, %v15974_v55  ;;  %14384 = vmatmul.mubr.msk.bf16.vlgmr.msra.gmra.mrb[60].mxu1 %vm2812_vm0, %v2331_v22  ;;  %21051 = vst [vmem:[#allocation40_spill] sm:$0xff] %v16313_v59  ;;  %v1514_v30 = vpack.c.bf16 %v16307_v57, %v1482_v33  ;;  %v1203_v58 = vmax.f32 %v1121_v7, 0.0  ;;  %v16342_v3 = vrot.slane %v2333_v52, %v15974_v55 }
 0x156   : > { %14408 = vmatpush3.bf16.msra.mxu1 %v15936_v31  ;;  %v1204_v40 = vmax.f32 %v1124_v20, 0.0  ;;  %v15253_v31 = vld [vmem:[%s20559_s3 + $0x70] sm:$0xff]   ;;  %v13576_v20 = vpack.c.bf16 %v16232_v1, %v16232_v1  ;;  %v16345_v22 = vrot.slane %v13585_v50, %v15974_v55  ;;  %v16359_v52 = vrot.slane %v1769_v15, %v15974_v55 }
 0x157   : > { %v2335_v7 = vcombine.low %v16301_v54, %v16276_v48  ;;  %14409 = vmatprep.subr.bf16.mxu1 %v15252_v37  ;;  %v1263_v29 = vcombine.high %v1203_v58, %v1203_v58  ;;  %21055 = vst [vmem:[#allocation42_spill] sm:$0xff] %v16342_v3  ;;  %v16353_v1 = vcombine.high %v16301_v54, %v16301_v54  ;;  %v1484_v46 = vsel %vm16321_vm5, %v1203_v58, 0.0  ;;  %vm1406_vm5 = vmand %vm16496_vm14, %vm1385_vm9 }
 0x158   : > { %21056 = vst [vmem:[#allocation43_spill] sm:$0xff] %v16345_v22  ;;  %v2364_v39 = vcombine.low %v16339_v53, %v16342_v3  ;;  %v1776_v36 = vrot.slane %v13576_v20, %v15974_v55  ;;  %v16371_v58 = vrot.slane %v1777_v4, %v15974_v55  ;;  %v13577_v15 = vpack.c.bf16 %v16307_v57, %v16307_v57 }
 0x159   : > { %v1128_v62 = vpop.f32.mrb[28].mxu1  ;;  %21057 = vst [vmem:[#allocation44_spill] sm:$0xff] %v16353_v1  ;;  %v1432_v50 = vcombine.low %v1263_v29, %v1204_v40  ;;  %v16362_v63 = vrot.slane %v2335_v7, %v15974_v55  ;;  %v1515_v4 = vpack.c.bf16 %v1484_v46, %v1484_v46  ;;  %v1264_v53 = vcombine.high %v1204_v40, %v1204_v40 }
 0x15a   : > { %v14345_v12 = vpop.f32.mrb[29].mxu1  ;;  %14410 = vmatpush3.bf16.msra.mxu1 %v15252_v37  ;;  %21059 = vst [vmem:[#allocation46_spill] sm:$0xff] %v16371_v58  ;;  %v1129_v7 = vadd.f32 %v15945_v0, %v1128_v62  ;;  %v2372_v51 = vrot.slane %v2364_v39, %v15974_v55  ;;  %v1832_v62 = vrot.slane %v1514_v30, %v15974_v55  ;;  %vm1328_vm4 = vcmp.lt.s32.totalorder %v16085_v18, 16 }
 0x15b   : > { %v1131_v33 = vpop.f32.mrb[30].mxu1  ;;  %v1817_v12 = vrot.slane %v1513_v38, %v15974_v55  ;;  %21058 = vst [vmem:[#allocation45_spill] sm:$0xff] %v16362_v63  ;;  %14411 = vmatprep.subr.bf16.mxu1 %v15253_v31  ;;  %v15254_v38 = vld [vmem:[%s20559_s3 + $0x78] sm:$0xff]   ;;  %v1839_v30 = vrot.slane %v13577_v15, %v15974_v55  ;;  %v16410_v59 = vcombine.high %v16371_v58, %v16371_v58 }
 0x15c   : > { %v14346_v42 = vpop.f32.mrb[31].mxu1  ;;  %v1205_v5 = vmax.f32 %v1129_v7, 0.0  ;;  %v1132_v39 = vadd.f32 %v15945_v0, %v1131_v33  ;;  %v16405_v7 = vcombine.high %v16359_v52, %v16359_v52  ;;  %v16418_v33 = vrot.slane %v1776_v36, %v15974_v55 }
 0x15d   : > { %v2365_v42 = vcombine.low %v16345_v22, %v16362_v63  ;;  %v4529_v57 = vcombine.high %v1817_v12, %v1817_v12  ;;  %21065 = vst [vmem:[#allocation48_spill] sm:$0xff] %v16410_v59  ;;  %v1880_v2 = vrot.slane %v1515_v4, %v15974_v55  ;;  %v13586_v15 = vcombine.high %v16301_v54, %v16276_v48 }
 0x15e   : > { %14412 = vmatpush3.bf16.msra.mxu1 %v15253_v31  ;;  %21064 = vst [vmem:[#allocation47_spill] sm:$0xff] %v16405_v7  ;;  %v1778_v31 = vcombine.high %v1776_v36, %v1776_v36  ;;  %v1433_v29 = vcombine.low %v1264_v53, %v1205_v5  ;;  %21067 = vst [vmem:[#allocation50_spill] sm:$0xff] %v16418_v33  ;;  %v2382_v36 = vcombine.low %v16279_v13, %v16359_v52 }
 0x15f   : > { %v2379_v40 = vrot.slane %v2365_v42, %v15974_v55  ;;  %14413 = vmatprep.subr.bf16.mxu1 %v15254_v38  ;;  %v16415_v42 = vld [vmem:[%s20559_s3 + $0xc0] sm:$0xff]   ;;  %v16424_v8 = vrot.slane %v4529_v57, %v15974_v55  ;;  %v1840_v4 = vcombine.high %v1832_v62, %v1832_v62  ;;  %v2383_v57 = vcombine.low %v16371_v58, %v16405_v7 }
 0x160   : > { %21066 = vst [vmem:[#allocation49_spill] sm:$0xff] %v16415_v42  ;;  %v1486_v43 = vsel %vm16379_vm6, %v1433_v29, 0.0  ;;  %v1841_v21 = vcombine.high %v1839_v30, %v1839_v30  ;;  %v16438_v46 = vrot.slane %v13586_v15, %v15974_v55  ;;  %v16441_v29 = vrot.slane %v2382_v36, %v15974_v55  ;;  %vm16581_vm6 = vmand %vm1315_vm15, %vm1327_vm1 }
 0x161   : > { %v1136_v20 = vpop.f32.mrb[32].mxu1  ;;  %v2380_v56 = vcombine.low %v2372_v51, %v2379_v40  ;;  %21068 = vst [vmem:[#allocation51_spill] sm:$0xff] %v16424_v8  ;;  %v1206_v40 = vmax.f32 %v1132_v39, 0.0  ;;  %v1265_v39 = vcombine.high %v1205_v5, %v1205_v5  ;;  %v16467_v5 = vrot.slane %v1778_v31, %v15974_v55  ;;  %vm16604_vm8 = vmand %vm16581_vm6, %vm1344_vm7 }
 0x162   : > { %v14349_v41 = vpop.f32.mrb[33].mxu1  ;;  %14414 = vmatpush3.bf16.msra.mxu1 %v15254_v38  ;;  %21069 = vst [vmem:[#allocation52_spill] sm:$0xff] %v16438_v46  ;;  %v4537_v38 = vcombine.high %v1880_v2, %v1880_v2  ;;  %v16480_v16 = vrot.slane %v1841_v21, %v15974_v55  ;;  %v16485_v37 = vrot.slane %v1880_v2, %v15974_v55  ;;  %vm16620_vm10 = vmand %vm16581_vm6, %vm1385_vm9  ;;  %vm1329_vm15 = vcmp.lt.s32.totalorder %v16098_v24, 16 }
 0x163   : > { %v1139_v53 = vpop.f32.mrb[34].mxu1  ;;  %v1485_v41 = vsel %vm16397_vm11, %v1432_v50, 0.0  ;;  %14387 = vmatprep.mubr.msk.bf16.mxu1 %vm2812_vm0, %v2380_v56  ;;  %v2384_v50 = vcombine.low %v16410_v59, %v16418_v33  ;;  %14439 = vmatprep.subr.bf16.mxu1 %v16415_v42  ;;  %v1137_v56 = vadd.f32 %v15945_v0, %v1136_v20  ;;  %21074 = vst [vmem:[#allocation55_spill] sm:$0xff] %v16467_v5  ;;  %vm16639_vm11 = vmand %vm1316_vm3, %vm1328_vm4  ;;  %vm1318_vm1 = vcmp.ge.s32.totalorder %v16116_v34, 0 }
 0x164   : > { %v14350_v9 = vpop.f32.mrb[35].mxu1  ;;  %v1516_v51 = vpack.c.bf16 %v1486_v43, %v1485_v41  ;;  %v16458_v41 = vrot.slane %v2383_v57, %v15974_v55  ;;  %v16471_v59 = vrot.slane %v1840_v4, %v15974_v55  ;;  %v1266_v7 = vcombine.high %v1206_v40, %v1206_v40  ;;  %21078 = vst [vmem:[#allocation59_spill] sm:$0xff] %v16480_v16  ;;  %vm16737_vm3 = vmand %vm16639_vm11, %vm1385_vm9 }
 0x165   : > { %v16447_v9 = vrot.slane %v1817_v12, %v15974_v55  ;;  %v16461_v36 = vrot.slane %v2384_v50, %v15974_v55  ;;  %v2413_v12 = vcombine.low %v16438_v46, %v16441_v29  ;;  %v16474_v57 = vrot.slane %v1832_v62, %v15974_v55  ;;  %21079 = vst [vmem:[#allocation60_spill] sm:$0xff] %v16485_v37 }
 0x166   : > { %21073 = vst [vmem:[#allocation54_spill] sm:$0xff] %v16458_v41  ;;  %21075 = vst [vmem:[#allocation56_spill] sm:$0xff] %v16471_v59  ;;  %v16477_v50 = vrot.slane %v1839_v30, %v15974_v55  ;;  %v16488_v4 = vrot.slane %v4537_v38, %v15974_v55  ;;  %v1487_v62 = vsel %vm16453_vm13, %v1265_v39, 0.0  ;;  %v1207_v30 = vmax.f32 %v1137_v56, 0.0 }
 0x167   : > { %21070 = vst [vmem:[#allocation53_spill] sm:$0xff] %v16447_v9  ;;  %21076 = vst [vmem:[#allocation57_spill] sm:$0xff] %v16474_v57  ;;  %v2414_v20 = vcombine.low %v16458_v41, %v16461_v36  ;;  %v2421_v38 = vrot.slane %v2413_v12, %v15974_v55  ;;  %v16506_v39 = vcombine.high %v16418_v33, %v16418_v33 }
 0x168   : > { %21077 = vst [vmem:[#allocation58_spill] sm:$0xff] %v16477_v50  ;;  %21080 = vst [vmem:[#allocation61_spill] sm:$0xff] %v16488_v4  ;;  %v1434_v8 = vcombine.low %v1206_v40, %v1266_v7  ;;  %v1267_v25 = vcombine.high %v1207_v30, %v1207_v30  ;;  %v16510_v56 = vcombine.high %v16467_v5, %v16467_v5 }
 0x169   : > { %v1144_v10 = vpop.f32.mrb[36].mxu1  ;;  %v2428_v15 = vrot.slane %v2414_v20, %v15974_v55  ;;  %21083 = vst [vmem:[#allocation62_spill] sm:$0xff] %v16506_v39  ;;  %v2432_v17 = vcombine.low %v16474_v57, %v16471_v59  ;;  %v1517_v28 = vpack.c.bf16 %v1487_v62, %v1487_v62  ;;  %v1140_v7 = vadd.f32 %v15945_v0, %v1139_v53  ;;  %vm16663_vm13 = vmand %vm16639_vm11, %vm1344_vm7 }
 0x16a   : > { %v14353_v31 = vpop.f32.mrb[37].mxu1  ;;  %21084 = vst [vmem:[#allocation63_spill] sm:$0xff] %v16510_v56  ;;  %v2430_v40 = vcombine.low %v16467_v5, %v16506_v39  ;;  %v1435_v20 = vcombine.low %v1207_v30, %v1267_v25  ;;  %v13587_v62 = vcombine.high %v16474_v57, %v16471_v59  ;;  %v1895_v46 = vrot.slane %v1516_v51, %v15974_v55 }
 0x16b   : > { %v1147_v2 = vpop.f32.mrb[38].mxu1  ;;  %v13578_v31 = vpack.c.bf16 %v1486_v43, %v1486_v43  ;;  %v2429_v12 = vcombine.low %v2421_v38, %v2428_v15  ;;  %v16530_v63 = vrot.slane %v2432_v17, %v15974_v55  ;;  %v1145_v25 = vadd.f32 %v15945_v0, %v1144_v10 }
 0x16c   : > { %v14354_v11 = vpop.f32.mrb[39].mxu1  ;;  %v16536_v53 = vrot.slane %v2430_v40, %v15974_v55  ;;  %v1488_v30 = vsel %vm16518_vm2, %v1434_v8, 0.0  ;;  %v16543_v38 = vsel %vm16496_vm14, %v1435_v20, 0.0  ;;  %v16549_v51 = vrot.slane %v13587_v62, %v15974_v55 }
 0x16d   : > { %v2431_v11 = vcombine.low %v16510_v56, %v16447_v9  ;;  %21087 = vst [vmem:[#allocation64_spill] sm:$0xff] %v16530_v63  ;;  %v1902_v3 = vrot.slane %v13578_v31, %v15974_v55  ;;  %14388 = vmatmul.mubr.msk.bf16.gmra.mrb[64].mxu1 %vm2812_vm0, %v2429_v12  ;;  %v16554_v10 = vpack.c.bf16 %v16543_v38, %v1488_v30  ;;  %v1208_v15 = vmax.f32 %v1140_v7, 0.0 }
 0x16e   : > { %21089 = vst [vmem:[#allocation66_spill] sm:$0xff] %v16549_v51  ;;  %v1209_v43 = vmax.f32 %v1145_v25, 0.0  ;;  %v1943_v20 = vrot.slane %v1517_v28, %v15974_v55  ;;  %v2463_v7 = vcombine.low %v16530_v63, %v16549_v51  ;;  %v1903_v25 = vcombine.high %v1895_v46, %v1895_v46 }
 0x16f   : > { %v16546_v17 = vrot.slane %v2431_v11, %v15974_v55  ;;  %v1148_v40 = vadd.f32 %v15945_v0, %v1147_v2  ;;  %v16575_v23 = vrot.slane %v1895_v46, %v15974_v55  ;;  %v1268_v51 = vcombine.high %v1208_v15, %v1208_v15 }
 0x170   : > { %v2477_v39 = vrot.slane %v2463_v7, %v15974_v55  ;;  %v1269_v63 = vcombine.high %v1209_v43, %v1209_v43  ;;  %v4545_v7 = vcombine.high %v1943_v20, %v1943_v20  ;;  %v16592_v30 = vrot.slane %v1903_v25, %v15974_v55 }
 0x171   : > { %21088 = vst [vmem:[#allocation65_spill] sm:$0xff] %v16546_v17  ;;  %v1152_v31 = vpop.f32.mrb[40].mxu1  ;;  %v2462_v11 = vcombine.low %v16536_v53, %v16546_v17  ;;  %21090 = vst [vmem:[#allocation67_spill] sm:$0xff] %v16575_v23  ;;  %v1490_v17 = vsel %vm1406_vm5, %v1208_v15, 0.0  ;;  %v1436_v28 = vcombine.low %v1268_v51, %v1209_v43  ;;  %v1210_v14 = vmax.f32 %v1148_v40, 0.0 }
 0x172   : > { %v14357_v12 = vpop.f32.mrb[41].mxu1  ;;  %21095 = vst [vmem:[#allocation70_spill] sm:$0xff] %v16592_v30  ;;  %v4022_v56 = vcombine.low %v16441_v29, %v16458_v41  ;;  %v1519_v4 = vpack.c.bf16 %v1490_v17, %v1490_v17  ;;  %v13579_v43 = vpack.c.bf16 %v16543_v38, %v16543_v38  ;;  %v16614_v40 = vcombine.high %v16575_v23, %v16575_v23 }
 0x173   : > { %v1155_v62 = vpop.f32.mrb[42].mxu1  ;;  %v1904_v12 = vcombine.high %v1902_v3, %v1902_v3  ;;  %v2470_v21 = vrot.slane %v2462_v11, %v15974_v55  ;;  %v16589_v11 = vrot.slane %v1943_v20, %v15974_v55  ;;  %v1270_v29 = vcombine.high %v1210_v14, %v1210_v14 }
 0x174   : > { %v14358_v8 = vpop.f32.mrb[43].mxu1  ;;  %v1156_v20 = vadd.f32 %v15945_v0, %v1155_v62  ;;  %v1437_v17 = vcombine.low %v1269_v63, %v1210_v14  ;;  %21099 = vst [vmem:[#allocation72_spill] sm:$0xff] %v16614_v40  ;;  %v2479_v38 = vcombine.low %v16477_v50, %v16480_v16  ;;  %v13588_v63 = vcombine.high %v16477_v50, %v16480_v16 }
 0x175   : > { %v16586_v8 = vrot.slane %v1902_v3, %v15974_v55  ;;  %21094 = vst [vmem:[#allocation69_spill] sm:$0xff] %v16589_v11  ;;  %v2478_v46 = vcombine.low %v2470_v21, %v2477_v39  ;;  %v16595_v15 = vrot.slane %v1904_v12, %v15974_v55  ;;  %v1153_v39 = vadd.f32 %v15945_v0, %v1152_v31 }
 0x176   : > { %v1212_v62 = vmax.f32 %v1156_v20, 0.0  ;;  %v1491_v14 = vsel %vm16604_vm8, %v1436_v28, 0.0  ;;  %v2482_v20 = vcombine.low %v16592_v30, %v16614_v40  ;;  %v2481_v28 = vcombine.low %v16485_v37, %v16575_v23 }
 0x177   : > { %21093 = vst [vmem:[#allocation68_spill] sm:$0xff] %v16586_v8  ;;  %21096 = vst [vmem:[#allocation71_spill] sm:$0xff] %v16595_v15  ;;  %14391 = vmatprep.mubr.msk.bf16.mxu1 %vm2812_vm0, %v2478_v46  ;;  %v1211_v31 = vmax.f32 %v1153_v39, 0.0  ;;  %v16629_v46 = vrot.slane %v4545_v7, %v15974_v55  ;;  %v2006_v7 = vrot.slane %v1519_v4, %v15974_v55  ;;  %v1493_v2 = vsel %vm16620_vm10, %v1270_v29, 0.0 }
 0x178   : > { %v16651_v18 = vrot.slane %v2479_v38, %v15974_v55  ;;  %v16654_v16 = vrot.slane %v13588_v63, %v15974_v55  ;;  %v1965_v4 = vrot.slane %v13579_v43, %v15974_v55  ;;  %vm1317_vm14 = vcmp.ge.s32.totalorder %v16098_v24, 0  ;;  %v16773_v24 = vld [vmem:[%s20558_s2] ss:$0 sm:$0xff] }
 0x179   : > { %v1160_v51 = vpop.f32.mrb[44].mxu1  ;;  %21102 = vst [vmem:[#allocation73_spill] sm:$0xff] %v16629_v46  ;;  %v1271_v3 = vcombine.high %v1211_v31, %v1211_v31  ;;  %v16670_v38 = vrot.slane %v4022_v56, %v15974_v55  ;;  %v16673_v43 = vrot.slane %v2482_v20, %v15974_v55  ;;  %v4553_v40 = vcombine.high %v2006_v7, %v2006_v7  ;;  %vm16759_vm4 = vmand %vm1317_vm14, %vm1329_vm15 }
 0x17a   : > { %v14361_v25 = vpop.f32.mrb[45].mxu1  ;;  %21105 = vst [vmem:[#allocation74_spill] sm:$0xff] %v16651_v18  ;;  %21106 = vst [vmem:[#allocation75_spill] sm:$0xff] %v16654_v16  ;;  %v1161_v63 = vadd.f32 %v15945_v0, %v1160_v51  ;;  %v1521_v23 = vpack.c.bf16 %v1493_v2, %v1493_v2  ;;  %v2511_v51 = vcombine.low %v16651_v18, %v16654_v16  ;;  %vm1330_vm2 = vcmp.lt.s32.totalorder %v16116_v34, 16 }
 0x17b   : > { %v1163_v21 = vpop.f32.mrb[46].mxu1  ;;  %v1492_v25 = vsel %vm16581_vm6, %v1437_v17, 0.0  ;;  %v1272_v17 = vcombine.high %v1212_v62, %v1212_v62  ;;  %v1438_v29 = vcombine.low %v1211_v31, %v1271_v3  ;;  %21109 = vst [vmem:[#allocation76_spill] sm:$0xff] %v16670_v38  ;;  %21110 = vst [vmem:[#allocation77_spill] sm:$0xff] %v16673_v43  ;;  %v16680_v31 = vrot.slane %v2481_v28, %v15974_v55 }
 0x17c   : > { %v14362_v41 = vpop.f32.mrb[47].mxu1  ;;  %v1520_v22 = vpack.c.bf16 %v1492_v25, %v1491_v14  ;;  %v13580_v14 = vpack.c.bf16 %v1492_v25, %v1492_v25  ;;  %v16677_v25 = vrot.slane %v2006_v7, %v15974_v55  ;;  %v1967_v7 = vcombine.high %v1965_v4, %v1965_v4  ;;  %vm16790_vm5 = vmand %vm16759_vm4, %vm1344_vm7 }
 0x17d   : > { %v1958_v41 = vrot.slane %v16554_v10, %v15974_v55  ;;  %v1439_v10 = vcombine.low %v1212_v62, %v1272_v17  ;;  %21112 = vst [vmem:[#allocation79_spill] sm:$0xff] %v16680_v31  ;;  %v1494_v56 = vsel %vm16663_vm13, %v1438_v29, 0.0  ;;  %v16697_v12 = vrot.slane %v1965_v4, %v15974_v55  ;;  %vm1415_vm6 = vmand %vm16759_vm4, %vm1385_vm9 }
 0x17e   : > { %21111 = vst [vmem:[#allocation78_spill] sm:$0xff] %v16677_v25  ;;  %v2021_v37 = vrot.slane %v1520_v22, %v15974_v55  ;;  %v2028_v2 = vrot.slane %v13580_v14, %v15974_v55  ;;  %v2512_v29 = vcombine.low %v16680_v31, %v16673_v43  ;;  %v2069_v16 = vrot.slane %v1521_v23, %v15974_v55  ;;  %vm16830_vm8 = vmand %vm1318_vm1, %vm1330_vm2 }
 0x17f   : > { %v16687_v62 = vsel %vm16639_vm11, %v1439_v10, 0.0  ;;  %v1966_v17 = vcombine.high %v1958_v41, %v1958_v41  ;;  %v16694_v22 = vrot.slane %v1958_v41, %v15974_v55  ;;  %21114 = vst [vmem:[#allocation81_spill] sm:$0xff] %v16697_v12  ;;  %v1213_v10 = vmax.f32 %v1161_v63, 0.0  ;;  %vm16859_vm10 = vmand %vm16830_vm8, %vm1344_vm7 }
 0x180   : > { %v1522_v28 = vpack.c.bf16 %v16687_v62, %v1494_v56  ;;  %v1164_v14 = vadd.f32 %v15945_v0, %v1163_v21  ;;  %v16708_v56 = vcombine.high %v16586_v8, %v16586_v8  ;;  %v2029_v41 = vcombine.high %v2021_v37, %v2021_v37  ;;  %vm1418_vm11 = vmand %vm16830_vm8, %vm1385_vm9 }
 0x181   : > { %v1168_v3 = vpop.f32.mrb[48].mxu1  ;;  %21113 = vst [vmem:[#allocation80_spill] sm:$0xff] %v16694_v22  ;;  %v2519_v4 = vrot.slane %v2511_v51, %v15974_v55  ;;  %v2526_v18 = vrot.slane %v2512_v29, %v15974_v55  ;;  %v1273_v42 = vcombine.high %v1213_v10, %v1213_v10  ;;  %v16713_v63 = vrot.slane %v1966_v17, %v15974_v55 }
 0x182   : > { %v14365_v20 = vpop.f32.mrb[49].mxu1  ;;  %21116 = vst [vmem:[#allocation83_spill] sm:$0xff] %v16708_v56  ;;  %v16719_v23 = vrot.slane %v2021_v37, %v15974_v55  ;;  %v16724_v0 = vrot.slane %v2028_v2, %v15974_v55  ;;  %v1214_v51 = vmax.f32 %v1164_v14, 0.0  ;;  %v16728_v17 = vcombine.high %v16592_v30, %v16592_v30 }
 0x183   : > { %v1171_v38 = vpop.f32.mrb[50].mxu1  ;;  %v16702_v20 = vrot.slane %v4553_v40, %v15974_v55  ;;  %21117 = vst [vmem:[#allocation84_spill] sm:$0xff] %v16713_v63  ;;  %v2030_v40 = vcombine.high %v2028_v2, %v2028_v2  ;;  %v2527_v21 = vcombine.low %v2519_v4, %v2526_v18  ;;  %v4561_v29 = vcombine.high %v2069_v16, %v2069_v16 }
 0x184   : > { %v14366_v50 = vpop.f32.mrb[51].mxu1  ;;  %21119 = vst [vmem:[#allocation86_spill] sm:$0xff] %v16719_v23  ;;  %21120 = vst [vmem:[#allocation87_spill] sm:$0xff] %v16724_v0  ;;  %v16743_v18 = vcombine.high %v16595_v15, %v16595_v15  ;;  %v2529_v2 = vcombine.low %v16595_v15, %v16708_v56  ;;  %v16750_v4 = vrot.slane %v2029_v41, %v15974_v55 }
 0x185   : > { %21115 = vst [vmem:[#allocation82_spill] sm:$0xff] %v16702_v20  ;;  %v16716_v50 = vrot.slane %v1967_v7, %v15974_v55  ;;  %21121 = vst [vmem:[#allocation88_spill] sm:$0xff] %v16728_v17  ;;  %v16731_v7 = vrot.slane %v2069_v16, %v15974_v55  ;;  %v13581_v16 = vpack.c.bf16 %v16687_v62, %v16687_v62  ;;  %14392 = vmatmul.mubr.msk.bf16.gmra.mrb[68].mxu1 %vm2812_vm0, %v2527_v21 }
 0x186   : > { %21125 = vst [vmem:[#allocation90_spill] sm:$0xff] %v16743_v18  ;;  %21126 = vst [vmem:[#allocation91_spill] sm:$0xff] %v16750_v4  ;;  %v1440_v43 = vcombine.low %v1273_v42, %v1214_v51  ;;  %v2528_v56 = vcombine.low %v16728_v17, %v16586_v8  ;;  %v2084_v41 = vrot.slane %v1522_v28, %v15974_v55 }
 0x187   : > { %21118 = vst [vmem:[#allocation85_spill] sm:$0xff] %v16716_v50  ;;  %21122 = vst [vmem:[#allocation89_spill] sm:$0xff] %v16731_v7  ;;  %v2530_v62 = vcombine.low %v16743_v18, %v16589_v11  ;;  %v2531_v21 = vcombine.low %v16694_v22, %v16713_v63  ;;  %v1169_v15 = vadd.f32 %v16773_v24, %v1168_v3 }
 0x188   : > { %v1274_v17 = vcombine.high %v1214_v51, %v1214_v51  ;;  %v16781_v28 = vrot.slane %v2528_v56, %v15974_v55  ;;  %v16784_v18 = vrot.slane %v2529_v2, %v15974_v55  ;;  %v1172_v51 = vadd.f32 %v16773_v24, %v1171_v38 }
 0x189   : > { %v16747_v14 = vpop.f32.mrb[52].mxu1  ;;  %v16795_v3 = vrot.slane %v2530_v62, %v15974_v55  ;;  %v1215_v56 = vmax.f32 %v1169_v15, 0.0  ;;  %v16802_v37 = vrot.slane %v2030_v40, %v15974_v55  ;;  %v2091_v2 = vrot.slane %v13581_v16, %v15974_v55 }
 0x18a   : > { %v14369_v31 = vpop.f32.mrb[53].mxu1  ;;  %21129 = vst [vmem:[#allocation92_spill] sm:$0xff] %v16781_v28  ;;  %21130 = vst [vmem:[#allocation93_spill] sm:$0xff] %v16784_v18  ;;  %v2560_v30 = vcombine.low %v16781_v28, %v16784_v18  ;;  %v1216_v59 = vmax.f32 %v1172_v51, 0.0  ;;  %v2092_v15 = vcombine.high %v2084_v41, %v2084_v41  ;;  %v1497_v38 = vsel %vm16790_vm5, %v1440_v43, 0.0 }
 0x18b   : > { %v16776_v42 = vpop.f32.mrb[54].mxu1  ;;  %v1496_v31 = vsel %vm16737_vm3, %v1213_v10, 0.0  ;;  %21133 = vst [vmem:[#allocation94_spill] sm:$0xff] %v16795_v3  ;;  %v16798_v10 = vrot.slane %v2531_v21, %v15974_v55  ;;  %21135 = vst [vmem:[#allocation96_spill] sm:$0xff] %v16802_v37  ;;  %v1441_v21 = vcombine.low %v1274_v17, %v1215_v56  ;;  %v1275_v40 = vcombine.high %v1215_v56, %v1215_v56 }
 0x18c   : > { %v14370_v11 = vpop.f32.mrb[55].mxu1  ;;  %v1523_v9 = vpack.c.bf16 %v1496_v31, %v1496_v31  ;;  %v2568_v57 = vrot.slane %v2560_v30, %v15974_v55  ;;  %v1276_v31 = vcombine.high %v1216_v59, %v1216_v59  ;;  %v2093_v8 = vcombine.high %v2091_v2, %v2091_v2 }
 0x18d   : > { %21134 = vst [vmem:[#allocation95_spill] sm:$0xff] %v16798_v10  ;;  %v16805_v11 = vrot.slane %v4561_v29, %v15974_v55  ;;  %v2561_v62 = vcombine.low %v16795_v3, %v16798_v10  ;;  %v13589_v29 = vcombine.high %v16694_v22, %v16713_v63  ;;  %v1498_v17 = vsel %vm16759_vm4, %v1441_v21, 0.0 }
 0x18e   : > { %v1524_v43 = vpack.c.bf16 %v1498_v17, %v1497_v38  ;;  %v13582_v56 = vpack.c.bf16 %v1498_v17, %v1498_v17  ;;  %v16837_v39 = vrot.slane %v1523_v9, %v15974_v55  ;;  %v13590_v38 = vcombine.high %v16697_v12, %v16716_v50 }
 0x18f   : > { %21136 = vst [vmem:[#allocation97_spill] sm:$0xff] %v16805_v11  ;;  %v2575_v16 = vrot.slane %v2561_v62, %v15974_v55  ;;  %v2578_v62 = vcombine.low %v16697_v12, %v16716_v50  ;;  %v2580_v17 = vcombine.low %v16677_v25, %v16719_v23  ;;  %v16845_v34 = vsel %vm1415_vm6, %v1275_v40, 0.0 }
 0x190   : > { %v2147_v3 = vrot.slane %v1524_v43, %v15974_v55  ;;  %v16848_v28 = vcombine.low %v1216_v59, %v1276_v31  ;;  %v16867_v59 = vrot.slane %v13590_v38, %v15974_v55  ;;  %v16873_v31 = vrot.slane %v2084_v41, %v15974_v55 }
 0x191   : > { %v16824_v51 = vpop.f32.mrb[56].mxu1  ;;  %v2576_v21 = vcombine.low %v2568_v57, %v2575_v16  ;;  %v2154_v57 = vrot.slane %v13582_v56, %v15974_v55  ;;  %v16864_v40 = vrot.slane %v2578_v62, %v15974_v55  ;;  %v16876_v43 = vrot.slane %v2091_v2, %v15974_v55 }
 0x192   : > { %v14373_v10 = vpop.f32.mrb[57].mxu1  ;;  %21143 = vst [vmem:[#allocation100_spill] sm:$0xff] %v16867_v59  ;;  %21145 = vst [vmem:[#allocation102_spill] sm:$0xff] %v16873_v31  ;;  %v16879_v56 = vrot.slane %v2092_v15, %v15974_v55  ;;  %v16886_v62 = vrot.slane %v16837_v39, %v15974_v55  ;;  %v1525_v38 = vpack.c.bf16 %v16845_v34, %v16845_v34  ;;  %v1500_v15 = vsel %vm16859_vm10, %v16848_v28, 0.0 }
 0x193   : > { %v16843_v18 = vpop.f32.mrb[58].mxu1  ;;  %v16851_v10 = vrot.slane %v13589_v29, %v15974_v55  ;;  %14395 = vmatprep.mubr.msk.bf16.mxu1 %vm2812_vm0, %v2576_v21  ;;  %21142 = vst [vmem:[#allocation99_spill] sm:$0xff] %v16864_v40  ;;  %v16870_v29 = vrot.slane %v2580_v17, %v15974_v55  ;;  %21146 = vst [vmem:[#allocation103_spill] sm:$0xff] %v16876_v43  ;;  %v16882_v21 = vrot.slane %v2093_v8, %v15974_v55 }
 0x194   : > { %v14374_v9 = vpop.f32.mrb[59].mxu1  ;;  %21147 = vst [vmem:[#allocation104_spill] sm:$0xff] %v16879_v56  ;;  %21149 = vst [vmem:[#allocation106_spill] sm:$0xff] %v16886_v62  ;;  %v2155_v17 = vcombine.high %v2147_v3, %v2147_v3  ;;  %v16899_v8 = vcombine.high %v16719_v23, %v16719_v23  ;;  %v2156_v34 = vcombine.high %v2154_v57, %v2154_v57 }
 0x195   : > { %21139 = vst [vmem:[#allocation98_spill] sm:$0xff] %v16851_v10  ;;  %21144 = vst [vmem:[#allocation101_spill] sm:$0xff] %v16870_v29  ;;  %v2609_v41 = vcombine.low %v16851_v10, %v16864_v40  ;;  %v2610_v2 = vcombine.low %v16867_v59, %v16870_v29  ;;  %v16903_v9 = vcombine.high %v16724_v0, %v16724_v0 }
 0x196   : > { %21148 = vst [vmem:[#allocation105_spill] sm:$0xff] %v16882_v21  ;;  %21150 = vst [vmem:[#allocation107_spill] sm:$0xff] %v16899_v8  ;;  %v16909_v29 = vcombine.high %v16750_v4, %v16750_v4  ;;  %v16913_v28 = vcombine.high %v16802_v37, %v16802_v37  ;;  %v2626_v16 = vcombine.low %v16750_v4, %v16899_v8 }
 0x197   : > { %21151 = vst [vmem:[#allocation108_spill] sm:$0xff] %v16903_v9  ;;  %v2617_v50 = vrot.slane %v2609_v41, %v15974_v55  ;;  %v2624_v40 = vrot.slane %v2610_v2, %v15974_v55  ;;  %v2628_v59 = vcombine.low %v16802_v37, %v16903_v9  ;;  %v1177_v10 = vadd.f32 %v16773_v24, %v16747_v14 }
 0x198   : > { %21152 = vst [vmem:[#allocation109_spill] sm:$0xff] %v16909_v29  ;;  %21153 = vst [vmem:[#allocation110_spill] sm:$0xff] %v16913_v28  ;;  %v16922_v41 = vrot.slane %v2147_v3, %v15974_v55  ;;  %v2627_v23 = vcombine.low %v16909_v29, %v16724_v0  ;;  %v2675_v63 = vcombine.low %v16873_v31, %v16879_v56 }
 0x199   : > { %v2625_v2 = vcombine.low %v2617_v50, %v2624_v40  ;;  %v16929_v12 = vrot.slane %v2154_v57, %v15974_v55  ;;  %v2629_v8 = vcombine.low %v16913_v28, %v16731_v7  ;;  %v16934_v9 = vrot.slane %v2626_v16, %v15974_v55 }
 0x19a   : > { %21154 = vst [vmem:[#allocation111_spill] sm:$0xff] %v16922_v41  ;;  %v1217_v14 = vmax.f32 %v1177_v10, 0.0  ;;  %v16938_v50 = vrot.slane %v2627_v23, %v15974_v55  ;;  %v13591_v3 = vcombine.high %v16873_v31, %v16879_v56  ;;  %v2677_v40 = vcombine.low %v16876_v43, %v16882_v21 }
 0x19b   : > { %21155 = vst [vmem:[#allocation112_spill] sm:$0xff] %v16929_v12  ;;  %21156 = vst [vmem:[#allocation113_spill] sm:$0xff] %v16934_v9  ;;  %14396 = vmatmul.mubr.msk.bf16.gmra.mrb[72].mxu1 %vm2812_vm0, %v2625_v2  ;;  %v13592_v57 = vcombine.high %v16876_v43, %v16882_v21  ;;  %v16947_v28 = vrot.slane %v2628_v59, %v15974_v55  ;;  %v16950_v16 = vrot.slane %v2629_v8, %v15974_v55 }
 0x19c   : > { %21157 = vst [vmem:[#allocation114_spill] sm:$0xff] %v16938_v50  ;;  %v1277_v10 = vcombine.high %v1217_v14, %v1217_v14  ;;  %v16953_v2 = vrot.slane %v2675_v63, %v15974_v55  ;;  %v2658_v23 = vcombine.low %v16934_v9, %v16938_v50  ;;  %v16958_v29 = vrot.slane %v13591_v3, %v15974_v55 }
 0x19d   : > { %21158 = vst [vmem:[#allocation115_spill] sm:$0xff] %v16950_v16  ;;  %v16961_v56 = vrot.slane %v2677_v40, %v15974_v55  ;;  %v16964_v21 = vrot.slane %v13592_v57, %v15974_v55  ;;  %v16967_v59 = vrot.slane %v2155_v17, %v15974_v55  ;;  %v2659_v8 = vcombine.low %v16947_v28, %v16950_v16 }
 0x19e   : > { %21159 = vst [vmem:[#allocation116_spill] sm:$0xff] %v16953_v2  ;;  %21160 = vst [vmem:[#allocation117_spill] sm:$0xff] %v16958_v29  ;;  %v1443_v63 = vcombine.low %v1217_v14, %v1277_v10  ;;  %v1180_v43 = vadd.f32 %v16773_v24, %v16776_v42  ;;  %v2666_v50 = vrot.slane %v2658_v23, %v15974_v55 }
 0x19f   : > { %21161 = vst [vmem:[#allocation118_spill] sm:$0xff] %v16961_v56  ;;  %21162 = vst [vmem:[#allocation119_spill] sm:$0xff] %v16964_v21  ;;  %v2707_v3 = vcombine.low %v16953_v2, %v16958_v29  ;;  %v2708_v40 = vcombine.low %v16961_v56, %v16964_v21  ;;  %v16980_v57 = vcombine.high %v16922_v41, %v16922_v41 }
 0x1a0   : > { %21163 = vst [vmem:[#allocation120_spill] sm:$0xff] %v16967_v59  ;;  %v16983_v17 = vrot.slane %v2156_v34, %v15974_v55  ;;  %v2673_v14 = vrot.slane %v2659_v8, %v15974_v55  ;;  %v16988_v42 = vsel %vm16830_vm8, %v1443_v63, 0.0  ;;  %v16992_v10 = vcombine.high %v16929_v12, %v16929_v12 }
 0x1a1   : > { %21164 = vst [vmem:[#allocation121_spill] sm:$0xff] %v16980_v57  ;;  %v4569_v23 = vcombine.high %v16837_v39, %v16837_v39  ;;  %v16997_v29 = vpack.c.bf16 %v16988_v42, %v1500_v15  ;;  %v2715_v56 = vrot.slane %v2707_v3, %v15974_v55  ;;  %v2722_v34 = vrot.slane %v2708_v40, %v15974_v55 }
 0x1a2   : > { %21165 = vst [vmem:[#allocation122_spill] sm:$0xff] %v16983_v17  ;;  %21166 = vst [vmem:[#allocation123_spill] sm:$0xff] %v16992_v10  ;;  %v2674_v21 = vcombine.low %v2666_v50, %v2673_v14  ;;  %v17004_v63 = vcombine.high %v16967_v59, %v16967_v59  ;;  %v2724_v16 = vcombine.low %v16886_v62, %v16922_v41  ;;  %v17011_v15 = vmax.f32 %v1180_v43, 0.0 }
 0x1a3   : > { %v17009_v2 = vrot.slane %v1525_v38, %v15974_v55  ;;  %v2723_v39 = vcombine.low %v2715_v56, %v2722_v34  ;;  %v2725_v3 = vcombine.low %v16967_v59, %v16980_v57  ;;  %v21168_v50 = vcombine.low %v16461_v36, %v16536_v53 }
 0x1a4   : > { %21167 = vst [vmem:[#allocation124_spill] sm:$0xff] %v17004_v63  ;;  %14399 = vmatprep.mubr.msk.bf16.mxu1 %vm2812_vm0, %v2674_v21  ;;  %v2726_v43 = vcombine.low %v17004_v63, %v16929_v12  ;;  %v2727_v56 = vcombine.low %v16983_v17, %v16992_v10  ;;  %v17035_v53 = vrot.slane %v4569_v23, %v15974_v55  ;;  %v17053_v23 = vsel %vm1418_vm11, %v17011_v15, 0.0 }
 0x1a5   : > { %v17020_v14 = vrot.slane %v21168_v50, %v15974_v55  ;;  %14400 = vmatmul.mubr.msk.bf16.gmra.mrb[76].mxu1 %vm2812_vm0, %v2723_v39  ;;  %v17040_v21 = vrot.slane %v2724_v16, %v15974_v55  ;;  %v17043_v50 = vrot.slane %v2725_v3, %v15974_v55  ;;  %v17050_v38 = vrot.slane %v17009_v2, %v15974_v55 }
 0x1a6   : > { %21170 = vst [vmem:[#allocation126_spill] sm:$0xff] %v17035_v53  ;;  %v17046_v40 = vrot.slane %v2726_v43, %v15974_v55  ;;  %v17056_v39 = vrot.slane %v2727_v56, %v15974_v55  ;;  %v17060_v16 = vcombine.high %v16983_v17, %v16983_v17  ;;  %v1278_v3 = vcombine.high %v17011_v15, %v17011_v15 }
 0x1a7   : > { %21169 = vst [vmem:[#allocation125_spill] sm:$0xff] %v17020_v14  ;;  %21171 = vst [vmem:[#allocation127_spill] sm:$0xff] %v17050_v38  ;;  %v2756_v43 = vcombine.low %v17040_v21, %v17043_v50  ;;  %v3120_v30 = vcombine.low %v16105_v26, %v16137_v45  ;;  %v13618_v36 = vcombine.high %v16105_v26, %v16137_v45 }
 0x1a8   : > { %21172 = vst [vmem:[#allocation128_spill] sm:$0xff] %v17060_v16  ;;  %v13609_v56 = vpack.c.bf16 %v16988_v42, %v16988_v42  ;;  %v2757_v34 = vcombine.low %v17046_v40, %v17056_v39  ;;  %v2773_v8 = vcombine.low %v17060_v16, %v17050_v38  ;;  %v3122_v15 = vcombine.low %v16134_v44, %v16161_v60 }
 0x1a9   : > { %v2764_v63 = vrot.slane %v2756_v43, %v15974_v55  ;;  %v13619_v57 = vcombine.high %v16134_v44, %v16161_v60  ;;  %v3130_v11 = vrot.slane %v3120_v30, %v15974_v55  ;;  %v3137_v46 = vrot.slane %v13618_v36, %v15974_v55 }
 0x1aa   : > { %v2771_v42 = vrot.slane %v2757_v34, %v15974_v55  ;;  %v17086_v20 = vrot.slane %v2773_v8, %v15974_v55  ;;  %v3144_v26 = vrot.slane %v3122_v15, %v15974_v55  ;;  %v7745_v10 = vcombine.low %v16088_v19, %v16137_v45 }
 0x1ab   : > { %v3151_v16 = vrot.slane %v13619_v57, %v15974_v55  ;;  %v17095_v43 = vcombine.high %v16273_v6, %v16273_v6  ;;  %v3172_v30 = vcombine.low %v16276_v48, %v16353_v1  ;;  %v3152_v44 = vcombine.low %v3130_v11, %v3137_v46 }
 0x1ac   : > { %v2772_v34 = vcombine.low %v2764_v63, %v2771_v42  ;;  %v2787_v8 = vrot.slane %v17086_v20, %v15974_v55  ;;  %v21173_v36 = vcombine.low %v16205_v49, %v16295_v61  ;;  %v7752_v19 = vrot.slane %v7745_v10, %v15974_v55 }
 0x1ad   : > { %v3153_v15 = vcombine.low %v3144_v26, %v3151_v16  ;;  %v3171_v60 = vcombine.low %v17095_v43, %v16301_v54  ;;  %v21174_v1 = vcombine.low %v16273_v6, %v16349_v27  ;;  %v3160_v11 = vrot.slane %v3152_v44, %v15974_v55 }
 0x1ae   : > { %v3179_v57 = vrot.slane %v21173_v36, %v15974_v55  ;;  %14403 = vmatprep.mubr.msk.bf16.mxu1 %vm2812_vm0, %v2772_v34  ;;  %v17117_v42 = vrot.slane %v3172_v30, %v15974_v55  ;;  %v1185_v26 = vadd.f32 %v16773_v24, %v16824_v51  ;;  %v1300_v10 = vadd.s32 11, %v15947_v32 }
 0x1af   : > { %v17112_v63 = vrot.slane %v21174_v1, %v15974_v55  ;;  %14404 = vmatmul.mubr.msk.bf16.gmra.mrb[80].mxu1 %vm2812_vm0, %v2787_v8  ;;  %v17124_v16 = vrot.slane %v3153_v15, %v15974_v55  ;;  %v7753_v36 = vcombine.low %v7752_v19, %v3137_v46  ;;  %v17127_v1 = vrot.slane %v3171_v60, %v15974_v55 }
 0x1b0   : > { %21176 = vst [vmem:[#allocation130_spill] sm:$0xff] %v17117_v42  ;;  %v1219_v44 = vmax.f32 %v1185_v26, 0.0  ;;  %vm1319_vm13 = vcmp.ge.s32.totalorder %v1300_v10, 0  ;;  %vm1331_vm14 = vcmp.lt.s32.totalorder %v1300_v10, 16  ;;  %v17132_v30 = vcombine.high %v16276_v48, %v16276_v48 }
 0x1b1   : > { %21175 = vst [vmem:[#allocation129_spill] sm:$0xff] %v17112_v63  ;;  %21177 = vst [vmem:[#allocation131_spill] sm:$0xff] %v17124_v16  ;;  %v3201_v34 = vcombine.low %v3179_v57, %v17112_v63  ;;  %v17136_v32 = vrot.slane %v16997_v29, %v15974_v55  ;;  %v3168_v51 = vcombine.low %v3160_v11, %v17124_v16 }
 0x1b2   : > { %21178 = vst [vmem:[#allocation132_spill] sm:$0xff] %v17127_v1  ;;  %v17140_v46 = vrot.slane %v7753_v36, %v15974_v55  ;;  %v3202_v60 = vcombine.low %v17127_v1, %v17117_v42  ;;  %vm17144_vm15 = vmand %vm1319_vm13, %vm1331_vm14  ;;  %v1444_v15 = vcombine.low %v1278_v3, %v1219_v44  ;;  %v3218_v19 = vcombine.low %v17132_v30, %v16279_v13 }
 0x1b3   : > { %v3209_v57 = vrot.slane %v3201_v34, %v15974_v55  ;;  %v3219_v29 = vcombine.low %v16359_v52, %v16371_v58  ;;  %14415 = vmatprep.mubr.msk.bf16.mxu1 %vm2812_vm0, %v3168_v51  ;;  %v13620_v10 = vcombine.high %v16359_v52, %v16371_v58  ;;  %v3221_v3 = vcombine.low %v16418_v33, %v16467_v5  ;;  %vm17167_vm1 = vmand %vm17144_vm15, %vm1344_vm7 }
 0x1b4   : > { %21179 = vst [vmem:[#allocation133_spill] sm:$0xff] %v17140_v46  ;;  %v17157_v26 = vrot.slane %v3202_v60, %v15974_v55  ;;  %v1279_v36 = vcombine.high %v1219_v44, %v1219_v44  ;;  %v17172_v51 = vrot.slane %v3218_v19, %v15974_v55  ;;  %v13621_v11 = vcombine.high %v16418_v33, %v16467_v5  ;;  %v15256_v19 = vld [vmem:[%s20559_s3 + $0xc8] sm:$0xff]   ;;  %v21188_v46 = vld [vmem:[#allocation57_spill] sm:$0xff]  ;;  %vm17242_vm7 = vmand %vm17144_vm15, %vm1385_vm9 }
 0x1b5   : > { %v3235_v60 = vrot.slane %v3219_v29, %v15974_v55  ;;  %v17179_v44 = vrot.slane %v13620_v10, %v15974_v55  ;;  %v17182_v35 = vrot.slane %v3221_v3, %v15974_v55  ;;  %v1188_v1 = vadd.f32 %v16773_v24, %v16843_v18  ;;  %v21190_v10 = vld [vmem:[#allocation56_spill] sm:$0xff]  ;;  %v21195_v33 = vld [vmem:[#allocation58_spill] sm:$0xff] }
 0x1b6   : > { %21182 = vst [vmem:[#allocation134_spill] sm:$0xff] %v17157_v26  ;;  %21185 = vst [vmem:[#allocation135_spill] sm:$0xff] %v17172_v51  ;;  %v3217_v42 = vcombine.low %v3209_v57, %v17157_v26  ;;  %v3039_v29 = vrot.slane %v13609_v56, %v15974_v55  ;;  %v17193_v57 = vcombine.high %v21188_v46, %v21188_v46  ;;  %v1503_v18 = vsel %vm17167_vm1, %v1444_v15, 0.0  ;;  %v21192_v56 = vld [vmem:[#allocation53_spill] sm:$0xff] }
 0x1b7   : > { %21186 = vst [vmem:[#allocation136_spill] sm:$0xff] %v17179_v44  ;;  %21187 = vst [vmem:[#allocation137_spill] sm:$0xff] %v17182_v35  ;;  %v3250_v16 = vcombine.low %v17172_v51, %v3235_v60  ;;  %v17197_v26 = vcombine.high %v21190_v10, %v21190_v10  ;;  %v3251_v24 = vcombine.low %v17179_v44, %v17182_v35  ;;  %v1220_v3 = vmax.f32 %v1188_v1, 0.0  ;;  %v21193_v51 = vld [vmem:[#allocation49_spill] sm:$0xff] }
 0x1b8   : > { %21189 = vst [vmem:[#allocation57_spill] sm:$0xff] %v17193_v57  ;;  %14416 = vmatmul.mubr.msk.bf16.vlgmr.msra.gmra.mrb[60].mxu1 %vm2812_vm0, %v3217_v42  ;;  %v3268_v60 = vcombine.low %v21192_v56, %v21188_v46  ;;  %v17209_v5 = vrot.slane %v13621_v11, %v15974_v55  ;;  %v3269_v42 = vcombine.low %v21190_v10, %v17193_v57  ;;  %v21200_v57 = vld [vmem:[#allocation59_spill] sm:$0xff] }
 0x1b9   : > { %21191 = vst [vmem:[#allocation138_spill] sm:$0xff] %v17197_v26  ;;  %14440 = vmatpush3.bf16.msra.mxu1 %v21193_v51  ;;  %v3258_v63 = vrot.slane %v3250_v16, %v15974_v55  ;;  %v3270_v15 = vcombine.low %v17197_v26, %v21195_v33  ;;  %v17216_v34 = vrot.slane %v3251_v24, %v15974_v55 }
 0x1ba   : > { %21194 = vst [vmem:[#allocation49_spill] sm:$0xff] %v17209_v5  ;;  %v1445_v1 = vcombine.low %v1279_v36, %v1220_v3  ;;  %v3284_v44 = vrot.slane %v3268_v60, %v15974_v55  ;;  %v17221_v51 = vcombine.high %v21195_v33, %v21195_v33  ;;  %14441 = vmatprep.subr.bf16.mxu1 %v15256_v19  ;;  %v15257_v36 = vld [vmem:[%s20559_s3 + $0xd0] sm:$0xff]  }
 0x1bb   : > { %21196 = vst [vmem:[#allocation139_spill] sm:$0xff] %v17216_v34  ;;  %v1280_v16 = vcombine.high %v1220_v3, %v1220_v3  ;;  %v17224_v11 = vrot.slane %v3269_v42, %v15974_v55  ;;  %v17227_v35 = vrot.slane %v3270_v15, %v15974_v55  ;;  %v17231_v26 = vcombine.high %v21200_v57, %v21200_v57 }
 0x1bc   : > { %21197 = vst [vmem:[#allocation140_spill] sm:$0xff] %v17221_v51  ;;  %v3266_v60 = vcombine.low %v3258_v63, %v17216_v34  ;;  %v1504_v42 = vsel %vm17144_vm15, %v1445_v1, 0.0  ;;  %v3299_v15 = vcombine.low %v17209_v5, %v3284_v44  ;;  %v4577_v33 = vcombine.high %v17009_v2, %v17009_v2  ;;  %v21205_v44 = vld [vmem:[#allocation60_spill] sm:$0xff]  ;;  %v21206_v1 = vld [vmem:[#allocation70_spill] sm:$0xff]  ;;  %v21207_v5 = vld [vmem:[#allocation67_spill] sm:$0xff] }
 0x1bd   : > { %21198 = vst [vmem:[#allocation141_spill] sm:$0xff] %v17224_v11  ;;  %21199 = vst [vmem:[#allocation142_spill] sm:$0xff] %v17227_v35  ;;  %v21204_v63 = vpack.c.bf16 %v17053_v23, %v17053_v23  ;;  %v1528_v47 = vpack.c.bf16 %v1504_v42, %v1503_v18  ;;  %v3300_v34 = vcombine.low %v17224_v11, %v17227_v35  ;;  %14442 = vmatpush3.bf16.msra.mxu1 %v15256_v19  ;;  %v15258_v18 = vld [vmem:[%s20559_s3 + $0xd8] sm:$0xff]  }
 0x1be   : > { %21201 = vst [vmem:[#allocation143_spill] sm:$0xff] %v17231_v26  ;;  %14419 = vmatprep.mubr.msk.bf16.mxu1 %vm2812_vm0, %v3266_v60  ;;  %v3316_v8 = vcombine.low %v21200_v57, %v17221_v51  ;;  %v3317_v2 = vcombine.low %v17231_v26, %v21205_v44  ;;  %v3318_v23 = vcombine.low %v21207_v5, %v21206_v1  ;;  %v17274_v60 = vsel %vm17242_vm7, %v1280_v16, 0.0  ;;  %v21222_v51 = vld [vmem:[#allocation81_spill] sm:$0xff] }
 0x1bf   : > { %v17255_v24 = vrot.slane %v21204_v63, %v15974_v55  ;;  %v3040_v19 = vcombine.high %v17136_v32, %v17136_v32  ;;  %v3041_v63 = vcombine.high %v3039_v29, %v3039_v29  ;;  %v17277_v10 = vrot.slane %v3300_v34, %v15974_v55  ;;  %14443 = vmatprep.subr.bf16.mxu1 %v15257_v36 }
 0x1c0   : > { %v3307_v11 = vrot.slane %v3299_v15, %v15974_v55  ;;  %v13622_v35 = vcombine.high %v21207_v5, %v21206_v1  ;;  %v17283_v53 = vrot.slane %v3317_v2, %v15974_v55  ;;  %v3340_v44 = vrot.slane %v3318_v23, %v15974_v55  ;;  %v21220_v1 = vld [vmem:[#allocation68_spill] sm:$0xff] }
 0x1c1   : > { %21208 = vst [vmem:[#allocation144_spill] sm:$0xff] %v17277_v10  ;;  %v17287_v26 = vrot.slane %v4577_v33, %v15974_v55  ;;  %v17291_v16 = vrot.slane %v17136_v32, %v15974_v55  ;;  %v17294_v34 = vrot.slane %v3039_v29, %v15974_v55  ;;  %v17298_v3 = vrot.slane %v17255_v24, %v15974_v55  ;;  %v17310_v32 = vld [vmem:[%s20559_s3 + $0x20] sm:$0xff]  }
 0x1c2   : > { %21209 = vst [vmem:[#allocation145_spill] sm:$0xff] %v17283_v53  ;;  %14444 = vmatpush3.bf16.msra.mxu1 %v15257_v36  ;;  %v13644_v15 = vpack.c.bf16 %v1504_v42, %v1504_v42  ;;  %v3315_v2 = vcombine.low %v3307_v11, %v17277_v10  ;;  %v17302_v23 = vrot.slane %v3316_v8, %v15974_v55  ;;  %v21219_v10 = vld [vmem:[#allocation71_spill] sm:$0xff] }
 0x1c3   : > { %21210 = vst [vmem:[#allocation146_spill] sm:$0xff] %v17287_v26  ;;  %21211 = vst [vmem:[#allocation147_spill] sm:$0xff] %v17291_v16  ;;  %v17305_v33 = vrot.slane %v13622_v35, %v15974_v55  ;;  %14445 = vmatprep.subr.bf16.mxu1 %v15258_v18  ;;  %v17313_v29 = vrot.slane %v3040_v19, %v15974_v55  ;;  %v17316_v36 = vrot.slane %v3041_v63, %v15974_v55 }
 0x1c4   : > { %21212 = vst [vmem:[#allocation148_spill] sm:$0xff] %v17294_v34  ;;  %21213 = vst [vmem:[#allocation149_spill] sm:$0xff] %v17298_v3  ;;  %v17323_v35 = vrot.slane %v1528_v47, %v15974_v55  ;;  %14420 = vmatmul.mubr.msk.bf16.gmra.mrb[64].mxu1 %vm2812_vm0, %v3315_v2  ;;  %v3348_v8 = vcombine.low %v17302_v23, %v17283_v53  ;;  %v17331_v63 = vcombine.high %v16694_v22, %v16694_v22  ;;  %v21221_v47 = vld [vmem:[#allocation69_spill] sm:$0xff] }
 0x1c5   : > { %21214 = vst [vmem:[#allocation150_spill] sm:$0xff] %v17302_v23  ;;  %21215 = vst [vmem:[#allocation151_spill] sm:$0xff] %v17305_v33  ;;  %v3349_v19 = vcombine.low %v3340_v44, %v17305_v33  ;;  %v3365_v11 = vcombine.low %v21220_v1, %v21219_v10  ;;  %v13623_v42 = vcombine.high %v21220_v1, %v21219_v10  ;;  %v21225_v33 = vld [vmem:[#allocation84_spill] sm:$0xff] }
 0x1c6   : > { %21216 = vst [vmem:[#allocation152_spill] sm:$0xff] %v17313_v29  ;;  %21217 = vst [vmem:[#allocation153_spill] sm:$0xff] %v17316_v36  ;;  %v3367_v5 = vcombine.low %v21221_v47, %v16694_v22  ;;  %v17341_v2 = vcombine.high %v21222_v51, %v21222_v51  ;;  %14446 = vmatpush3.bf16.msra.mxu1 %v15258_v18  ;;  %v17344_v44 = vrot.slane %v13644_v15, %v15974_v55 }
 0x1c7   : > { %21218 = vst [vmem:[#allocation154_spill] sm:$0xff] %v17331_v63  ;;  %v17347_v53 = vrot.slane %v3348_v8, %v15974_v55  ;;  %v3363_v23 = vrot.slane %v3349_v19, %v15974_v55  ;;  %v3368_v57 = vcombine.low %v21225_v33, %v17331_v63  ;;  %14471 = vmatprep.subr.bf16.mxu1 %v17310_v32  ;;  %v21229_v63 = vld [vmem:[#allocation85_spill] sm:$0xff] }
 0x1c8   : > { %21223 = vst [vmem:[#allocation81_spill] sm:$0xff] %v17341_v2  ;;  %v17354_v22 = vrot.slane %v3365_v11, %v15974_v55  ;;  %v17357_v47 = vrot.slane %v13623_v42, %v15974_v55  ;;  %v3389_v18 = vrot.slane %v3367_v5, %v15974_v55  ;;  %v17362_v15 = vcombine.high %v21225_v33, %v21225_v33  ;;  %v21230_v33 = vld [vmem:[#allocation86_spill] sm:$0xff] }
 0x1c9   : > { %21224 = vst [vmem:[#allocation155_spill] sm:$0xff] %v17347_v53  ;;  %v3364_v8 = vcombine.low %v17347_v53, %v3363_v23  ;;  %v17366_v19 = vrot.slane %v3368_v57, %v15974_v55  ;;  %v17370_v10 = vcombine.high %v21229_v63, %v21229_v63  ;;  %v3415_v11 = vcombine.low %v21229_v63, %v17341_v2 }
 0x1ca   : > { %21226 = vst [vmem:[#allocation156_spill] sm:$0xff] %v17354_v22  ;;  %21227 = vst [vmem:[#allocation157_spill] sm:$0xff] %v17357_v47  ;;  %v3397_v42 = vcombine.low %v17354_v22, %v17357_v47  ;;  %v3414_v5 = vcombine.low %v17362_v15, %v21222_v51  ;;  %v3417_v1 = vcombine.low %v21230_v33, %v16750_v4 }
 0x1cb   : > { %21228 = vst [vmem:[#allocation158_spill] sm:$0xff] %v17366_v19  ;;  %v13624_v57 = vcombine.high %v21230_v33, %v16750_v4  ;;  %14423 = vmatprep.mubr.msk.bf16.mxu1 %vm2812_vm0, %v3364_v8  ;;  %v3398_v23 = vcombine.low %v3389_v18, %v17366_v19  ;;  %v3416_v53 = vcombine.low %v17370_v10, %v16677_v25 }
 0x1cc   : > { %v17387_v2 = vrot.slane %v3415_v11, %v15974_v55  ;;  %v3464_v47 = vcombine.low %v16724_v0, %v16802_v37  ;;  %v17392_v22 = vrot.slane %v3397_v42, %v15974_v55  ;;  %v17395_v63 = vrot.slane %v3414_v5, %v15974_v55 }
 0x1cd   : > { %v3445_v4 = vrot.slane %v3417_v1, %v15974_v55  ;;  %v13625_v18 = vcombine.high %v16724_v0, %v16802_v37  ;;  %v3412_v8 = vrot.slane %v3398_v23, %v15974_v55  ;;  %v17402_v19 = vrot.slane %v3416_v53, %v15974_v55  ;;  %v21238_v37 = vld [vmem:[#allocation103_spill] sm:$0xff] }
 0x1ce   : > { %21231 = vst [vmem:[#allocation159_spill] sm:$0xff] %v17387_v2  ;;  %21232 = vst [vmem:[#allocation160_spill] sm:$0xff] %v17392_v22  ;;  %v3466_v11 = vcombine.low %v16731_v7, %v16873_v31  ;;  %v17407_v33 = vrot.slane %v13624_v57, %v15974_v55  ;;  %v3446_v42 = vcombine.low %v17395_v63, %v17387_v2  ;;  %v21241_v2 = vld [vmem:[#allocation104_spill] sm:$0xff] }
 0x1cf   : > { %21233 = vst [vmem:[#allocation161_spill] sm:$0xff] %v17395_v63  ;;  %21234 = vst [vmem:[#allocation162_spill] sm:$0xff] %v17402_v19  ;;  %v17412_v5 = vrot.slane %v3464_v47, %v15974_v55  ;;  %v17415_v1 = vrot.slane %v13625_v18, %v15974_v55  ;;  %v17419_v23 = vcombine.high %v16873_v31, %v16873_v31  ;;  %v21242_v31 = vld [vmem:[#allocation105_spill] sm:$0xff] }
 0x1d0   : > { %21235 = vst [vmem:[#allocation163_spill] sm:$0xff] %v17407_v33  ;;  %v3413_v53 = vcombine.low %v17392_v22, %v3412_v8  ;;  %v3447_v7 = vcombine.low %v17402_v19, %v3445_v4  ;;  %v3494_v57 = vrot.slane %v3466_v11, %v15974_v55  ;;  %v17426_v0 = vcombine.high %v21238_v37, %v21238_v37 }
 0x1d1   : > { %21236 = vst [vmem:[#allocation164_spill] sm:$0xff] %v17412_v5  ;;  %21237 = vst [vmem:[#allocation165_spill] sm:$0xff] %v17415_v1  ;;  %v17429_v47 = vrot.slane %v3446_v42, %v15974_v55  ;;  %v3495_v18 = vcombine.low %v17407_v33, %v17412_v5  ;;  %v17435_v63 = vcombine.high %v21241_v2, %v21241_v2 }
 0x1d2   : > { %21239 = vst [vmem:[#allocation166_spill] sm:$0xff] %v17426_v0  ;;  %v17439_v8 = vcombine.high %v21242_v31, %v21242_v31  ;;  %14424 = vmatmul.mubr.msk.bf16.gmra.mrb[68].mxu1 %vm2812_vm0, %v3413_v53  ;;  %v3461_v4 = vrot.slane %v3447_v7, %v15974_v55  ;;  %v3496_v11 = vcombine.low %v17415_v1, %v3494_v57 }
 0x1d3   : > { %21240 = vst [vmem:[#allocation167_spill] sm:$0xff] %v17429_v47  ;;  %v3512_v42 = vcombine.low %v21241_v2, %v17419_v23  ;;  %v3514_v5 = vcombine.low %v21242_v31, %v17426_v0  ;;  %v17449_v33 = vrot.slane %v3495_v18, %v15974_v55  ;;  %v3513_v22 = vcombine.low %v17435_v63, %v21238_v37 }
 0x1d4   : > { %21243 = vst [vmem:[#allocation168_spill] sm:$0xff] %v17439_v8  ;;  %v3515_v19 = vcombine.low %v17439_v8, %v16886_v62  ;;  %v3561_v7 = vcombine.low %v16922_v41, %v16967_v59  ;;  %v3462_v53 = vcombine.low %v17429_v47, %v3461_v4  ;;  %v3510_v57 = vrot.slane %v3496_v11, %v15974_v55  ;;  %v21323_v8 = vld [vmem:[#allocation23_spill] sm:$0xff] }
 0x1d5   : > { %21244 = vst [vmem:[#allocation169_spill] sm:$0xff] %v17449_v33  ;;  %v17460_v1 = vrot.slane %v3512_v42, %v15974_v55  ;;  %v17463_v0 = vrot.slane %v3514_v5, %v15974_v55  ;;  %v17466_v18 = vrot.slane %v3513_v22, %v15974_v55  ;;  %v13626_v62 = vcombine.high %v16922_v41, %v16967_v59 }
 0x1d6   : > { %v17469_v31 = vrot.slane %v3515_v19, %v15974_v55  ;;  %v3563_v4 = vcombine.low %v16929_v12, %v16983_v17  ;;  %14427 = vmatprep.mubr.msk.bf16.mxu1 %vm2812_vm0, %v3462_v53  ;;  %v3511_v11 = vcombine.low %v17449_v33, %v3510_v57  ;;  %v13627_v5 = vcombine.high %v16929_v12, %v16983_v17  ;;  %v21279_v12 = vld [vmem:[#allocation92_spill] sm:$0xff] }
 0x1d7   : > { %21245 = vst [vmem:[#allocation170_spill] sm:$0xff] %v17460_v1  ;;  %21246 = vst [vmem:[#allocation171_spill] sm:$0xff] %v17463_v0  ;;  %v3571_v42 = vrot.slane %v3561_v7, %v15974_v55  ;;  %v17482_v22 = vcombine.high %v17291_v16, %v17291_v16  ;;  %v3544_v19 = vcombine.low %v17460_v1, %v17466_v18  ;;  %v21324_v37 = vshll.u32 %v21323_v8, 16 }
 0x1d8   : > { %21247 = vst [vmem:[#allocation172_spill] sm:$0xff] %v17466_v18  ;;  %21248 = vst [vmem:[#allocation173_spill] sm:$0xff] %v17469_v31  ;;  %v3545_v47 = vcombine.low %v17463_v0, %v17469_v31  ;;  %v17489_v59 = vrot.slane %v13626_v62, %v15974_v55  ;;  %v17492_v53 = vrot.slane %v3563_v4, %v15974_v55 }
 0x1d9   : > { %21249 = vst [vmem:[#allocation174_spill] sm:$0xff] %v17482_v22  ;;  %v17495_v57 = vrot.slane %v13627_v5, %v15974_v55  ;;  %v17499_v7 = vcombine.high %v17294_v34, %v17294_v34  ;;  %v17503_v33 = vcombine.high %v17313_v29, %v17313_v29  ;;  %v3610_v18 = vcombine.low %v17050_v38, %v17291_v16 }
 0x1da   : > { %21250 = vst [vmem:[#allocation175_spill] sm:$0xff] %v17489_v59  ;;  %21251 = vst [vmem:[#allocation176_spill] sm:$0xff] %v17492_v53  ;;  %v3552_v62 = vrot.slane %v3544_v19, %v15974_v55  ;;  %v3559_v0 = vrot.slane %v3545_v47, %v15974_v55  ;;  %v3593_v4 = vcombine.low %v3571_v42, %v17489_v59  ;;  %14428 = vmatmul.mubr.msk.bf16.gmra.mrb[72].mxu1 %vm2812_vm0, %v3511_v11 }
 0x1db   : > { %21252 = vst [vmem:[#allocation177_spill] sm:$0xff] %v17495_v57  ;;  %21253 = vst [vmem:[#allocation178_spill] sm:$0xff] %v17499_v7  ;;  %v3611_v5 = vcombine.low %v17313_v29, %v17482_v22  ;;  %v3594_v31 = vcombine.low %v17492_v53, %v17495_v57  ;;  %v3612_v1 = vcombine.low %v17503_v33, %v17294_v34  ;;  %v21266_v57 = vld [vmem:[#allocation42_spill] sm:$0xff]  ;;  %v21268_v22 = vld [vmem:[#allocation45_spill] sm:$0xff] }
 0x1dc   : > { %21254 = vst [vmem:[#allocation179_spill] sm:$0xff] %v17503_v33  ;;  %v3613_v38 = vcombine.low %v17316_v36, %v17499_v7  ;;  %v3620_v19 = vrot.slane %v3610_v18, %v15974_v55  ;;  %v17520_v17 = vcombine.low %v3552_v62, %v3559_v0  ;;  %v3601_v47 = vrot.slane %v3593_v4, %v15974_v55  ;;  %v21267_v33 = vld [vmem:[#allocation52_spill] sm:$0xff] }
 0x1dd   : > { %v17524_v42 = vrot.slane %v3611_v5, %v15974_v55  ;;  %v17528_v11 = vcombine.high %v17316_v36, %v17316_v36  ;;  %v17532_v53 = vrot.slane %v3594_v31, %v15974_v55  ;;  %v17535_v59 = vrot.slane %v3612_v1, %v15974_v55 }
 0x1de   : > { %21255 = vst [vmem:[#allocation180_spill] sm:$0xff] %v17520_v17  ;;  %v17538_v0 = vrot.slane %v3613_v38, %v15974_v55  ;;  %v21261_v18 = vcombine.high %v17255_v24, %v17255_v24  ;;  %v3925_v4 = vcombine.high %v17323_v35, %v17323_v35  ;;  %v21263_v31 = vpack.c.bf16 %v17274_v60, %v17274_v60 }
 0x1df   : > { %21256 = vst [vmem:[#allocation181_spill] sm:$0xff] %v17524_v42  ;;  %21257 = vst [vmem:[#allocation182_spill] sm:$0xff] %v17528_v11  ;;  %14431 = vmatprep.mubr.msk.bf16.mxu1 %vm2812_vm0, %v17520_v17  ;;  %v3642_v38 = vcombine.low %v3620_v19, %v17524_v42  ;;  %v3926_v1 = vcombine.high %v17344_v44, %v17344_v44  ;;  %v17567_v60 = vrot.slane %v17323_v35, %v15974_v55  ;;  %v21274_v17 = vld [vmem:[#allocation66_spill] sm:$0xff] }
 0x1e0   : > { %21258 = vst [vmem:[#allocation183_spill] sm:$0xff] %v17532_v53  ;;  %21259 = vst [vmem:[#allocation184_spill] sm:$0xff] %v17535_v59  ;;  %v17544_v62 = vrot.slane %v21261_v18, %v15974_v55  ;;  %v17552_v5 = vrot.slane %v21263_v31, %v15974_v55  ;;  %v3643_v24 = vcombine.low %v17535_v59, %v17538_v0  ;;  %v21265_v18 = vld [vmem:[#allocation43_spill] sm:$0xff]  ;;  %v21271_v59 = vld [vmem:[#allocation64_spill] sm:$0xff] }
 0x1e1   : > { %21260 = vst [vmem:[#allocation185_spill] sm:$0xff] %v17538_v0  ;;  %v4005_v7 = vcombine.low %v21266_v57, %v21265_v18  ;;  %21269 = vst [vmem:[#allocation42_spill] sm:$0xff] %v17567_v60  ;;  %v17571_v31 = vrot.slane %v17344_v44, %v15974_v55  ;;  %v3609_v19 = vcombine.low %v3601_v47, %v17532_v53  ;;  %v21272_v18 = vld [vmem:[#allocation65_spill] sm:$0xff]  ;;  %v21277_v47 = vld [vmem:[#allocation79_spill] sm:$0xff] }
 0x1e2   : > { %21262 = vst [vmem:[#allocation186_spill] sm:$0xff] %v17544_v62  ;;  %21264 = vst [vmem:[#allocation187_spill] sm:$0xff] %v17552_v5  ;;  %v4006_v62 = vcombine.low %v21268_v22, %v21267_v33  ;;  %v3659_v42 = vcombine.low %v17528_v11, %v17298_v3  ;;  %v3650_v0 = vrot.slane %v3642_v38, %v15974_v55  ;;  %v21273_v22 = vld [vmem:[#allocation74_spill] sm:$0xff]  ;;  %v21278_v53 = vld [vmem:[#allocation75_spill] sm:$0xff] }
 0x1e3   : > { %21270 = vst [vmem:[#allocation52_spill] sm:$0xff] %v17571_v31  ;;  %v3657_v57 = vrot.slane %v3643_v24, %v15974_v55  ;;  %v4039_v33 = vcombine.low %v21272_v18, %v21271_v59  ;;  %v4040_v35 = vcombine.low %v21274_v17, %v21273_v22  ;;  %v17583_v26 = vrot.slane %v3925_v4, %v15974_v55  ;;  %v21280_v38 = vld [vmem:[#allocation77_spill] sm:$0xff] }
 0x1e4   : > { %v17587_v44 = vrot.slane %v17552_v5, %v15974_v55  ;;  %v4056_v11 = vcombine.low %v21278_v53, %v21277_v47  ;;  %v4057_v41 = vcombine.low %v21280_v38, %v21279_v12  ;;  %14432 = vmatmul.mubr.msk.bf16.gmra.mrb[76].mxu1 %vm2812_vm0, %v3609_v19  ;;  %v4013_v59 = vrot.slane %v4005_v7, %v15974_v55  ;;  %v21284_v47 = vld [vmem:[#allocation94_spill] sm:$0xff]  ;;  %v21285_v53 = vld [vmem:[#allocation93_spill] sm:$0xff]  ;;  %v21287_v19 = vld [vmem:[#allocation95_spill] sm:$0xff] }
 0x1e5   : > { %21275 = vst [vmem:[#allocation45_spill] sm:$0xff] %v17583_v26  ;;  %v3658_v24 = vcombine.low %v3650_v0, %v3657_v57  ;;  %v17596_v17 = vrot.slane %v4006_v62, %v15974_v55  ;;  %v17599_v4 = vrot.slane %v4039_v33, %v15974_v55  ;;  %v17602_v22 = vrot.slane %v4040_v35, %v15974_v55  ;;  %v21286_v38 = vld [vmem:[#allocation98_spill] sm:$0xff]  ;;  %v21290_v57 = vld [vmem:[#allocation100_spill] sm:$0xff]  ;;  %v21291_v33 = vld [vmem:[#allocation99_spill] sm:$0xff] }
 0x1e6   : > { %21276 = vst [vmem:[#allocation64_spill] sm:$0xff] %v17587_v44  ;;  %v17605_v18 = vrot.slane %v4057_v41, %v15974_v55  ;;  %v4073_v12 = vcombine.low %v21285_v53, %v21284_v47  ;;  %v4074_v0 = vcombine.low %v21287_v19, %v21286_v38  ;;  %v17612_v7 = vrot.slane %v3926_v1, %v15974_v55  ;;  %v21292_v41 = vld [vmem:[#allocation101_spill] sm:$0xff] }
 0x1e7   : > { %21281 = vst [vmem:[#allocation74_spill] sm:$0xff] %v17596_v17  ;;  %21282 = vst [vmem:[#allocation66_spill] sm:$0xff] %v17602_v22  ;;  %14435 = vmatprep.mubr.msk.bf16.mxu1 %vm2812_vm0, %v3658_v24  ;;  %v17616_v62 = vrot.slane %v3659_v42, %v15974_v55  ;;  %v4090_v35 = vcombine.low %v21291_v33, %v21290_v57  ;;  %v4091_v5 = vcombine.low %v21292_v41, %v16934_v9  ;;  %v21294_v24 = vld [vmem:[#allocation114_spill] sm:$0xff]  ;;  %v21295_v33 = vld [vmem:[#allocation76_spill] sm:$0xff] }
 0x1e8   : > { %21283 = vst [vmem:[#allocation79_spill] sm:$0xff] %v17605_v18  ;;  %21288 = vst [vmem:[#allocation92_spill] sm:$0xff] %v17612_v7  ;;  %v17624_v53 = vcombine.high %v17567_v60, %v17567_v60  ;;  %v17627_v47 = vrot.slane %v4056_v11, %v15974_v55  ;;  %v17630_v1 = vrot.slane %v4074_v0, %v15974_v55 }
 0x1e9   : > { %21289 = vst [vmem:[#allocation77_spill] sm:$0xff] %v17616_v62  ;;  %v4107_v42 = vcombine.low %v21294_v24, %v16947_v28  ;;  %v3673_v19 = vrot.slane %v17616_v62, %v15974_v55  ;;  %v4021_v57 = vcombine.low %v4013_v59, %v17596_v17  ;;  %v4038_v41 = vcombine.low %v21295_v33, %v17020_v14  ;;  %v21298_v28 = vld [vmem:[#allocation116_spill] sm:$0xff]  ;;  %v21299_v24 = vld [vmem:[#allocation115_spill] sm:$0xff] }
 0x1ea   : > { %21293 = vst [vmem:[#allocation94_spill] sm:$0xff] %v17624_v53  ;;  %v17640_v9 = vrot.slane %v4073_v12, %v15974_v55  ;;  %v4055_v11 = vcombine.low %v17599_v4, %v17602_v22  ;;  %v17647_v38 = vrot.slane %v4090_v35, %v15974_v55  ;;  %v4108_v62 = vcombine.low %v21299_v24, %v21298_v28  ;;  %v21301_v35 = vld [vmem:[#allocation119_spill] sm:$0xff]  ;;  %v21303_v24 = vld [vmem:[#allocation117_spill] sm:$0xff] }
 0x1eb   : > { %v17654_v33 = vrot.slane %v4091_v5, %v15974_v55  ;;  %v4141_v12 = vcombine.low %v17043_v50, %v17046_v40  ;;  %v4142_v4 = vcombine.low %v17056_v39, %v17086_v20  ;;  %v17661_v0 = vrot.slane %v4107_v42, %v15974_v55  ;;  %v21302_v5 = vld [vmem:[#allocation118_spill] sm:$0xff] }
 0x1ec   : > { %21296 = vst [vmem:[#allocation93_spill] sm:$0xff] %v17640_v9  ;;  %21297 = vst [vmem:[#allocation95_spill] sm:$0xff] %v17647_v38  ;;  %v4125_v22 = vcombine.low %v21301_v35, %v17040_v21  ;;  %v4158_v28 = vcombine.low %v17291_v16, %v17313_v29  ;;  %v13653_v59 = vcombine.high %v17291_v16, %v17313_v29  ;;  %14436 = vmatmul.mubr.msk.bf16.gmra.mrb[84].mxu1 %vm2812_vm0, %v3673_v19  ;;  %v21320_v29 = vld [vmem:[#allocation19_spill] sm:$0xff] }
 0x1ed   : > { %21300 = vst [vmem:[#allocation100_spill] sm:$0xff] %v17661_v0  ;;  %v4124_v40 = vcombine.low %v21303_v24, %v21302_v5  ;;  %v4149_v50 = vrot.slane %v4141_v12, %v15974_v55  ;;  %v4156_v20 = vrot.slane %v4142_v4, %v15974_v55  ;;  %v4160_v39 = vcombine.low %v17294_v34, %v17316_v36 }
 0x1ee   : > { %14447 = vmatprep.mubr.msk.bf16.mxu1 %vm2812_vm0, %v4021_v57  ;;  %v17678_v21 = vrot.slane %v4108_v62, %v15974_v55  ;;  %v13654_v42 = vcombine.high %v17294_v34, %v17316_v36  ;;  %v4168_v19 = vrot.slane %v4158_v28, %v15974_v55  ;;  %v17684_v35 = vrot.slane %v13653_v59, %v15974_v55 }
 0x1ef   : > { %v17686_v24 = vcombine.low %v4149_v50, %v4156_v20  ;;  %v4182_v12 = vrot.slane %v4160_v39, %v15974_v55  ;;  %v17691_v4 = vcombine.high %v17571_v31, %v17571_v31  ;;  %v17695_v62 = vcombine.high %v17583_v26, %v17583_v26 }
 0x1f0   : > { %21304 = vst [vmem:[#allocation99_spill] sm:$0xff] %v17684_v35  ;;  %v17698_v57 = vrot.slane %v4125_v22, %v15974_v55  ;;  %v4189_v28 = vrot.slane %v13654_v42, %v15974_v55  ;;  %v4207_v59 = vcombine.low %v17298_v3, %v17567_v60  ;;  %v4208_v5 = vcombine.low %v17583_v26, %v17624_v53 }
 0x1f1   : > { %21305 = vst [vmem:[#allocation101_spill] sm:$0xff] %v17686_v24  ;;  %21306 = vst [vmem:[#allocation114_spill] sm:$0xff] %v17691_v4  ;;  %v4190_v20 = vcombine.low %v4168_v19, %v17684_v35  ;;  %v4209_v39 = vcombine.low %v17695_v62, %v17571_v31  ;;  %v4210_v22 = vcombine.low %v17612_v7, %v17691_v4  ;;  %v15260_v19 = vld [vmem:[%s20559_s3 + $0x28] sm:$0xff]   ;;  %v21314_v31 = vld [vmem:[#allocation21_spill] sm:$0xff]  ;;  %v4638_v16 = vshll.u32 %v21320_v29, 16 }
 0x1f2   : > { %21307 = vst [vmem:[#allocation76_spill] sm:$0xff] %v17695_v62  ;;  %v17713_v14 = vrot.slane %v4124_v40, %v15974_v55  ;;  %v4191_v42 = vcombine.low %v4182_v12, %v4189_v28  ;;  %v17716_v17 = vrot.slane %v4207_v59, %v15974_v55  ;;  %v17719_v53 = vrot.slane %v4208_v5, %v15974_v55  ;;  %v21310_v59 = vld [vmem:[#allocation20_spill] sm:$0xff]  ;;  %v21312_v4 = vld [vmem:[#allocation18_spill] sm:$0xff] }
 0x1f3   : > { %v17727_v35 = vrot.slane %v4209_v39, %v15974_v55  ;;  %v17730_v40 = vrot.slane %v4210_v22, %v15974_v55  ;;  %v17734_v12 = vcombine.high %v17612_v7, %v17612_v7  ;;  %v17740_v5 = vcombine.high %v21310_v59, %v21310_v59 }
 0x1f4   : > { %21308 = vst [vmem:[#allocation116_spill] sm:$0xff] %v17713_v14  ;;  %v17744_v50 = vcombine.high %v21312_v4, %v21312_v4  ;;  %v4606_v39 = vshll.u32 %v21312_v4, 16  ;;  %14448 = vmatmul.mubr.msk.bf16.vlgmr.msra.gmra.mrb[60].mxu1 %vm2812_vm0, %v4038_v41  ;;  %v17749_v22 = vrot.slane %v4190_v20, %v15974_v55  ;;  %v4609_v28 = vshrl.u32 %v21312_v4, 16  ;;  %v15261_v4 = vld [vmem:[%s20559_s3 + $0x30] sm:$0xff]  }
 0x1f5   : > { %21309 = vst [vmem:[#allocation118_spill] sm:$0xff] %v17734_v12  ;;  %21311 = vst [vmem:[#allocation117_spill] sm:$0xff] %v17740_v5  ;;  %v4256_v7 = vcombine.low %v17734_v12, %v17587_v44  ;;  %v4614_v62 = vshll.u32 %v21314_v31, 16  ;;  %14472 = vmatpush3.bf16.msra.mxu1 %v17310_v32  ;;  %14451 = vmatprep.mubr.msk.bf16.mxu1 %vm2812_vm0, %v4055_v11  ;;  %v17759_v3 = vrot.slane %v4191_v42, %v15974_v55  ;;  %v21317_v44 = vld [vmem:[#allocation17_spill] sm:$0xff] }
 0x1f6   : > { %21313 = vst [vmem:[#allocation188_spill] sm:$0xff] %v17744_v50  ;;  %14473 = vmatprep.subr.bf16.mxu1 %v15260_v19  ;;  %v21318_v60 = vshrl.u32 %v21317_v44, 16  ;;  %v4617_v42 = vshrl.u32 %v21314_v31, 16  ;;  %v4622_v41 = vshll.u32 %v17744_v50, 16  ;;  %v4625_v36 = vshrl.u32 %v17744_v50, 16 }
 0x1f7   : > { %21316 = vst [vmem:[#allocation189_spill] sm:$0xff] %v17759_v3  ;;  %v4616_v11 = vsel %vm16180_vm12, %v4609_v28, %v4614_v62  ;;  %v4630_v20 = vshll.u32 %v21310_v59, 16  ;;  %v4633_v34 = vshrl.u32 %v21310_v59, 16  ;;  %v17781_v44 = vrot.slane %v4256_v7, %v15974_v55  ;;  %v21321_v59 = vld [vmem:[#allocation29_spill] sm:$0xff] }
 0x1f8   : > { %v4608_v32 = vsel %vm16180_vm12, %v21318_v60, %v4606_v39  ;;  %v4624_v60 = vsel %vm16180_vm12, %v4617_v42, %v4622_v41  ;;  %v4641_v62 = vshrl.u32 %v21320_v29, 16  ;;  %v4646_v28 = vshll.u32 %v17740_v5, 16  ;;  %v15262_v7 = vld [vmem:[%s20559_s3 + $0x38] sm:$0xff]  }
 0x1f9   : > { %14474 = vmatpush3.bf16.msra.mxu1 %v15260_v19  ;;  %v4632_v39 = vsel %vm16180_vm12, %v4625_v36, %v4630_v20  ;;  %v4640_v31 = vsel %vm16180_vm12, %v4633_v34, %v4638_v16  ;;  %v4649_v50 = vshrl.u32 %v17740_v5, 16  ;;  %v4654_v26 = vshll.u32 %v21321_v59, 16 }
 0x1fa   : > { %14475 = vmatprep.subr.bf16.mxu1 %v15261_v4  ;;  %v4648_v41 = vsel %vm16180_vm12, %v4641_v62, %v4646_v28  ;;  %v4657_v19 = vshrl.u32 %v21321_v59, 16  ;;  %v5362_v42 = vcombine.low %v4608_v32, %v4616_v11  ;;  %v5363_v29 = vcombine.low %v4624_v60, %v4632_v39  ;;  %v21329_v39 = vld [vmem:[#allocation25_spill] sm:$0xff]  ;;  %v21365_v59 = vld [vmem:[#allocation56_spill] sm:$0xff] }
 0x1fb   : > { %v4656_v36 = vsel %vm16180_vm12, %v4649_v50, %v4654_v26  ;;  %v5364_v16 = vcombine.low %v4640_v31, %v4648_v41  ;;  %v4679_v34 = vshll.u32 %v16137_v45, 16  ;;  %v4682_v20 = vshrl.u32 %v16137_v45, 16  ;;  %v21325_v26 = vld [vmem:[#allocation28_spill] sm:$0xff] }
 0x1fc   : > { %v21322_v5 = vcombine.low %v17627_v47, %v17605_v18  ;;  %v4664_v62 = vsel %vm16180_vm12, %v4657_v19, %v21324_v37  ;;  %v5372_v32 = vrot.slane %v5362_v42, %v15974_v55  ;;  %v5379_v11 = vrot.slane %v5363_v29, %v15974_v55  ;;  %v21360_v18 = vld [vmem:[#allocation55_spill] sm:$0xff] }
 0x1fd   : > { %v4695_v31 = vshll.u32 %v21325_v26, 16  ;;  %v21326_v50 = vcombine.low %v17640_v9, %v17630_v1  ;;  %14476 = vmatpush3.bf16.msra.mxu1 %v15261_v4  ;;  %v5365_v45 = vcombine.low %v4656_v36, %v4664_v62  ;;  %v5386_v47 = vrot.slane %v5364_v16, %v15974_v55  ;;  %v17829_v1 = vld [vmem:[%s20559_s3 + $0x80] sm:$0xff]  }
 0x1fe   : > { %14452 = vmatmul.mubr.msk.bf16.gmra.mrb[64].mxu1 %vm2812_vm0, %v21322_v5  ;;  %v21327_v5 = vld [vmem:[#allocation22_spill] sm:$0xff]  ;;  %v4698_v28 = vshrl.u32 %v21325_v26, 16  ;;  %14477 = vmatprep.subr.bf16.mxu1 %v15262_v7  ;;  %v5394_v29 = vcombine.low %v5372_v32, %v5379_v11  ;;  %v21330_v4 = vshll.u32 %v21329_v39, 16  ;;  %v21331_v19 = vshrl.u32 %v21329_v39, 16  ;;  %v21338_v39 = vld [vmem:[#allocation31_spill] sm:$0xff] }
 0x1ff   : > { %14455 = vmatprep.mubr.msk.bf16.mxu1 %vm2812_vm0, %v21326_v50  ;;  %v21328_v60 = vshrl.u32 %v21327_v5, 16  ;;  %v21332_v36 = vld [vmem:[#allocation26_spill] sm:$0xff]  ;;  %v5393_v11 = vrot.slane %v5365_v45, %v15974_v55  ;;  %v21337_v50 = vld [vmem:[#allocation27_spill] sm:$0xff]  ;;  %v4898_v8 = vshll.u32 %v21365_v59, 16 }
 0x200   : > { %v17835_v41 = vsel %vm16180_vm12, %v4682_v20, %v21330_v4  ;;  %v17841_v42 = vsel %vm16180_vm12, %v21331_v19, %v4695_v31  ;;  %v21333_v16 = vshll.u32 %v21332_v36, 16  ;;  %v4719_v5 = vshll.u32 %v21337_v50, 16 }
 0x201   : > { %v17823_v37 = vsel %vm16180_vm12, %v21328_v60, %v4679_v34  ;;  %v21334_v34 = vld [vmem:[#allocation24_spill] sm:$0xff]  ;;  %v4722_v31 = vshrl.u32 %v21337_v50, 16  ;;  %v17861_v60 = vrot.slane %v5394_v29, %v15974_v55  ;;  %v5412_v19 = vcombine.low %v17835_v41, %v17841_v42  ;;  %14478 = vmatpush3.bf16.msra.mxu1 %v15262_v7 }
 0x202   : > { %v21335_v62 = vshrl.u32 %v21334_v34, 16  ;;  %v21336_v26 = vshll.u32 %v21334_v34, 16  ;;  %v5411_v4 = vcombine.low %v21338_v39, %v17823_v37  ;;  %14503 = vmatprep.subr.bf16.mxu1 %v17829_v1 }
 0x204   : > { %v17849_v32 = vsel %vm16180_vm12, %v21335_v62, %v21333_v16  ;;  %v17856_v20 = vsel %vm16180_vm12, %v4698_v28, %v21336_v26  ;;  %v5395_v16 = vcombine.low %v5386_v47, %v5393_v11  ;;  %v21339_v28 = vshrl.u32 %v21332_v36, 16  ;;  %v21340_v62 = vld [vmem:[#allocation37_spill] sm:$0xff] }
 0x205   : > { %v5413_v45 = vcombine.low %v17856_v20, %v17849_v32  ;;  %v21341_v29 = vshll.u32 %v21340_v62, 16  ;;  %v4730_v50 = vshrl.u32 %v21340_v62, 16  ;;  %v5421_v47 = vrot.slane %v5411_v4, %v15974_v55 }
 0x206   : > { %v17873_v34 = vsel %vm16180_vm12, %v21339_v28, %v4719_v5  ;;  %v5428_v36 = vrot.slane %v5412_v19, %v15974_v55  ;;  %v21342_v5 = vcombine.low %v17716_v17, %v17719_v53  ;;  %v4735_v28 = vshll.u32 %v16205_v49, 16 }
 0x207   : > { %v17879_v26 = vsel %vm16180_vm12, %v4722_v31, %v21341_v29  ;;  %v5435_v11 = vrot.slane %v5413_v45, %v15974_v55  ;;  %v17895_v31 = vrot.slane %v5395_v16, %v15974_v55  ;;  %v4747_v62 = vshrl.u32 %v16295_v61, 16 }
 0x208   : > { %v5414_v7 = vcombine.low %v17873_v34, %v17879_v26  ;;  %v17892_v39 = vrot.slane %v21342_v5, %v15974_v55  ;;  %v21343_v4 = vcombine.low %v17647_v38, %v17654_v33  ;;  %v5443_v45 = vcombine.low %v5421_v47, %v5428_v36  ;;  %v21359_v38 = vld [vmem:[#allocation50_spill] sm:$0xff] }
 0x209   : > { %v4752_v29 = vshll.u32 %v16273_v6, 16  ;;  %v4755_v17 = vshrl.u32 %v16273_v6, 16  ;;  %v21344_v53 = vcombine.low %v17661_v0, %v17678_v21  ;;  %v21345_v61 = vcombine.low %v17727_v35, %v17730_v40 }
 0x20a   : > { %14456 = vmatmul.mubr.msk.bf16.gmra.mrb[68].mxu1 %vm2812_vm0, %v21343_v4  ;;  %v5442_v19 = vrot.slane %v5414_v7, %v15974_v55  ;;  %v4738_v7 = vshrl.u32 %v16205_v49, 16  ;;  %v4760_v47 = vshll.u32 %v16349_v27, 16  ;;  %v17922_v5 = vsel %vm16180_vm12, %v4730_v50, %v4735_v28 }
 0x20b   : > { %14459 = vmatprep.mubr.msk.bf16.mxu1 %vm2812_vm0, %v21344_v53  ;;  %v17914_v16 = vrot.slane %v21345_v61, %v15974_v55  ;;  %v17926_v21 = vsel %vm16180_vm12, %v4747_v62, %v4752_v29  ;;  %v4763_v35 = vshrl.u32 %v16349_v27, 16  ;;  %v4768_v4 = vshll.u32 %v17095_v43, 16 }
 0x20c   : > { %v5444_v36 = vcombine.low %v5435_v11, %v5442_v19  ;;  %v17931_v40 = vsel %vm16180_vm12, %v4755_v17, %v4760_v47  ;;  %v4771_v53 = vshrl.u32 %v17095_v43, 16  ;;  %v4776_v11 = vshll.u32 %v16301_v54, 16  ;;  %v21346_v19 = vld [vmem:[#allocation33_spill] sm:$0xff]  ;;  %v21348_v17 = vld [vmem:[#allocation44_spill] sm:$0xff] }
 0x20d   : > { %v21347_v61 = vshll.u32 %v21346_v19, 16  ;;  %v4779_v28 = vshrl.u32 %v16301_v54, 16  ;;  %v4784_v27 = vshll.u32 %v16276_v48, 16  ;;  %v4787_v62 = vshrl.u32 %v16276_v48, 16 }
 0x20e   : > { %v17947_v29 = vsel %vm16180_vm12, %v4763_v35, %v4768_v4  ;;  %v17951_v43 = vsel %vm16180_vm12, %v4771_v53, %v4776_v11  ;;  %v4792_v47 = vshll.u32 %v21348_v17, 16  ;;  %v5461_v48 = vcombine.low %v17926_v21, %v17931_v40 }
 0x20f   : > { %v17940_v50 = vsel %vm16180_vm12, %v4738_v7, %v21347_v61  ;;  %v17957_v61 = vrot.slane %v5443_v45, %v15974_v55  ;;  %v17961_v54 = vsel %vm16180_vm12, %v4779_v28, %v4784_v27  ;;  %v5462_v35 = vcombine.low %v17947_v29, %v17951_v43 }
 0x210   : > { %v5460_v7 = vcombine.low %v17922_v5, %v17940_v50  ;;  %v17968_v4 = vrot.slane %v5444_v36, %v15974_v55  ;;  %v17972_v53 = vsel %vm16180_vm12, %v4787_v62, %v4792_v47  ;;  %v6312_v45 = vcombine.low %v17940_v50, %v17926_v21 }
 0x211   : > { %v21349_v28 = vcombine.low %v17713_v14, %v17698_v57  ;;  %v5463_v27 = vcombine.low %v17961_v54, %v17972_v53  ;;  %v17985_v36 = vrot.slane %v5461_v48, %v15974_v55  ;;  %v17988_v62 = vrot.slane %v5462_v35, %v15974_v55 }
 0x212   : > { %v4206_v57 = vcombine.low %v17749_v22, %v17759_v3  ;;  %v4270_v50 = vrot.slane %v17781_v44, %v15974_v55  ;;  %v5470_v47 = vrot.slane %v5460_v7, %v15974_v55  ;;  %v4800_v48 = vshll.u32 %v17132_v30, 16  ;;  %v21355_v3 = vld [vmem:[#allocation48_spill] sm:$0xff] }
 0x213   : > { %14460 = vmatmul.mubr.msk.bf16.gmra.mrb[72].mxu1 %vm2812_vm0, %v21349_v28  ;;  %21350 = vst [vmem:[#allocation17_spill] sm:$0xff] %v17985_v36  ;;  %21351 = vst [vmem:[#allocation30_spill] sm:$0xff] %v17988_v62  ;;  %v4255_v35 = vcombine.low %v17892_v39, %v17914_v16  ;;  %v18003_v28 = vrot.slane %v5463_v27, %v15974_v55  ;;  %v4795_v21 = vshrl.u32 %v21348_v17, 16  ;;  %v4803_v11 = vshrl.u32 %v17132_v30, 16  ;;  %v21354_v27 = vld [vmem:[#allocation47_spill] sm:$0xff] }
 0x214   : > { %14463 = vmatprep.mubr.msk.bf16.mxu1 %vm2812_vm0, %v17686_v24  ;;  %v5492_v33 = vcombine.low %v5470_v47, %v17985_v36  ;;  %v4820_v44 = vshrl.u32 %v16359_v52, 16  ;;  %v4825_v7 = vshll.u32 %v16371_v58, 16  ;;  %v21353_v16 = vshll.u32 %v16279_v13, 16 }
 0x215   : > { %21352 = vst [vmem:[#allocation28_spill] sm:$0xff] %v18003_v28  ;;  %v5493_v24 = vcombine.low %v17988_v62, %v18003_v28  ;;  %v18016_v39 = vsel %vm16180_vm12, %v4795_v21, %v4800_v48  ;;  %v4828_v17 = vshrl.u32 %v16371_v58, 16  ;;  %v4833_v47 = vshll.u32 %v21354_v27, 16  ;;  %v21356_v21 = vld [vmem:[#allocation40_spill] sm:$0xff] }
 0x216   : > { %v18022_v30 = vsel %vm16180_vm12, %v4803_v11, %v21353_v16  ;;  %v18027_v52 = vsel %vm16180_vm12, %v4820_v44, %v4825_v7  ;;  %v4836_v22 = vshrl.u32 %v21354_v27, 16  ;;  %v4841_v14 = vshll.u32 %v21355_v3, 16 }
 0x217   : > { %v21357_v48 = vshll.u32 %v21356_v21, 16  ;;  %v21358_v0 = vshrl.u32 %v16279_v13, 16  ;;  %v4844_v16 = vshrl.u32 %v21355_v3, 16  ;;  %v4849_v9 = vshll.u32 %v21359_v38, 16  ;;  %v21368_v21 = vld [vmem:[#allocation57_spill] sm:$0xff] }
 0x218   : > { %v4852_v44 = vshrl.u32 %v21359_v38, 16  ;;  %v18045_v7 = vsel %vm16180_vm12, %v4828_v17, %v4833_v47  ;;  %v18049_v27 = vsel %vm16180_vm12, %v4836_v22, %v4841_v14  ;;  %v4857_v13 = vshll.u32 %v21360_v18, 16 }
 0x219   : > { %v18038_v11 = vsel %vm16180_vm12, %v21358_v0, %v21357_v48  ;;  %v5509_v0 = vcombine.low %v18016_v39, %v18022_v30  ;;  %v18056_v3 = vrot.slane %v5493_v24, %v15974_v55  ;;  %v18060_v38 = vsel %vm16180_vm12, %v4844_v16, %v4849_v9 }
 0x21a   : > { %v5510_v17 = vcombine.low %v18038_v11, %v18027_v52  ;;  %v5511_v14 = vcombine.low %v18045_v7, %v18049_v27  ;;  %v18068_v22 = vrot.slane %v5492_v33, %v15974_v55  ;;  %v4860_v9 = vshrl.u32 %v21360_v18, 16  ;;  %v21362_v33 = vld [vmem:[#allocation62_spill] sm:$0xff] }
 0x21b   : > { %14464 = vmatmul.mubr.msk.bf16.gmra.mrb[76].mxu1 %vm2812_vm0, %v4206_v57  ;;  %v18072_v57 = vsel %vm16180_vm12, %v4852_v44, %v4857_v13  ;;  %v18075_v24 = vrot.slane %v5509_v0, %v15974_v55  ;;  %v4865_v16 = vshll.u32 %v21362_v33, 16  ;;  %v18088_v6 = vrot.slane %v6312_v45, %v15974_v55  ;;  %v21363_v44 = vld [vmem:[#allocation63_spill] sm:$0xff] }
 0x21c   : > { %14467 = vmatprep.mubr.msk.bf16.mxu1 %vm2812_vm0, %v4255_v35  ;;  %v5512_v47 = vcombine.low %v18060_v38, %v18072_v57  ;;  %v18081_v48 = vrot.slane %v5510_v17, %v15974_v55  ;;  %v18084_v35 = vrot.slane %v5511_v14, %v15974_v55  ;;  %v4868_v13 = vshrl.u32 %v21362_v33, 16 }
 0x21d   : > { %21361 = vst [vmem:[#allocation22_spill] sm:$0xff] %v18075_v24  ;;  %v4873_v0 = vshll.u32 %v21363_v44, 16  ;;  %v4876_v18 = vshrl.u32 %v21363_v44, 16  ;;  %v5508_v49 = vcombine.low %v18068_v22, %v18056_v3  ;;  %v18104_v45 = vsel %vm16180_vm12, %v4860_v9, %v4865_v16  ;;  %v21366_v16 = vld [vmem:[#allocation51_spill] sm:$0xff] }
 0x21e   : > { %v18096_v17 = vrot.slane %v5512_v47, %v15974_v55  ;;  %v5541_v14 = vcombine.low %v18075_v24, %v18081_v48  ;;  %v4881_v44 = vshll.u32 %v21192_v56, 16  ;;  %v4884_v3 = vshrl.u32 %v21192_v56, 16 }
 0x21f   : > { %v18108_v33 = vsel %vm16180_vm12, %v4868_v13, %v4873_v0  ;;  %v4893_v19 = vshrl.u32 %v21188_v46, 16  ;;  %v21367_v13 = vshll.u32 %v21366_v16, 16  ;;  %v4901_v56 = vshrl.u32 %v21365_v59, 16 }
 0x220   : > { %21364 = vst [vmem:[#allocation25_spill] sm:$0xff] %v18096_v17  ;;  %v5542_v22 = vcombine.low %v18084_v35, %v18096_v17  ;;  %v18115_v47 = vrot.slane %v5541_v14, %v15974_v55  ;;  %v18121_v9 = vsel %vm16180_vm12, %v4876_v18, %v4881_v44  ;;  %v4906_v58 = vshll.u32 %v21368_v21, 16  ;;  %v21369_v44 = vld [vmem:[#allocation138_spill] sm:$0xff] }
 0x221   : > { %v18127_v0 = vsel %vm16180_vm12, %v4884_v3, %v21367_v13  ;;  %v18137_v14 = vsel %vm16180_vm12, %v4893_v19, %v4898_v8  ;;  %v4909_v18 = vshrl.u32 %v21368_v21, 16  ;;  %v4914_v16 = vshll.u32 %v21369_v44, 16 }
 0x222   : > { %v18133_v46 = vrot.slane %v5542_v22, %v15974_v55  ;;  %v21370_v3 = vcombine.low %v17861_v60, %v17895_v31  ;;  %v18147_v13 = vsel %vm16180_vm12, %v4901_v56, %v4906_v58  ;;  %v21372_v22 = vld [vmem:[#allocation58_spill] sm:$0xff]  ;;  %v5558_v8 = vcombine.low %v18104_v45, %v18108_v33 }
 0x223   : > { %14468 = vmatmul.mubr.msk.bf16.gmra.mrb[88].mxu1 %vm2812_vm0, %v4270_v50  ;;  %21371 = vst [vmem:[#allocation26_spill] sm:$0xff] %v18147_v13  ;;  %v4917_v50 = vshrl.u32 %v21369_v44, 16  ;;  %v4922_v59 = vshll.u32 %v21372_v22, 16  ;;  %v18157_v21 = vsel %vm16180_vm12, %v4909_v18, %v4914_v16  ;;  %v5559_v60 = vcombine.low %v18121_v9, %v18127_v0 }
 0x224   : > { %14479 = vmatprep.mubr.msk.bf16.mxu1 %vm2812_vm0, %v21370_v3  ;;  %21373 = vst [vmem:[#allocation24_spill] sm:$0xff] %v18157_v21  ;;  %v5560_v58 = vcombine.low %v18137_v14, %v18147_v13  ;;  %v5557_v56 = vcombine.low %v18115_v47, %v18133_v46  ;;  %v18170_v44 = vrot.slane %v5558_v8, %v15974_v55  ;;  %v21376_v3 = vld [vmem:[#allocation59_spill] sm:$0xff]  ;;  %v4925_v28 = vshrl.u32 %v21372_v22, 16  ;;  %v21379_v46 = vld [vmem:[#allocation140_spill] sm:$0xff] }
 0x225   : > { %v18167_v31 = vsel %vm16180_vm12, %v4917_v50, %v4922_v59  ;;  %v4930_v19 = vshll.u32 %v21376_v3, 16  ;;  %v18176_v18 = vrot.slane %v5559_v60, %v15974_v55  ;;  %v4933_v24 = vshrl.u32 %v21376_v3, 16  ;;  %v15264_v22 = vld [vmem:[%s20559_s3 + $0x88] sm:$0xff]  }
 0x226   : > { %21374 = vst [vmem:[#allocation27_spill] sm:$0xff] %v18167_v31  ;;  %21375 = vst [vmem:[#allocation31_spill] sm:$0xff] %v18170_v44  ;;  %v5561_v16 = vcombine.low %v18157_v21, %v18167_v31  ;;  %v18181_v47 = vrot.slane %v5560_v58, %v15974_v55  ;;  %v4938_v50 = vshll.u32 %v21379_v46, 16  ;;  %v4941_v8 = vshrl.u32 %v21379_v46, 16  ;;  %v21381_v3 = vld [vmem:[#allocation143_spill] sm:$0xff]  ;;  %v21385_v31 = vld [vmem:[#allocation60_spill] sm:$0xff] }
 0x227   : > { %21377 = vst [vmem:[#allocation37_spill] sm:$0xff] %v18176_v18  ;;  %v5590_v60 = vcombine.low %v18170_v44, %v18176_v18  ;;  %v4946_v58 = vshll.u32 %v21381_v3, 16  ;;  %v4949_v62 = vshrl.u32 %v21381_v3, 16  ;;  %v18199_v59 = vsel %vm16180_vm12, %v4925_v28, %v4930_v19  ;;  %v21387_v13 = vld [vmem:[#allocation67_spill] sm:$0xff] }
 0x228   : > { %21378 = vst [vmem:[#allocation44_spill] sm:$0xff] %v18181_v47  ;;  %v18188_v36 = vrot.slane %v5561_v16, %v15974_v55  ;;  %v18203_v46 = vsel %vm16180_vm12, %v4933_v24, %v4938_v50  ;;  %v21383_v16 = vld [vmem:[#allocation61_spill] sm:$0xff]  ;;  %v21386_v18 = vshrl.u32 %v21385_v31, 16  ;;  %v4966_v21 = vshrl.u32 %v21387_v13, 16 }
 0x229   : > { %21382 = vst [vmem:[#allocation48_spill] sm:$0xff] %v18203_v46  ;;  %v21384_v17 = vshll.u32 %v21383_v16, 16  ;;  %v21388_v3 = vcombine.low %v17957_v61, %v17968_v4  ;;  %v5598_v24 = vrot.slane %v5590_v60, %v15974_v55  ;;  %v18223_v19 = vsel %vm16180_vm12, %v4941_v8, %v4946_v58  ;;  %v21391_v61 = vld [vmem:[#allocation70_spill] sm:$0xff]  ;;  %v21393_v58 = vld [vmem:[#allocation88_spill] sm:$0xff] }
 0x22a   : > { %21380 = vst [vmem:[#allocation47_spill] sm:$0xff] %v18188_v36  ;;  %v5591_v28 = vcombine.low %v18181_v47, %v18188_v36  ;;  %v21389_v50 = vshll.u32 %v21385_v31, 16  ;;  %v4971_v4 = vshll.u32 %v21391_v61, 16  ;;  %v4974_v13 = vshrl.u32 %v21391_v61, 16  ;;  %v21396_v16 = vld [vmem:[#allocation68_spill] sm:$0xff] }
 0x22b   : > { %v18211_v44 = vsel %vm16180_vm12, %v21386_v18, %v21384_v17  ;;  %14480 = vmatmul.mubr.msk.bf16.vlgmr.msra.gmra.mrb[60].mxu1 %vm2812_vm0, %v21388_v3  ;;  %v21392_v18 = vld [vmem:[#allocation72_spill] sm:$0xff]  ;;  %v4987_v31 = vshll.u32 %v21393_v58, 16  ;;  %v4995_v61 = vshll.u32 %v21396_v16, 16 }
 0x22c   : > { %v18229_v17 = vsel %vm16180_vm12, %v4949_v62, %v21389_v50  ;;  %14504 = vmatpush3.bf16.msra.mxu1 %v17829_v1  ;;  %14483 = vmatprep.mubr.msk.bf16.mxu1 %vm2812_vm0, %v5508_v49  ;;  %v4979_v60 = vshll.u32 %v21392_v18, 16  ;;  %v4982_v3 = vshrl.u32 %v21392_v18, 16  ;;  %v5605_v8 = vrot.slane %v5591_v28, %v15974_v55  ;;  %v15265_v49 = vld [vmem:[%s20559_s3 + $0x90] sm:$0xff]  }
 0x22d   : > { %21390 = vst [vmem:[#allocation50_spill] sm:$0xff] %v18229_v17  ;;  %14505 = vmatprep.subr.bf16.mxu1 %v15264_v22  ;;  %v5607_v62 = vcombine.low %v18199_v59, %v18203_v46  ;;  %v5608_v1 = vcombine.low %v18223_v19, %v18229_v17  ;;  %v18248_v50 = vsel %vm16180_vm12, %v4966_v21, %v4971_v4  ;;  %v4990_v18 = vshrl.u32 %v21393_v58, 16 }
 0x22e   : > { %21394 = vst [vmem:[#allocation55_spill] sm:$0xff] %v18248_v50  ;;  %v18252_v28 = vsel %vm16180_vm12, %v4974_v13, %v4979_v60  ;;  %v5606_v47 = vcombine.low %v5598_v24, %v5605_v8  ;;  %v18258_v36 = vsel %vm16180_vm12, %v4982_v3, %v4987_v31  ;;  %v5609_v17 = vcombine.low %v18211_v44, %v18248_v50  ;;  %v21401_v60 = vld [vmem:[#allocation71_spill] sm:$0xff]  ;;  %v21406_v50 = vld [vmem:[#allocation69_spill] sm:$0xff] }
 0x22f   : > { %21395 = vst [vmem:[#allocation62_spill] sm:$0xff] %v18252_v28  ;;  %21397 = vst [vmem:[#allocation63_spill] sm:$0xff] %v18258_v36  ;;  %v18263_v46 = vrot.slane %v5607_v62, %v15974_v55  ;;  %v5610_v21 = vcombine.low %v18252_v28, %v18258_v36  ;;  %v18268_v4 = vrot.slane %v5608_v1, %v15974_v55  ;;  %v4998_v31 = vshrl.u32 %v21396_v16, 16  ;;  %v15266_v62 = vld [vmem:[%s20559_s3 + $0x98] sm:$0xff]  }
 0x230   : > { %14506 = vmatpush3.bf16.msra.mxu1 %v15264_v22  ;;  %v18272_v24 = vsel %vm16180_vm12, %v4990_v18, %v4995_v61  ;;  %v18276_v13 = vrot.slane %v5609_v17, %v15974_v55  ;;  %v5003_v3 = vshll.u32 %v21401_v60, 16  ;;  %v5006_v8 = vshrl.u32 %v21401_v60, 16  ;;  %v21402_v22 = vld [vmem:[#allocation83_spill] sm:$0xff]  ;;  %v21404_v61 = vld [vmem:[#allocation90_spill] sm:$0xff] }
 0x231   : > { %21398 = vst [vmem:[#allocation57_spill] sm:$0xff] %v18263_v46  ;;  %21399 = vst [vmem:[#allocation138_spill] sm:$0xff] %v18268_v4  ;;  %v5011_v58 = vshll.u32 %v21402_v22, 16  ;;  %14507 = vmatprep.subr.bf16.mxu1 %v15265_v49  ;;  %v18285_v1 = vrot.slane %v5610_v21, %v15974_v55  ;;  %v5639_v16 = vcombine.low %v18263_v46, %v18268_v4  ;;  %v5014_v17 = vshrl.u32 %v21402_v22, 16 }
 0x232   : > { %21400 = vst [vmem:[#allocation58_spill] sm:$0xff] %v18276_v13  ;;  %v5019_v18 = vshll.u32 %v21404_v61, 16  ;;  %v18294_v60 = vsel %vm16180_vm12, %v4998_v31, %v5003_v3  ;;  %v5022_v21 = vshrl.u32 %v21404_v61, 16  ;;  %v5027_v28 = vshll.u32 %v21406_v50, 16  ;;  %v21408_v61 = vld [vmem:[#allocation84_spill] sm:$0xff] }
 0x233   : > { %21403 = vst [vmem:[#allocation59_spill] sm:$0xff] %v18285_v1  ;;  %14484 = vmatmul.mubr.msk.bf16.gmra.mrb[64].mxu1 %vm2812_vm0, %v5557_v56  ;;  %21405 = vst [vmem:[#allocation140_spill] sm:$0xff] %v18294_v60  ;;  %v18298_v36 = vsel %vm16180_vm12, %v5006_v8, %v5011_v58  ;;  %v5640_v22 = vcombine.low %v18276_v13, %v18285_v1  ;;  %v5647_v4 = vrot.slane %v5639_v16, %v15974_v55  ;;  %v21407_v8 = vld [vmem:[#allocation80_spill] sm:$0xff]  ;;  %v18321_v16 = vld [vmem:[%s20559_s3 + $0xe0] sm:$0xff]  }
 0x234   : > { %14487 = vmatprep.mubr.msk.bf16.mxu1 %vm2812_vm0, %v5606_v47  ;;  %v18308_v56 = vsel %vm16180_vm12, %v5014_v17, %v5019_v18  ;;  %v5030_v31 = vshrl.u32 %v21406_v50, 16  ;;  %14508 = vmatpush3.bf16.msra.mxu1 %v15265_v49  ;;  %v18313_v3 = vsel %vm16180_vm12, %v5022_v21, %v5027_v28  ;;  %v5039_v58 = vshrl.u32 %v21407_v8, 16  ;;  %21409 = vst [vmem:[#allocation143_spill] sm:$0xff] %v18321_v16  ;;  %v21410_v18 = vld [vmem:[#allocation73_spill] sm:$0xff]  ;;  %v21413_v21 = vld [vmem:[#allocation154_spill] sm:$0xff] }
 0x235   : > { %v5044_v47 = vshll.u32 %v21408_v61, 16  ;;  %v5047_v46 = vshrl.u32 %v21408_v61, 16  ;;  %14509 = vmatprep.subr.bf16.mxu1 %v15266_v62  ;;  %v5654_v17 = vrot.slane %v5640_v22, %v15974_v55  ;;  %v21411_v49 = vshll.u32 %v21410_v18, 16 }
 0x236   : > { %v5052_v8 = vshll.u32 %v21413_v21, 16  ;;  %v5656_v50 = vcombine.low %v18272_v24, %v18294_v60  ;;  %v5657_v13 = vcombine.low %v18298_v36, %v18308_v56  ;;  %v5055_v18 = vshrl.u32 %v21413_v21, 16 }
 0x237   : > { %v18328_v28 = vsel %vm16180_vm12, %v5030_v31, %v21411_v49  ;;  %v18335_v61 = vsel %vm16180_vm12, %v5039_v58, %v5044_v47  ;;  %v5655_v1 = vcombine.low %v5647_v4, %v5654_v17  ;;  %v5060_v60 = vshll.u32 %v17362_v15, 16  ;;  %v21419_v17 = vld [vmem:[#allocation85_spill] sm:$0xff] }
 0x238   : > { %21412 = vst [vmem:[#allocation67_spill] sm:$0xff] %v18328_v28  ;;  %v5658_v22 = vcombine.low %v18313_v3, %v18328_v28  ;;  %v18344_v31 = vsel %vm16180_vm12, %v5047_v46, %v5052_v8  ;;  %v18347_v49 = vrot.slane %v5656_v50, %v15974_v55  ;;  %14510 = vmatpush3.bf16.msra.mxu1 %v15266_v62  ;;  %v5063_v4 = vshrl.u32 %v17362_v15, 16 }
 0x239   : > { %21414 = vst [vmem:[#allocation72_spill] sm:$0xff] %v18344_v31  ;;  %v5659_v58 = vcombine.low %v18335_v61, %v18344_v31  ;;  %v18353_v47 = vrot.slane %v5657_v13, %v15974_v55  ;;  %14535 = vmatprep.subr.bf16.mxu1 %v18321_v16  ;;  %v18362_v46 = vsel %vm16180_vm12, %v5055_v18, %v5060_v60  ;;  %v5068_v50 = vshll.u32 %v21222_v51, 16 }
 0x23a   : > { %21415 = vst [vmem:[#allocation88_spill] sm:$0xff] %v18347_v49  ;;  %v18356_v28 = vrot.slane %v5658_v22, %v15974_v55  ;;  %21418 = vst [vmem:[#allocation83_spill] sm:$0xff] %v18362_v46  ;;  %v5071_v62 = vshrl.u32 %v21222_v51, 16  ;;  %v5076_v21 = vshll.u32 %v21419_v17, 16  ;;  %v5079_v8 = vshrl.u32 %v21419_v17, 16  ;;  %v21421_v22 = vld [vmem:[#allocation81_spill] sm:$0xff] }
 0x23b   : > { %21416 = vst [vmem:[#allocation68_spill] sm:$0xff] %v18353_v47  ;;  %14488 = vmatmul.mubr.msk.bf16.gmra.mrb[68].mxu1 %vm2812_vm0, %v5655_v1  ;;  %v18369_v13 = vrot.slane %v5659_v58, %v15974_v55  ;;  %v5688_v15 = vcombine.low %v18347_v49, %v18353_v47  ;;  %v5084_v16 = vshll.u32 %v21421_v22, 16  ;;  %v18377_v60 = vsel %vm16180_vm12, %v5063_v4, %v5068_v50 }
 0x23c   : > { %21417 = vst [vmem:[#allocation71_spill] sm:$0xff] %v18356_v28  ;;  %21422 = vst [vmem:[#allocation80_spill] sm:$0xff] %v18377_v60  ;;  %v18381_v51 = vsel %vm16180_vm12, %v5071_v62, %v5076_v21  ;;  %v5087_v1 = vshrl.u32 %v21421_v22, 16  ;;  %v5092_v18 = vshll.u32 %v17370_v10, 16  ;;  %v5095_v4 = vshrl.u32 %v17370_v10, 16  ;;  %v21426_v62 = vld [vmem:[#allocation82_spill] sm:$0xff] }
 0x23d   : > { %21420 = vst [vmem:[#allocation90_spill] sm:$0xff] %v18369_v13  ;;  %21423 = vst [vmem:[#allocation154_spill] sm:$0xff] %v18381_v51  ;;  %v5689_v58 = vcombine.low %v18356_v28, %v18369_v13  ;;  %v5696_v47 = vrot.slane %v5688_v15, %v15974_v55  ;;  %v18390_v17 = vsel %vm16180_vm12, %v5079_v8, %v5084_v16  ;;  %v21427_v21 = vshll.u32 %v21426_v62, 16  ;;  %v21430_v28 = vld [vmem:[#allocation86_spill] sm:$0xff]  ;;  %v21431_v13 = vld [vmem:[#allocation91_spill] sm:$0xff] }
 0x23e   : > { %21424 = vst [vmem:[#allocation85_spill] sm:$0xff] %v18390_v17  ;;  %v18395_v50 = vsel %vm16180_vm12, %v5087_v1, %v5092_v18  ;;  %v21428_v22 = vshrl.u32 %v16677_v25, 16  ;;  %v5112_v15 = vshrl.u32 %v21430_v28, 16  ;;  %v5117_v31 = vshll.u32 %v21431_v13, 16 }
 0x23f   : > { %21425 = vst [vmem:[#allocation81_spill] sm:$0xff] %v18395_v50  ;;  %v5703_v16 = vrot.slane %v5689_v58, %v15974_v55  ;;  %v21432_v10 = vshll.u32 %v16677_v25, 16  ;;  %v5705_v1 = vcombine.low %v18362_v46, %v18377_v60  ;;  %v5706_v18 = vcombine.low %v18381_v51, %v18390_v17 }
 0x240   : > { %v18403_v49 = vsel %vm16180_vm12, %v21428_v22, %v21427_v21  ;;  %v18420_v21 = vsel %vm16180_vm12, %v5112_v15, %v5117_v31  ;;  %v5120_v58 = vshrl.u32 %v21431_v13, 16  ;;  %v21435_v22 = vld [vmem:[#allocation107_spill] sm:$0xff] }
 0x241   : > { %21429 = vst [vmem:[#allocation190_spill] sm:$0xff] %v18403_v49  ;;  %v18412_v8 = vsel %vm16180_vm12, %v5095_v4, %v21432_v10  ;;  %21434 = vst [vmem:[#allocation191_spill] sm:$0xff] %v18420_v21  ;;  %v5125_v25 = vshll.u32 %v21435_v22, 16  ;;  %v5704_v62 = vcombine.low %v5696_v47, %v5703_v16  ;;  %v5708_v4 = vcombine.low %v18403_v49, %v18420_v21 }
 0x242   : > { %21433 = vst [vmem:[#allocation86_spill] sm:$0xff] %v18412_v8  ;;  %v5707_v28 = vcombine.low %v18395_v50, %v18412_v8  ;;  %v18429_v10 = vrot.slane %v5705_v1, %v15974_v55  ;;  %v18432_v17 = vrot.slane %v5706_v18, %v15974_v55  ;;  %v5128_v13 = vshrl.u32 %v21435_v22, 16  ;;  %v21439_v8 = vld [vmem:[#allocation109_spill] sm:$0xff]  ;;  %v21442_v22 = vld [vmem:[#allocation96_spill] sm:$0xff] }
 0x243   : > { %v18439_v15 = vsel %vm16180_vm12, %v5120_v58, %v5125_v25  ;;  %v5133_v47 = vshll.u32 %v21439_v8, 16  ;;  %14491 = vmatprep.mubr.msk.bf16.mxu1 %vm2812_vm0, %v5704_v62  ;;  %v18445_v16 = vrot.slane %v5708_v4, %v15974_v55  ;;  %v5136_v18 = vshrl.u32 %v21439_v8, 16 }
 0x244   : > { %21436 = vst [vmem:[#allocation107_spill] sm:$0xff] %v18429_v10  ;;  %21437 = vst [vmem:[#allocation192_spill] sm:$0xff] %v18432_v17  ;;  %v18435_v31 = vrot.slane %v5707_v28, %v15974_v55  ;;  %v5737_v1 = vcombine.low %v18429_v10, %v18432_v17  ;;  %v21441_v28 = vld [vmem:[#allocation87_spill] sm:$0xff]  ;;  %v5149_v49 = vshll.u32 %v21442_v22, 16  ;;  %v5152_v62 = vshrl.u32 %v21442_v22, 16  ;;  %v21443_v17 = vld [vmem:[#allocation108_spill] sm:$0xff] }
 0x245   : > { %21440 = vst [vmem:[#allocation109_spill] sm:$0xff] %v18445_v16  ;;  %v5141_v21 = vshll.u32 %v21441_v28, 16  ;;  %v18453_v25 = vsel %vm16180_vm12, %v5128_v13, %v5133_v47  ;;  %v5144_v58 = vshrl.u32 %v21441_v28, 16  ;;  %v5157_v10 = vshll.u32 %v21443_v17, 16  ;;  %v21445_v28 = vld [vmem:[#allocation110_spill] sm:$0xff] }
 0x246   : > { %21438 = vst [vmem:[#allocation193_spill] sm:$0xff] %v18435_v31  ;;  %v5738_v4 = vcombine.low %v18435_v31, %v18445_v16  ;;  %v5745_v50 = vrot.slane %v5737_v1, %v15974_v55  ;;  %v5160_v47 = vshrl.u32 %v21443_v17, 16  ;;  %v5165_v60 = vshll.u32 %v21445_v28, 16 }
 0x247   : > { %v18463_v8 = vsel %vm16180_vm12, %v5136_v18, %v5141_v21  ;;  %v18468_v13 = vsel %vm16180_vm12, %v5144_v58, %v5149_v49  ;;  %v5168_v22 = vshrl.u32 %v21445_v28, 16  ;;  %v18476_v1 = vsel %vm16180_vm12, %v5152_v62, %v5157_v10  ;;  %v21447_v21 = vld [vmem:[#allocation89_spill] sm:$0xff]  ;;  %v21449_v28 = vld [vmem:[#allocation102_spill] sm:$0xff] }
 0x248   : > { %21444 = vst [vmem:[#allocation87_spill] sm:$0xff] %v18468_v13  ;;  %v5752_v16 = vrot.slane %v5738_v4, %v15974_v55  ;;  %21446 = vst [vmem:[#allocation96_spill] sm:$0xff] %v18476_v1  ;;  %v5173_v18 = vshll.u32 %v21447_v21, 16  ;;  %v5176_v31 = vshrl.u32 %v21447_v21, 16  ;;  %v18482_v49 = vsel %vm16180_vm12, %v5160_v47, %v5165_v60  ;;  %v21451_v62 = vld [vmem:[#allocation97_spill] sm:$0xff] }
 0x249   : > { %21448 = vst [vmem:[#allocation108_spill] sm:$0xff] %v18482_v49  ;;  %v5754_v17 = vcombine.low %v18439_v15, %v18453_v25  ;;  %v5755_v58 = vcombine.low %v18463_v8, %v18468_v13  ;;  %v5185_v4 = vshrl.u32 %v21449_v28, 16  ;;  %v21452_v46 = vshll.u32 %v21451_v62, 16  ;;  %v21460_v62 = vld [vmem:[#allocation103_spill] sm:$0xff] }
 0x24a   : > { %v5753_v51 = vcombine.low %v5745_v50, %v5752_v16  ;;  %v18491_v10 = vsel %vm16180_vm12, %v5168_v22, %v5173_v18  ;;  %v5756_v60 = vcombine.low %v18476_v1, %v18482_v49  ;;  %v5190_v16 = vshll.u32 %v21241_v2, 16 }
 0x24b   : > { %21450 = vst [vmem:[#allocation110_spill] sm:$0xff] %v18491_v10  ;;  %v18497_v21 = vsel %vm16180_vm12, %v5176_v31, %v21452_v46  ;;  %v18504_v13 = vrot.slane %v5754_v17, %v15974_v55  ;;  %v18507_v50 = vrot.slane %v5755_v58, %v15974_v55  ;;  %v5193_v46 = vshrl.u32 %v21241_v2, 16 }
 0x24c   : > { %21453 = vst [vmem:[#allocation102_spill] sm:$0xff] %v18497_v21  ;;  %v5757_v47 = vcombine.low %v18491_v10, %v18497_v21  ;;  %14492 = vmatmul.mubr.msk.bf16.gmra.mrb[72].mxu1 %vm2812_vm0, %v5753_v51  ;;  %v18512_v22 = vrot.slane %v5756_v60, %v15974_v55  ;;  %v5198_v31 = vshll.u32 %v17419_v23, 16  ;;  %v5201_v18 = vshrl.u32 %v17419_v23, 16  ;;  %v21470_v10 = vld [vmem:[#allocation106_spill] sm:$0xff] }
 0x24d   : > { %21454 = vst [vmem:[#allocation194_spill] sm:$0xff] %v18504_v13  ;;  %21455 = vst [vmem:[#allocation195_spill] sm:$0xff] %v18507_v50  ;;  %v5786_v17 = vcombine.low %v18504_v13, %v18507_v50  ;;  %v18524_v58 = vsel %vm16180_vm12, %v5185_v4, %v5190_v16  ;;  %v5206_v51 = vshll.u32 %v17435_v63, 16  ;;  %v5209_v2 = vshrl.u32 %v17435_v63, 16  ;;  %v21462_v16 = vld [vmem:[#allocation105_spill] sm:$0xff] }
 0x24e   : > { %21456 = vst [vmem:[#allocation196_spill] sm:$0xff] %v18512_v22  ;;  %v18518_v28 = vrot.slane %v5757_v47, %v15974_v55  ;;  %21458 = vst [vmem:[#allocation198_spill] sm:$0xff] %v18524_v58  ;;  %v18529_v60 = vsel %vm16180_vm12, %v5193_v46, %v5198_v31  ;;  %v5214_v23 = vshll.u32 %v21460_v62, 16  ;;  %v5217_v47 = vshrl.u32 %v21460_v62, 16  ;;  %v21464_v31 = vld [vmem:[#allocation166_spill] sm:$0xff] }
 0x24f   : > { %21459 = vst [vmem:[#allocation199_spill] sm:$0xff] %v18529_v60  ;;  %v5794_v13 = vrot.slane %v5786_v17, %v15974_v55  ;;  %v18539_v4 = vsel %vm16180_vm12, %v5201_v18, %v5206_v51  ;;  %v5222_v50 = vshll.u32 %v21462_v16, 16  ;;  %v5225_v63 = vshrl.u32 %v21462_v16, 16  ;;  %v21466_v18 = vld [vmem:[#allocation168_spill] sm:$0xff] }
 0x250   : > { %21457 = vst [vmem:[#allocation197_spill] sm:$0xff] %v18518_v28  ;;  %v5787_v21 = vcombine.low %v18512_v22, %v18518_v28  ;;  %21461 = vst [vmem:[#allocation103_spill] sm:$0xff] %v18539_v4  ;;  %v18544_v46 = vsel %vm16180_vm12, %v5209_v2, %v5214_v23  ;;  %v5230_v49 = vshll.u32 %v21464_v31, 16  ;;  %v5233_v62 = vshrl.u32 %v21464_v31, 16  ;;  %v21468_v31 = vld [vmem:[#allocation126_spill] sm:$0xff] }
 0x251   : > { %21463 = vst [vmem:[#allocation105_spill] sm:$0xff] %v18544_v46  ;;  %v18552_v17 = vsel %vm16180_vm12, %v5217_v47, %v5222_v50  ;;  %v5238_v51 = vshll.u32 %v21466_v18, 16  ;;  %v5241_v22 = vshrl.u32 %v21466_v18, 16  ;;  %v5803_v23 = vcombine.low %v18524_v58, %v18529_v60 }
 0x252   : > { %v5801_v28 = vrot.slane %v5787_v21, %v15974_v55  ;;  %21465 = vst [vmem:[#allocation166_spill] sm:$0xff] %v18552_v17  ;;  %v18558_v2 = vsel %vm16180_vm12, %v5225_v63, %v5230_v49  ;;  %v5804_v16 = vcombine.low %v18539_v4, %v18544_v46  ;;  %v21469_v21 = vshll.u32 %v21468_v31, 16 }
 0x253   : > { %21467 = vst [vmem:[#allocation168_spill] sm:$0xff] %v18558_v2  ;;  %v21471_v1 = vshrl.u32 %v21470_v10, 16  ;;  %v18574_v18 = vsel %vm16180_vm12, %v5233_v62, %v5238_v51  ;;  %v21473_v49 = vshll.u32 %v21470_v10, 16  ;;  %v5805_v31 = vcombine.low %v18552_v17, %v18558_v2  ;;  %v21480_v10 = vld [vmem:[#allocation121_spill] sm:$0xff]  ;;  %v21484_v17 = vld [vmem:[#allocation112_spill] sm:$0xff] }
 0x254   : > { %v5802_v47 = vcombine.low %v5794_v13, %v5801_v28  ;;  %21472 = vst [vmem:[#allocation200_spill] sm:$0xff] %v18574_v18  ;;  %v18590_v13 = vrot.slane %v5804_v16, %v15974_v55  ;;  %v21477_v28 = vld [vmem:[#allocation111_spill] sm:$0xff]  ;;  %v5271_v2 = vshll.u32 %v21480_v10, 16  ;;  %v5274_v16 = vshrl.u32 %v21480_v10, 16 }
 0x255   : > { %v18570_v50 = vsel %vm16180_vm12, %v21471_v1, %v21469_v21  ;;  %v18580_v63 = vsel %vm16180_vm12, %v5241_v22, %v21473_v49  ;;  %v18587_v1 = vrot.slane %v5803_v23, %v15974_v55  ;;  %v5258_v62 = vshrl.u32 %v21477_v28, 16  ;;  %v21479_v22 = vld [vmem:[#allocation120_spill] sm:$0xff] }
 0x256   : > { %21474 = vst [vmem:[#allocation201_spill] sm:$0xff] %v18580_v63  ;;  %v5806_v46 = vcombine.low %v18574_v18, %v18580_v63  ;;  %21476 = vst [vmem:[#allocation203_spill] sm:$0xff] %v18590_v13  ;;  %14495 = vmatprep.mubr.msk.bf16.mxu1 %vm2812_vm0, %v5802_v47  ;;  %v18595_v51 = vrot.slane %v5805_v31, %v15974_v55  ;;  %v5263_v21 = vshll.u32 %v21479_v22, 16  ;;  %v5266_v49 = vshrl.u32 %v21479_v22, 16  ;;  %v21482_v28 = vld [vmem:[#allocation124_spill] sm:$0xff] }
 0x257   : > { %21475 = vst [vmem:[#allocation202_spill] sm:$0xff] %v18587_v1  ;;  %v5835_v23 = vcombine.low %v18587_v1, %v18590_v13  ;;  %v5279_v18 = vshll.u32 %v21482_v28, 16  ;;  %v5282_v22 = vshrl.u32 %v21482_v28, 16  ;;  %v21487_v1 = vld [vmem:[#allocation123_spill] sm:$0xff] }
 0x258   : > { %21478 = vst [vmem:[#allocation111_spill] sm:$0xff] %v18595_v51  ;;  %v18601_v63 = vrot.slane %v5806_v46, %v15974_v55  ;;  %v18609_v31 = vsel %vm16180_vm12, %v5258_v62, %v5263_v21  ;;  %v18613_v47 = vsel %vm16180_vm12, %v5266_v49, %v5271_v2  ;;  %v5287_v46 = vshll.u32 %v21484_v17, 16  ;;  %v21486_v2 = vld [vmem:[#allocation122_spill] sm:$0xff] }
 0x259   : > { %21483 = vst [vmem:[#allocation124_spill] sm:$0xff] %v18609_v31  ;;  %v5843_v13 = vrot.slane %v5835_v23, %v15974_v55  ;;  %v18622_v10 = vsel %vm16180_vm12, %v5274_v16, %v5279_v18  ;;  %v5290_v62 = vshrl.u32 %v21484_v17, 16  ;;  %v5295_v49 = vshll.u32 %v21486_v2, 16 }
 0x25a   : > { %21481 = vst [vmem:[#allocation121_spill] sm:$0xff] %v18601_v63  ;;  %v5836_v60 = vcombine.low %v18595_v51, %v18601_v63  ;;  %21485 = vst [vmem:[#allocation112_spill] sm:$0xff] %v18622_v10  ;;  %v18627_v21 = vsel %vm16180_vm12, %v5282_v22, %v5287_v46  ;;  %v5298_v28 = vshrl.u32 %v21486_v2, 16  ;;  %v5303_v4 = vshll.u32 %v21487_v1, 16  ;;  %v21488_v46 = vld [vmem:[#allocation128_spill] sm:$0xff]  ;;  %v21489_v51 = vld [vmem:[#allocation127_spill] sm:$0xff] }
 0x25b   : > { %v5306_v23 = vshrl.u32 %v21487_v1, 16  ;;  %v5852_v18 = vcombine.low %v18570_v50, %v18609_v31  ;;  %v5853_v17 = vcombine.low %v18613_v47, %v18622_v10  ;;  %v18640_v22 = vsel %vm16180_vm12, %v5290_v62, %v5295_v49 }
 0x25c   : > { %v5850_v63 = vrot.slane %v5836_v60, %v15974_v55  ;;  %v18644_v16 = vsel %vm16180_vm12, %v5298_v28, %v5303_v4  ;;  %v5314_v2 = vshrl.u32 %v21488_v46, 16  ;;  %v5319_v60 = vshll.u32 %v21489_v51, 16 }
 0x25d   : > { %v21490_v1 = vshll.u32 %v21488_v46, 16  ;;  %v5854_v10 = vcombine.low %v18627_v21, %v18640_v22  ;;  %v18657_v62 = vrot.slane %v5852_v18, %v15974_v55  ;;  %v18662_v49 = vrot.slane %v5853_v17, %v15974_v55 }
 0x25e   : > { %v5851_v58 = vcombine.low %v5843_v13, %v5850_v63  ;;  %v18666_v63 = vsel %vm16180_vm12, %v5314_v2, %v5319_v60  ;;  %v5322_v13 = vshrl.u32 %v21489_v51, 16  ;;  %v21491_v28 = vcombine.low %v17931_v40, %v17947_v29  ;;  %v21494_v29 = vld [vmem:[#allocation146_spill] sm:$0xff] }
 0x25f   : > { %v18652_v31 = vsel %vm16180_vm12, %v5306_v23, %v21490_v1  ;;  %v21492_v18 = vcombine.low %v17951_v43, %v17961_v54  ;;  %v21493_v17 = vcombine.low %v17972_v53, %v18016_v39  ;;  %v18683_v2 = vrot.slane %v5854_v10, %v15974_v55 }
 0x260   : > { %v5855_v4 = vcombine.low %v18644_v16, %v18652_v31  ;;  %v6329_v23 = vrot.slane %v21491_v28, %v15974_v55  ;;  %14496 = vmatmul.mubr.msk.bf16.gmra.mrb[76].mxu1 %vm2812_vm0, %v5851_v58  ;;  %v5884_v40 = vcombine.low %v18657_v62, %v18662_v49  ;;  %v21495_v28 = vshll.u32 %v21494_v29, 16 }
 0x261   : > { %v6336_v46 = vrot.slane %v21492_v18, %v15974_v55  ;;  %v6343_v1 = vrot.slane %v21493_v17, %v15974_v55  ;;  %v6263_v54 = vcombine.low %v17823_v37, %v17835_v41  ;;  %v21496_v53 = vcombine.low %v18081_v48, %v18084_v35  ;;  %v21497_v41 = vld [vmem:[#allocation147_spill] sm:$0xff] }
 0x262   : > { %v18686_v60 = vrot.slane %v5855_v4, %v15974_v55  ;;  %v18694_v43 = vsel %vm16180_vm12, %v5322_v13, %v21495_v28  ;;  %v6264_v10 = vcombine.low %v17841_v42, %v17856_v20  ;;  %v6265_v4 = vcombine.low %v17849_v32, %v17873_v34 }
 0x263   : > { %v18702_v39 = vrot.slane %v21496_v53, %v15974_v55  ;;  %v5901_v58 = vcombine.low %v18666_v63, %v18694_v43  ;;  %v5892_v37 = vrot.slane %v5884_v40, %v15974_v55  ;;  %v6159_v18 = vshrl.u32 %v21497_v41, 16 }
 0x264   : > { %v5885_v13 = vcombine.low %v18683_v2, %v18686_v60  ;;  %v6266_v48 = vcombine.low %v17879_v26, %v17922_v5  ;;  %v6273_v17 = vrot.slane %v6263_v54, %v15974_v55  ;;  %v6280_v42 = vrot.slane %v6264_v10, %v15974_v55 }
 0x265   : > { %v18717_v35 = vrot.slane %v5901_v58, %v15974_v55  ;;  %v6287_v20 = vrot.slane %v6265_v4, %v15974_v55  ;;  %v6344_v40 = vcombine.low %v18088_v6, %v6329_v23  ;;  %v6345_v28 = vcombine.low %v6336_v46, %v6343_v1 }
 0x266   : > { %v5899_v32 = vrot.slane %v5885_v13, %v15974_v55  ;;  %v6294_v34 = vrot.slane %v6266_v48, %v15974_v55  ;;  %v6295_v26 = vcombine.low %v6273_v17, %v6280_v42  ;;  %v6361_v5 = vcombine.low %v18022_v30, %v18038_v11  ;;  %v21500_v48 = vld [vmem:[#allocation152_spill] sm:$0xff] }
 0x267   : > { %v5915_v53 = vrot.slane %v18717_v35, %v15974_v55  ;;  %v6362_v54 = vcombine.low %v18027_v52, %v18045_v7  ;;  %v6352_v4 = vrot.slane %v6344_v40, %v15974_v55  ;;  %v6359_v13 = vrot.slane %v6345_v28, %v15974_v55  ;;  %v21502_v28 = vld [vmem:[#allocation48_spill] sm:$0xff] }
 0x268   : > { %v5900_v58 = vcombine.low %v5892_v37, %v5899_v32  ;;  %v6296_v10 = vcombine.low %v6287_v20, %v6294_v34  ;;  %v6303_v41 = vrot.slane %v6295_v26, %v15974_v55  ;;  %v6363_v6 = vcombine.low %v18049_v27, %v18060_v38  ;;  %v21501_v32 = vld [vmem:[#allocation27_spill] sm:$0xff]  ;;  %v21503_v26 = vld [vmem:[#allocation50_spill] sm:$0xff] }
 0x269   : > { %v6364_v23 = vcombine.low %v18072_v57, %v18104_v45  ;;  %v6371_v46 = vrot.slane %v6361_v5, %v15974_v55  ;;  %v6360_v52 = vcombine.low %v6352_v4, %v6359_v13  ;;  %v6378_v11 = vrot.slane %v6362_v54, %v15974_v55  ;;  %v21498_v57 = vld [vmem:[#allocation24_spill] sm:$0xff]  ;;  %v21499_v45 = vld [vmem:[#allocation26_spill] sm:$0xff]  ;;  %v21506_v13 = vld [vmem:[#allocation63_spill] sm:$0xff] }
 0x26a   : > { %14499 = vmatprep.mubr.msk.bf16.mxu1 %vm2812_vm0, %v5900_v58  ;;  %v6310_v30 = vrot.slane %v6296_v10, %v15974_v55  ;;  %v6410_v7 = vcombine.low %v18108_v33, %v18121_v9  ;;  %v6385_v1 = vrot.slane %v6363_v6, %v15974_v55  ;;  %v6411_v38 = vcombine.low %v18127_v0, %v18137_v14  ;;  %v21504_v54 = vld [vmem:[#allocation62_spill] sm:$0xff]  ;;  %v21505_v58 = vld [vmem:[#allocation55_spill] sm:$0xff] }
 0x26b   : > { %14500 = vmatmul.mubr.msk.bf16.gmra.mrb[92].mxu1 %vm2812_vm0, %v5915_v53  ;;  %v6392_v27 = vrot.slane %v6364_v23, %v15974_v55  ;;  %v6412_v37 = vcombine.low %v21499_v45, %v21498_v57  ;;  %v6164_v17 = vshll.u32 %v21500_v48, 16  ;;  %v6393_v20 = vcombine.low %v6371_v46, %v6378_v11 }
 0x26c   : > { %v6311_v42 = vcombine.low %v6303_v41, %v6310_v30  ;;  %v6413_v34 = vcombine.low %v21501_v32, %v18199_v59  ;;  %v6427_v9 = vrot.slane %v6411_v38, %v15974_v55  ;;  %v6459_v53 = vcombine.low %v21502_v28, %v18223_v19  ;;  %v21507_v30 = vld [vmem:[#allocation140_spill] sm:$0xff]  ;;  %v21512_v32 = vld [vmem:[#allocation83_spill] sm:$0xff] }
 0x26d   : > { %v6394_v33 = vcombine.low %v6385_v1, %v6392_v27  ;;  %v6434_v40 = vrot.slane %v6412_v37, %v15974_v55  ;;  %v6420_v0 = vrot.slane %v6410_v7, %v15974_v55  ;;  %v6460_v5 = vcombine.low %v21503_v26, %v18211_v44  ;;  %v21508_v44 = vld [vmem:[#allocation25_spill] sm:$0xff]  ;;  %v21509_v7 = vld [vmem:[#allocation31_spill] sm:$0xff] }
 0x26e   : > { %14511 = vmatprep.mubr.msk.bf16.mxu1 %vm2812_vm0, %v6311_v42  ;;  %v6441_v14 = vrot.slane %v6413_v34, %v15974_v55  ;;  %v6461_v59 = vcombine.low %v21505_v58, %v21504_v54  ;;  %v6401_v10 = vrot.slane %v6393_v20, %v15974_v55  ;;  %v6462_v41 = vcombine.low %v21506_v13, %v18272_v24  ;;  %v15268_v24 = vld [vmem:[%s20559_s3 + $0xe8] sm:$0xff]   ;;  %v21513_v34 = vld [vmem:[#allocation72_spill] sm:$0xff]  ;;  %v21518_v58 = vld [vmem:[#allocation81_spill] sm:$0xff] }
 0x26f   : > { %v6408_v4 = vrot.slane %v6394_v33, %v15974_v55  ;;  %v6469_v19 = vrot.slane %v6459_v53, %v15974_v55  ;;  %v6442_v6 = vcombine.low %v6420_v0, %v6427_v9  ;;  %v6476_v46 = vrot.slane %v6460_v5, %v15974_v55  ;;  %v21511_v42 = vld [vmem:[#allocation67_spill] sm:$0xff]  ;;  %v21514_v53 = vld [vmem:[#allocation154_spill] sm:$0xff]  ;;  %v21515_v0 = vld [vmem:[#allocation80_spill] sm:$0xff] }
 0x270   : > { %v6443_v23 = vcombine.low %v6434_v40, %v6441_v14  ;;  %v6508_v11 = vcombine.low %v21507_v30, %v18298_v36  ;;  %v21510_v1 = vcombine.low %v21508_v44, %v21509_v7  ;;  %v6483_v38 = vrot.slane %v6461_v59, %v15974_v55  ;;  %v21519_v59 = vld [vmem:[#allocation85_spill] sm:$0xff]  ;;  %v21520_v13 = vld [vmem:[#allocation190_spill] sm:$0xff] }
 0x271   : > { %v6490_v57 = vrot.slane %v6462_v41, %v15974_v55  ;;  %v6509_v45 = vcombine.low %v18308_v56, %v18313_v3  ;;  %v18788_v36 = vsel %vm16180_vm12, %v6159_v18, %v6164_v17  ;;  %v6409_v37 = vcombine.low %v6401_v10, %v6408_v4  ;;  %v21516_v3 = vld [vmem:[#allocation186_spill] sm:$0xff]  ;;  %v21517_v18 = vld [vmem:[#allocation143_spill] sm:$0xff] }
 0x272   : > { %v18777_v27 = vrot.slane %v21510_v1, %v15974_v55  ;;  %v6510_v20 = vcombine.low %v21511_v42, %v18335_v61  ;;  %v6511_v33 = vcombine.low %v21513_v34, %v21512_v32  ;;  %v6457_v9 = vrot.slane %v6443_v23, %v15974_v55  ;;  %v15269_v4 = vld [vmem:[%s20559_s3 + $0xf0] sm:$0xff]   ;;  %v21521_v41 = vld [vmem:[#allocation86_spill] sm:$0xff] }
 0x273   : > { %14512 = vmatmul.mubr.msk.bf16.vlgmr.msra.gmra.mrb[60].mxu1 %vm2812_vm0, %v6360_v52  ;;  %v6491_v40 = vcombine.low %v6469_v19, %v6476_v46  ;;  %v6492_v28 = vcombine.low %v6483_v38, %v6490_v57  ;;  %v6557_v56 = vcombine.low %v21515_v0, %v21514_v53  ;;  %v6228_v14 = vshll.u32 %v21516_v3, 16 }
 0x274   : > { %14536 = vmatpush3.bf16.msra.mxu1 %v21517_v18  ;;  %14515 = vmatprep.mubr.msk.bf16.mxu1 %vm2812_vm0, %v6409_v37  ;;  %v6450_v61 = vrot.slane %v6442_v6, %v15974_v55  ;;  %v6518_v17 = vrot.slane %v6508_v11, %v15974_v55  ;;  %v6525_v26 = vrot.slane %v6509_v45, %v15974_v55  ;;  %v21522_v6 = vld [vmem:[#allocation191_spill] sm:$0xff]  ;;  %v21523_v45 = vld [vmem:[#allocation96_spill] sm:$0xff] }
 0x275   : > { %v6506_v52 = vrot.slane %v6492_v28, %v15974_v55  ;;  %14537 = vmatprep.subr.bf16.mxu1 %v15268_v24  ;;  %v6532_v5 = vrot.slane %v6510_v20, %v15974_v55  ;;  %v6539_v54 = vrot.slane %v6511_v33, %v15974_v55  ;;  %v6558_v10 = vcombine.low %v21519_v59, %v21518_v58  ;;  %v21524_v37 = vld [vmem:[#allocation87_spill] sm:$0xff]  ;;  %v21526_v20 = vld [vmem:[#allocation108_spill] sm:$0xff]  ;;  %v21533_v59 = vld [vmem:[#allocation182_spill] sm:$0xff] }
 0x276   : > { %v6559_v19 = vcombine.low %v21521_v41, %v21520_v13  ;;  %v6560_v23 = vcombine.low %v21522_v6, %v18439_v15  ;;  %v6567_v46 = vrot.slane %v6557_v56, %v15974_v55  ;;  %v6606_v30 = vcombine.low %v18453_v25, %v18463_v8  ;;  %v21525_v15 = vld [vmem:[#allocation110_spill] sm:$0xff]  ;;  %v21529_v56 = vld [vmem:[#allocation103_spill] sm:$0xff]  ;;  %v21535_v6 = vld [vmem:[#allocation168_spill] sm:$0xff] }
 0x277   : > { %v6458_v11 = vcombine.low %v6450_v61, %v6457_v9  ;;  %v6499_v44 = vrot.slane %v6491_v40, %v15974_v55  ;;  %v6541_v7 = vcombine.low %v6532_v5, %v6539_v54  ;;  %v6574_v1 = vrot.slane %v6558_v10, %v15974_v55  ;;  %v21527_v25 = vld [vmem:[#allocation198_spill] sm:$0xff]  ;;  %v21530_v18 = vld [vmem:[#allocation199_spill] sm:$0xff]  ;;  %v21532_v54 = vld [vmem:[#allocation105_spill] sm:$0xff] }
 0x278   : > { %14538 = vmatpush3.bf16.msra.mxu1 %v15268_v24  ;;  %v6581_v38 = vrot.slane %v6559_v19, %v15974_v55  ;;  %v6588_v57 = vrot.slane %v6560_v23, %v15974_v55  ;;  %v6607_v42 = vcombine.low %v21524_v37, %v21523_v45  ;;  %v6608_v32 = vcombine.low %v21526_v20, %v21525_v15  ;;  %v21528_v8 = vld [vmem:[#allocation102_spill] sm:$0xff]  ;;  %v15270_v24 = vld [vmem:[%s20559_s3 + $0xf8] sm:$0xff]  }
 0x279   : > { %v6507_v34 = vcombine.low %v6499_v44, %v6506_v52  ;;  %v6540_v33 = vcombine.low %v6518_v17, %v6525_v26  ;;  %14539 = vmatprep.subr.bf16.mxu1 %v15269_v4  ;;  %v6609_v9 = vcombine.low %v21528_v8, %v21527_v25  ;;  %v6616_v40 = vrot.slane %v6606_v30, %v15974_v55  ;;  %v21531_v5 = vld [vmem:[#allocation166_spill] sm:$0xff]  ;;  %v21534_v19 = vld [vmem:[#allocation200_spill] sm:$0xff]  ;;  %v21536_v30 = vld [vmem:[#allocation201_spill] sm:$0xff] }
 0x27a   : > { %v6589_v28 = vcombine.low %v6567_v46, %v6574_v1  ;;  %v6590_v53 = vcombine.low %v6581_v38, %v6588_v57  ;;  %v6623_v0 = vrot.slane %v6607_v42, %v15974_v55  ;;  %v6655_v61 = vcombine.low %v21530_v18, %v21529_v56  ;;  %v18854_v1 = vld [vmem:[%s20559_s3 + $0x40] sm:$0xff]   ;;  %v21537_v42 = vld [vmem:[#allocation124_spill] sm:$0xff] }
 0x27b   : > { %14516 = vmatmul.mubr.msk.bf16.gmra.mrb[64].mxu1 %vm2812_vm0, %v6458_v11  ;;  %v6555_v17 = vrot.slane %v6541_v7, %v15974_v55  ;;  %v6630_v26 = vrot.slane %v6608_v32, %v15974_v55  ;;  %v6637_v52 = vrot.slane %v6609_v9, %v15974_v55  ;;  %v6656_v58 = vcombine.low %v21532_v54, %v21531_v5  ;;  %v21541_v18 = vld [vmem:[#allocation148_spill] sm:$0xff] }
 0x27c   : > { %v6212_v10 = vshll.u32 %v21533_v59, 16  ;;  %14519 = vmatprep.mubr.msk.bf16.mxu1 %vm2812_vm0, %v6507_v34  ;;  %v6604_v13 = vrot.slane %v6590_v53, %v15974_v55  ;;  %v6638_v41 = vcombine.low %v6616_v40, %v6623_v0  ;;  %14540 = vmatpush3.bf16.msra.mxu1 %v15269_v4  ;;  %v6657_v23 = vcombine.low %v21535_v6, %v21534_v19  ;;  %v21540_v53 = vld [vmem:[#allocation179_spill] sm:$0xff] }
 0x27d   : > { %v6639_v46 = vcombine.low %v6630_v26, %v6637_v52  ;;  %v6658_v11 = vcombine.low %v21536_v30, %v18570_v50  ;;  %v6665_v44 = vrot.slane %v6655_v61, %v15974_v55  ;;  %v6672_v7 = vrot.slane %v6656_v58, %v15974_v55  ;;  %14541 = vmatprep.subr.bf16.mxu1 %v15270_v24  ;;  %v21542_v26 = vld [vmem:[#allocation153_spill] sm:$0xff] }
 0x27e   : > { %v6707_v4 = vcombine.low %v18652_v31, %v18666_v63  ;;  %v6548_v38 = vrot.slane %v6540_v33, %v15974_v55  ;;  %v6597_v57 = vrot.slane %v6589_v28, %v15974_v55  ;;  %v6679_v45 = vrot.slane %v6657_v23, %v15974_v55  ;;  %v21538_v31 = vld [vmem:[#allocation112_spill] sm:$0xff]  ;;  %v21539_v33 = vld [vmem:[#allocation174_spill] sm:$0xff] }
 0x27f   : > { %v6753_v50 = vcombine.low %v18694_v43, %v18788_v36  ;;  %v6686_v37 = vrot.slane %v6658_v11, %v15974_v55  ;;  %v6704_v15 = vcombine.low %v21537_v42, %v18613_v47  ;;  %v6167_v20 = vshrl.u32 %v21500_v48, 16 }
 0x280   : > { %v6556_v32 = vcombine.low %v6548_v38, %v6555_v17  ;;  %v6605_v34 = vcombine.low %v6597_v57, %v6604_v13  ;;  %v6705_v63 = vcombine.low %v21538_v31, %v18627_v21  ;;  %v6172_v25 = vshll.u32 %v21539_v33, 16  ;;  %14542 = vmatpush3.bf16.msra.mxu1 %v15270_v24 }
 0x281   : > { %v6646_v8 = vrot.slane %v6638_v41, %v15974_v55  ;;  %v6653_v9 = vrot.slane %v6639_v46, %v15974_v55  ;;  %v6687_v43 = vcombine.low %v6665_v44, %v6672_v7  ;;  %v6706_v40 = vcombine.low %v18640_v22, %v18644_v16  ;;  %14567 = vmatprep.subr.bf16.mxu1 %v18854_v1  ;;  %v21543_v41 = vld [vmem:[#allocation178_spill] sm:$0xff] }
 0x282   : > { %v6688_v47 = vcombine.low %v6679_v45, %v6686_v37  ;;  %v6175_v28 = vshrl.u32 %v21539_v33, 16  ;;  %v6180_v0 = vshll.u32 %v21540_v53, 16  ;;  %v6183_v21 = vshrl.u32 %v21540_v53, 16 }
 0x283   : > { %14520 = vmatmul.mubr.msk.bf16.gmra.mrb[68].mxu1 %vm2812_vm0, %v6556_v32  ;;  %v6714_v24 = vrot.slane %v6704_v15, %v15974_v55  ;;  %v6735_v56 = vrot.slane %v6707_v4, %v15974_v55  ;;  %v6188_v61 = vshll.u32 %v21541_v18, 16  ;;  %v6191_v17 = vshrl.u32 %v21541_v18, 16  ;;  %v21544_v32 = vld [vmem:[#allocation149_spill] sm:$0xff] }
 0x284   : > { %14523 = vmatprep.mubr.msk.bf16.mxu1 %vm2812_vm0, %v6605_v34  ;;  %v6721_v22 = vrot.slane %v6705_v63, %v15974_v55  ;;  %v18887_v16 = vsel %vm16180_vm12, %v6175_v28, %v6180_v0  ;;  %v6196_v52 = vshll.u32 %v21542_v26, 16  ;;  %v6199_v5 = vshrl.u32 %v21542_v26, 16  ;;  %v2225_v0 = vld [vmem:[#allocation2 + $0xb0] sm:$0xf] }
 0x285   : > { %v6695_v54 = vrot.slane %v6687_v43, %v15974_v55  ;;  %v18894_v58 = vsel %vm16180_vm12, %v6167_v20, %v6172_v25  ;;  %v18898_v13 = vsel %vm16180_vm12, %v6183_v21, %v6188_v61  ;;  %v6204_v19 = vshll.u32 %v21543_v41, 16  ;;  %v21547_v61 = vld [vmem:[#allocation22_spill] sm:$0xff]  ;;  %v21550_v26 = vld [vmem:[#allocation195_spill] sm:$0xff] }
 0x286   : > { %v6702_v6 = vrot.slane %v6688_v47, %v15974_v55  ;;  %v18904_v23 = vsel %vm16180_vm12, %v6191_v17, %v6196_v52  ;;  %v6207_v46 = vshrl.u32 %v21543_v41, 16  ;;  %v6754_v30 = vcombine.low %v18894_v58, %v18887_v16  ;;  %v21548_v17 = vld [vmem:[#allocation28_spill] sm:$0xff]  ;;  %v21551_v41 = vld [vmem:[#allocation202_spill] sm:$0xff] }
 0x287   : > { %v6654_v11 = vcombine.low %v6646_v8, %v6653_v9  ;;  %v6728_v44 = vrot.slane %v6706_v40, %v15974_v55  ;;  %v18912_v7 = vsel %vm16180_vm12, %v6199_v5, %v6204_v19  ;;  %v6755_v4 = vcombine.low %v18898_v13, %v18904_v23  ;;  %v21552_v19 = vld [vmem:[#allocation197_spill] sm:$0xff] }
 0x288   : > { %v6736_v38 = vcombine.low %v6714_v24, %v6721_v22  ;;  %v18918_v57 = vsel %vm16180_vm12, %v6207_v46, %v6212_v10  ;;  %v6763_v45 = vrot.slane %v6753_v50, %v15974_v55  ;;  %v6770_v37 = vrot.slane %v6754_v30, %v15974_v55  ;;  %v21549_v22 = vld [vmem:[#allocation196_spill] sm:$0xff] }
 0x289   : > { %v6737_v42 = vcombine.low %v6728_v44, %v6735_v56  ;;  %v6756_v15 = vcombine.low %v18912_v7, %v18918_v57  ;;  %v6777_v20 = vrot.slane %v6755_v4, %v15974_v55  ;;  %v6223_v34 = vshrl.u32 %v21544_v32, 16  ;;  %v21545_v56 = vld [vmem:[#allocation30_spill] sm:$0xff]  ;;  %v21554_v44 = vld [vmem:[#allocation203_spill] sm:$0xff] }
 0x28a   : > { %v6703_v31 = vcombine.low %v6695_v54, %v6702_v6  ;;  %v6785_v63 = vcombine.low %v6763_v45, %v6770_v37  ;;  %v6215_v10 = vshrl.u32 %v21533_v59, 16  ;;  %v6220_v50 = vshll.u32 %v21544_v32, 16 }
 0x28b   : > { %14524 = vmatmul.mubr.msk.bf16.gmra.mrb[72].mxu1 %vm2812_vm0, %v6654_v11  ;;  %v6784_v33 = vrot.slane %v6756_v15, %v15974_v55  ;;  %v6744_v25 = vrot.slane %v6736_v38, %v15974_v55  ;;  %v6751_v8 = vrot.slane %v6737_v42, %v15974_v55  ;;  %v18937_v43 = vsel %vm16180_vm12, %v6223_v34, %v6228_v14  ;;  %v21546_v14 = vld [vmem:[#allocation17_spill] sm:$0xff]  ;;  %v21553_v11 = vld [vmem:[#allocation111_spill] sm:$0xff] }
 0x28c   : > { %14527 = vmatprep.mubr.msk.bf16.mxu1 %vm2812_vm0, %v6703_v31  ;;  %v7197_v40 = vcombine.low %v18702_v39, %v18777_v27  ;;  %v6793_v59 = vrot.slane %v6785_v63, %v15974_v55  ;;  %v18945_v28 = vsel %vm16180_vm12, %v6215_v10, %v6220_v50  ;;  %v7164_v18 = vcombine.low %v21546_v14, %v21545_v56  ;;  %v14405_v27 = vpop.f32.mrb[80].mxu1  ;;  %v21555_v42 = vld [vmem:[#allocation121_spill] sm:$0xff]  ;;  %v21560_v56 = vld [vmem:[#allocation88_spill] sm:$0xff]  ;;  %v21561_v14 = vld [vmem:[#allocation59_spill] sm:$0xff] }
 0x28d   : > { %v6786_v9 = vcombine.low %v6777_v20, %v6784_v33  ;;  %v6802_v53 = vcombine.low %v18945_v28, %v18937_v43  ;;  %v6752_v21 = vcombine.low %v6744_v25, %v6751_v8  ;;  %v7165_v39 = vcombine.low %v21548_v17, %v21547_v61  ;;  %v18956_v54 = vpop.f32.mrb[81].mxu1  ;;  %v21556_v25 = vld [vmem:[#allocation57_spill] sm:$0xff]  ;;  %v21557_v8 = vld [vmem:[#allocation47_spill] sm:$0xff]  ;;  %v21563_v17 = vld [vmem:[#allocation90_spill] sm:$0xff] }
 0x28e   : > { %v7266_v52 = vcombine.low %v21550_v26, %v21549_v22  ;;  %v2999_v5 = vadd.f32 %v14405_v27, %v2225_v0  ;;  %v7267_v6 = vcombine.low %v21552_v19, %v21551_v41  ;;  %v14406_v30 = vpop.f32.mrb[82].mxu1  ;;  %v7283_v4 = vcombine.low %v21554_v44, %v21553_v11  ;;  %v21562_v61 = vld [vmem:[#allocation107_spill] sm:$0xff]  ;;  %v21564_v26 = vld [vmem:[#allocation58_spill] sm:$0xff]  ;;  %v21567_v19 = vld [vmem:[#allocation68_spill] sm:$0xff] }
 0x28f   : > { %v6800_v47 = vrot.slane %v6786_v9, %v15974_v55  ;;  %v6809_v46 = vrot.slane %v6802_v53, %v15974_v55  ;;  %v18964_v38 = vpop.f32.mrb[83].mxu1  ;;  %v7284_v15 = vcombine.low %v21555_v42, %v18657_v62  ;;  %v7300_v20 = vcombine.low %v18662_v49, %v18683_v2  ;;  %v21559_v53 = vld [vmem:[#allocation37_spill] sm:$0xff]  ;;  %v15272_v27 = vld [vmem:[%s20559_s3 + $0x48] sm:$0xff]   ;;  %v15273_v11 = vld [vmem:[%s20559_s3 + $0x50] sm:$0xff]  }
 0x290   : > { %3022 = vst [vmem:[#allocation2 + $0xb0] sm:$0xf] %v2999_v5  ;;  %v18967_v45 = vrot.slane %v7266_v52, %v15974_v55  ;;  %v18970_v37 = vrot.slane %v7267_v6, %v15974_v55  ;;  %v7172_v34 = vrot.slane %v7164_v18, %v15974_v55  ;;  %v7179_v31 = vrot.slane %v7165_v39, %v15974_v55  ;;  %v21565_v52 = vld [vmem:[#allocation138_spill] sm:$0xff]  ;;  %v21566_v41 = vld [vmem:[#allocation71_spill] sm:$0xff] }
 0x291   : > { %v6801_v24 = vcombine.low %v6793_v59, %v6800_v47  ;;  %v7301_v63 = vcombine.low %v18686_v60, %v18717_v35  ;;  %v18983_v10 = vrot.slane %v7283_v4, %v15974_v55  ;;  %v18986_v50 = vrot.slane %v7284_v15, %v15974_v55  ;;  %v21558_v47 = vld [vmem:[#allocation44_spill] sm:$0xff]  ;;  %v21568_v4 = vld [vmem:[#allocation42_spill] sm:$0xff] }
 0x292   : > { %v7282_v33 = vcombine.low %v18967_v45, %v18970_v37  ;;  %v18989_v62 = vrot.slane %v7300_v20, %v15974_v55  ;;  %v6816_v2 = vrot.slane %v6809_v46, %v15974_v55  ;;  %v7180_v35 = vcombine.low %v7172_v34, %v7179_v31  ;;  %v21569_v42 = vld [vmem:[#allocation118_spill] sm:$0xff]  ;;  %v21586_v37 = vld [vmem:[#allocation23_spill] sm:$0xff] }
 0x293   : > { %14528 = vmatmul.mubr.msk.bf16.gmra.mrb[76].mxu1 %vm2812_vm0, %v6752_v21  ;;  %v18992_v49 = vrot.slane %v7301_v63, %v15974_v55  ;;  %v7299_v60 = vcombine.low %v18983_v10, %v18986_v50  ;;  %v7199_v9 = vcombine.low %v21557_v8, %v21556_v25  ;;  %v7198_v0 = vcombine.low %v21559_v53, %v21558_v47  ;;  %v21571_v63 = vld [vmem:[#allocation193_spill] sm:$0xff]  ;;  %v21573_v25 = vld [vmem:[#allocation194_spill] sm:$0xff] }
 0x294   : > { %14531 = vmatprep.mubr.msk.bf16.mxu1 %vm2812_vm0, %v6801_v24  ;;  %v7216_v18 = vcombine.low %v21561_v14, %v21560_v56  ;;  %v7233_v39 = vcombine.low %v21563_v17, %v21562_v61  ;;  %v7215_v5 = vcombine.low %v21565_v52, %v21564_v26  ;;  %v7232_v6 = vcombine.low %v21567_v19, %v21566_v41  ;;  %v21574_v8 = vld [vmem:[#allocation109_spill] sm:$0xff]  ;;  %v21576_v14 = vld [vmem:[#allocation76_spill] sm:$0xff] }
 0x295   : > { %v7316_v59 = vcombine.low %v18989_v62, %v18992_v49  ;;  %v7213_v21 = vrot.slane %v7199_v9, %v15974_v55  ;;  %v7206_v24 = vrot.slane %v7198_v0, %v15974_v55  ;;  %v7113_v15 = vshll.u32 %v21569_v42, 16  ;;  %v21575_v0 = vld [vmem:[#allocation94_spill] sm:$0xff]  ;;  %v15274_v56 = vld [vmem:[%s20559_s3 + $0x58] sm:$0xff]  }
 0x296   : > { %v7230_v46 = vrot.slane %v7216_v18, %v15974_v55  ;;  %v7247_v30 = vrot.slane %v7233_v39, %v15974_v55  ;;  %v7223_v44 = vrot.slane %v7215_v5, %v15974_v55  ;;  %v7240_v20 = vrot.slane %v7232_v6, %v15974_v55  ;;  %v21577_v17 = vld [vmem:[#allocation52_spill] sm:$0xff]  ;;  %v21579_v5 = vld [vmem:[#allocation114_spill] sm:$0xff] }
 0x297   : > { %v7214_v22 = vcombine.low %v7206_v24, %v7213_v21  ;;  %v7250_v9 = vcombine.low %v21574_v8, %v21573_v25  ;;  %v7073_v21 = vshll.u32 %v21575_v0, 16  ;;  %v7076_v24 = vshrl.u32 %v21575_v0, 16  ;;  %v21582_v8 = vld [vmem:[#allocation187_spill] sm:$0xff] }
 0x298   : > { %v7231_v31 = vcombine.low %v7223_v44, %v7230_v46  ;;  %v7248_v47 = vcombine.low %v7240_v20, %v7247_v30  ;;  %v7081_v18 = vshll.u32 %v21576_v14, 16  ;;  %v7084_v61 = vshrl.u32 %v21576_v14, 16  ;;  %v19057_v30 = vld [vmem:[%s20559_s3 + $0xa0] sm:$0xff]  }
 0x299   : > { %v7089_v39 = vshll.u32 %v21577_v17, 16  ;;  %v7105_v41 = vshll.u32 %v21579_v5, 16  ;;  %v7108_v19 = vshrl.u32 %v21579_v5, 16  ;;  %v7264_v46 = vrot.slane %v7250_v9, %v15974_v55 }
 0x29a   : > { %v7051_v9 = vcombine.high %v21582_v8, %v21582_v8  ;;  %v7319_v14 = vcombine.low %v18904_v23, %v18912_v7 }
 0x29b   : > { %14532 = vmatmul.mubr.msk.bf16.gmra.mrb[96].mxu1 %vm2812_vm0, %v6816_v2  ;;  %v21572_v2 = vld [vmem:[#allocation192_spill] sm:$0xff] }
 0x29c   : > { %14543 = vmatprep.mubr.msk.bf16.mxu1 %vm2812_vm0, %v7180_v35  ;;  %v7249_v35 = vcombine.low %v21572_v2, %v21571_v63  ;;  %v21581_v63 = vld [vmem:[#allocation40_spill] sm:$0xff]  ;;  %v7341_v23 = vrot.slane %v7319_v14, %v15974_v55 }
 0x29e   : > { %v7257_v44 = vrot.slane %v7249_v35, %v15974_v55  ;;  %v7115_v35 = vsel %vm16180_vm12, %v7108_v19, %v7113_v15 }
 0x2a3   : > { %14544 = vmatmul.mubr.msk.bf16.vlgmr.msra.gmra.mrb[60].mxu1 %vm2812_vm0, %v7197_v40  ;;  %v7060_v40 = vshrl.u32 %v21568_v4, 16 }
 0x2a4   : > { %14568 = vmatpush3.bf16.msra.mxu1 %v18854_v1  ;;  %14547 = vmatprep.mubr.msk.bf16.mxu1 %vm2812_vm0, %v7214_v22  ;;  %v21570_v1 = vld [vmem:[#allocation45_spill] sm:$0xff]  ;;  %v21578_v22 = vld [vmem:[#allocation92_spill] sm:$0xff] }
 0x2a5   : > { %14569 = vmatprep.subr.bf16.mxu1 %v15272_v27  ;;  %v7065_v34 = vshll.u32 %v21570_v1, 16  ;;  %v7068_v53 = vshrl.u32 %v21570_v1, 16  ;;  %v7097_v26 = vshll.u32 %v21578_v22, 16  ;;  %v7100_v52 = vshrl.u32 %v21578_v22, 16 }
 0x2a7   : > { %v7067_v6 = vsel %vm16180_vm12, %v7060_v40, %v7065_v34  ;;  %v7075_v20 = vsel %vm16180_vm12, %v7068_v53, %v7073_v21  ;;  %v7091_v40 = vsel %vm16180_vm12, %v7084_v61, %v7089_v39  ;;  %v7107_v25 = vsel %vm16180_vm12, %v7100_v52, %v7105_v41  ;;  %v21585_v52 = vld [vmem:[#allocation136_spill] sm:$0xff] }
 0x2a8   : > { %14570 = vmatpush3.bf16.msra.mxu1 %v15272_v27  ;;  %v7092_v27 = vshrl.u32 %v21577_v17, 16  ;;  %v7318_v53 = vcombine.low %v18887_v16, %v18898_v13  ;;  %v7366_v0 = vcombine.low %v18937_v43, %v7067_v6  ;;  %v7265_v21 = vcombine.low %v7257_v44, %v7264_v46  ;;  %v21583_v16 = vld [vmem:[#allocation49_spill] sm:$0xff] }
 0x2a9   : > { %14571 = vmatprep.subr.bf16.mxu1 %v15273_v11  ;;  %v7369_v61 = vcombine.low %v7107_v25, %v7115_v35  ;;  %v21584_v13 = vld [vmem:[#allocation137_spill] sm:$0xff]  ;;  %v7116_v44 = vshrl.u32 %v21569_v42, 16  ;;  %v21590_v25 = vld [vmem:[#allocation188_spill] sm:$0xff] }
 0x2aa   : > { %v7099_v34 = vsel %vm16180_vm12, %v7092_v27, %v7097_v26  ;;  %v8642_v43 = vcombine.low %v21584_v13, %v21583_v16 }
 0x2ab   : > { %14548 = vmatmul.mubr.msk.bf16.gmra.mrb[64].mxu1 %vm2812_vm0, %v7231_v31  ;;  %v7083_v31 = vsel %vm16180_vm12, %v7076_v24, %v7081_v18  ;;  %v7317_v24 = vcombine.low %v18788_v36, %v18894_v58  ;;  %v7368_v18 = vcombine.low %v7091_v40, %v7099_v34  ;;  %v7334_v36 = vrot.slane %v7318_v53, %v15974_v55  ;;  %v21589_v34 = vld [vmem:[#allocation20_spill] sm:$0xff] }
 0x2ac   : > { %14551 = vmatprep.mubr.msk.bf16.mxu1 %vm2812_vm0, %v7248_v47  ;;  %14572 = vmatpush3.bf16.msra.mxu1 %v15273_v11  ;;  %v21580_v11 = vld [vmem:[#allocation46_spill] sm:$0xff]  ;;  %v7320_v47 = vcombine.low %v18918_v57, %v18945_v28  ;;  %v7367_v15 = vcombine.low %v7075_v20, %v7083_v31  ;;  %v19093_v28 = vrot.slane %v7051_v9, %v15974_v55  ;;  %v21588_v20 = vld [vmem:[#allocation64_spill] sm:$0xff]  ;;  %v21591_v9 = vld [vmem:[#allocation21_spill] sm:$0xff] }
 0x2ad   : > { %14573 = vmatprep.subr.bf16.mxu1 %v15274_v56  ;;  %v7779_v2 = vcombine.low %v21581_v63, %v21580_v11  ;;  %v7327_v58 = vrot.slane %v7317_v24, %v15974_v55  ;;  %v7390_v27 = vrot.slane %v7368_v18, %v15974_v55  ;;  %v7397_v26 = vrot.slane %v7369_v61, %v15974_v55 }
 0x2ae   : > { %v7348_v7 = vrot.slane %v7320_v47, %v15974_v55  ;;  %v7383_v39 = vrot.slane %v7367_v15, %v15974_v55  ;;  %v19112_v41 = vrot.slane %v8642_v43, %v15974_v55  ;;  %v7129_v19 = vshll.u32 %v19093_v28, 16  ;;  %v21592_v47 = vld [vmem:[#allocation18_spill] sm:$0xff] }
 0x2af   : > { %v19087_v57 = vrot.slane %v7779_v2, %v15974_v55  ;;  %v7349_v6 = vcombine.low %v7327_v58, %v7334_v36  ;;  %v7121_v31 = vshll.u32 %v21588_v20, 16  ;;  %v7124_v11 = vshrl.u32 %v21588_v20, 16 }
 0x2b0   : > { %14574 = vmatpush3.bf16.msra.mxu1 %v15274_v56  ;;  %v7376_v56 = vrot.slane %v7366_v0, %v15974_v55  ;;  %v7350_v46 = vcombine.low %v7341_v23, %v7348_v7  ;;  %v7399_v40 = vcombine.low %v7390_v27, %v7397_v26  ;;  %v7697_v35 = vcombine.low %v21590_v25, %v21589_v34  ;;  %v21593_v0 = vld [vmem:[#allocation117_spill] sm:$0xff]  ;;  %v21596_v27 = vld [vmem:[#allocation32_spill] sm:$0xff] }
 0x2b1   : > { %14599 = vmatprep.subr.bf16.mxu1 %v19057_v30  ;;  %v8641_v45 = vcombine.low %v19087_v57, %v21585_v52  ;;  %v7357_v42 = vrot.slane %v7349_v6, %v15974_v55  ;;  %v7696_v53 = vcombine.low %v21592_v47, %v21591_v9  ;;  %v7123_v10 = vsel %vm16180_vm12, %v7116_v44, %v7121_v31  ;;  %v21598_v31 = vld [vmem:[#allocation51_spill] sm:$0xff] }
 0x2b2   : > { %v7398_v2 = vcombine.low %v7376_v56, %v7383_v39  ;;  %v7364_v14 = vrot.slane %v7350_v46, %v15974_v55  ;;  %v7131_v50 = vsel %vm16180_vm12, %v7124_v11, %v7129_v19  ;;  %v21595_v39 = vld [vmem:[#allocation33_spill] sm:$0xff]  ;;  %v21600_v47 = vld [vmem:[#allocation135_spill] sm:$0xff] }
 0x2b3   : > { %14552 = vmatmul.mubr.msk.bf16.gmra.mrb[68].mxu1 %vm2812_vm0, %v7265_v21  ;;  %v19121_v8 = vrot.slane %v8641_v45, %v15974_v55  ;;  %v21594_v21 = vld [vmem:[#allocation19_spill] sm:$0xff]  ;;  %v7706_v18 = vrot.slane %v7696_v53, %v15974_v55  ;;  %v7415_v43 = vcombine.low %v7123_v10, %v7131_v50  ;;  %v7762_v26 = vcombine.low %v21596_v27, %v21595_v39  ;;  %v21597_v46 = vld [vmem:[#allocation129_spill] sm:$0xff] }
 0x2b4   : > { %14555 = vmatprep.mubr.msk.bf16.mxu1 %vm2812_vm0, %v7282_v33  ;;  %v21587_v33 = vld [vmem:[#allocation29_spill] sm:$0xff]  ;;  %v7698_v24 = vcombine.low %v21594_v21, %v21593_v0  ;;  %v7406_v49 = vrot.slane %v7398_v2, %v15974_v55  ;;  %v7365_v13 = vcombine.low %v7357_v42, %v7364_v14  ;;  %v7787_v53 = vcombine.low %v21600_v47, %v19087_v57  ;;  %v15276_v0 = vld [vmem:[%s20559_s3 + $0xa8] sm:$0xff]  }
 0x2b5   : > { %v7699_v5 = vcombine.low %v21587_v33, %v21586_v37  ;;  %v8657_v15 = vcombine.low %v19121_v8, %v19112_v41  ;;  %v7422_v23 = vrot.slane %v7415_v43, %v15974_v55  ;;  %v7769_v37 = vrot.slane %v7762_v26, %v15974_v55  ;;  %v3110_v33 = vld [vmem:[#allocation2 + $0xb0] sm:$0xf]  ;;  %v21599_v11 = vld [vmem:[#allocation53_spill] sm:$0xff]  ;;  %v21603_v14 = vld [vmem:[#allocation134_spill] sm:$0xff] }
 0x2b6   : > { %v7720_v61 = vrot.slane %v7698_v24, %v15974_v55  ;;  %v7796_v2 = vcombine.low %v21599_v11, %v21598_v31  ;;  %v21602_v21 = vld [vmem:[#allocation61_spill] sm:$0xff]  ;;  %v21613_v26 = vld [vmem:[#allocation144_spill] sm:$0xff]  ;;  %v21669_v41 = vld [vmem:[#allocation170_spill] sm:$0xff] }
 0x2b7   : > { %v7727_v62 = vrot.slane %v7699_v5, %v15974_v55  ;;  %v7429_v52 = vrot.slane %v7422_v23, %v15974_v55  ;;  %v7770_v44 = vcombine.low %v7769_v37, %v21597_v46  ;;  %v21604_v50 = vld [vmem:[#allocation133_spill] sm:$0xff]  ;;  %v21611_v23 = vld [vmem:[#allocation91_spill] sm:$0xff] }
 0x2b8   : > { %v19171_v9 = vrot.slane %v7796_v2, %v15974_v55  ;;  %v15278_v27 = vld [vmem:[%s20559_s3 + $0xb8] sm:$0xff]   ;;  %v15279_v11 = vld [vmem:[%s20559_s3 + $0x100] sm:$0xff]  }
 0x2b9   : > { %v7729_v58 = vcombine.low %v7720_v61, %v7727_v62  ;;  %v7777_v42 = vrot.slane %v7770_v44, %v15974_v55 }
 0x2ba   : > { %v7804_v57 = vcombine.low %v21583_v16, %v19171_v9  ;;  %v21609_v16 = vld [vmem:[#allocation139_spill] sm:$0xff] }
 0x2bb   : > { %14556 = vmatmul.mubr.msk.bf16.gmra.mrb[72].mxu1 %vm2812_vm0, %v7299_v60  ;;  %v7413_v60 = vrot.slane %v7399_v40, %v15974_v55  ;;  %v7743_v56 = vrot.slane %v7729_v58, %v15974_v55  ;;  %v7778_v10 = vcombine.low %v7777_v42, %v21603_v14  ;;  %v21620_v14 = vld [vmem:[#allocation165_spill] sm:$0xff] }
 0x2bc   : > { %14559 = vmatprep.mubr.msk.bf16.mxu1 %vm2812_vm0, %v7316_v59  ;;  %v7713_v59 = vrot.slane %v7697_v35, %v15974_v55 }
 0x2bd   : > { %v7414_v36 = vcombine.low %v7406_v49, %v7413_v60  ;;  %v21607_v49 = vld [vmem:[#allocation73_spill] sm:$0xff] }
 0x2be   : > { %v7728_v12 = vcombine.low %v7706_v18, %v7713_v59  ;;  %v21608_v60 = vld [vmem:[#allocation69_spill] sm:$0xff]  ;;  %v7794_v18 = vrot.slane %v7787_v53, %v15974_v55  ;;  %v21618_v53 = vld [vmem:[#allocation162_spill] sm:$0xff] }
 0x2bf   : > { %v14437_v5 = vpop.f32.mrb[84].mxu1  ;;  %v7830_v59 = vcombine.low %v21608_v60, %v21607_v49 }
 0x2c0   : > { %v7736_v7 = vrot.slane %v7728_v12, %v15974_v55  ;;  %v3884_v19 = vadd.f32 %v14437_v5, %v3110_v33  ;;  %v3848_v6 = vpop.f32.mrb[85].mxu1  ;;  %v21610_v12 = vld [vmem:[#allocation151_spill] sm:$0xff]  ;;  %v21615_v33 = vld [vmem:[#allocation97_spill] sm:$0xff] }
 0x2c1   : > { %v19164_v40 = vadd.f32 %v3848_v6, %v18956_v54  ;;  %v14438_v34 = vpop.f32.mrb[86].mxu1  ;;  %v21601_v54 = vld [vmem:[#allocation70_spill] sm:$0xff]  ;;  %v19200_v43 = vrot.slane %v7830_v59, %v15974_v55  ;;  %v21616_v5 = vld [vmem:[#allocation89_spill] sm:$0xff] }
 0x2c2   : > { %v7744_v45 = vcombine.low %v7736_v7, %v7743_v56  ;;  %3907 = vst [vmem:[#allocation2 + $0xb0] sm:$0xf] %v3884_v19  ;;  %v3851_v25 = vpop.f32.mrb[87].mxu1  ;;  %v7813_v24 = vcombine.low %v21602_v21, %v21601_v54  ;;  %v21612_v7 = vld [vmem:[#allocation82_spill] sm:$0xff]  ;;  %v7864_v19 = vcombine.low %v21616_v5, %v21615_v33  ;;  %v21619_v54 = vld [vmem:[#allocation160_spill] sm:$0xff]  ;;  %v21628_v5 = vld [vmem:[#allocation35_spill] sm:$0xff] }
 0x2c3   : > { %14560 = vmatmul.mubr.msk.bf16.gmra.mrb[76].mxu1 %vm2812_vm0, %v7365_v13  ;;  %v19167_v35 = vadd.f32 %v3851_v25, %v18964_v38  ;;  %v21605_v38 = vld [vmem:[#allocation131_spill] sm:$0xff]  ;;  %v7847_v56 = vcombine.low %v21612_v7, %v21611_v23 }
 0x2c4   : > { %14563 = vmatprep.mubr.msk.bf16.mxu1 %vm2812_vm0, %v7414_v36  ;;  %v21606_v62 = vcombine.low %v21604_v50, %v21605_v38  ;;  %v19193_v61 = vrot.slane %v7813_v24, %v15974_v55  ;;  %v15277_v13 = vld [vmem:[%s20559_s3 + $0xb0] sm:$0xff]   ;;  %v7795_v36 = vcombine.low %v7794_v18, %v21609_v16  ;;  %v19226_v34 = vrot.slane %v7864_v19, %v15974_v55  ;;  %v21622_v38 = vld [vmem:[#allocation126_spill] sm:$0xff] }
 0x2c5   : > { %v19219_v44 = vrot.slane %v7847_v56, %v15974_v55  ;;  %v21617_v25 = vld [vmem:[#allocation155_spill] sm:$0xff]  ;;  %v21621_v50 = vld [vmem:[#allocation120_spill] sm:$0xff]  ;;  %v21626_v56 = vld [vmem:[#allocation38_spill] sm:$0xff] }
 0x2c6   : > { %v7821_v58 = vcombine.low %v19193_v61, %v21610_v12  ;;  %v21623_v18 = vld [vmem:[#allocation167_spill] sm:$0xff]  ;;  %v21629_v19 = vld [vmem:[#allocation34_spill] sm:$0xff]  ;;  %v8727_v8 = vcombine.low %v19226_v34, %v21669_v41 }
 0x2c8   : > { %v7828_v6 = vrot.slane %v7821_v58, %v15974_v55 }
 0x2ca   : > { %v7829_v42 = vcombine.low %v21617_v25, %v7828_v6  ;;  %v8176_v6 = vcombine.low %v21629_v19, %v21628_v5  ;;  %v21631_v25 = vld [vmem:[#allocation36_spill] sm:$0xff] }
 0x2cb   : > { %14564 = vmatmul.mubr.msk.bf16.gmra.mrb[100].mxu1 %vm2812_vm0, %v7429_v52 }
 0x2cc   : > { %14575 = vmatprep.mubr.msk.bf16.mxu1 %vm2812_vm0, %v7744_v45  ;;  %v21614_v45 = vld [vmem:[#allocation158_spill] sm:$0xff] }
 0x2cd   : > { %v7838_v37 = vcombine.low %v19200_v43, %v21614_v45 }
 0x2cf   : > { %v7845_v2 = vrot.slane %v7838_v37, %v15974_v55 }
 0x2d1   : > { %v7846_v24 = vcombine.low %v21619_v54, %v7845_v2  ;;  %v21630_v2 = vld [vmem:[#allocation41_spill] sm:$0xff] }
 0x2d3   : > { %14576 = vmatmul.mubr.msk.bf16.vlgmr.msra.gmra.mrb[60].mxu1 %vm2812_vm0, %v21606_v62  ;;  %v7881_v62 = vcombine.low %v21622_v38, %v21621_v50 }
 0x2d4   : > { %14600 = vmatpush3.bf16.msra.mxu1 %v19057_v30  ;;  %14579 = vmatprep.mubr.msk.bf16.mxu1 %vm2812_vm0, %v7778_v10  ;;  %v7811_v30 = vrot.slane %v7804_v57, %v15974_v55  ;;  %v7872_v10 = vcombine.low %v21620_v14, %v19226_v34 }
 0x2d5   : > { %14601 = vmatprep.subr.bf16.mxu1 %v15276_v0  ;;  %v19241_v59 = vrot.slane %v7881_v62, %v15974_v55  ;;  %v21634_v62 = vld [vmem:[#allocation43_spill] sm:$0xff] }
 0x2d6   : > { %v7812_v52 = vcombine.low %v7811_v30, %v21613_v26  ;;  %v7879_v60 = vrot.slane %v7872_v10, %v15974_v55  ;;  %v21624_v30 = vld [vmem:[#allocation169_spill] sm:$0xff]  ;;  %v7898_v26 = vcombine.low %v21489_v51, %v21494_v29  ;;  %v21633_v51 = vld [vmem:[#allocation39_spill] sm:$0xff]  ;;  %v8184_v10 = vrot.slane %v8176_v6, %v15974_v55 }
 0x2d8   : > { %14602 = vmatpush3.bf16.msra.mxu1 %v15276_v0  ;;  %v7855_v0 = vcombine.low %v21618_v53, %v19219_v44  ;;  %v7880_v16 = vcombine.low %v21624_v30, %v7879_v60 }
 0x2d9   : > { %14603 = vmatprep.subr.bf16.mxu1 %v15277_v13 }
 0x2da   : > { %v7862_v57 = vrot.slane %v7855_v0, %v15974_v55  ;;  %v21632_v0 = vld [vmem:[#allocation180_spill] sm:$0xff] }
 0x2db   : > { %14580 = vmatmul.mubr.msk.bf16.gmra.mrb[64].mxu1 %vm2812_vm0, %v7795_v36  ;;  %v21625_v36 = vld [vmem:[#allocation175_spill] sm:$0xff] }
 0x2dc   : > { %14583 = vmatprep.mubr.msk.bf16.mxu1 %vm2812_vm0, %v7812_v52  ;;  %14604 = vmatpush3.bf16.msra.mxu1 %v15277_v13  ;;  %v7863_v13 = vcombine.low %v21623_v18, %v7862_v57  ;;  %v7889_v58 = vcombine.low %v19241_v59, %v21625_v36  ;;  %v21627_v52 = vld [vmem:[#allocation183_spill] sm:$0xff]  ;;  %v21635_v18 = vld [vmem:[#allocation56_spill] sm:$0xff] }
 0x2dd   : > { %14605 = vmatprep.subr.bf16.mxu1 %v15278_v27 }
 0x2de   : > { %v7896_v23 = vrot.slane %v7889_v58, %v15974_v55  ;;  %v3995_v58 = vld [vmem:[#allocation2 + $0xb0] sm:$0xf] }
 0x2e0   : > { %14606 = vmatpush3.bf16.msra.mxu1 %v15278_v27  ;;  %v8193_v27 = vcombine.low %v21595_v39, %v21626_v56  ;;  %v7897_v37 = vcombine.low %v7896_v23, %v21627_v52  ;;  %v19264_v39 = vrot.slane %v7898_v26, %v15974_v55  ;;  %v21637_v52 = vld [vmem:[#allocation54_spill] sm:$0xff] }
 0x2e1   : > { %14631 = vmatprep.subr.bf16.mxu1 %v15279_v11 }
 0x2e2   : > { %v8200_v54 = vrot.slane %v8193_v27, %v15974_v55  ;;  %v7912_v60 = vrot.slane %v19264_v39, %v15974_v55  ;;  %v21636_v27 = vld [vmem:[#allocation60_spill] sm:$0xff] }
 0x2e3   : > { %14584 = vmatmul.mubr.msk.bf16.gmra.mrb[68].mxu1 %vm2812_vm0, %v7829_v42  ;;  %v8177_v42 = vcombine.low %v21631_v25, %v21630_v2  ;;  %v8244_v26 = vcombine.low %v21636_v27, %v21602_v21  ;;  %v21646_v27 = vld [vmem:[#allocation104_spill] sm:$0xff] }
 0x2e4   : > { %14587 = vmatprep.mubr.msk.bf16.mxu1 %vm2812_vm0, %v7846_v24  ;;  %v8210_v24 = vcombine.low %v21633_v51, %v21581_v63  ;;  %v8201_v57 = vcombine.low %v8200_v54, %v21634_v62  ;;  %v21639_v51 = vld [vmem:[#allocation65_spill] sm:$0xff] }
 0x2e5   : > { %v8191_v50 = vrot.slane %v8177_v42, %v15974_v55  ;;  %v8251_v21 = vrot.slane %v8244_v26, %v15974_v55  ;;  %v21641_v62 = vld [vmem:[#allocation125_spill] sm:$0xff]  ;;  %v8295_v26 = vcombine.low %v21615_v33, %v21646_v27 }
 0x2e6   : > { %v8208_v19 = vrot.slane %v8201_v57, %v15974_v55 }
 0x2e7   : > { %v8192_v30 = vcombine.low %v8184_v10, %v8191_v50  ;;  %v21640_v10 = vld [vmem:[#allocation84_spill] sm:$0xff]  ;;  %v8302_v33 = vrot.slane %v8295_v26, %v15974_v55  ;;  %v21659_v26 = vld [vmem:[#allocation130_spill] sm:$0xff] }
 0x2e8   : > { %v8261_v50 = vcombine.low %v21607_v49, %v21640_v10  ;;  %v15281_v49 = vld [vmem:[%s20559_s3 + $0x110] sm:$0xff]  }
 0x2e9   : > { %v21652_v10 = vld [vmem:[#allocation95_spill] sm:$0xff] }
 0x2eb   : > { %14588 = vmatmul.mubr.msk.bf16.gmra.mrb[72].mxu1 %vm2812_vm0, %v7863_v13  ;;  %v8227_v13 = vcombine.low %v21598_v31, %v21635_v18  ;;  %v21643_v18 = vld [vmem:[#allocation75_spill] sm:$0xff] }
 0x2ec   : > { %14591 = vmatprep.mubr.msk.bf16.mxu1 %vm2812_vm0, %v7880_v16  ;;  %v8217_v16 = vrot.slane %v8210_v24, %v15974_v55 }
 0x2ed   : > { %v8234_v6 = vrot.slane %v8227_v13, %v15974_v55  ;;  %v8252_v13 = vcombine.low %v21643_v18, %v8251_v21 }
 0x2ef   : > { %v8235_v24 = vcombine.low %v21639_v51, %v8234_v6 }
 0x2f3   : > { %14592 = vmatmul.mubr.msk.bf16.gmra.mrb[76].mxu1 %vm2812_vm0, %v21632_v0  ;;  %v21638_v0 = vld [vmem:[#allocation74_spill] sm:$0xff] }
 0x2f4   : > { %14595 = vmatprep.mubr.msk.bf16.mxu1 %vm2812_vm0, %v7897_v37  ;;  %v8218_v37 = vcombine.low %v8217_v16, %v21637_v52  ;;  %v8209_v54 = vcombine.low %v8208_v19, %v21638_v0  ;;  %v8268_v16 = vrot.slane %v8261_v50, %v15974_v55  ;;  %v15282_v52 = vld [vmem:[%s20559_s3 + $0x118] sm:$0xff]   ;;  %v21648_v19 = vld [vmem:[#allocation79_spill] sm:$0xff] }
 0x2f6   : > { %v14469_v23 = vpop.f32.mrb[88].mxu1  ;;  %v8225_v42 = vrot.slane %v8218_v37, %v15974_v55  ;;  %v21647_v37 = vld [vmem:[#allocation106_spill] sm:$0xff] }
 0x2f7   : > { %v4481_v63 = vadd.f32 %v14469_v23, %v3995_v58  ;;  %v4445_v56 = vpop.f32.mrb[89].mxu1  ;;  %v8259_v58 = vrot.slane %v8252_v13, %v15974_v55 }
 0x2f8   : > { %v19282_v5 = vadd.f32 %v4445_v56, %v19164_v40  ;;  %v14470_v31 = vpop.f32.mrb[90].mxu1  ;;  %v15280_v40 = vld [vmem:[%s20559_s3 + $0x108] sm:$0xff]   ;;  %v8226_v57 = vcombine.low %v8225_v42, %v21641_v62 }
 0x2f9   : > { %4504 = vst [vmem:[#allocation2 + $0xb0] sm:$0xf] %v4481_v63  ;;  %v4448_v2 = vpop.f32.mrb[91].mxu1  ;;  %v21645_v63 = vld [vmem:[#allocation98_spill] sm:$0xff]  ;;  %v8312_v31 = vcombine.low %v21647_v37, %v21622_v38  ;;  %v8260_v6 = vcombine.low %v8259_v58, %v21648_v19  ;;  %v21650_v38 = vld [vmem:[#allocation93_spill] sm:$0xff]  ;;  %v21653_v62 = vld [vmem:[#allocation119_spill] sm:$0xff] }
 0x2fa   : > { %v19287_v25 = vadd.f32 %v4448_v2, %v19167_v35  ;;  %v21642_v35 = vld [vmem:[#allocation78_spill] sm:$0xff]  ;;  %v8269_v56 = vcombine.low %v8268_v16, %v21645_v63  ;;  %v21649_v2 = vld [vmem:[#allocation113_spill] sm:$0xff] }
 0x2fb   : > { %14596 = vmatmul.mubr.msk.bf16.gmra.mrb[104].mxu1 %vm2812_vm0, %v7912_v60  ;;  %v8278_v60 = vcombine.low %v21642_v35, %v21612_v7  ;;  %v21644_v7 = vld [vmem:[#allocation66_spill] sm:$0xff]  ;;  %v8329_v35 = vcombine.low %v21494_v29, %v21500_v48  ;;  %v8346_v48 = vcombine.low %v21544_v32, %v21516_v3  ;;  %v21660_v37 = vld [vmem:[#allocation101_spill] sm:$0xff] }
 0x2fc   : > { %14607 = vmatprep.mubr.msk.bf16.mxu1 %vm2812_vm0, %v8192_v30  ;;  %v8242_v30 = vrot.slane %v8235_v24, %v15974_v55  ;;  %v8276_v21 = vrot.slane %v8269_v56, %v15974_v55  ;;  %v21651_v24 = vld [vmem:[#allocation115_spill] sm:$0xff]  ;;  %v21658_v56 = vld [vmem:[#allocation132_spill] sm:$0xff] }
 0x2fd   : > { %v8285_v23 = vrot.slane %v8278_v60, %v15974_v55  ;;  %v8336_v13 = vrot.slane %v8329_v35, %v15974_v55  ;;  %v8624_v27 = vcombine.low %v21597_v46, %v21658_v56  ;;  %v21672_v56 = vld [vmem:[#allocation173_spill] sm:$0xff] }
 0x2fe   : > { %v8277_v51 = vcombine.low %v21650_v38, %v8276_v21  ;;  %v21662_v21 = vld [vmem:[#allocation142_spill] sm:$0xff]  ;;  %v21664_v38 = vld [vmem:[#allocation145_spill] sm:$0xff] }
 0x2ff   : > { %v8286_v42 = vcombine.low %v8285_v23, %v21649_v2  ;;  %v21656_v23 = vld [vmem:[#allocation99_spill] sm:$0xff]  ;;  %v8632_v19 = vrot.slane %v8624_v27, %v15974_v55  ;;  %v21673_v27 = vld [vmem:[#allocation176_spill] sm:$0xff] }
 0x301   : > { %v8293_v0 = vrot.slane %v8286_v42, %v15974_v55  ;;  %v21661_v42 = vld [vmem:[#allocation150_spill] sm:$0xff] }
 0x302   : > { %v8659_v46 = vcombine.low %v21662_v21, %v21661_v42  ;;  %v21675_v42 = vld [vmem:[#allocation171_spill] sm:$0xff]  ;;  %v21676_v21 = vld [vmem:[#allocation172_spill] sm:$0xff] }
 0x303   : > { %14608 = vmatmul.mubr.msk.bf16.vlgmr.msra.gmra.mrb[60].mxu1 %vm2812_vm0, %v8209_v54  ;;  %v8319_v54 = vrot.slane %v8312_v31, %v15974_v55  ;;  %v8294_v50 = vcombine.low %v21652_v10, %v8293_v0  ;;  %v8353_v31 = vrot.slane %v8346_v48, %v15974_v55 }
 0x304   : > { %14632 = vmatpush3.bf16.msra.mxu1 %v15279_v11  ;;  %14611 = vmatprep.mubr.msk.bf16.mxu1 %vm2812_vm0, %v8226_v57  ;;  %v8243_v11 = vcombine.low %v8242_v30, %v21644_v7  ;;  %v21654_v30 = vld [vmem:[#allocation100_spill] sm:$0xff]  ;;  %v8337_v7 = vcombine.low %v8336_v13, %v21656_v23  ;;  %v8673_v0 = vrot.slane %v8659_v46, %v15974_v55 }
 0x305   : > { %14633 = vmatprep.subr.bf16.mxu1 %v15280_v40  ;;  %v8320_v57 = vcombine.low %v21653_v62, %v8319_v54  ;;  %v8360_v32 = vrot.slane %v8353_v31, %v15974_v55  ;;  %v8741_v23 = vrot.slane %v8727_v8, %v15974_v55  ;;  %v8743_v46 = vcombine.low %v21676_v21, %v21675_v42  ;;  %v15309_v42 = vld [vmem:[#allocation4 + $0x184] ss:$8 sps:$4 sm:$0xff]  }
 0x306   : > { %v8344_v29 = vrot.slane %v8337_v7, %v15974_v55  ;;  %v5352_v7 = vld [vmem:[#allocation2 + $0xb0] sm:$0xf] }
 0x307   : > { %v8327_v18 = vrot.slane %v8320_v57, %v15974_v55 }
 0x308   : > { %14634 = vmatpush3.bf16.msra.mxu1 %v15280_v40  ;;  %v8303_v40 = vcombine.low %v21651_v24, %v8302_v33  ;;  %v21665_v24 = vld [vmem:[#allocation156_spill] sm:$0xff] }
 0x309   : > { %14635 = vmatprep.subr.bf16.mxu1 %v15281_v49 }
 0x30a   : > { %v8310_v60 = vrot.slane %v8303_v40, %v15974_v55  ;;  %v8676_v40 = vcombine.low %v21610_v12, %v21665_v24  ;;  %v21680_v24 = vld [vmem:[#allocation185_spill] sm:$0xff] }
 0x30b   : > { %14612 = vmatmul.mubr.msk.bf16.gmra.mrb[64].mxu1 %vm2812_vm0, %v8243_v11  ;;  %v21657_v11 = vld [vmem:[#allocation189_spill] sm:$0xff] }
 0x30c   : > { %14615 = vmatprep.mubr.msk.bf16.mxu1 %vm2812_vm0, %v8260_v6  ;;  %14636 = vmatpush3.bf16.msra.mxu1 %v15281_v49  ;;  %v8311_v16 = vcombine.low %v21654_v30, %v8310_v60  ;;  %v21655_v49 = vld [vmem:[#allocation116_spill] sm:$0xff]  ;;  %v8345_v63 = vcombine.low %v8344_v29, %v21657_v11 }
 0x30d   : > { %14637 = vmatprep.subr.bf16.mxu1 %v15282_v52  ;;  %v8328_v58 = vcombine.low %v21655_v49, %v8327_v18 }
 0x310   : > { %14638 = vmatpush3.bf16.msra.mxu1 %v15282_v52  ;;  %v8625_v52 = vcombine.low %v21659_v26, %v21600_v47  ;;  %v21663_v47 = vld [vmem:[#allocation141_spill] sm:$0xff]  ;;  %v8760_v26 = vcombine.low %v21625_v36, %v21673_v27  ;;  %v13908_v36 = vcombine.high %v21577_v17, %v21578_v22 }
 0x311   : > { %v8658_v33 = vcombine.low %v19171_v9, %v21663_v47  ;;  %v21667_v9 = vld [vmem:[#allocation157_spill] sm:$0xff] }
 0x312   : > { %v8639_v6 = vrot.slane %v8625_v52, %v15974_v55  ;;  %v8692_v57 = vcombine.low %v21667_v9, %v19200_v43  ;;  %v21670_v43 = vld [vmem:[#allocation159_spill] sm:$0xff] }
 0x313   : > { %14616 = vmatmul.mubr.msk.bf16.gmra.mrb[68].mxu1 %vm2812_vm0, %v8277_v51  ;;  %v8666_v54 = vrot.slane %v8658_v33, %v15974_v55  ;;  %v8675_v51 = vcombine.low %v21664_v38, %v19193_v61  ;;  %v8690_v61 = vrot.slane %v8676_v40, %v15974_v55  ;;  %v8709_v30 = vcombine.low %v21670_v43, %v21618_v53 }
 0x314   : > { %14619 = vmatprep.mubr.msk.bf16.mxu1 %vm2812_vm0, %v8294_v50  ;;  %v8640_v2 = vcombine.low %v8632_v19, %v8639_v6  ;;  %v21666_v50 = vld [vmem:[#allocation161_spill] sm:$0xff]  ;;  %v8700_v60 = vrot.slane %v8692_v57, %v15974_v55 }
 0x315   : > { %v8674_v10 = vcombine.low %v8666_v54, %v8673_v0  ;;  %v8693_v62 = vcombine.low %v21614_v45, %v21666_v50  ;;  %v8683_v35 = vrot.slane %v8675_v51, %v15974_v55  ;;  %v21668_v45 = vld [vmem:[#allocation163_spill] sm:$0xff]  ;;  %v8717_v34 = vrot.slane %v8709_v30, %v15974_v55  ;;  %v21674_v19 = vld [vmem:[#allocation177_spill] sm:$0xff]  ;;  %v21677_v0 = vld [vmem:[#allocation184_spill] sm:$0xff] }
 0x316   : > { %v8710_v13 = vcombine.low %v19219_v44, %v21668_v45  ;;  %v8761_v6 = vcombine.low %v21674_v19, %v19264_v39  ;;  %v8768_v39 = vrot.slane %v8760_v26, %v15974_v55  ;;  %v21678_v54 = vld [vmem:[#allocation181_spill] sm:$0xff] }
 0x317   : > { %v8707_v12 = vrot.slane %v8693_v62, %v15974_v55  ;;  %v8691_v18 = vcombine.low %v8683_v35, %v8690_v61  ;;  %v8777_v38 = vcombine.low %v21678_v54, %v21677_v0  ;;  %v21679_v51 = vld [vmem:[#allocation77_spill] sm:$0xff] }
 0x318   : > { %v8778_v40 = vcombine.low %v21680_v24, %v21679_v51 }
 0x319   : > { %v8785_v9 = vrot.slane %v8777_v38, %v15974_v55 }
 0x31a   : > { %v8792_v57 = vrot.slane %v8778_v40, %v15974_v55 }
 0x31b   : > { %14620 = vmatmul.mubr.msk.bf16.gmra.mrb[72].mxu1 %vm2812_vm0, %v8311_v16  ;;  %v21671_v16 = vld [vmem:[#allocation164_spill] sm:$0xff] }
 0x31c   : > { %14623 = vmatprep.mubr.msk.bf16.mxu1 %vm2812_vm0, %v8328_v58  ;;  %v8726_v49 = vcombine.low %v21671_v16, %v21620_v14  ;;  %v8724_v58 = vrot.slane %v8710_v13, %v15974_v55  ;;  %v8744_v14 = vcombine.low %v21672_v56, %v19241_v59  ;;  %v8796_v59 = vcombine.low %v21577_v17, %v21578_v22  ;;  %v15300_v56 = vld [vmem:[#allocation4 + $0x50] ss:$8 sps:$4 sm:$0xff]  }
 0x31d   : > { %v8825_v17 = vrot.slane %v13908_v36, %v15974_v55  ;;  %v8751_v22 = vrot.slane %v8743_v46, %v15974_v55  ;;  %v20969_v36 = vmov 0  }
 0x31e   : > { %v8734_v11 = vrot.slane %v8726_v49, %v15974_v55  ;;  %v8818_v47 = vrot.slane %v8796_v59, %v15974_v55  ;;  %v15306_v59 = vld [vmem:[#allocation4 + $0x70] ss:$8 sps:$4 sm:$0xff]   ;;  %10365 = vmatprep.mubr.bf16.mxu0 %v20969_v36 }
 0x320   : > { %v8742_v31 = vcombine.low %v8734_v11, %v8741_v23  ;;  %v8827_v62 = vcombine.low %v8818_v47, %v8825_v17  ;;  %v15286_v23 = vld [vmem:[#allocation4 + $0x14] ss:$8 sps:$4 sm:$0xff]   ;;  %v15295_v11 = vld [vmem:[#allocation4 + $0x44] ss:$8 sps:$4 sm:$0xff]  }
 0x322   : > { %v8841_v61 = vrot.slane %v8827_v62, %v15974_v55 }
 0x323   : > { %14624 = vmatmul.mubr.msk.bf16.gmra.mrb[76].mxu1 %vm2812_vm0, %v21660_v37  ;;  %v8725_v37 = vcombine.low %v8717_v34, %v8724_v58  ;;  %v15285_v58 = vld [vmem:[#allocation4] ss:$8 sps:$4 sm:$0xff]   ;;  %v15294_v34 = vld [vmem:[#allocation4 + $0x30] ss:$8 sps:$4 sm:$0xff]  }
 0x324   : > { %14627 = vmatprep.mubr.msk.bf16.mxu1 %vm2812_vm0, %v8345_v63 }
 0x32b   : > { %14628 = vmatmul.mubr.msk.bf16.gmra.mrb[108].mxu1 %vm2812_vm0, %v8360_v32  ;;  %v8794_v32 = vcombine.low %v21516_v3, %v21570_v1  ;;  %v8758_v3 = vrot.slane %v8744_v14, %v15974_v55  ;;  %v15301_v14 = vld [vmem:[#allocation4 + $0x64] ss:$8 sps:$4 sm:$0xff]  }
 0x32c   : > { %14639 = vmatprep.mubr.msk.bf16.mxu1 %vm2812_vm0, %v8640_v2 }
 0x32d   : > { %v8759_v33 = vcombine.low %v8751_v22, %v8758_v3 }
 0x333   : > { %14640 = vmatmul.mubr.msk.bf16.vlgmr.msra.gmra.mrb[60].mxu1 %vm2812_vm0, %v8657_v15  ;;  %v8708_v15 = vcombine.low %v8700_v60, %v8707_v12  ;;  %v8793_v12 = vcombine.low %v8785_v9, %v8792_v57  ;;  %v8843_v60 = vcombine.low %v21588_v20, %v19093_v28  ;;  %v15283_v20 = vld [vmem:[#allocation4 + $0x4] ss:$8 sps:$4 sm:$0xff]  }
 0x334   : > { %14643 = vmatprep.mubr.msk.bf16.mxu1 %vm2812_vm0, %v8674_v10  ;;  %10333 = vmatprep.subr.bf16.mxu0 %v15283_v20 }
 0x335   : > { %v8850_v45 = vrot.slane %v8843_v60, %v15974_v55  ;;  %14663 = vmatprep.subr.bf16.mxu1 %v15283_v20  ;;  %10334 = vmatpush1.bf16.msra.mxu0 %v15285_v58 }
 0x336   : > { %14671 = vmatpush1.bf16.msra.mxu1 %v15285_v58  ;;  %10335 = vmatprep.subr.bf16.mxu0 %v15286_v23 }
 0x337   : > { %v8857_v13 = vrot.slane %v8850_v45, %v15974_v55  ;;  %14664 = vmatprep.subr.bf16.mxu1 %v15286_v23 }
 0x33b   : > { %14644 = vmatmul.mubr.msk.bf16.gmra.mrb[64].mxu1 %vm2812_vm0, %v8691_v18 }
 0x33c   : > { %14647 = vmatprep.mubr.msk.bf16.mxu1 %vm2812_vm0, %v8708_v15 }
 0x33e   : > { %v14501_v44 = vpop.f32.mrb[92].mxu1 }
 0x33f   : > { %v6126_v29 = vadd.f32 %v14501_v44, %v5352_v7  ;;  %v6090_v48 = vpop.f32.mrb[93].mxu1  ;;  %v15288_v7 = vld [vmem:[#allocation4 + $0x10] ss:$8 sps:$4 sm:$0xff]   ;;  %v15289_v44 = vld [vmem:[#allocation4 + $0x24] ss:$8 sps:$4 sm:$0xff]  }
 0x340   : > { %v6124_v63 = vadd.f32 %v6090_v48, %v19282_v5  ;;  %v14502_v53 = vpop.f32.mrb[94].mxu1  ;;  %v13907_v5 = vcombine.high %v21568_v4, %v21570_v1  ;;  %v8804_v4 = vrot.slane %v8794_v32, %v15974_v55  ;;  %10336 = vmatpush1.bf16.msra.mxu0 %v15288_v7  ;;  %14672 = vmatpush1.bf16.msra.mxu1 %v15288_v7  ;;  %v15292_v48 = vld [vmem:[#allocation4 + $0x34] ss:$8 sps:$4 sm:$0xff]   ;;  %v15303_v32 = vld [vmem:[#allocation4 + $0x60] ss:$8 sps:$4 sm:$0xff]  }
 0x341   : > { %6149 = vst [vmem:[#allocation2 + $0xb0] sm:$0xf] %v6126_v29  ;;  %v6093_v52 = vpop.f32.mrb[95].mxu1  ;;  %10337 = vmatprep.subr.bf16.mxu0 %v15289_v44  ;;  %14665 = vmatprep.subr.bf16.mxu1 %v15289_v44  ;;  %v15291_v29 = vld [vmem:[#allocation4 + $0x20] ss:$8 sps:$4 sm:$0xff]  }
 0x342   : > { %v6125_v2 = vadd.f32 %v6093_v52, %v19287_v25  ;;  %v8775_v25 = vrot.slane %v8761_v6, %v15974_v55  ;;  %v8811_v1 = vrot.slane %v13907_v5, %v15974_v55  ;;  %v15298_v53 = vld [vmem:[#allocation4 + $0x54] ss:$8 sps:$4 sm:$0xff]  }
 0x343   : > { %14648 = vmatmul.mubr.msk.bf16.gmra.mrb[68].mxu1 %vm2812_vm0, %v8725_v37  ;;  %v15304_v5 = vld [vmem:[#allocation4 + $0x74] ss:$8 sps:$4 sm:$0xff]  }
 0x344   : > { %14651 = vmatprep.mubr.msk.bf16.mxu1 %vm2812_vm0, %v8742_v31  ;;  %v8776_v10 = vcombine.low %v8768_v39, %v8775_v25  ;;  %v8826_v50 = vcombine.low %v8804_v4, %v8811_v1  ;;  %10338 = vmatpush1.bf16.msra.mxu0 %v15291_v29 }
 0x345   : > { %14673 = vmatpush1.bf16.msra.mxu1 %v15291_v29  ;;  %10339 = vmatprep.subr.bf16.mxu0 %v15292_v48 }
 0x346   : > { %v8834_v35 = vrot.slane %v8826_v50, %v15974_v55  ;;  %14666 = vmatprep.subr.bf16.mxu1 %v15292_v48 }
 0x348   : > { %v8842_v18 = vcombine.low %v8834_v35, %v8841_v61  ;;  %v6253_v41 = vld [vmem:[#allocation2 + $0xb0] sm:$0xf]  ;;  %10340 = vmatpush1.bf16.msra.mxu0 %v15294_v34  ;;  %v19457_v35 = vstv %s13926_s21  ;;  %v21681_v61 = vld [vmem:[#allocation13_spill] sm:$0xff]  ;;  %s13400_s21 = sadd.s32 %s14148_s16, %s14147_s15 }
 0x349   : > { %14674 = vmatpush1.bf16.msra.mxu1 %v15294_v34  ;;  %10341 = vmatprep.subr.bf16.mxu0 %v15295_v11  ;;  %vm9587_vm9 = vcmp.ge.s32.totalorder %v19457_v35, 0  ;;  %v19479_v23 = vadd.s32 5, %v19457_v35  ;;  %s14149_s17 = sshll.u32 %s13400_s21, 4 }
 0x34a   : > { %14667 = vmatprep.subr.bf16.mxu1 %v15295_v11  ;;  %s20503_s30 = scalar_lea.hbm %s20564_s8, %s14149_s17 }
 0x34b   : > { %14652 = vmatmul.mubr.msk.bf16.gmra.mrb[72].mxu1 %vm2812_vm0, %v8759_v33  ;;  %vm9592_vm14 = vcmp.ge.s32.totalorder %v19479_v23, 0  ;;  %vm9602_vm15 = vcmp.lt.s32.totalorder %v19479_v23, 16 }
 0x34c   : > { %14655 = vmatprep.mubr.msk.bf16.mxu1 %vm2812_vm0, %v8776_v10  ;;  %v19452_v10 = vld [vmem:[%s20560_s4] ss:$0 sm:$0xff] }
 0x353   : > { %14656 = vmatmul.mubr.msk.bf16.gmra.mrb[76].mxu1 %vm2812_vm0, %v8793_v12  ;;  %v19460_v12 = vadd.s32 4294967295, %v21681_v61 }
 0x354   : > { %14659 = vmatprep.mubr.msk.bf16.mxu1 %vm2812_vm0, %v8842_v18  ;;  %v9575_v18 = vadd.s32 1, %v19457_v35 }
 0x355   : > { %vm20973_vm12 = vcmp.ge.s32.totalorder %v19460_v12, 0 }
 0x356   : > { %vm9588_vm2 = vcmp.ge.s32.totalorder %v9575_v18, 0  ;;  %vm9598_vm3 = vcmp.lt.s32.totalorder %v9575_v18, 16 }
 0x357   : > { %vm19528_vm6 = vmand %vm9588_vm2, %vm9598_vm3 }
 0x358   : > { %vm19555_vm13 = vmand %vm19528_vm6, %vm20973_vm12 }
 0x359   : > { %vm20971_vm1 = vmpackc.low %vm19528_vm6, %vm19555_vm13 }
 0x35b   : > { %14660 = vmatmul.mubr.msk.bf16.gmra.mrb[112].mxu1 %vm2812_vm0, %v8857_v13  ;;  %vm9597_vm0 = vcmp.lt.s32.totalorder %v19457_v35, 16 }
 0x35c   : > { %10415 = vmatprep.mubr.bf16.mxu1 %v20969_v36  ;;  %vm19506_vm4 = vmand %vm9587_vm9, %vm9597_vm0 }
 0x35d   : > { %vm19518_vm5 = vmand %vm19506_vm4, %vm20973_vm12 }
 0x35e   : > { %vm13946_vm11 = vmpackc.low %vm19506_vm4, %vm19518_vm5 }
 0x36e   : > { %v14533_v8 = vpop.f32.mrb[96].mxu1 }
 0x36f   : > { %v7027_v15 = vadd.f32 %v14533_v8, %v6253_v41  ;;  %v6991_v43 = vpop.f32.mrb[97].mxu1 }
 0x370   : > { %v7025_v30 = vadd.f32 %v6991_v43, %v6124_v63  ;;  %v14534_v16 = vpop.f32.mrb[98].mxu1  ;;  %v15297_v63 = vld [vmem:[#allocation4 + $0x40] ss:$8 sps:$4 sm:$0xff]  }
 0x371   : > { %7050 = vst [vmem:[#allocation2 + $0xb0] sm:$0xf] %v7027_v15  ;;  %v6994_v49 = vpop.f32.mrb[99].mxu1  ;;  %10342 = vmatpush1.bf16.msra.mxu0 %v15297_v63  ;;  %14675 = vmatpush1.bf16.msra.mxu1 %v15297_v63  ;;  %v21682_v15 = vld [vmem:[#allocation14_spill] sm:$0xff]  ;;  %v19473_v16 = vadd.s32 2, %v19457_v35 }
 0x372   : > { %v7026_v28 = vadd.f32 %v6994_v49, %v6125_v2  ;;  %10343 = vmatprep.subr.bf16.mxu0 %v15298_v53  ;;  %14668 = vmatprep.subr.bf16.mxu1 %v15298_v53 }
 0x373   : > { %vm9589_vm8 = vcmp.ge.s32.totalorder %v19473_v16, 0  ;;  %vm9599_vm10 = vcmp.lt.s32.totalorder %v19473_v16, 16  ;;  %v15324_v16 = vld [vmem:[#allocation4 + $0x1d4] ss:$8 sps:$4 sm:$0xff]  }
 0x374   : > { %vm19610_vm7 = vmand %vm9589_vm8, %vm9599_vm10 }
 0x375   : > { %10344 = vmatpush1.bf16.msra.mxu0 %v15300_v56  ;;  %14676 = vmatpush1.bf16.msra.mxu1 %v15300_v56  ;;  %vm19630_vm9 = vmand %vm19610_vm7, %vm20973_vm12 }
 0x376   : > { %10345 = vmatprep.subr.bf16.mxu0 %v15301_v14  ;;  %14669 = vmatprep.subr.bf16.mxu1 %v15301_v14  ;;  %vm19662_vm3 = vmpackc.low %vm19610_vm7, %vm19630_vm9 }
 0x378   : > { %v7154_v27 = vld [vmem:[#allocation2 + $0xb0] sm:$0xf] }
 0x379   : > { %10346 = vmatpush1.bf16.msra.mxu0 %v15303_v32  ;;  %14677 = vmatpush1.bf16.msra.mxu1 %v15303_v32 }
 0x37a   : > { %10347 = vmatprep.subr.bf16.mxu0 %v15304_v5  ;;  %14670 = vmatprep.subr.bf16.mxu1 %v15304_v5 }
 0x37d   : > { %10348 = vmatpush1.bf16.msra.mxu0 %v15306_v59  ;;  %14678 = vmatpush1.bf16.msra.mxu1 %v15306_v59 }
 0x37e   : > { %10639 = vmatprep.subr.bf16.mxu0 %v15309_v42 }
 0x39e   : > { %v14565_v26 = vpop.f32.mrb[100].mxu1 }
 0x39f   : > { %v7640_v52 = vadd.f32 %v14565_v26, %v7154_v27  ;;  %v7604_v37 = vpop.f32.mrb[101].mxu1  ;;  %v19489_v26 = vadd.s32 3, %v19457_v35 }
 0x3a0   : > { %v7638_v31 = vadd.f32 %v7604_v37, %v7025_v30  ;;  %v14566_v19 = vpop.f32.mrb[102].mxu1 }
 0x3a1   : > { %7663 = vst [vmem:[#allocation2 + $0xb0] sm:$0xf] %v7640_v52  ;;  %v7607_v6 = vpop.f32.mrb[103].mxu1  ;;  %vm9590_vm0 = vcmp.ge.s32.totalorder %v19489_v26, 0  ;;  %vm9600_vm2 = vcmp.lt.s32.totalorder %v19489_v26, 16 }
 0x3a2   : > { %v7639_v2 = vadd.f32 %v7607_v6, %v7026_v28 }
 0x3a8   : > { %v7686_v21 = vld [vmem:[#allocation2 + $0xb0] sm:$0xf] }
 0x3ce   : > { %v14597_v46 = vpop.f32.mrb[104].mxu1 }
 0x3cf   : > { %v8120_v3 = vadd.f32 %v14597_v46, %v7686_v21  ;;  %v8084_v39 = vpop.f32.mrb[105].mxu1 }
 0x3d0   : > { %v8118_v25 = vadd.f32 %v8084_v39, %v7638_v31  ;;  %v14598_v4 = vpop.f32.mrb[106].mxu1 }
 0x3d1   : > { %8143 = vst [vmem:[#allocation2 + $0xb0] sm:$0xf] %v8120_v3  ;;  %v8087_v1 = vpop.f32.mrb[107].mxu1 }
 0x3d2   : > { %v8119_v47 = vadd.f32 %v8087_v1, %v7639_v2 }
 0x3d8   : > { %v8166_v17 = vld [vmem:[#allocation2 + $0xb0] sm:$0xf] }
 0x3fe   : > { %v14629_v22 = vpop.f32.mrb[108].mxu1 }
 0x3ff   : > { %v8568_v33 = vadd.f32 %v14629_v22, %v8166_v17  ;;  %v8532_v0 = vpop.f32.mrb[109].mxu1 }
 0x400   : > { %v19445_v54 = vadd.f32 %v8532_v0, %v8118_v25  ;;  %v14630_v38 = vpop.f32.mrb[110].mxu1 }
 0x401   : > { %8591 = vst [vmem:[#allocation2 + $0xb0] sm:$0xf] %v8568_v33  ;;  %v8535_v51 = vpop.f32.mrb[111].mxu1 }
 0x402   : > { %v19447_v24 = vadd.f32 %v8535_v51, %v8119_v47 }
 0x406   : > { %v14641_v40 = vpop.f32.mrb[60].mxu1 }
 0x407   : > { %v8952_v50 = vpop.f32.mrb[61].mxu1  ;;  %v9124_v57 = vadd.f32 %v14641_v40, %v19452_v10 }
 0x408   : > { %v14642_v62 = vpop.f32.mrb[62].mxu1  ;;  %v9122_v60 = vadd.f32 %v19452_v10, %v8952_v50 }
 0x409   : > { %v8955_v9 = vpop.f32.mrb[63].mxu1  ;;  %v9147_v45 = vmax.f32 %v9124_v57, 0.0  ;;  %v9125_v13 = vadd.f32 %v14642_v62, %v19452_v10 }
 0x40a   : > { %v9123_v41 = vadd.f32 %v19452_v10, %v8955_v9  ;;  %v9145_v8 = vmax.f32 %v9122_v60, 0.0 }
 0x40b   : > { %v19469_v43 = vrot.slane %v9147_v45, %v21682_v15  ;;  %v9225_v30 = vcombine.high %v9147_v45, %v9147_v45  ;;  %v9148_v44 = vmax.f32 %v9125_v13, 0.0  ;;  %v15384_v13 = vld [vmem:[#allocation4 + $0x214] ss:$8 sps:$4 sm:$0xff]  }
 0x40c   : > { %v9146_v28 = vmax.f32 %v9123_v41, 0.0  ;;  %v9191_v20 = vcombine.high %v9145_v8, %v9145_v8  ;;  %v9198_v58 = vrot.slane %v9145_v8, %v21682_v15 }
 0x40d   : > { %v9239_v29 = vrot.slane %v9225_v30, %v21682_v15  ;;  %v9240_v48 = vcombine.high %v19469_v43, %v19469_v43  ;;  %v9242_v32 = vcombine.high %v9148_v44, %v9148_v44  ;;  %v9249_v2 = vrot.slane %v9148_v44, %v21682_v15 }
 0x40e   : > { %v19475_v49 = vpop.f32.mrb[64].mxu1  ;;  %v9205_v11 = vrot.slane %v9191_v20, %v21682_v15  ;;  %v9206_v63 = vcombine.high %v9198_v58, %v9198_v58  ;;  %v9208_v53 = vcombine.high %v9146_v28, %v9146_v28  ;;  %v9215_v14 = vrot.slane %v9146_v28, %v21682_v15 }
 0x40f   : > { %v8968_v7 = vpop.f32.mrb[65].mxu1  ;;  %v9241_v27 = vcombine.high %v9239_v29, %v9239_v29  ;;  %v9724_v21 = vcombine.low %v9240_v48, %v9239_v29  ;;  %v9256_v39 = vrot.slane %v9242_v32, %v21682_v15  ;;  %v9257_v25 = vcombine.high %v9249_v2, %v9249_v2 }
 0x410   : > { %v19484_v34 = vpop.f32.mrb[66].mxu1  ;;  %v9207_v52 = vcombine.high %v9205_v11, %v9205_v11  ;;  %v9222_v37 = vrot.slane %v9208_v53, %v21682_v15  ;;  %v9683_v31 = vcombine.low %v9198_v58, %v9206_v63  ;;  %v9223_v19 = vcombine.high %v9215_v14, %v9215_v14 }
 0x411   : > { %v8971_v56 = vpop.f32.mrb[67].mxu1  ;;  %v9126_v6 = vadd.f32 %v19452_v10, %v8968_v7  ;;  %v9725_v17 = vcombine.low %v9241_v27, %v9249_v2  ;;  %v9732_v22 = vrot.slane %v9724_v21, %v21682_v15  ;;  %v9258_v51 = vcombine.high %v9256_v39, %v9256_v39  ;;  %v15307_v7 = vld [vmem:[#allocation4 + $0x180] ss:$8 sps:$4 sm:$0xff]  }
 0x412   : > { %v9224_v5 = vcombine.high %v9222_v37, %v9222_v37  ;;  %v9684_v59 = vcombine.low %v9205_v11, %v9207_v52  ;;  %v9691_v42 = vrot.slane %v9683_v31, %v21682_v15  ;;  %v9700_v46 = vcombine.low %v9215_v14, %v9223_v19  ;;  %v15334_v14 = vld [vmem:[#allocation4 + $0x310] ss:$8 sps:$4 sm:$0xff]  }
 0x413   : > { %v9149_v3 = vmax.f32 %v9126_v6, 0.0  ;;  %v9739_v60 = vrot.slane %v9725_v17, %v21682_v15  ;;  %v9741_v41 = vcombine.low %v9257_v25, %v9256_v39  ;;  %v9127_v30 = vadd.f32 %v19452_v10, %v8971_v56  ;;  %v15312_v56 = vld [vmem:[#allocation4 + $0x194] ss:$8 sps:$4 sm:$0xff]  }
 0x414   : > { %v9698_v1 = vrot.slane %v9684_v59, %v21682_v15  ;;  %v9701_v47 = vcombine.low %v9222_v37, %v9224_v5  ;;  %v9708_v38 = vrot.slane %v9700_v46, %v21682_v15  ;;  %v19537_v58 = vadd.s32 6, %v19457_v35 }
 0x415   : > { %v19512_v40 = vrot.slane %v9149_v3, %v21682_v15  ;;  %v9740_v20 = vcombine.low %v9732_v22, %v9739_v60  ;;  %v9749_v18 = vrot.slane %v9741_v41, %v21682_v15  ;;  %v9128_v29 = vadd.f32 %v19475_v49, %v19452_v10  ;;  %v15313_v60 = vld [vmem:[#allocation4 + $0x1a0] ss:$8 sps:$4 sm:$0xff]  }
 0x416   : > { %v19496_v4 = vpop.f32.mrb[68].mxu1  ;;  %v9699_v9 = vcombine.low %v9691_v42, %v9698_v1  ;;  %v9715_v57 = vrot.slane %v9701_v47, %v21682_v15  ;;  %v9150_v48 = vmax.f32 %v9127_v30, 0.0  ;;  %v9259_v27 = vcombine.high %v9149_v3, %v9149_v3  ;;  %v15310_v42 = vld [vmem:[#allocation4 + $0x190] ss:$8 sps:$4 sm:$0xff]   ;;  %v15315_v47 = vld [vmem:[#allocation4 + $0x1a4] ss:$8 sps:$4 sm:$0xff]  }
 0x417   : > { %v19500_v33 = vpop.f32.mrb[69].mxu1  ;;  %v9742_v8 = vcombine.low %v9258_v51, %v19512_v40  ;;  %v19562_v31 = vadd.s32 4, %v19457_v35  ;;  %v19571_v6 = vmax.f32 %v9128_v29, 0.0  ;;  %v19576_v5 = vadd.s32 7, %v19457_v35 }
 0x418   : > { %v14650_v50 = vpop.f32.mrb[70].mxu1  ;;  %v9716_v28 = vcombine.low %v9708_v38, %v9715_v57  ;;  %v10123_v11 = vsel %vm19518_vm5, %v9699_v9, 0.0  ;;  %v9276_v37 = vcombine.high %v9150_v48, %v9150_v48  ;;  %v9273_v32 = vrot.slane %v9259_v27, %v21682_v15  ;;  %vm19674_vm5 = vmand %vm9592_vm14, %vm9602_vm15 }
 0x419   : > { %v19524_v45 = vpop.f32.mrb[71].mxu1  ;;  %v9756_v44 = vrot.slane %v9742_v8, %v21682_v15  ;;  %v9283_v2 = vrot.slane %v9150_v48, %v21682_v15  ;;  %v10126_v21 = vsel %vm19555_vm13, %v9740_v20, 0.0  ;;  %v9133_v3 = vadd.f32 %v14650_v50, %v19452_v10  ;;  %vm19697_vm8 = vmand %vm19674_vm5, %vm20973_vm12 }
 0x41a   : > { %v10124_v63 = vsel %vm19506_vm4, %v9716_v28, 0.0  ;;  %v13947_v53 = vpack.c.bf16 %v9716_v28, %v9699_v9  ;;  %v9275_v17 = vcombine.high %v9273_v32, %v9273_v32  ;;  %v9290_v38 = vrot.slane %v9276_v37, %v21682_v15  ;;  %vm19725_vm10 = vmpackc.low %vm19674_vm5, %vm19697_vm8 }
 0x41b   : > { %v19559_v52 = vpack.c.bf16 %v10124_v63, %v10123_v11  ;;  %v9757_v49 = vcombine.low %v9749_v18, %v9756_v44  ;;  %v9291_v51 = vcombine.high %v9283_v2, %v9283_v2  ;;  %v9129_v50 = vadd.f32 %v19484_v34, %v19452_v10  ;;  %v15318_v34 = vld [vmem:[#allocation4 + $0x1b4] ss:$8 sps:$4 sm:$0xff]  }
 0x41c   : > { %13948 = vmatmul.mubr.msk.bf16.vlgmr.msra.gmra.mrb[0].mxu0 %vm13946_vm11, %v13947_v53  ;;  %v9300_v62 = vrot.slane %v19571_v6, %v21682_v15  ;;  %v9765_v9 = vcombine.low %v9273_v32, %v9275_v17  ;;  %v9292_v41 = vcombine.high %v9290_v38, %v9290_v38  ;;  %v9156_v30 = vmax.f32 %v9133_v3, 0.0  ;;  %vm19737_vm11 = vmand %vm9590_vm0, %vm9600_vm2 }
 0x41d   : > { %10640 = vmatpush1.bf16.msra.mxu0 %v15307_v7  ;;  %10375 = vmatprep.mubr.bf16.mxu0 %v20969_v36  ;;  %v10127_v46 = vsel %vm19528_vm6, %v9757_v49, 0.0  ;;  %v19588_v1 = vpack.c.bf16 %v9757_v49, %v9740_v20  ;;  %v9766_v8 = vcombine.low %v9283_v2, %v9291_v51  ;;  %v9130_v28 = vadd.f32 %v19452_v10, %v19500_v33  ;;  %v15316_v2 = vld [vmem:[#allocation4 + $0x1b0] ss:$8 sps:$4 sm:$0xff]  }
 0x41e   : > { %v19564_v19 = vpop.f32.mrb[72].mxu1  ;;  %10641 = vmatprep.subr.bf16.mxu0 %v15312_v56  ;;  %v19586_v25 = vpack.c.bf16 %v10127_v46, %v10126_v21  ;;  %v9308_v20 = vcombine.high %v9300_v62, %v9300_v62  ;;  %v9773_v7 = vrot.slane %v9765_v9, %v21682_v15  ;;  %v9782_v11 = vcombine.low %v9290_v38, %v9292_v41  ;;  %v15369_v41 = vld [vmem:[#allocation4 + $0xc4] ss:$8 sps:$4 sm:$0xff]  }
 0x41f   : > { %v9000_v59 = vpop.f32.mrb[73].mxu1  ;;  %v9780_v48 = vrot.slane %v9766_v8, %v21682_v15  ;;  %v9378_v33 = vcombine.high %v9156_v30, %v9156_v30  ;;  %v19616_v63 = vrot.slane %v9156_v30, %v21682_v15  ;;  %v9152_v21 = vmax.f32 %v9129_v50, 0.0  ;;  %v15319_v8 = vld [vmem:[#allocation4 + $0x1c0] ss:$8 sps:$4 sm:$0xff]  }
 0x420   : > { %v19584_v39 = vpop.f32.mrb[74].mxu1  ;;  %v9134_v57 = vadd.f32 %v19452_v10, %v9000_v59  ;;  %v9783_v56 = vcombine.low %v9300_v62, %v9308_v20  ;;  %vm9593_vm14 = vcmp.ge.s32.totalorder %v19537_v58, 0  ;;  %vm9603_vm15 = vcmp.lt.s32.totalorder %v19537_v58, 16 }
 0x421   : > { %v9003_v22 = vpop.f32.mrb[75].mxu1  ;;  %10642 = vmatpush1.bf16.msra.mxu0 %v15310_v42  ;;  %v9781_v59 = vcombine.low %v9773_v7, %v9780_v48  ;;  %v9790_v42 = vrot.slane %v9782_v11, %v21682_v15  ;;  %v9392_v17 = vrot.slane %v9378_v33, %v21682_v15  ;;  %v9153_v7 = vmax.f32 %v9130_v28, 0.0 }
 0x422   : > { %10643 = vmatprep.subr.bf16.mxu0 %v15315_v47  ;;  %v9135_v18 = vadd.f32 %v19452_v10, %v9003_v22  ;;  %v9157_v44 = vmax.f32 %v9134_v57, 0.0  ;;  %v9797_v3 = vrot.slane %v9783_v56, %v21682_v15  ;;  %v15321_v47 = vld [vmem:[#allocation4 + $0x1c4] ss:$8 sps:$4 sm:$0xff]   ;;  %v9393_v22 = vcombine.high %v19616_v63, %v19616_v63 }
 0x423   : > { %v10129_v51 = vsel %vm19630_vm9, %v9781_v59, 0.0  ;;  %v9394_v57 = vcombine.high %v9392_v17, %v9392_v17  ;;  %v21697_v48 = vmov 0  ;;  %v9293_v33 = vcombine.high %v19571_v6, %v19571_v6  ;;  %vm19761_vm9 = vmand %vm19737_vm11, %vm20973_vm12 }
 0x424   : > { %13951 = vmatmul.mubr.msk.bf16.gmra.mrb[4].mxu0 %vm20971_vm1, %v19588_v1  ;;  %v19634_v27 = vmax.f32 %v9135_v18, 0.0  ;;  %v9395_v49 = vcombine.high %v9157_v44, %v9157_v44  ;;  %v9402_v37 = vrot.slane %v9157_v44, %v21682_v15  ;;  %v9798_v9 = vcombine.low %v9790_v42, %v9797_v3 }
 0x425   : > { %10644 = vmatpush1.bf16.msra.mxu0 %v15313_v60  ;;  %10385 = vmatprep.mubr.bf16.mxu0 %v20969_v36  ;;  %v21698_v48 = vsel %vm19674_vm5, 4294967295, %v21697_v48  ;;  %v9310_v6 = vcombine.high %v9152_v21, %v9152_v21  ;;  %v9317_v3 = vrot.slane %v9152_v21, %v21682_v15  ;;  %v9136_v26 = vadd.f32 %v19564_v19, %v19452_v10 }
 0x426   : > { %v19618_v53 = vpop.f32.mrb[76].mxu1  ;;  %10645 = vmatprep.subr.bf16.mxu0 %v15318_v34  ;;  %v9409_v50 = vrot.slane %v9395_v49, %v21682_v15  ;;  %v9410_v62 = vcombine.high %v9402_v37, %v9402_v37  ;;  %v19656_v60 = vrot.slane %v19634_v27, %v21682_v15  ;;  %v9888_v34 = vcombine.low %v9393_v22, %v9392_v17 }
 0x427   : > { %v19637_v32 = vpop.f32.mrb[77].mxu1  ;;  %v10130_v18 = vsel %vm19610_vm7, %v9798_v9, 0.0  ;;  %v19668_v44 = vpack.c.bf16 %v9798_v9, %v9781_v59  ;;  %v9889_v11 = vcombine.low %v9394_v57, %v9402_v37  ;;  %v8614_v59 = vld [vmem:[#allocation2 + $0xb0] sm:$0xf]  ;;  %v19690_v37 = vrot.slane %v9293_v33, %v21682_v15 }
 0x428   : > { %v19641_v46 = vpop.f32.mrb[78].mxu1  ;;  %v9411_v30 = vcombine.high %v9409_v50, %v9409_v50  ;;  %v9905_v20 = vcombine.low %v9410_v62, %v9409_v50  ;;  %v19680_v28 = vpack.c.bf16 %v10130_v18, %v10129_v51  ;;  %v9896_v56 = vrot.slane %v9888_v34, %v21682_v15  ;;  %v15322_v62 = vld [vmem:[#allocation4 + $0x1d0] ss:$8 sps:$4 sm:$0xff]  }
 0x429   : > { %v19649_v38 = vpop.f32.mrb[79].mxu1  ;;  %10646 = vmatpush1.bf16.msra.mxu0 %v15316_v2  ;;  %v9903_v23 = vrot.slane %v9889_v11, %v21682_v15  ;;  %v9327_v50 = vcombine.high %v9153_v7, %v9153_v7  ;;  %v19704_v9 = vadd.s32 8, %v19457_v35  ;;  %v9324_v34 = vrot.slane %v9310_v6, %v21682_v15  ;;  %v15391_v6 = vld [vmem:[#allocation4 + $0x240] ss:$8 sps:$4 sm:$0xff]  }
 0x42a   : > { %10647 = vmatprep.subr.bf16.mxu0 %v15321_v47  ;;  %v9906_v49 = vcombine.low %v9411_v30, %v19656_v60  ;;  %v9913_v2 = vrot.slane %v9905_v20, %v21682_v15  ;;  %v9309_v30 = vcombine.high %v19690_v37, %v19690_v37  ;;  %v15327_v20 = vld [vmem:[#allocation4 + $0x1e4] ss:$8 sps:$4 sm:$0xff]   ;;  %v9325_v33 = vcombine.high %v9317_v3, %v9317_v3 }
 0x42b   : > { %vm9601_vm2 = vcmp.lt.s32.totalorder %v19562_v31, 16  ;;  %vm21716_vm1 = vcmp.ge.s32.totalorder %v19562_v31, 0 }
 0x42c   : > { %13954 = vmatmul.mubr.msk.bf16.gmra.mrb[8].mxu0 %vm19662_vm3, %v19668_v44  ;;  %v9920_v51 = vrot.slane %v9906_v49, %v21682_v15  ;;  %v9334_v49 = vrot.slane %v9153_v7, %v21682_v15  ;;  %vm19846_vm0 = vmand %vm21716_vm1, %vm9601_vm2  ;;  %vm9595_vm2 = vcmp.ge.s32.totalorder %v19704_v9, 0 }
 0x42d   : > { %10648 = vmatpush1.bf16.msra.mxu0 %v15319_v8  ;;  %10395 = vmatprep.mubr.bf16.mxu0 %v20969_v36  ;;  %v9904_v8 = vcombine.low %v9896_v56, %v9903_v23 }
 0x42e   : > { %v14661_v42 = vpop.f32.mrb[112].mxu1  ;;  %10649 = vmatprep.subr.bf16.mxu0 %v15324_v16  ;;  %v9921_v11 = vcombine.low %v9913_v2, %v9920_v51  ;;  %v9326_v2 = vcombine.high %v9324_v34, %v9324_v34  ;;  %v9723_v16 = vrot.slane %v19469_v43, %v21682_v15  ;;  %v11126_v43 = vshll.u32 %v19559_v52, 16 }
 0x42f   : > { %v9068_v47 = vadd.f32 %v14661_v42, %v8614_v59  ;;  %v9032_v17 = vpop.f32.mrb[113].mxu1  ;;  %v19714_v59 = vrot.slane %v9327_v50, %v21682_v15  ;;  %v10138_v56 = vsel %vm19697_vm8, %v9904_v8, 0.0  ;;  %v9806_v42 = vcombine.low %v9309_v30, %v9317_v3  ;;  %v15330_v50 = vld [vmem:[#allocation4 + $0x1f4] ss:$8 sps:$4 sm:$0xff]   ;;  %vm19786_vm8 = vmpackc.low %vm19737_vm11, %vm19761_vm9 }
 0x430   : > { %v19707_v21 = vadd.f32 %v9032_v17, %v19445_v54  ;;  %v14662_v57 = vpop.f32.mrb[114].mxu1  ;;  %v10139_v7 = vsel %vm19674_vm5, %v9921_v11, 0.0  ;;  %v19731_v23 = vpack.c.bf16 %v9921_v11, %v9904_v8  ;;  %v15325_v17 = vld [vmem:[#allocation4 + $0x1e0] ss:$8 sps:$4 sm:$0xff]   ;;  %v9823_v51 = vcombine.low %v9326_v2, %v9334_v49  ;;  %vm19855_vm5 = vmand %vm19846_vm0, %vm20973_vm12 }
 0x431   : > { %9091 = vst [vmem:[#allocation2 + $0xb0] sm:$0xf] %v9068_v47  ;;  %v9035_v18 = vpop.f32.mrb[115].mxu1  ;;  %v9807_v47 = vcombine.low %v9325_v33, %v9324_v34  ;;  %10650 = vmatpush1.bf16.msra.mxu0 %v15322_v62  ;;  %v19743_v3 = vpack.c.bf16 %v10139_v7, %v10138_v56  ;;  %v9814_v22 = vrot.slane %v9806_v42, %v21682_v15  ;;  %v15328_v56 = vld [vmem:[#allocation4 + $0x1f0] ss:$8 sps:$4 sm:$0xff]   ;;  %vm19889_vm1 = vmpackc.low %vm19846_vm0, %vm19855_vm5 }
 0x432   : > { %v19717_v54 = vadd.f32 %v9035_v18, %v19447_v24  ;;  %v9342_v24 = vcombine.high %v9334_v49, %v9334_v49  ;;  %10651 = vmatprep.subr.bf16.mxu0 %v15327_v20  ;;  %13963 = vmatmul.mubr.msk.bf16.vlgmr.msra.gmra.mrb[116].mxu1 %vm19725_vm10, %v19731_v23  ;;  %v9137_v8 = vadd.f32 %v19584_v39, %v19452_v10  ;;  %v9159_v20 = vmax.f32 %v9136_v26, 0.0 }
 0x433   : > { %v9821_v62 = vrot.slane %v9807_v47, %v21682_v15  ;;  %v9412_v30 = vcombine.high %v19634_v27, %v19634_v27  ;;  %v9831_v34 = vrot.slane %v9823_v51, %v21682_v15  ;;  %10425 = vmatprep.mubr.bf16.mxu1 %v20969_v36  ;;  %v9131_v18 = vadd.f32 %v19452_v10, %v19524_v45  ;;  %v15375_v51 = vld [vmem:[#allocation4 + $0xe4] ss:$8 sps:$4 sm:$0xff]  }
 0x434   : > { %v9824_v57 = vcombine.low %v9342_v24, %v19714_v59  ;;  %v9132_v39 = vadd.f32 %v19496_v4, %v19452_v10  ;;  %v19772_v33 = vmax.f32 %v9137_v8, 0.0  ;;  %v9429_v2 = vcombine.high %v9159_v20, %v9159_v20  ;;  %v15333_v4 = vld [vmem:[#allocation4 + $0x304] ss:$8 sps:$4 sm:$0xff]  }
 0x435   : > { %v9822_v27 = vcombine.low %v9814_v22, %v9821_v62  ;;  %v9426_v49 = vrot.slane %v9412_v30, %v21682_v15  ;;  %10652 = vmatpush1.bf16.msra.mxu0 %v15325_v17  ;;  %v9436_v42 = vrot.slane %v9159_v20, %v21682_v15  ;;  %v9154_v45 = vmax.f32 %v9131_v18, 0.0 }
 0x436   : > { %v9838_v11 = vrot.slane %v9824_v57, %v21682_v15  ;;  %v9155_v7 = vmax.f32 %v9132_v39, 0.0  ;;  %10653 = vmatprep.subr.bf16.mxu0 %v15330_v50  ;;  %v9453_v17 = vrot.slane %v19772_v33, %v21682_v15  ;;  %v9443_v26 = vrot.slane %v9429_v2, %v21682_v15 }
 0x437   : > { %v10132_v47 = vsel %vm19761_vm9, %v9822_v27, 0.0  ;;  %v9428_v22 = vcombine.high %v9426_v49, %v9426_v49  ;;  %v9444_v50 = vcombine.high %v9436_v42, %v9436_v42  ;;  %v9344_v62 = vcombine.high %v9154_v45, %v9154_v45  ;;  %vm19807_vm9 = vmand %vm9593_vm14, %vm9603_vm15 }
 0x438   : > { %v9839_v24 = vcombine.low %v9831_v34, %v9838_v11  ;;  %v9351_v57 = vrot.slane %v9154_v45, %v21682_v15  ;;  %v9461_v34 = vcombine.high %v9453_v17, %v9453_v17  ;;  %v9445_v18 = vcombine.high %v9443_v26, %v9443_v26  ;;  %vm19820_vm14 = vmand %vm19807_vm9, %vm20973_vm12  ;;  %v9114_v55 = vld [vmem:[#allocation2 + $0xb0] sm:$0xf] }
 0x439   : > { %v9929_v20 = vcombine.low %v9426_v49, %v9428_v22  ;;  %10654 = vmatpush1.bf16.msra.mxu0 %v15328_v56  ;;  %v9930_v39 = vcombine.low %v9436_v42, %v9444_v50  ;;  %v9358_v11 = vrot.slane %v9344_v62, %v21682_v15  ;;  %v21709_v49 = vmov 0  ;;  %vm19833_vm15 = vmpackc.low %vm19807_vm9, %vm19820_vm14 }
 0x43a   : > { %v10133_v8 = vsel %vm19737_vm11, %v9839_v24, 0.0  ;;  %v19794_v30 = vpack.c.bf16 %v9839_v24, %v9822_v27  ;;  %10945 = vmatprep.subr.bf16.mxu0 %v15333_v4  ;;  %v9947_v45 = vcombine.low %v9453_v17, %v9461_v34  ;;  %v9359_v36 = vcombine.high %v9351_v57, %v9351_v57 }
 0x43b   : > { %v19796_v19 = vpack.c.bf16 %v10133_v8, %v10132_v47  ;;  %v9937_v2 = vrot.slane %v9929_v20, %v21682_v15  ;;  %v9361_v27 = vcombine.high %v9155_v7, %v9155_v7  ;;  %v21710_v49 = vsel %vm19807_vm9, 4294967295, %v21709_v49 }
 0x43c   : > { %13957 = vmatmul.mubr.msk.bf16.gmra.mrb[12].mxu0 %vm19786_vm8, %v19794_v30  ;;  %v9944_v56 = vrot.slane %v9930_v39, %v21682_v15  ;;  %v9946_v42 = vcombine.low %v9443_v26, %v9445_v18  ;;  %v21711_v4 = vmov 0   ;;  %v9360_v24 = vcombine.high %v9358_v11, %v9358_v11 }
 0x43d   : > { %10405 = vmatprep.mubr.bf16.mxu0 %v21711_v4  ;;  %v9368_v47 = vrot.slane %v9155_v7, %v21682_v15  ;;  %v9961_v22 = vrot.slane %v9947_v45, %v21682_v15  ;;  %v9375_v17 = vrot.slane %v9361_v27, %v21682_v15  ;;  %v9847_v26 = vcombine.low %v9351_v57, %v9359_v36 }
 0x43e   : > { %v9138_v7 = vadd.f32 %v19452_v10, %v19637_v32  ;;  %v9945_v50 = vcombine.low %v9937_v2, %v9944_v56  ;;  %v9954_v62 = vrot.slane %v9946_v42, %v21682_v15  ;;  %v9848_v34 = vcombine.low %v9358_v11, %v9360_v24 }
 0x43f   : > { %v9376_v8 = vcombine.high %v9368_v47, %v9368_v47  ;;  %v9377_v18 = vcombine.high %v9375_v17, %v9375_v17  ;;  %v9855_v39 = vrot.slane %v9847_v26, %v21682_v15  ;;  %v9139_v36 = vadd.f32 %v19452_v10, %v19649_v38 }
 0x440   : > { %v9161_v32 = vmax.f32 %v9138_v7, 0.0  ;;  %v9962_v57 = vcombine.low %v9954_v62, %v9961_v22  ;;  %v10141_v2 = vsel %vm19820_vm14, %v9945_v50, 0.0  ;;  %v21717_v11 = vmov 0 }
 0x441   : > { %v21718_v11 = vsel %vm19846_vm0, 4294967295, %v21717_v11  ;;  %v9862_v45 = vrot.slane %v9848_v34, %v21682_v15  ;;  %v9864_v27 = vcombine.low %v9368_v47, %v9376_v8  ;;  %v9865_v56 = vcombine.low %v9375_v17, %v9377_v18 }
 0x442   : > { %v9162_v42 = vmax.f32 %v9139_v36, 0.0  ;;  %v9446_v31 = vcombine.high %v19772_v33, %v19772_v33  ;;  %v9463_v24 = vcombine.high %v9161_v32, %v9161_v32  ;;  %v10142_v58 = vsel %vm19807_vm9, %v9962_v57, 0.0 }
 0x443   : > { %v19863_v22 = vpack.c.bf16 %v9962_v57, %v9945_v50  ;;  %v9863_v47 = vcombine.low %v9855_v39, %v9862_v45  ;;  %v9872_v26 = vrot.slane %v9864_v27, %v21682_v15  ;;  %v19866_v7 = vpack.c.bf16 %v10142_v58, %v10141_v2  ;;  %v15381_v2 = vld [vmem:[#allocation4 + $0x204] ss:$8 sps:$4 sm:$0xff]  }
 0x444   : > { %v9879_v62 = vrot.slane %v9865_v56, %v21682_v15  ;;  %v19870_v8 = vrot.slane %v9446_v31, %v21682_v15  ;;  %v9470_v17 = vrot.slane %v9161_v32, %v21682_v15  ;;  %v9477_v50 = vrot.slane %v9463_v24, %v21682_v15 }
 0x445   : > { %21721 = vst [vmem:[#allocation122_spill] sm:$0xff] %v19866_v7  ;;  %13966 = vmatmul.mubr.msk.bf16.gmra.mrb[120].mxu1 %vm19833_vm15, %v19863_v22  ;;  %v10135_v33 = vsel %vm19855_vm5, %v9863_v47, 0.0  ;;  %v9480_v34 = vcombine.high %v9162_v42, %v9162_v42  ;;  %v9487_v18 = vrot.slane %v9162_v42, %v21682_v15  ;;  %v9140_v32 = vadd.f32 %v19618_v53, %v19452_v10 }
 0x446   : > { %v9880_v39 = vcombine.low %v9872_v26, %v9879_v62  ;;  %10435 = vmatprep.mubr.bf16.mxu1 %v21711_v4  ;;  %v9462_v36 = vcombine.high %v19870_v8, %v19870_v8  ;;  %v9478_v57 = vcombine.high %v9470_v17, %v9470_v17  ;;  %v9479_v45 = vcombine.high %v9477_v50, %v9477_v50 }
 0x447   : > { %v19894_v27 = vrot.slane %v9480_v34, %v21682_v15  ;;  %v9495_v56 = vcombine.high %v9487_v18, %v9487_v18  ;;  %v9141_v42 = vadd.f32 %v19641_v46, %v19452_v10  ;;  %vm9605_vm14 = vcmp.lt.s32.totalorder %v19704_v9, 16 }
 0x448   : > { %v10136_v53 = vsel %vm19846_vm0, %v9880_v39, 0.0  ;;  %v19902_v38 = vpack.c.bf16 %v9880_v39, %v9863_v47  ;;  %vm21725_vm5 = vcmp.lt.s32.totalorder %v19576_v5, 16  ;;  %vm21726_vm12 = vcmp.ge.s32.totalorder %v19576_v5, 0 }
 0x449   : > { %21724 = vst [vmem:[#allocation123_spill] sm:$0xff] %v19894_v27  ;;  %vm19908_vm9 = vmand %vm21726_vm12, %vm21725_vm5  ;;  %v21727_v31 = vmov 0  ;;  %v9970_v24 = vcombine.low %v9462_v36, %v9470_v17  ;;  %v9971_v58 = vcombine.low %v9478_v57, %v9477_v50  ;;  %v19912_v46 = vpack.c.bf16 %v10136_v53, %v10135_v33  ;;  %v15336_v33 = vld [vmem:[#allocation4 + $0x314] ss:$8 sps:$4 sm:$0xff]  }
 0x44a   : > { %v21728_v31 = vsel %vm19908_vm9, 4294967295, %v21727_v31  ;;  %v9987_v26 = vcombine.low %v9479_v45, %v9487_v18  ;;  %v9988_v62 = vcombine.low %v9495_v56, %v19894_v27  ;;  %v9163_v34 = vmax.f32 %v9140_v32, 0.0  ;;  %13960 = vmatmul.mubr.msk.bf16.gmra.mrb[16].mxu0 %vm19889_vm1, %v19902_v38 }
 0x44b   : > { %21729 = vst [vmem:[#allocation128_spill] sm:$0xff] %v21728_v31  ;;  %v9978_v47 = vrot.slane %v9970_v24, %v21682_v15  ;;  %v9985_v5 = vrot.slane %v9971_v58, %v21682_v15  ;;  %v9164_v39 = vmax.f32 %v9141_v42, 0.0  ;;  %v9142_v17 = vadd.f32 %v19452_v10, %v19707_v21  ;;  %10671 = vmatprep.mubr.bf16.mxu0 %v21711_v4 }
 0x44c   : > { %vm21730_vm12 = vcmp.ge.s32.totalorder %v19460_v12, 0  ;;  %v9995_v50 = vrot.slane %v9987_v26, %v21682_v15  ;;  %v10002_v18 = vrot.slane %v9988_v62, %v21682_v15  ;;  %v9497_v36 = vcombine.high %v9163_v34, %v9163_v34 }
 0x44d   : > { %vm19926_vm5 = vmand %vm19908_vm9, %vm21730_vm12  ;;  %v9504_v57 = vrot.slane %v9163_v34, %v21682_v15  ;;  %v9986_v32 = vcombine.low %v9978_v47, %v9985_v5  ;;  %v9514_v45 = vcombine.high %v9164_v39, %v9164_v39  ;;  %v9521_v21 = vrot.slane %v9164_v39, %v21682_v15 }
 0x44e   : > { %v9143_v56 = vadd.f32 %v19452_v10, %v19717_v54  ;;  %v10003_v42 = vcombine.low %v9995_v50, %v10002_v18  ;;  %v9511_v53 = vrot.slane %v9497_v36, %v21682_v15  ;;  %v9144_v58 = vadd.f32 %v19452_v10, %v9114_v55  ;;  %vm19945_vm12 = vmpackc.low %vm19908_vm9, %vm19926_vm5  ;;  %v15331_v55 = vld [vmem:[#allocation4 + $0x300] ss:$8 sps:$4 sm:$0xff]  }
 0x44f   : > { %v9512_v24 = vcombine.high %v9504_v57, %v9504_v57  ;;  %v10144_v26 = vsel %vm19926_vm5, %v9986_v32, 0.0  ;;  %v9528_v34 = vrot.slane %v9514_v45, %v21682_v15  ;;  %v9529_v54 = vcombine.high %v9521_v21, %v9521_v21  ;;  %vm21735_vm5 = vmpackc.low %vm19528_vm6, %vm19555_vm13 }
 0x450   : > { %v9165_v47 = vmax.f32 %v9142_v17, 0.0  ;;  %v10145_v5 = vsel %vm19908_vm9, %v10003_v42, 0.0  ;;  %v19952_v39 = vpack.c.bf16 %v10003_v42, %v9986_v32  ;;  %v9513_v10 = vcombine.high %v9511_v53, %v9511_v53  ;;  %vm19970_vm9 = vmand %vm9595_vm2, %vm9605_vm14 }
 0x451   : > { %v10011_v50 = vcombine.low %v9504_v57, %v9512_v24  ;;  %v19954_v18 = vpack.c.bf16 %v10145_v5, %v10144_v26  ;;  %v9530_v36 = vcombine.high %v9528_v34, %v9528_v34  ;;  %v10028_v61 = vcombine.low %v9521_v21, %v9529_v54  ;;  %v15402_v57 = vld [vmem:[#allocation4 + $0x274] ss:$8 sps:$4 sm:$0xff]  }
 0x452   : > { %v9166_v7 = vmax.f32 %v9143_v56, 0.0  ;;  %13969 = vmatmul.mubr.msk.bf16.gmra.mrb[124].mxu1 %vm19945_vm12, %v19952_v39  ;;  %v10012_v45 = vcombine.low %v9511_v53, %v9513_v10  ;;  %v9167_v31 = vmax.f32 %v9144_v58, 0.0  ;;  %v9531_v27 = vcombine.high %v9165_v47, %v9165_v47  ;;  %13988 = vmatmul.mubr.msk.bf16.vlgmr.msra.gmra.mrb[0].mxu0 %vm21735_vm5, %v19588_v1  ;;  %v15339_v58 = vld [vmem:[#allocation4 + $0x324] ss:$8 sps:$4 sm:$0xff]  }
 0x453   : > { %v10019_v17 = vrot.slane %v10011_v50, %v21682_v15  ;;  %v10029_v32 = vcombine.low %v9528_v34, %v9530_v36  ;;  %v10036_v21 = vrot.slane %v10028_v61, %v21682_v15  ;;  %v19976_v56 = vrot.slane %v9165_v47, %v21682_v15  ;;  %10946 = vmatpush1.bf16.msra.mxu0 %v15331_v55  ;;  %v15337_v50 = vld [vmem:[#allocation4 + $0x320] ss:$8 sps:$4 sm:$0xff]  }
 0x454   : > { %v9548_v42 = vcombine.high %v9166_v7, %v9166_v7  ;;  %10681 = vmatprep.mubr.bf16.mxu0 %v21711_v4  ;;  %v10026_v1 = vrot.slane %v10012_v45, %v21682_v15  ;;  %v9545_v53 = vrot.slane %v9531_v27, %v21682_v15  ;;  %v9555_v9 = vrot.slane %v9166_v7, %v21682_v15  ;;  %v15342_v45 = vld [vmem:[#allocation4 + $0x334] ss:$8 sps:$4 sm:$0xff]  }
 0x455   : > { %v9583_v24 = vadd.s32 9, %v19457_v35  ;;  %10947 = vmatprep.subr.bf16.mxu0 %v15336_v33  ;;  %v10043_v61 = vrot.slane %v10029_v32, %v21682_v15  ;;  %v9546_v26 = vcombine.high %v19976_v56, %v19976_v56  ;;  %v19988_v54 = vrot.slane %v9167_v31, %v21682_v15 }
 0x456   : > { %v9562_v34 = vrot.slane %v9548_v42, %v21682_v15  ;;  %vm21738_vm13 = vcmp.ge.s32.totalorder %v19460_v12, 0  ;;  %v10027_v35 = vcombine.low %v10019_v17, %v10026_v1  ;;  %v9547_v27 = vcombine.high %v9545_v53, %v9545_v53 }
 0x457   : > { %vm19994_vm2 = vmand %vm19970_vm9, %vm21738_vm13  ;;  %v9563_v47 = vcombine.high %v9555_v9, %v9555_v9  ;;  %vm9596_vm14 = vcmp.ge.s32.totalorder %v9583_v24, 0  ;;  %v10044_v5 = vcombine.low %v10036_v21, %v10043_v61  ;;  %vm9606_vm5 = vcmp.lt.s32.totalorder %v9583_v24, 16  ;;  %10948 = vmatpush1.bf16.msra.mxu0 %v15334_v14  ;;  %v15340_v61 = vld [vmem:[#allocation4 + $0x330] ss:$8 sps:$4 sm:$0xff]  }
 0x458   : > { %v9564_v55 = vcombine.high %v9562_v34, %v9562_v34  ;;  %v10052_v10 = vcombine.low %v9546_v26, %v9545_v53  ;;  %vm19998_vm0 = vmand %vm9596_vm14, %vm9606_vm5  ;;  %v10053_v33 = vcombine.low %v9547_v27, %v9555_v9  ;;  %10949 = vmatprep.subr.bf16.mxu0 %v15339_v58  ;;  %v10147_v17 = vsel %vm19994_vm2, %v10027_v35, 0.0 }
 0x459   : > { %v10069_v36 = vcombine.low %v9563_v47, %v9562_v34  ;;  %v10148_v32 = vsel %vm19970_vm9, %v10044_v5, 0.0  ;;  %v20006_v21 = vpack.c.bf16 %v10044_v5, %v10027_v35  ;;  %vm20020_vm14 = vmand %vm19998_vm0, %vm21738_vm13  ;;  %v15345_v34 = vld [vmem:[#allocation4 + $0x344] ss:$8 sps:$4 sm:$0xff]   ;;  %v15343_v5 = vld [vmem:[#allocation4 + $0x340] ss:$8 sps:$4 sm:$0xff]   ;;  %v9274_v20 = vcombine.high %v19512_v40, %v19512_v40 }
 0x45a   : > { %v10070_v42 = vcombine.low %v9564_v55, %v19988_v54  ;;  %v20009_v14 = vpack.c.bf16 %v10148_v32, %v10147_v17  ;;  %v10060_v1 = vrot.slane %v10052_v10, %v21682_v15  ;;  %v10067_v53 = vrot.slane %v10053_v33, %v21682_v15  ;;  %13991 = vmatmul.mubr.msk.bf16.gmra.mrb[4].mxu0 %vm19662_vm3, %v19668_v44  ;;  %v15348_v10 = vld [vmem:[#allocation4 + $0x354] ss:$8 sps:$4 sm:$0xff]   ;;  %v15351_v33 = vld [vmem:[#allocation4 + $0x364] ss:$8 sps:$4 sm:$0xff]   ;;  %v15352_v17 = vld [vmem:[#allocation4 + $0x370] ss:$8 sps:$4 sm:$0xff]  }
 0x45b   : > { %v10077_v24 = vrot.slane %v10069_v36, %v21682_v15  ;;  %10691 = vmatprep.mubr.bf16.mxu0 %v21711_v4  ;;  %10950 = vmatpush1.bf16.msra.mxu0 %v15337_v50  ;;  %v15346_v50 = vld [vmem:[#allocation4 + $0x350] ss:$8 sps:$4 sm:$0xff]   ;;  %v15349_v36 = vld [vmem:[#allocation4 + $0x360] ss:$8 sps:$4 sm:$0xff]   ;;  %v15357_v32 = vld [vmem:[#allocation4 + $0x84] ss:$8 sps:$4 sm:$0xff]  }
 0x45c   : > { %v10084_v58 = vrot.slane %v10070_v42, %v21682_v15  ;;  %v20027_v26 = vcombine.low %v10060_v1, %v10067_v53  ;;  %10951 = vmatprep.subr.bf16.mxu0 %v15342_v45  ;;  %v15354_v45 = vld [vmem:[#allocation4 + $0x374] ss:$8 sps:$4 sm:$0xff]   ;;  %vm14007_vm5 = vmpackc.low %vm19970_vm9, %vm19994_vm2  ;;  %v15355_v42 = vld [vmem:[#allocation4 + $0x80] ss:$8 sps:$4 sm:$0xff]   ;;  %v11128_v62 = vrot.slane %v11126_v43, 1  ;;  %v11124_v40 = vshrl.u32 %v19559_v52, 16 }
 0x45d   : > { %v15360_v1 = vld [vmem:[#allocation4 + $0x94] ss:$8 sps:$4 sm:$0xff]   ;;  %v15358_v53 = vld [vmem:[#allocation4 + $0x90] ss:$8 sps:$4 sm:$0xff]   ;;  %v11138_v9 = vshll.u32 %v19586_v25, 16  ;;  %vm12187_vm13 = vcmask 1046528  }
 0x45e   : > { %v20029_v35 = vcombine.low %v10077_v24, %v10084_v58  ;;  %v10150_v12 = vsel %vm20020_vm14, %v20027_v26, 0.0  ;;  %v15363_v24 = vld [vmem:[#allocation4 + $0xa4] ss:$8 sps:$4 sm:$0xff]   ;;  %v15361_v58 = vld [vmem:[#allocation4 + $0xa0] ss:$8 sps:$4 sm:$0xff]  }
 0x45f   : > { %10952 = vmatpush1.bf16.msra.mxu0 %v15340_v61  ;;  %v15366_v61 = vld [vmem:[#allocation4 + $0xb4] ss:$8 sps:$4 sm:$0xff]  }
 0x460   : > { %v10151_v27 = vsel %vm19998_vm0, %v20029_v35, 0.0  ;;  %v14048_v47 = vpack.c.bf16 %v20029_v35, %v20027_v26  ;;  %10953 = vmatprep.subr.bf16.mxu0 %v15345_v34  ;;  %v15364_v34 = vld [vmem:[#allocation4 + $0xb0] ss:$8 sps:$4 sm:$0xff]   ;;  %v9805_v26 = vrot.slane %v19690_v37, %v21682_v15  ;;  %v15396_v43 = vld [vmem:[#allocation4 + $0x254] ss:$8 sps:$4 sm:$0xff]  }
 0x461   : > { %v20039_v55 = vpack.c.bf16 %v10151_v27, %v10150_v12  ;;  %v15372_v12 = vld [vmem:[#allocation4 + $0xd4] ss:$8 sps:$4 sm:$0xff]   ;;  %v15370_v27 = vld [vmem:[#allocation4 + $0xd0] ss:$8 sps:$4 sm:$0xff]  }
 0x462   : > { %13994 = vmatmul.mubr.msk.bf16.gmra.mrb[8].mxu0 %vm19786_vm8, %v19794_v30 }
 0x463   : > { %10701 = vmatprep.mubr.bf16.mxu0 %v21711_v4  ;;  %10954 = vmatpush1.bf16.msra.mxu0 %v15343_v5  ;;  %v15378_v5 = vld [vmem:[#allocation4 + $0xf4] ss:$8 sps:$4 sm:$0xff]  }
 0x464   : > { %10955 = vmatprep.subr.bf16.mxu0 %v15348_v10  ;;  %v15376_v10 = vld [vmem:[#allocation4 + $0xf0] ss:$8 sps:$4 sm:$0xff]  }
 0x467   : > { %10956 = vmatpush1.bf16.msra.mxu0 %v15346_v50 }
 0x468   : > { %10957 = vmatprep.subr.bf16.mxu0 %v15351_v33  ;;  %v15379_v33 = vld [vmem:[#allocation4 + $0x200] ss:$8 sps:$4 sm:$0xff]  }
 0x46a   : > { %13997 = vmatmul.mubr.msk.bf16.gmra.mrb[12].mxu0 %vm19889_vm1, %v19902_v38 }
 0x46b   : > { %10711 = vmatprep.mubr.bf16.mxu0 %v21711_v4  ;;  %10958 = vmatpush1.bf16.msra.mxu0 %v15349_v36 }
 0x46c   : > { %10959 = vmatprep.subr.bf16.mxu0 %v15354_v45 }
 0x46f   : > { %10960 = vmatpush1.bf16.msra.mxu0 %v15352_v17  ;;  %v15382_v17 = vld [vmem:[#allocation4 + $0x210] ss:$8 sps:$4 sm:$0xff]  }
 0x470   : > { %11356 = vmatprep.subr.bf16.mxu0 %v15357_v32  ;;  %v11136_v32 = vshrl.u32 %v19586_v25, 16 }
 0x472   : > { %14000 = vmatmul.mubr.msk.bf16.gmra.mrb[16].mxu0 %vm19725_vm10, %v19731_v23 }
 0x473   : > { %10721 = vmatprep.mubr.bf16.mxu0 %v21711_v4 }
 0x47a   : > { %14003 = vmatmul.mubr.msk.bf16.gmra.mrb[20].mxu0 %vm19833_vm15, %v19863_v22 }
 0x47b   : > { %10731 = vmatprep.mubr.bf16.mxu0 %v21711_v4 }
 0x482   : > { %14006 = vmatmul.mubr.msk.bf16.gmra.mrb[24].mxu0 %vm19945_vm12, %v19952_v39 }
 0x483   : > { %10741 = vmatprep.mubr.bf16.mxu0 %v21711_v4 }
 0x48a   : > { %14009 = vmatmul.mubr.msk.bf16.gmra.mrb[28].mxu0 %vm14007_vm5, %v20006_v21 }
 0x48b   : > { %10977 = vmatprep.mubr.bf16.mxu0 %v21711_v4 }
 0x492   : > { %14028 = vmatmul.mubr.msk.bf16.vlgmr.msra.gmra.mrb[0].mxu0 %vm19662_vm3, %v19668_v44  ;;  %v15367_v44 = vld [vmem:[#allocation4 + $0xc0] ss:$8 sps:$4 sm:$0xff]  }
 0x493   : > { %11357 = vmatpush1.bf16.msra.mxu0 %v15355_v42  ;;  %10987 = vmatprep.mubr.bf16.mxu0 %v21711_v4 }
 0x494   : > { %11358 = vmatprep.subr.bf16.mxu0 %v15360_v1  ;;  %v15387_v1 = vld [vmem:[#allocation4 + $0x224] ss:$8 sps:$4 sm:$0xff]  }
 0x497   : > { %11359 = vmatpush1.bf16.msra.mxu0 %v15358_v53  ;;  %v9343_v53 = vcombine.high %v19714_v59, %v19714_v59  ;;  %v11148_v59 = vshrl.u32 %v19680_v28, 16 }
 0x498   : > { %11360 = vmatprep.subr.bf16.mxu0 %v15363_v24 }
 0x49a   : > { %14031 = vmatmul.mubr.msk.bf16.gmra.mrb[4].mxu0 %vm19786_vm8, %v19794_v30  ;;  %v15373_v30 = vld [vmem:[#allocation4 + $0xe0] ss:$8 sps:$4 sm:$0xff]  }
 0x49b   : > { %10997 = vmatprep.mubr.bf16.mxu0 %v21711_v4  ;;  %11361 = vmatpush1.bf16.msra.mxu0 %v15361_v58  ;;  %v11150_v58 = vshll.u32 %v19680_v28, 16 }
 0x49c   : > { %11362 = vmatprep.subr.bf16.mxu0 %v15366_v61  ;;  %v15385_v61 = vld [vmem:[#allocation4 + $0x220] ss:$8 sps:$4 sm:$0xff]  }
 0x49f   : > { %11363 = vmatpush1.bf16.msra.mxu0 %v15364_v34 }
 0x4a0   : > { %11364 = vmatprep.subr.bf16.mxu0 %v15369_v41  ;;  %v15390_v41 = vld [vmem:[#allocation4 + $0x234] ss:$8 sps:$4 sm:$0xff]  }
 0x4a2   : > { %14034 = vmatmul.mubr.msk.bf16.gmra.mrb[8].mxu0 %vm19889_vm1, %v19902_v38  ;;  %v21745_v38 = vld [vmem:[#allocation15_spill] sm:$0xff] }
 0x4a3   : > { %11007 = vmatprep.mubr.bf16.mxu0 %v21711_v4  ;;  %11365 = vmatpush1.bf16.msra.mxu0 %v15367_v44  ;;  %v20093_v50 = vadd.s32 4294967295, %v21745_v38  ;;  %v9846_v44 = vrot.slane %v9343_v53, %v21682_v15  ;;  %v11162_v38 = vshll.u32 %v19796_v19, 16 }
 0x4a4   : > { %11366 = vmatprep.subr.bf16.mxu0 %v15372_v12 }
 0x4a5   : > { %vm9652_vm3 = vcmp.lt.s32.totalorder %v20093_v50, 16 }
 0x4a6   : > { %vm9658_vm8 = vmand %vm19528_vm6, %vm9652_vm3 }
 0x4a7   : > { %11367 = vmatpush1.bf16.msra.mxu0 %v15370_v27  ;;  %vm9661_vm6 = vmand %vm19610_vm7, %vm9652_vm3  ;;  %v11152_v27 = vrot.slane %v11150_v58, 1 }
 0x4a8   : > { %11368 = vmatprep.subr.bf16.mxu0 %v15375_v51  ;;  %v10131_v37 = vsel %vm9661_vm6, %v9805_v26, 0.0  ;;  %vm9664_vm7 = vmand %vm19737_vm11, %vm9652_vm3  ;;  %vm21746_vm11 = vnez %v21718_v11 }
 0x4a9   : > { %v20149_v34 = vpack.c.bf16 %v10131_v37, %v10131_v37  ;;  %vm9667_vm1 = vmand %vm21746_vm11, %vm9652_vm3  ;;  %v15400_v37 = vld [vmem:[#allocation4 + $0x270] ss:$8 sps:$4 sm:$0xff]  }
 0x4aa   : > { %14037 = vmatmul.mubr.msk.bf16.gmra.mrb[12].mxu0 %vm19725_vm10, %v19731_v23  ;;  %vm9655_vm10 = vmand %vm19506_vm4, %vm9652_vm3 }
 0x4ab   : > { %11017 = vmatprep.mubr.bf16.mxu0 %v21711_v4  ;;  %11369 = vmatpush1.bf16.msra.mxu0 %v15373_v30  ;;  %v10125_v23 = vsel %vm9655_vm10, %v9723_v16, 0.0  ;;  %vm14047_vm4 = vmpackc.low %vm19998_vm0, %vm20020_vm14  ;;  %v11155_v51 = vshll.u32 %v20149_v34, 16  ;;  %v15388_v30 = vld [vmem:[#allocation4 + $0x230] ss:$8 sps:$4 sm:$0xff]   ;;  %vm21748_vm14 = vnez %v21710_v49 }
 0x4ac   : > { %11370 = vmatprep.subr.bf16.mxu0 %v15378_v5  ;;  %v20120_v0 = vpack.c.bf16 %v10125_v23, %v10125_v23  ;;  %v10134_v5 = vsel %vm9664_vm7, %v9846_v44, 0.0  ;;  %vm9682_vm10 = vmand %vm19998_vm0, %vm9652_vm3 }
 0x4ad   : > { %v11157_v16 = vrot.slane %v11155_v51, 1  ;;  %v20164_v23 = vpack.c.bf16 %v10134_v5, %v10134_v5 }
 0x4af   : > { %11371 = vmatpush1.bf16.msra.mxu0 %v15376_v10  ;;  %v15393_v10 = vld [vmem:[#allocation4 + $0x244] ss:$8 sps:$4 sm:$0xff]  }
 0x4b0   : > { %11675 = vmatprep.subr.bf16.mxu0 %v15381_v2  ;;  %v11153_v2 = vor.u32 %v11152_v27, %v11148_v59  ;;  %v9572_v27 = vcombine.high %v19988_v54, %v19988_v54  ;;  %v9969_v59 = vrot.slane %v19870_v8, %v21682_v15  ;;  %v11184_v8 = vshrl.u32 %v19743_v3, 16 }
 0x4b2   : > { %14040 = vmatmul.mubr.msk.bf16.gmra.mrb[16].mxu0 %vm19833_vm15, %v19863_v22  ;;  %v9764_v22 = vrot.slane %v9274_v20, %v21682_v15  ;;  %vm11122_vm15 = vsmask.f32 7424  ;;  %v9887_v20 = vrot.slane %v19616_v63, %v21682_v15  ;;  %v11167_v63 = vshll.u32 %v20164_v23, 16 }
 0x4b3   : > { %11027 = vmatprep.mubr.bf16.mxu0 %v21711_v4 }
 0x4b4   : > { %v10128_v7 = vsel %vm9658_vm8, %v9764_v22, 0.0  ;;  %v20169_v22 = vsel %vm11122_vm15, %v11153_v2, %v11157_v16  ;;  %v10137_v11 = vsel %vm9667_vm1, %v9887_v20, 0.0  ;;  %v21749_v16 = vld [vmem:[#allocation123_spill] sm:$0xff] }
 0x4b5   : > { %v20134_v45 = vpack.c.bf16 %v10128_v7, %v10128_v7  ;;  %v15394_v7 = vld [vmem:[#allocation4 + $0x250] ss:$8 sps:$4 sm:$0xff]   ;;  %v20188_v26 = vpack.c.bf16 %v10137_v11, %v10137_v11  ;;  %v9496_v49 = vcombine.high %v21749_v16, %v21749_v16 }
 0x4b7   : > { %v11143_v42 = vshll.u32 %v20134_v45, 16  ;;  %v10010_v31 = vrot.slane %v9496_v49, %v21682_v15  ;;  %v15417_v49 = vld [vmem:[#allocation4 + $0x3c4] ss:$8 sps:$4 sm:$0xff]  }
 0x4b9   : > { %v11145_v29 = vrot.slane %v11143_v42, 1  ;;  %v11172_v42 = vshrl.u32 %v19912_v46, 16 }
 0x4ba   : > { %14043 = vmatmul.mubr.msk.bf16.gmra.mrb[20].mxu0 %vm19945_vm12, %v19952_v39  ;;  %v11131_v39 = vshll.u32 %v20120_v0, 16  ;;  %vm9679_vm12 = vmand %vm19970_vm9, %vm9652_vm3  ;;  %vm21747_vm9 = vnez %v21698_v48 }
 0x4bb   : > { %11037 = vmatprep.mubr.bf16.mxu0 %v21711_v4  ;;  %vm9670_vm2 = vmand %vm21747_vm9, %vm9652_vm3 }
 0x4bc   : > { %v11133_v36 = vrot.slane %v11131_v39, 1  ;;  %v11160_v39 = vshrl.u32 %v19796_v19, 16 }
 0x4c2   : > { %14046 = vmatmul.mubr.msk.bf16.gmra.mrb[24].mxu0 %vm14007_vm5, %v20006_v21  ;;  %v11129_v21 = vor.u32 %v11128_v62, %v11124_v40  ;;  %v11164_v62 = vrot.slane %v11162_v38, 1  ;;  %v10051_v40 = vrot.slane %v19976_v56, %v21682_v15  ;;  %vm9673_vm5 = vmand %vm21748_vm14, %vm9652_vm3 }
 0x4c3   : > { %11047 = vmatprep.mubr.bf16.mxu0 %v21711_v4  ;;  %v10143_v38 = vsel %vm9673_vm5, %v9969_v59, 0.0  ;;  %v15406_v59 = vld [vmem:[#allocation4 + $0x390] ss:$8 sps:$4 sm:$0xff]  }
 0x4c4   : > { %v11134_v35 = vsel %vm11122_vm15, %v11129_v21, %v11133_v36  ;;  %v9427_v21 = vcombine.high %v19656_v60, %v19656_v60  ;;  %v11165_v56 = vor.u32 %v11164_v62, %v11160_v39  ;;  %v10149_v36 = vsel %vm9679_vm12, %v10051_v40, 0.0 }
 0x4c5   : > { %v20198_v60 = vpack.c.bf16 %v10149_v36, %v10149_v36  ;;  %v20237_v39 = vpack.c.bf16 %v10143_v38, %v10143_v38 }
 0x4c7   : > { %v12529_v48 = vrot.slane %v20198_v60, 1 }
 0x4ca   : > { %14049 = vmatmul.mubr.msk.bf16.gmra.mrb[28].mxu0 %vm14047_vm4, %v14048_v47  ;;  %v11140_v47 = vrot.slane %v11138_v9, 1  ;;  %v15399_v9 = vld [vmem:[#allocation4 + $0x264] ss:$8 sps:$4 sm:$0xff]  }
 0x4cb   : > { %11388 = vmatprep.mubr.bf16.mxu0 %v21711_v4 }
 0x4cc   : > { %v11141_v24 = vor.u32 %v11140_v47, %v11136_v32  ;;  %v9928_v47 = vrot.slane %v9427_v21, %v21682_v15 }
 0x4ce   : > { %v20153_v12 = vsel %vm11122_vm15, %v11141_v24, %v11145_v29  ;;  %v10140_v53 = vsel %vm9670_vm2, %v9928_v47, 0.0  ;;  %v15405_v24 = vld [vmem:[#allocation4 + $0x384] ss:$8 sps:$4 sm:$0xff]   ;;  %v11186_v29 = vshll.u32 %v19743_v3, 16 }
 0x4cf   : > { %v20207_v44 = vpack.c.bf16 %v10140_v53, %v10140_v53 }
 0x4d0   : > { %v11188_v5 = vrot.slane %v11186_v29, 1 }
 0x4d1   : > { %v11191_v54 = vshll.u32 %v20207_v44, 16 }
 0x4d2   : > { %11389 = vmatmul.mubr.bf16.vlgmr.msra.gmra.mrb[0].mxu0 %v11134_v35  ;;  %v15397_v35 = vld [vmem:[#allocation4 + $0x260] ss:$8 sps:$4 sm:$0xff]   ;;  %v11189_v20 = vor.u32 %v11188_v5, %v11184_v8  ;;  %v15411_v5 = vld [vmem:[#allocation4 + $0x3a4] ss:$8 sps:$4 sm:$0xff]  }
 0x4d3   : > { %11676 = vmatpush1.bf16.msra.mxu0 %v15379_v33  ;;  %11398 = vmatprep.mubr.bf16.mxu0 %v21711_v4  ;;  %v11174_v33 = vshll.u32 %v19912_v46, 16  ;;  %v11193_v40 = vrot.slane %v11191_v54, 1  ;;  %v15414_v54 = vld [vmem:[#allocation4 + $0x3b4] ss:$8 sps:$4 sm:$0xff]  }
 0x4d4   : > { %11677 = vmatprep.subr.bf16.mxu0 %v15384_v13  ;;  %v11169_v13 = vrot.slane %v11167_v63, 1  ;;  %v12840_v63 = vrot.slane %v20039_v55, 1 }
 0x4d5   : > { %v11176_v32 = vrot.slane %v11174_v33, 1  ;;  %v20243_v11 = vsel %vm11122_vm15, %v11189_v20, %v11193_v40  ;;  %v11203_v33 = vshll.u32 %v20237_v39, 16  ;;  %v15415_v20 = vld [vmem:[#allocation4 + $0x3c0] ss:$8 sps:$4 sm:$0xff]   ;;  %v15418_v40 = vld [vmem:[#allocation4 + $0x3d0] ss:$8 sps:$4 sm:$0xff]  }
 0x4d7   : > { %11678 = vmatpush1.bf16.msra.mxu0 %v15382_v17  ;;  %v20192_v17 = vsel %vm11122_vm15, %v11165_v56, %v11169_v13  ;;  %v11177_v58 = vor.u32 %v11176_v32, %v11172_v42  ;;  %v11205_v47 = vrot.slane %v11203_v33, 1  ;;  %v11208_v42 = vshrl.u32 %v19954_v18, 16  ;;  %v15426_v33 = vld [vmem:[#allocation4 + $0x3f4] ss:$8 sps:$4 sm:$0xff]  }
 0x4d8   : > { %11679 = vmatprep.subr.bf16.mxu0 %v15387_v1  ;;  %v11179_v1 = vshll.u32 %v20188_v26, 16 }
 0x4da   : > { %11399 = vmatmul.mubr.bf16.gmra.mrb[4].mxu0 %v20153_v12 }
 0x4db   : > { %11408 = vmatprep.mubr.bf16.mxu0 %v21711_v4  ;;  %11680 = vmatpush1.bf16.msra.mxu0 %v15385_v61  ;;  %v12528_v61 = vrot.slane %v20009_v14, 1 }
 0x4dc   : > { %11681 = vmatprep.subr.bf16.mxu0 %v15390_v41  ;;  %v11181_v41 = vrot.slane %v11179_v1, 1 }
 0x4dd   : > { %v20214_v51 = vsel %vm12187_vm13, %v12528_v61, %v12529_v48 }
 0x4df   : > { %11682 = vmatpush1.bf16.msra.mxu0 %v15388_v30  ;;  %v20217_v30 = vsel %vm11122_vm15, %v11177_v58, %v11181_v41  ;;  %v15403_v41 = vld [vmem:[#allocation4 + $0x380] ss:$8 sps:$4 sm:$0xff]  }
 0x4e0   : > { %11683 = vmatprep.subr.bf16.mxu0 %v15393_v10  ;;  %v10092_v10 = vrot.slane %v9572_v27, %v21682_v15  ;;  %v15408_v27 = vld [vmem:[#allocation4 + $0x394] ss:$8 sps:$4 sm:$0xff]  }
 0x4e2   : > { %11409 = vmatmul.mubr.bf16.gmra.mrb[8].mxu0 %v20169_v22  ;;  %v10152_v2 = vsel %vm9682_vm10, %v10092_v10, 0.0  ;;  %v15409_v10 = vld [vmem:[#allocation4 + $0x3a0] ss:$8 sps:$4 sm:$0xff]  }
 0x4e3   : > { %11418 = vmatprep.mubr.bf16.mxu0 %v21711_v4  ;;  %11684 = vmatpush1.bf16.msra.mxu0 %v15391_v6  ;;  %v20234_v6 = vpack.c.bf16 %v10152_v2, %v10152_v2 }
 0x4e4   : > { %11685 = vmatprep.subr.bf16.mxu0 %v15396_v43  ;;  %v21750_v43 = vld [vmem:[#allocation122_spill] sm:$0xff] }
 0x4e5   : > { %v11198_v62 = vshll.u32 %v21750_v43, 16  ;;  %v11196_v15 = vshrl.u32 %v21750_v43, 16 }
 0x4e7   : > { %11686 = vmatpush1.bf16.msra.mxu0 %v15394_v7  ;;  %v12841_v7 = vrot.slane %v20234_v6, 1  ;;  %v11200_v21 = vrot.slane %v11198_v62, 1  ;;  %v15420_v62 = vld [vmem:[#allocation4 + $0x3d4] ss:$8 sps:$4 sm:$0xff]  }
 0x4e8   : > { %11687 = vmatprep.subr.bf16.mxu0 %v15399_v9  ;;  %v21751_v9 = vld [vmem:[#allocation128_spill] sm:$0xff] }
 0x4e9   : > { %vm21752_vm0 = vnez %v21751_v9  ;;  %v20251_v56 = vsel %vm12187_vm13, %v12840_v63, %v12841_v7  ;;  %v11201_v13 = vor.u32 %v11200_v21, %v11196_v15  ;;  %v15423_v63 = vld [vmem:[#allocation4 + $0x3e4] ss:$8 sps:$4 sm:$0xff]   ;;  %v15421_v15 = vld [vmem:[#allocation4 + $0x3e0] ss:$8 sps:$4 sm:$0xff]  }
 0x4ea   : > { %11419 = vmatmul.mubr.bf16.gmra.mrb[12].mxu0 %v20192_v17  ;;  %vm9676_vm4 = vmand %vm21752_vm0, %vm9652_vm3 }
 0x4eb   : > { %11428 = vmatprep.mubr.bf16.mxu0 %v21711_v4  ;;  %11688 = vmatpush1.bf16.msra.mxu0 %v15397_v35  ;;  %v10146_v36 = vsel %vm9676_vm4, %v10010_v31, 0.0  ;;  %v11210_v35 = vshll.u32 %v19954_v18, 16 }
 0x4ec   : > { %11689 = vmatprep.subr.bf16.mxu0 %v15402_v57  ;;  %v20257_v50 = vpack.c.bf16 %v10146_v36, %v10146_v36  ;;  %v20260_v57 = vsel %vm11122_vm15, %v11201_v13, %v11205_v47  ;;  %v15424_v36 = vld [vmem:[#allocation4 + $0x3f0] ss:$8 sps:$4 sm:$0xff]   ;;  %v15429_v13 = vld [vmem:[#allocation4 + $0x104] ss:$8 sps:$4 sm:$0xff]  }
 0x4ed   : > { %v11212_v32 = vrot.slane %v11210_v35, 1  ;;  %v11536_v35 = vshll.u32 %v20009_v14, 16 }
 0x4ee   : > { %v11215_v1 = vshll.u32 %v20257_v50, 16 }
 0x4ef   : > { %11690 = vmatpush1.bf16.msra.mxu0 %v15400_v37  ;;  %v11213_v37 = vor.u32 %v11212_v32, %v11208_v42  ;;  %v11538_v47 = vrot.slane %v11536_v35, 1  ;;  %v11534_v32 = vshrl.u32 %v20009_v14, 16  ;;  %v11541_v42 = vshll.u32 %v20198_v60, 16  ;;  %v15433_v14 = vld [vmem:[#allocation4 + $0x120] ss:$8 sps:$4 sm:$0xff]  }
 0x4f0   : > { %11994 = vmatprep.subr.bf16.mxu0 %v15405_v24  ;;  %v11217_v53 = vrot.slane %v11215_v1, 1  ;;  %v15438_v60 = vld [vmem:[#allocation4 + $0x134] ss:$8 sps:$4 sm:$0xff]   ;;  %v15451_v35 = vld [vmem:[#allocation4 + $0x280] ss:$8 sps:$4 sm:$0xff]  }
 0x4f1   : > { %v11539_v1 = vor.u32 %v11538_v47, %v11534_v32  ;;  %v12189_v47 = vrot.slane %v20120_v0, 1  ;;  %v15456_v32 = vld [vmem:[#allocation4 + $0x294] ss:$8 sps:$4 sm:$0xff]  }
 0x4f2   : > { %11429 = vmatmul.mubr.bf16.gmra.mrb[16].mxu0 %v20217_v30  ;;  %v20271_v29 = vsel %vm11122_vm15, %v11213_v37, %v11217_v53  ;;  %v11543_v37 = vrot.slane %v11541_v42, 1 }
 0x4f3   : > { %11438 = vmatprep.mubr.bf16.mxu0 %v21711_v4 }
 0x4f4   : > { %v11544_v53 = vsel %vm11122_vm15, %v11539_v1, %v11543_v37  ;;  %v12191_v1 = vrot.slane %v19586_v25, 1  ;;  %v12192_v37 = vrot.slane %v20134_v45, 1  ;;  %v15463_v25 = vld [vmem:[#allocation4 + $0x2c0] ss:$8 sps:$4 sm:$0xff]   ;;  %v15468_v45 = vld [vmem:[#allocation4 + $0x2d4] ss:$8 sps:$4 sm:$0xff]  }
 0x4f6   : > { %v12193_v0 = vsel %vm12187_vm13, %v12191_v1, %v12192_v37  ;;  %v13182_v37 = vld [vmem:[%s20562_s6] sm:$0x3] }
 0x4fa   : > { %11439 = vmatmul.mubr.bf16.gmra.mrb[20].mxu0 %v20243_v11 }
 0x4fb   : > { %11448 = vmatprep.mubr.bf16.mxu0 %v21711_v4 }
 0x502   : > { %11449 = vmatmul.mubr.bf16.gmra.mrb[24].mxu0 %v20260_v57 }
 0x503   : > { %11458 = vmatprep.mubr.bf16.mxu0 %v21711_v4 }
 0x505   : > { %v20266_v24 = vpop.f32.mrb[116].mxu1 }
 0x506   : > { %v20268_v58 = vpop.f32.mrb[117].mxu1 }
 0x507   : > { %v20273_v48 = vpop.f32.mrb[118].mxu1 }
 0x508   : > { %v20276_v61 = vpop.f32.mrb[119].mxu1 }
 0x50a   : > { %11459 = vmatmul.mubr.bf16.gmra.mrb[28].mxu0 %v20271_v29 }
 0x50b   : > { %11707 = vmatprep.mubr.bf16.mxu0 %v21711_v4 }
 0x512   : > { %11708 = vmatmul.mubr.bf16.vlgmr.msra.gmra.mrb[0].mxu0 %v20153_v12  ;;  %v15412_v12 = vld [vmem:[#allocation4 + $0x3b0] ss:$8 sps:$4 sm:$0xff]  }
 0x513   : > { %11995 = vmatpush1.bf16.msra.mxu0 %v15403_v41  ;;  %11717 = vmatprep.mubr.bf16.mxu0 %v21711_v4  ;;  %v15427_v41 = vld [vmem:[#allocation4 + $0x100] ss:$8 sps:$4 sm:$0xff]  }
 0x514   : > { %11996 = vmatprep.subr.bf16.mxu0 %v15408_v27  ;;  %v15432_v27 = vld [vmem:[#allocation4 + $0x114] ss:$8 sps:$4 sm:$0xff]  }
 0x517   : > { %11997 = vmatpush1.bf16.msra.mxu0 %v15406_v59  ;;  %v15430_v59 = vld [vmem:[#allocation4 + $0x110] ss:$8 sps:$4 sm:$0xff]  }
 0x518   : > { %v20281_v8 = vpop.f32.mrb[120].mxu1  ;;  %11998 = vmatprep.subr.bf16.mxu0 %v15411_v5  ;;  %v15435_v5 = vld [vmem:[#allocation4 + $0x124] ss:$8 sps:$4 sm:$0xff]  }
 0x519   : > { %v20283_v2 = vpop.f32.mrb[121].mxu1 }
 0x51a   : > { %11718 = vmatmul.mubr.bf16.gmra.mrb[4].mxu0 %v20169_v22  ;;  %v20286_v38 = vpop.f32.mrb[122].mxu1 }
 0x51b   : > { %v20288_v16 = vpop.f32.mrb[123].mxu1  ;;  %11727 = vmatprep.mubr.bf16.mxu0 %v21711_v4  ;;  %11999 = vmatpush1.bf16.msra.mxu0 %v15409_v10  ;;  %v15436_v10 = vld [vmem:[#allocation4 + $0x130] ss:$8 sps:$4 sm:$0xff]  }
 0x51c   : > { %12000 = vmatprep.subr.bf16.mxu0 %v15414_v54  ;;  %v15441_v54 = vld [vmem:[#allocation4 + $0x144] ss:$8 sps:$4 sm:$0xff]  }
 0x51f   : > { %12001 = vmatpush1.bf16.msra.mxu0 %v15412_v12  ;;  %v15444_v12 = vld [vmem:[#allocation4 + $0x154] ss:$8 sps:$4 sm:$0xff]  }
 0x520   : > { %12002 = vmatprep.subr.bf16.mxu0 %v15417_v49  ;;  %v15442_v49 = vld [vmem:[#allocation4 + $0x150] ss:$8 sps:$4 sm:$0xff]  }
 0x522   : > { %11728 = vmatmul.mubr.bf16.gmra.mrb[8].mxu0 %v20192_v17 }
 0x523   : > { %11737 = vmatprep.mubr.bf16.mxu0 %v21711_v4  ;;  %12003 = vmatpush1.bf16.msra.mxu0 %v15415_v20  ;;  %v15447_v20 = vld [vmem:[#allocation4 + $0x164] ss:$8 sps:$4 sm:$0xff]  }
 0x524   : > { %12004 = vmatprep.subr.bf16.mxu0 %v15420_v62  ;;  %v15450_v62 = vld [vmem:[#allocation4 + $0x174] ss:$8 sps:$4 sm:$0xff]  }
 0x525   : > { %v20293_v31 = vpop.f32.mrb[124].mxu1 }
 0x526   : > { %v20295_v7 = vpop.f32.mrb[125].mxu1 }
 0x527   : > { %v20297_v21 = vpop.f32.mrb[126].mxu1  ;;  %12005 = vmatpush1.bf16.msra.mxu0 %v15418_v40  ;;  %v15448_v40 = vld [vmem:[#allocation4 + $0x170] ss:$8 sps:$4 sm:$0xff]  }
 0x528   : > { %v20299_v9 = vpop.f32.mrb[127].mxu1  ;;  %12006 = vmatprep.subr.bf16.mxu0 %v15423_v63  ;;  %v15453_v63 = vld [vmem:[#allocation4 + $0x284] ss:$8 sps:$4 sm:$0xff]  }
 0x52a   : > { %11738 = vmatmul.mubr.bf16.gmra.mrb[12].mxu0 %v20217_v30 }
 0x52b   : > { %11747 = vmatprep.mubr.bf16.mxu0 %v21711_v4  ;;  %12007 = vmatpush1.bf16.msra.mxu0 %v15421_v15 }
 0x52c   : > { %12008 = vmatprep.subr.bf16.mxu0 %v15426_v33  ;;  %v11860_v33 = vshll.u32 %v20234_v6, 16  ;;  %v15459_v6 = vld [vmem:[#allocation4 + $0x2a4] ss:$8 sps:$4 sm:$0xff]  }
 0x52f   : > { %12009 = vmatpush1.bf16.msra.mxu0 %v15424_v36 }
 0x530   : > { %12349 = vmatprep.subr.bf16.mxu0 %v15429_v13  ;;  %v11862_v13 = vrot.slane %v11860_v33, 1  ;;  %v15480_v33 = vld [vmem:[#allocation4 + $0x414] ss:$8 sps:$4 sm:$0xff]  }
 0x532   : > { %11748 = vmatmul.mubr.bf16.gmra.mrb[16].mxu0 %v20243_v11 }
 0x533   : > { %11757 = vmatprep.mubr.bf16.mxu0 %v21711_v4 }
 0x53a   : > { %11758 = vmatmul.mubr.bf16.gmra.mrb[20].mxu0 %v20260_v57 }
 0x53b   : > { %11767 = vmatprep.mubr.bf16.mxu0 %v21711_v4 }
 0x542   : > { %11768 = vmatmul.mubr.bf16.gmra.mrb[24].mxu0 %v20271_v29 }
 0x543   : > { %11777 = vmatprep.mubr.bf16.mxu0 %v21711_v4 }
 0x54a   : > { %11778 = vmatmul.mubr.bf16.gmra.mrb[28].mxu0 %v11544_v53 }
 0x54b   : > { %12026 = vmatprep.mubr.bf16.mxu0 %v21711_v4 }
 0x552   : > { %12027 = vmatmul.mubr.bf16.vlgmr.msra.gmra.mrb[0].mxu0 %v20169_v22  ;;  %v15439_v22 = vld [vmem:[#allocation4 + $0x140] ss:$8 sps:$4 sm:$0xff]  }
 0x553   : > { %12350 = vmatpush1.bf16.msra.mxu0 %v15427_v41  ;;  %12036 = vmatprep.mubr.bf16.mxu0 %v21711_v4  ;;  %v15460_v41 = vld [vmem:[#allocation4 + $0x2b0] ss:$8 sps:$4 sm:$0xff]  }
 0x554   : > { %12351 = vmatprep.subr.bf16.mxu0 %v15432_v27  ;;  %v15465_v27 = vld [vmem:[#allocation4 + $0x2c4] ss:$8 sps:$4 sm:$0xff]  }
 0x557   : > { %12352 = vmatpush1.bf16.msra.mxu0 %v15430_v59  ;;  %v12194_v59 = vrot.slane %v19680_v28, 1  ;;  %v12198_v28 = vrot.slane %v20164_v23, 1 }
 0x558   : > { %12353 = vmatprep.subr.bf16.mxu0 %v15435_v5  ;;  %v12195_v5 = vrot.slane %v20149_v34, 1  ;;  %v15469_v34 = vld [vmem:[#allocation4 + $0x2e0] ss:$8 sps:$4 sm:$0xff]  }
 0x55a   : > { %12037 = vmatmul.mubr.bf16.gmra.mrb[4].mxu0 %v20192_v17  ;;  %v15445_v17 = vld [vmem:[#allocation4 + $0x160] ss:$8 sps:$4 sm:$0xff]  }
 0x55b   : > { %12046 = vmatprep.mubr.bf16.mxu0 %v21711_v4  ;;  %12354 = vmatpush1.bf16.msra.mxu0 %v15433_v14  ;;  %v20343_v14 = vsel %vm12187_vm13, %v12194_v59, %v12195_v5 }
 0x55c   : > { %12355 = vmatprep.subr.bf16.mxu0 %v15438_v60  ;;  %v15466_v60 = vld [vmem:[#allocation4 + $0x2d0] ss:$8 sps:$4 sm:$0xff]  }
 0x55f   : > { %12356 = vmatpush1.bf16.msra.mxu0 %v15436_v10  ;;  %v15471_v10 = vld [vmem:[#allocation4 + $0x2e4] ss:$8 sps:$4 sm:$0xff]  }
 0x560   : > { %12357 = vmatprep.subr.bf16.mxu0 %v15441_v54  ;;  %v12197_v54 = vrot.slane %v19796_v19, 1  ;;  %v12201_v19 = vrot.slane %v20188_v26, 1  ;;  %v12207_v26 = vrot.slane %v20237_v39, 1  ;;  %v15483_v39 = vld [vmem:[#allocation4 + $0x424] ss:$8 sps:$4 sm:$0xff]  }
 0x562   : > { %12047 = vmatmul.mubr.bf16.gmra.mrb[8].mxu0 %v20217_v30  ;;  %v11855_v30 = vshll.u32 %v20039_v55, 16 }
 0x563   : > { %12056 = vmatprep.mubr.bf16.mxu0 %v21711_v4  ;;  %12358 = vmatpush1.bf16.msra.mxu0 %v15439_v22  ;;  %v15474_v22 = vld [vmem:[#allocation4 + $0x2f4] ss:$8 sps:$4 sm:$0xff]  }
 0x564   : > { %12359 = vmatprep.subr.bf16.mxu0 %v15444_v12  ;;  %v11857_v15 = vrot.slane %v11855_v30, 1  ;;  %v20350_v12 = vsel %vm12187_vm13, %v12197_v54, %v12198_v28  ;;  %v13259_v54 = vld [vmem:[%s20416_s18 + $0x8] sm:$0xff] }
 0x567   : > { %12360 = vmatpush1.bf16.msra.mxu0 %v15442_v49  ;;  %v15472_v49 = vld [vmem:[#allocation4 + $0x2f0] ss:$8 sps:$4 sm:$0xff]  }
 0x568   : > { %12361 = vmatprep.subr.bf16.mxu0 %v15447_v20  ;;  %v15477_v20 = vld [vmem:[#allocation4 + $0x404] ss:$8 sps:$4 sm:$0xff]  }
 0x56a   : > { %12057 = vmatmul.mubr.bf16.gmra.mrb[12].mxu0 %v20243_v11  ;;  %v11853_v11 = vshrl.u32 %v20039_v55, 16  ;;  %v15454_v55 = vld [vmem:[#allocation4 + $0x290] ss:$8 sps:$4 sm:$0xff]  }
 0x56b   : > { %12066 = vmatprep.mubr.bf16.mxu0 %v21711_v4  ;;  %12362 = vmatpush1.bf16.msra.mxu0 %v15445_v17  ;;  %v12200_v17 = vrot.slane %v19912_v46, 1  ;;  %v12206_v46 = vrot.slane %v21750_v43, 1  ;;  %v15478_v43 = vld [vmem:[#allocation4 + $0x410] ss:$8 sps:$4 sm:$0xff]  }
 0x56c   : > { %12363 = vmatprep.subr.bf16.mxu0 %v15450_v62  ;;  %v11858_v36 = vor.u32 %v11857_v15, %v11853_v11  ;;  %v12203_v62 = vrot.slane %v19743_v3, 1  ;;  %v12209_v3 = vrot.slane %v19954_v18, 1  ;;  %v15475_v11 = vld [vmem:[#allocation4 + $0x400] ss:$8 sps:$4 sm:$0xff]   ;;  %v15486_v18 = vld [vmem:[#allocation4 + $0x434] ss:$8 sps:$4 sm:$0xff]  }
 0x56d   : > { %v20357_v23 = vsel %vm12187_vm13, %v12200_v17, %v12201_v19  ;;  %v12208_v30 = vsel %vm12187_vm13, %v12206_v46, %v12207_v26  ;;  %v13262_v46 = vld [vmem:[%s20416_s18 + $0x20] sm:$0xff] }
 0x56f   : > { %12364 = vmatpush1.bf16.msra.mxu0 %v15448_v40  ;;  %v12204_v40 = vrot.slane %v20207_v44, 1  ;;  %v12210_v44 = vrot.slane %v20257_v50, 1  ;;  %v15484_v50 = vld [vmem:[#allocation4 + $0x430] ss:$8 sps:$4 sm:$0xff]  }
 0x570   : > { %12661 = vmatprep.subr.bf16.mxu0 %v15453_v63 }
 0x571   : > { %v20364_v63 = vsel %vm12187_vm13, %v12203_v62, %v12204_v40  ;;  %v12211_v15 = vsel %vm12187_vm13, %v12209_v3, %v12210_v44  ;;  %v13263_v44 = vld [vmem:[%s20416_s18 + $0x28] sm:$0xff] }
 0x572   : > { %12067 = vmatmul.mubr.bf16.gmra.mrb[16].mxu0 %v20260_v57  ;;  %v11863_v57 = vsel %vm11122_vm15, %v11858_v36, %v11862_v13  ;;  %v15481_v36 = vld [vmem:[#allocation4 + $0x420] ss:$8 sps:$4 sm:$0xff]   ;;  %v15489_v13 = vld [vmem:[#allocation4 + $0x444] ss:$8 sps:$4 sm:$0xff]  }
 0x573   : > { %12076 = vmatprep.mubr.bf16.mxu0 %v21711_v4 }
 0x57a   : > { %12077 = vmatmul.mubr.bf16.gmra.mrb[20].mxu0 %v20271_v29  ;;  %v12188_v29 = vrot.slane %v19559_v52, 1  ;;  %v15462_v52 = vld [vmem:[#allocation4 + $0x2b4] ss:$8 sps:$4 sm:$0xff]  }
 0x57b   : > { %12086 = vmatprep.mubr.bf16.mxu0 %v21711_v4 }
 0x57c   : > { %v12190_v42 = vsel %vm12187_vm13, %v12188_v29, %v12189_v47  ;;  %v15492_v29 = vld [vmem:[#allocation4 + $0x454] ss:$8 sps:$4 sm:$0xff]   ;;  %v15495_v47 = vld [vmem:[#allocation4 + $0x464] ss:$8 sps:$4 sm:$0xff]  }
 0x582   : > { %12087 = vmatmul.mubr.bf16.gmra.mrb[24].mxu0 %v11544_v53  ;;  %v15457_v53 = vld [vmem:[#allocation4 + $0x2a0] ss:$8 sps:$4 sm:$0xff]  }
 0x583   : > { %12096 = vmatprep.mubr.bf16.mxu0 %v21711_v4 }
 0x58a   : > { %12097 = vmatmul.mubr.bf16.gmra.mrb[28].mxu0 %v11863_v57  ;;  %v15487_v57 = vld [vmem:[#allocation4 + $0x440] ss:$8 sps:$4 sm:$0xff]  }
 0x58b   : > { %12381 = vmatprep.mubr.bf16.mxu0 %v21711_v4 }
 0x592   : > { %12382 = vmatmul.mubr.bf16.vlgmr.msra.gmra.mrb[0].mxu0 %v12190_v42  ;;  %v15498_v42 = vld [vmem:[#allocation4 + $0x474] ss:$8 sps:$4 sm:$0xff]  }
 0x593   : > { %12662 = vmatpush1.bf16.msra.mxu0 %v15451_v35  ;;  %12391 = vmatprep.mubr.bf16.mxu0 %v21711_v4  ;;  %v15490_v35 = vld [vmem:[#allocation4 + $0x450] ss:$8 sps:$4 sm:$0xff]  }
 0x594   : > { %12663 = vmatprep.subr.bf16.mxu0 %v15456_v32  ;;  %v15493_v32 = vld [vmem:[#allocation4 + $0x460] ss:$8 sps:$4 sm:$0xff]  }
 0x597   : > { %12664 = vmatpush1.bf16.msra.mxu0 %v15454_v55  ;;  %v15496_v55 = vld [vmem:[#allocation4 + $0x470] ss:$8 sps:$4 sm:$0xff]  }
 0x598   : > { %12665 = vmatprep.subr.bf16.mxu0 %v15459_v6  ;;  %v21753_v6 = vld [vmem:[#allocation13_spill] sm:$0xff] }
 0x599   : > { %v13186_v1 = vsub.s32 0, %v21753_v6 }
 0x59a   : > { %12392 = vmatmul.mubr.bf16.gmra.mrb[4].mxu0 %v12193_v0 }
 0x59b   : > { %12401 = vmatprep.mubr.bf16.mxu0 %v21711_v4  ;;  %12666 = vmatpush1.bf16.msra.mxu0 %v15457_v53  ;;  %v13190_v53 = vsub.s32 1, %v21753_v6 }
 0x59c   : > { %12667 = vmatprep.subr.bf16.mxu0 %v15462_v52  ;;  %v20409_v52 = vrot.slane %v13182_v37, %v13186_v1 }
 0x59f   : > { %12668 = vmatpush1.bf16.msra.mxu0 %v15460_v41 }
 0x5a0   : > { %12669 = vmatprep.subr.bf16.mxu0 %v15465_v27 }
 0x5a2   : > { %12402 = vmatmul.mubr.bf16.gmra.mrb[8].mxu0 %v20343_v14 }
 0x5a3   : > { %12411 = vmatprep.mubr.bf16.mxu0 %v21711_v4  ;;  %12670 = vmatpush1.bf16.msra.mxu0 %v15463_v25 }
 0x5a4   : > { %12671 = vmatprep.subr.bf16.mxu0 %v15468_v45  ;;  %v13258_v45 = vld [vmem:[%s20416_s18] sm:$0xff] }
 0x5a7   : > { %12672 = vmatpush1.bf16.msra.mxu0 %v15466_v60  ;;  %v13260_v60 = vld [vmem:[%s20416_s18 + $0x10] sm:$0xff] }
 0x5a8   : > { %12673 = vmatprep.subr.bf16.mxu0 %v15471_v10 }
 0x5aa   : > { %12412 = vmatmul.mubr.bf16.gmra.mrb[12].mxu0 %v20350_v12 }
 0x5ab   : > { %12421 = vmatprep.mubr.bf16.mxu0 %v21711_v4  ;;  %12674 = vmatpush1.bf16.msra.mxu0 %v15469_v34  ;;  %v13261_v34 = vld [vmem:[%s20416_s18 + $0x18] sm:$0xff] }
 0x5ac   : > { %12675 = vmatprep.subr.bf16.mxu0 %v15474_v22 }
 0x5af   : > { %12676 = vmatpush1.bf16.msra.mxu0 %v15472_v49 }
 0x5b0   : > { %12973 = vmatprep.subr.bf16.mxu0 %v15477_v20 }
 0x5b2   : > { %12422 = vmatmul.mubr.bf16.gmra.mrb[16].mxu0 %v20357_v23 }
 0x5b3   : > { %12431 = vmatprep.mubr.bf16.mxu0 %v21711_v4 }
 0x5ba   : > { %12432 = vmatmul.mubr.bf16.gmra.mrb[20].mxu0 %v20364_v63 }
 0x5bb   : > { %12441 = vmatprep.mubr.bf16.mxu0 %v21711_v4 }
 0x5c2   : > { %12442 = vmatmul.mubr.bf16.gmra.mrb[24].mxu0 %v12208_v30 }
 0x5c3   : > { %12451 = vmatprep.mubr.bf16.mxu0 %v21711_v4 }
 0x5ca   : > { %12452 = vmatmul.mubr.bf16.gmra.mrb[28].mxu0 %v12211_v15 }
 0x5cb   : > { %12693 = vmatprep.mubr.bf16.mxu0 %v21711_v4 }
 0x5d2   : > { %12694 = vmatmul.mubr.bf16.vlgmr.msra.gmra.mrb[0].mxu0 %v12193_v0  ;;  %v20411_v0 = vrot.slane %v13182_v37, %v13190_v53  ;;  %v13266_v53 = vld [vmem:[%s20416_s18 + $0x40] sm:$0xff] }
 0x5d3   : > { %12974 = vmatpush1.bf16.msra.mxu0 %v15475_v11  ;;  %12703 = vmatprep.mubr.bf16.mxu0 %v21711_v4 }
 0x5d4   : > { %12975 = vmatprep.subr.bf16.mxu0 %v15480_v33 }
 0x5d7   : > { %12976 = vmatpush1.bf16.msra.mxu0 %v15478_v43  ;;  %v13264_v43 = vld [vmem:[%s20416_s18 + $0x30] sm:$0xff] }
 0x5d8   : > { %12977 = vmatprep.subr.bf16.mxu0 %v15483_v39 }
 0x5da   : > { %12704 = vmatmul.mubr.bf16.gmra.mrb[4].mxu0 %v20343_v14 }
 0x5db   : > { %12713 = vmatprep.mubr.bf16.mxu0 %v21711_v4  ;;  %12978 = vmatpush1.bf16.msra.mxu0 %v15481_v36 }
 0x5dc   : > { %12979 = vmatprep.subr.bf16.mxu0 %v15486_v18 }
 0x5df   : > { %12980 = vmatpush1.bf16.msra.mxu0 %v15484_v50  ;;  %v13265_v50 = vld [vmem:[%s20416_s18 + $0x38] sm:$0xff] }
 0x5e0   : > { %12981 = vmatprep.subr.bf16.mxu0 %v15489_v13 }
 0x5e2   : > { %12714 = vmatmul.mubr.bf16.gmra.mrb[8].mxu0 %v20350_v12 }
 0x5e3   : > { %12723 = vmatprep.mubr.bf16.mxu0 %v21711_v4  ;;  %12982 = vmatpush1.bf16.msra.mxu0 %v15487_v57 }
 0x5e4   : > { %12983 = vmatprep.subr.bf16.mxu0 %v15492_v29 }
 0x5e7   : > { %12984 = vmatpush1.bf16.msra.mxu0 %v15490_v35 }
 0x5e8   : > { %12985 = vmatprep.subr.bf16.mxu0 %v15495_v47 }
 0x5ea   : > { %12724 = vmatmul.mubr.bf16.gmra.mrb[12].mxu0 %v20357_v23 }
 0x5eb   : > { %12733 = vmatprep.mubr.bf16.mxu0 %v21711_v4  ;;  %12986 = vmatpush1.bf16.msra.mxu0 %v15493_v32 }
 0x5ec   : > { %12987 = vmatprep.subr.bf16.mxu0 %v15498_v42 }
 0x5ef   : > { %12988 = vmatpush1.bf16.msra.mxu0 %v15496_v55 }
 0x5f2   : > { %12734 = vmatmul.mubr.bf16.gmra.mrb[16].mxu0 %v20364_v63 }
 0x5f3   : > { %12743 = vmatprep.mubr.bf16.mxu0 %v21711_v4 }
 0x5fa   : > { %12744 = vmatmul.mubr.bf16.gmra.mrb[20].mxu0 %v12208_v30 }
 0x5fb   : > { %12753 = vmatprep.mubr.bf16.mxu0 %v21711_v4 }
 0x602   : > { %12754 = vmatmul.mubr.bf16.gmra.mrb[24].mxu0 %v12211_v15 }
 0x603   : > { %12763 = vmatprep.mubr.bf16.mxu0 %v21711_v4 }
 0x60a   : > { %12764 = vmatmul.mubr.bf16.gmra.mrb[28].mxu0 %v20214_v51 }
 0x60b   : > { %13005 = vmatprep.mubr.bf16.mxu0 %v21711_v4 }
 0x612   : > { %13006 = vmatmul.mubr.bf16.vlgmr.msra.gmra.mrb[0].mxu0 %v20343_v14 }
 0x613   : > { %13015 = vmatprep.mubr.bf16.mxu0 %v21711_v4 }
 0x61a   : > { %13016 = vmatmul.mubr.bf16.gmra.mrb[4].mxu0 %v20350_v12 }
 0x61b   : > { %13025 = vmatprep.mubr.bf16.mxu0 %v21711_v4 }
 0x622   : > { %13026 = vmatmul.mubr.bf16.gmra.mrb[8].mxu0 %v20357_v23 }
 0x623   : > { %13035 = vmatprep.mubr.bf16.mxu0 %v21711_v4 }
 0x62a   : > { %13036 = vmatmul.mubr.bf16.gmra.mrb[12].mxu0 %v20364_v63 }
 0x62b   : > { %13045 = vmatprep.mubr.bf16.mxu0 %v21711_v4 }
 0x632   : > { %13046 = vmatmul.mubr.bf16.gmra.mrb[16].mxu0 %v12208_v30 }
 0x633   : > { %13055 = vmatprep.mubr.bf16.mxu0 %v21711_v4 }
 0x63a   : > { %13056 = vmatmul.mubr.bf16.gmra.mrb[20].mxu0 %v12211_v15 }
 0x63b   : > { %13065 = vmatprep.mubr.bf16.mxu0 %v21711_v4 }
 0x642   : > { %13066 = vmatmul.mubr.bf16.gmra.mrb[24].mxu0 %v20214_v51 }
 0x643   : > { %13075 = vmatprep.mubr.bf16.mxu0 %v21711_v4 }
 0x64a   : > { %13076 = vmatmul.mubr.bf16.gmra.mrb[28].mxu0 %v20251_v56 }
 0x6e5   : > { %v13007_v51 = vpop.f32.mrb[0].mxu0 }
 0x6e6   : > { %v13194_v4 = vadd.f32 %v20409_v52, %v13007_v51  ;;  %v13009_v56 = vpop.f32.mrb[1].mxu0 }
 0x6e7   : > { %v13195_v41 = vadd.f32 %v20411_v0, %v13009_v56  ;;  %v13011_v27 = vpop.f32.mrb[2].mxu0 }
 0x6e8   : > { %v13226_v59 = vmax.f32 %v13194_v4, 0.0  ;;  %v13196_v5 = vadd.f32 %v20409_v52, %v13011_v27  ;;  %v13013_v25 = vpop.f32.mrb[3].mxu0 }
 0x6e9   : > { %v13227_v14 = vmax.f32 %v13195_v41, 0.0  ;;  %v13197_v10 = vadd.f32 %v20411_v0, %v13013_v25  ;;  %v13267_v41 = vld [vmem:[%s20416_s18 + $0x48] sm:$0xff]  ;;  %v13268_v25 = vld [vmem:[%s20416_s18 + $0x50] sm:$0xff] }
 0x6ea   : > { %v13228_v28 = vmax.f32 %v13196_v5, 0.0  ;;  %v13290_v12 = vmul.f32 %v13258_v45, %v13226_v59 }
 0x6eb   : > { %v13229_v22 = vmax.f32 %v13197_v10, 0.0  ;;  %v13291_v20 = vmul.f32 %v13259_v54, %v13227_v14  ;;  %v13269_v10 = vld [vmem:[%s20416_s18 + $0x58] sm:$0xff] }
 0x6ec   : > { %v13292_v49 = vmul.f32 %v13260_v60, %v13228_v28 }
 0x6ed   : > { %v13293_v17 = vmul.f32 %v13261_v34, %v13229_v22  ;;  %v13017_v19 = vpop.f32.mrb[4].mxu0 }
 0x6ee   : > { %v13322_v23 = vadd.f32 %v13292_v49, %v13290_v12  ;;  %v13198_v62 = vadd.f32 %v20409_v52, %v13017_v19  ;;  %v13019_v40 = vpop.f32.mrb[5].mxu0 }
 0x6ef   : > { %v13343_v63 = vadd.f32 %v13293_v17, %v13291_v20  ;;  %v13199_v26 = vadd.f32 %v20411_v0, %v13019_v40  ;;  %v13021_v30 = vpop.f32.mrb[6].mxu0  ;;  %v13270_v40 = vld [vmem:[%s20416_s18 + $0x60] sm:$0xff] }
 0x6f0   : > { %v13230_v3 = vmax.f32 %v13198_v62, 0.0  ;;  %v13200_v15 = vadd.f32 %v20409_v52, %v13021_v30  ;;  %v13023_v11 = vpop.f32.mrb[7].mxu0  ;;  %v13271_v30 = vld [vmem:[%s20416_s18 + $0x68] sm:$0xff] }
 0x6f1   : > { %v13231_v33 = vmax.f32 %v13199_v26, 0.0  ;;  %v13201_v39 = vadd.f32 %v20411_v0, %v13023_v11  ;;  %v13272_v11 = vld [vmem:[%s20416_s18 + $0x70] sm:$0xff] }
 0x6f2   : > { %v13294_v36 = vmul.f32 %v13262_v46, %v13230_v3  ;;  %v13232_v18 = vmax.f32 %v13200_v15, 0.0 }
 0x6f3   : > { %v13295_v13 = vmul.f32 %v13263_v44, %v13231_v33  ;;  %v13233_v57 = vmax.f32 %v13201_v39, 0.0 }
 0x6f4   : > { %v13323_v29 = vadd.f32 %v13322_v23, %v13294_v36  ;;  %v13296_v35 = vmul.f32 %v13264_v43, %v13232_v18  ;;  %v13273_v36 = vld [vmem:[%s20416_s18 + $0x78] sm:$0xff] }
 0x6f5   : > { %v13344_v47 = vadd.f32 %v13343_v63, %v13295_v13  ;;  %v13297_v32 = vmul.f32 %v13265_v50, %v13233_v57  ;;  %v13027_v42 = vpop.f32.mrb[8].mxu0 }
 0x6f6   : > { %v13324_v55 = vadd.f32 %v13323_v29, %v13296_v35  ;;  %v13202_v6 = vadd.f32 %v20409_v52, %v13027_v42  ;;  %v13029_v1 = vpop.f32.mrb[9].mxu0 }
 0x6f7   : > { %v13345_v37 = vadd.f32 %v13344_v47, %v13297_v32  ;;  %v13203_v51 = vadd.f32 %v20411_v0, %v13029_v1  ;;  %v13031_v4 = vpop.f32.mrb[10].mxu0  ;;  %v13274_v1 = vld [vmem:[%s20416_s18 + $0x80] sm:$0xff] }
 0x6f8   : > { %v13234_v56 = vmax.f32 %v13202_v6, 0.0  ;;  %v13204_v27 = vadd.f32 %v20409_v52, %v13031_v4  ;;  %v13033_v59 = vpop.f32.mrb[11].mxu0  ;;  %v13275_v4 = vld [vmem:[%s20416_s18 + $0x88] sm:$0xff] }
 0x6f9   : > { %v13235_v5 = vmax.f32 %v13203_v51, 0.0  ;;  %v13205_v45 = vadd.f32 %v20411_v0, %v13033_v59  ;;  %v13276_v59 = vld [vmem:[%s20416_s18 + $0x90] sm:$0xff] }
 0x6fa   : > { %v13298_v14 = vmul.f32 %v13266_v53, %v13234_v56  ;;  %v13236_v60 = vmax.f32 %v13204_v27, 0.0 }
 0x6fb   : > { %v13299_v54 = vmul.f32 %v13267_v41, %v13235_v5  ;;  %v13237_v28 = vmax.f32 %v13205_v45, 0.0 }
 0x6fc   : > { %v13325_v34 = vadd.f32 %v13324_v55, %v13298_v14  ;;  %v13300_v22 = vmul.f32 %v13268_v25, %v13236_v60  ;;  %v13277_v14 = vld [vmem:[%s20416_s18 + $0x98] sm:$0xff] }
 0x6fd   : > { %v13346_v12 = vadd.f32 %v13345_v37, %v13299_v54  ;;  %v13301_v49 = vmul.f32 %v13269_v10, %v13237_v28  ;;  %v13037_v20 = vpop.f32.mrb[12].mxu0 }
 0x6fe   : > { %v13326_v17 = vadd.f32 %v13325_v34, %v13300_v22  ;;  %v13206_v19 = vadd.f32 %v20409_v52, %v13037_v20  ;;  %v13039_v23 = vpop.f32.mrb[13].mxu0 }
 0x6ff   : > { %v13347_v62 = vadd.f32 %v13346_v12, %v13301_v49  ;;  %v13207_v63 = vadd.f32 %v20411_v0, %v13039_v23  ;;  %v13041_v46 = vpop.f32.mrb[14].mxu0 }
 0x700   : > { %v13238_v26 = vmax.f32 %v13206_v19, 0.0  ;;  %v13208_v3 = vadd.f32 %v20409_v52, %v13041_v46  ;;  %v13043_v44 = vpop.f32.mrb[15].mxu0 }
 0x701   : > { %v13239_v15 = vmax.f32 %v13207_v63, 0.0  ;;  %v13209_v33 = vadd.f32 %v20411_v0, %v13043_v44 }
 0x702   : > { %v13302_v43 = vmul.f32 %v13270_v40, %v13238_v26  ;;  %v13240_v39 = vmax.f32 %v13208_v3, 0.0  ;;  %v13278_v26 = vld [vmem:[%s20416_s18 + $0xa0] sm:$0xff] }
 0x703   : > { %v13303_v18 = vmul.f32 %v13271_v30, %v13239_v15  ;;  %v13241_v50 = vmax.f32 %v13209_v33, 0.0  ;;  %v13279_v15 = vld [vmem:[%s20416_s18 + $0xa8] sm:$0xff]  ;;  %v13280_v33 = vld [vmem:[%s20416_s18 + $0xb0] sm:$0xff] }
 0x704   : > { %v13327_v13 = vadd.f32 %v13326_v17, %v13302_v43  ;;  %v13304_v57 = vmul.f32 %v13272_v11, %v13240_v39 }
 0x705   : > { %v13348_v29 = vadd.f32 %v13347_v62, %v13303_v18  ;;  %v13305_v35 = vmul.f32 %v13273_v36, %v13241_v50  ;;  %v13047_v47 = vpop.f32.mrb[16].mxu0  ;;  %v13281_v36 = vld [vmem:[%s20416_s18 + $0xb8] sm:$0xff] }
 0x706   : > { %v13328_v32 = vadd.f32 %v13327_v13, %v13304_v57  ;;  %v13210_v42 = vadd.f32 %v20409_v52, %v13047_v47  ;;  %v13049_v55 = vpop.f32.mrb[17].mxu0 }
 0x707   : > { %v13349_v6 = vadd.f32 %v13348_v29, %v13305_v35  ;;  %v13211_v37 = vadd.f32 %v20411_v0, %v13049_v55  ;;  %v13051_v53 = vpop.f32.mrb[18].mxu0 }
 0x708   : > { %v13242_v51 = vmax.f32 %v13210_v42, 0.0  ;;  %v13212_v56 = vadd.f32 %v20409_v52, %v13051_v53  ;;  %v13053_v41 = vpop.f32.mrb[19].mxu0 }
 0x709   : > { %v13243_v27 = vmax.f32 %v13211_v37, 0.0  ;;  %v13213_v5 = vadd.f32 %v20411_v0, %v13053_v41  ;;  %v13283_v41 = vld [vmem:[%s20416_s18 + $0xc8] sm:$0xff] }
 0x70a   : > { %v13306_v25 = vmul.f32 %v13274_v1, %v13242_v51  ;;  %v13244_v45 = vmax.f32 %v13212_v56, 0.0  ;;  %v13282_v51 = vld [vmem:[%s20416_s18 + $0xc0] sm:$0xff] }
 0x70b   : > { %v13307_v60 = vmul.f32 %v13275_v4, %v13243_v27  ;;  %v13245_v10 = vmax.f32 %v13213_v5, 0.0 }
 0x70c   : > { %v13329_v54 = vadd.f32 %v13328_v32, %v13306_v25  ;;  %v13308_v28 = vmul.f32 %v13276_v59, %v13244_v45 }
 0x70d   : > { %v13350_v34 = vadd.f32 %v13349_v6, %v13307_v60  ;;  %v13309_v22 = vmul.f32 %v13277_v14, %v13245_v10  ;;  %v13057_v12 = vpop.f32.mrb[20].mxu0  ;;  %v13285_v14 = vld [vmem:[%s20416_s18 + $0xd8] sm:$0xff] }
 0x70e   : > { %v13330_v49 = vadd.f32 %v13329_v54, %v13308_v28  ;;  %v14739_v20 = vadd.f32 %v13057_v12, %v20266_v24  ;;  %v13059_v17 = vpop.f32.mrb[21].mxu0 }
 0x70f   : > { %v13351_v19 = vadd.f32 %v13350_v34, %v13309_v22  ;;  %v14740_v23 = vadd.f32 %v13059_v17, %v20268_v58  ;;  %v13061_v62 = vpop.f32.mrb[22].mxu0 }
 0x710   : > { %v13214_v40 = vadd.f32 %v14739_v20, %v20409_v52  ;;  %v14741_v63 = vadd.f32 %v13061_v62, %v20273_v48  ;;  %v13063_v46 = vpop.f32.mrb[23].mxu0 }
 0x711   : > { %v13215_v30 = vadd.f32 %v14740_v23, %v20411_v0  ;;  %v14742_v3 = vadd.f32 %v13063_v46, %v20276_v61 }
 0x712   : > { %v13246_v44 = vmax.f32 %v13214_v40, 0.0  ;;  %v13216_v24 = vadd.f32 %v14741_v63, %v20409_v52  ;;  %v13286_v63 = vld [vmem:[%s20416_s18 + $0xe0] sm:$0xff] }
 0x713   : > { %v13247_v11 = vmax.f32 %v13215_v30, 0.0  ;;  %v13217_v58 = vadd.f32 %v14742_v3, %v20411_v0  ;;  %v13287_v30 = vld [vmem:[%s20416_s18 + $0xe8] sm:$0xff] }
 0x714   : > { %v13310_v43 = vmul.f32 %v13278_v26, %v13246_v44  ;;  %v13248_v39 = vmax.f32 %v13216_v24, 0.0 }
 0x715   : > { %v13311_v18 = vmul.f32 %v13279_v15, %v13247_v11  ;;  %v13249_v48 = vmax.f32 %v13217_v58, 0.0  ;;  %v13067_v50 = vpop.f32.mrb[24].mxu0 }
 0x716   : > { %v13331_v13 = vadd.f32 %v13330_v49, %v13310_v43  ;;  %v13312_v57 = vmul.f32 %v13280_v33, %v13248_v39  ;;  %v14743_v61 = vadd.f32 %v13067_v50, %v20281_v8  ;;  %v13069_v29 = vpop.f32.mrb[25].mxu0  ;;  %v13289_v33 = vld [vmem:[%s20416_s18 + $0xf8] sm:$0xff] }
 0x717   : > { %v13352_v35 = vadd.f32 %v13351_v19, %v13311_v18  ;;  %v13313_v47 = vmul.f32 %v13281_v36, %v13249_v48  ;;  %v14744_v32 = vadd.f32 %v13069_v29, %v20283_v2  ;;  %v13071_v42 = vpop.f32.mrb[26].mxu0  ;;  %v13284_v2 = vld [vmem:[%s20416_s18 + $0xd0] sm:$0xff] }
 0x718   : > { %v13332_v55 = vadd.f32 %v13331_v13, %v13312_v57  ;;  %v13218_v6 = vadd.f32 %v14743_v61, %v20409_v52  ;;  %v14745_v1 = vadd.f32 %v13071_v42, %v20286_v38  ;;  %v13073_v37 = vpop.f32.mrb[27].mxu0 }
 0x719   : > { %v13353_v53 = vadd.f32 %v13352_v35, %v13313_v47  ;;  %v13219_v4 = vadd.f32 %v14744_v32, %v20411_v0  ;;  %v14746_v8 = vadd.f32 %v13073_v37, %v20288_v16 }
 0x71a   : > { %v13250_v56 = vmax.f32 %v13218_v6, 0.0  ;;  %v13220_v27 = vadd.f32 %v14745_v1, %v20409_v52  ;;  %v21754_v1 = vld [vmem:[#allocation16_spill] sm:$0xff] }
 0x71b   : > { %v13251_v59 = vmax.f32 %v13219_v4, 0.0  ;;  %v13221_v5 = vadd.f32 %v14746_v8, %v20411_v0 }
 0x71c   : > { %v13314_v25 = vmul.f32 %v13282_v51, %v13250_v56  ;;  %v13252_v45 = vmax.f32 %v13220_v27, 0.0 }
 0x71d   : > { %v13315_v60 = vmul.f32 %v13283_v41, %v13251_v59  ;;  %v13253_v38 = vmax.f32 %v13221_v5, 0.0  ;;  %v13077_v10 = vpop.f32.mrb[28].mxu0 }
 0x71e   : > { %v13333_v54 = vadd.f32 %v13332_v55, %v13314_v25  ;;  %v13316_v28 = vmul.f32 %v13284_v2, %v13252_v45  ;;  %v14747_v16 = vadd.f32 %v13077_v10, %v20293_v31  ;;  %v13079_v34 = vpop.f32.mrb[29].mxu0 }
 0x71f   : > { %v13354_v22 = vadd.f32 %v13353_v53, %v13315_v60  ;;  %v13317_v12 = vmul.f32 %v13285_v14, %v13253_v38  ;;  %v14748_v49 = vadd.f32 %v13079_v34, %v20295_v7  ;;  %v13081_v20 = vpop.f32.mrb[30].mxu0  ;;  %v13288_v7 = vld [vmem:[%s20416_s18 + $0xf0] sm:$0xff]  ;;  %v21755_v53 = vlaneseq  ;;  %s15637_s18 = smov [#allocation7]  }
 0x720   : > { %v13334_v17 = vadd.f32 %v13333_v54, %v13316_v28  ;;  %v13222_v19 = vadd.f32 %v14747_v16, %v20409_v52  ;;  %v14749_v23 = vadd.f32 %v13081_v20, %v20297_v21  ;;  %v13083_v62 = vpop.f32.mrb[31].mxu0  ;;  %s15532_s26 = sshll.u32 %s15637_s18, 4  ;;  %s15533_s26 = int_to_ptr.vmem [resolvable:$false] %s15532_s26 }
 0x721   : > { %v13355_v40 = vadd.f32 %v13354_v22, %v13317_v12  ;;  %v13223_v46 = vadd.f32 %v14748_v49, %v20411_v0  ;;  %v14750_v31 = vadd.f32 %v13083_v62, %v20299_v9  ;;  %vm13384_vm3 = vcmp.lt.s32.totalorder %v21755_v53, 256  ;;  %s15534_s15 = scalar_lea.vmem %s15533_s26, 64  ;;  %p15535_p5 = scmp.lt.s32.totalorder %s20505_s11, %s15533_s26 }
 0x722   : > { %v13254_v26 = vmax.f32 %v13222_v19, 0.0  ;;  %v13224_v3 = vadd.f32 %v14749_v23, %v20409_v52  ;;  %p15536_p6 = scmp.lt.s32.totalorder %s15534_s15, %s15528_s14 }
 0x723   : > { %v13255_v44 = vmax.f32 %v13223_v46, 0.0  ;;  %v13225_v15 = vadd.f32 %v14750_v31, %v20411_v0 }
 0x724   : > { %v13318_v24 = vmul.f32 %v13286_v63, %v13254_v26  ;;  %v13256_v11 = vmax.f32 %v13224_v3, 0.0  ;;  %p15537_p7 = por %p15536_p6, %p15535_p5 }
 0x725   : > { %v13319_v21 = vmul.f32 %v13287_v30, %v13255_v44  ;;  %v13257_v58 = vmax.f32 %v13225_v15, 0.0 }
 0x726   : > { %v13335_v43 = vadd.f32 %v13334_v17, %v13318_v24  ;;  %v13320_v39 = vmul.f32 %v13288_v7, %v13256_v11  ;;  %p15538_p9 = pnand %p15537_p7, %p15531_p2 }
 0x727   : > { %v13356_v36 = vadd.f32 %v13355_v40, %v13319_v21  ;;  %v13321_v9 = vmul.f32 %v13289_v33, %v13257_v58 }
 0x728   : > { %v13336_v18 = vadd.f32 %v13335_v43, %v13320_v39 }
 0x729   : > { %v13357_v48 = vadd.f32 %v13356_v36, %v13321_v9 }
 0x72a   : > { %v13337_v50 = vrot.slane %v13336_v18, 4 }
 0x72b   : > { %v13358_v52 = vrot.slane %v13357_v48, 4 }
 0x72c   : > { %v13338_v13 = vadd.f32 %v13337_v50, %v13336_v18 }
 0x72d   : > { %v13359_v57 = vadd.f32 %v13358_v52, %v13357_v48 }
 0x72e   : > { %v13339_v61 = vrot.slane %v13338_v13, 2 }
 0x72f   : > { %v13360_v0 = vrot.slane %v13359_v57, 2 }
 0x730   : > { %v13340_v29 = vadd.f32 %v13339_v61, %v13338_v13 }
 0x731   : > { %v13361_v35 = vadd.f32 %v13360_v0, %v13359_v57 }
 0x732   : > { %v13341_v47 = vrot.slane %v13340_v29, 1 }
 0x733   : > { %v13362_v32 = vrot.slane %v13361_v35, 1 }
 0x734   : > { %v13342_v42 = vadd.f32 %v13341_v47, %v13340_v29 }
 0x735   : > { %v13363_v55 = vadd.f32 %v13362_v32, %v13361_v35 }
 0x737   : > { %v13366_v6 = vcombine.low %v13342_v42, %v13363_v55 }
 0x739   : > { %v13373_v37 = vrot.slane %v13366_v6, %v21754_v1 }
 0x73b   : > { %v13380_v51 = vrot.slane %v13373_v37, %v21754_v1 }
 0x73d   : > { %13386 = vst.msk [vmem:[%s352_s22] sm:$0x3] %vm13384_vm3, %v13380_v51 }
 0x73e   : > { %15541 = shalt.err (!%p15538_p9)
}
 0x73f   : > { %s15542_s13 = scalar_lea.hbm %s20503_s30, 32  ;;  %s15546_s17 = scalar_lea.hbm %s20564_s8, 128 }
 0x740   : > { %p15543_p11 = scmp.ne.s32.totalorder %s20503_s30, %s15542_s13  ;;  %p15547_p4 = scmp.lt.u32.totalorder %s20503_s30, %s20564_s8 }
 0x741   : > { %p15548_p3 = scmp.lt.u32.totalorder %s15546_s17, %s15542_s13  ;;  %p15550_p10 = scmp.lt.u32.totalorder %s15542_s13, %s20503_s30 }
 0x742   : > { %p15544_p13 = pnand %p15543_p11, %p21756_p12 }
 0x743   : > { %p15549_p8 = por %p15548_p3, %p15547_p4 }
 0x744   : > { %p15545_p1 = pneg %p15544_p13 }
 0x745   : > { %p15551_p0 = por %p15550_p10, %p15549_p8 }
 0x747   : > { %p15552_p2 = pnand %p15551_p0, %p15545_p1 }
 0x749   : > { %15555 = shalt.err (!%p15552_p2)
}
 0x74a   : > { %15160 = dma.vmem_to_hbm [thread:$0]  (%p21756_p12), %s20505_s11, 32, %s20503_s30, %s13388_s9  }
 0x74b PF: > { %p15172_p5 = scmp.ge.s32.totalorder %s15626_s12, 2  ;;  %s13416_s24 = sand.u32 1, %s15598_s27  }
 0x74c   : > { %p21757_p6 = scmp.ne.s32.totalorder %s20986_s20, 0  ;;  %s13417_s14 = scalar_lea.sflag [#allocation6], %s13416_s24 }
 0x74e   : > { %p15167_p7 = pnand %p15172_p5, %p21757_p6 }
 0x750   : > { %15593 = dma.done.wait (!%p15167_p7), %s13417_s14, 32  }
 0x751   : > { %15595 = vsyncadd (!%p15167_p7), %s13417_s14, 4294967264  ;;  %s22_s12 = sadd.s32 1, %s15626_s12   ;;  %s21758_s9 = sld [smem:[#allocation10_spill]] }
 0x752   : > { %p19_p9 = scmp.ge.s32.totalorder %s22_s12, 6   ;;  %s21759_s19 = sld [smem:[#allocation11_spill]] }
 0x753   : > { %s21760_s11 = sld [smem:[#allocation12_spill]]  ;;  %s21761_s27 = smov %s15602_s28 }
 0x754   : > { %s21762_s28 = smov %s15606_s29  ;;  %s21763_s29 = smov %s15762_s25 }
 0x755   : > { %s21764_s30 = smov %s15618_s10  ;;  %21 = sbr.rel (!%p19_p9) target bundleno = 6 (0x6), region = 111 }
 0x758   : > { %s21765_s10 = smov %s21759_s19 }
 0x75c   :  { %13422 = vsyncpa [#allocation5], 1 }
 0x75d   :  { %13424 = vsyncpa [#allocation5 + $0x1], 1 }
 0x75e   :  { %13425 = vsyncpa [#allocation6], 1 }
 0x75f   :  { %13427 = vsyncpa [#allocation6 + $0x1], 1 }

</bundles_post_ra>
